<compile_context>
chip_gen: v6e
topology: v6e:2x2x1
jax: 0.10.0
libtpu: 0.0.40
codegen_flags: <defaults>
</compile_context>

<pallas_src>
import functools

import jax
import jax.numpy as jnp
from jax.experimental import pallas as pl
from jax.experimental.pallas import tpu as pltpu

nc, ngf, nz = 3, 64, 100
K = 4          # every ConvTranspose2d kernel in the module is 4x4
BN_EPS = 1e-5


# ----------------------------------------------------------------------------
# Pallas kernel: out[p] = act( P[p] @ W[p] + bias ), parity-batched, K-tiled.
# ----------------------------------------------------------------------------
def _matmul_bias_act_kernel(p_ref, w_ref, b_ref, o_ref, acc_ref, *, activation):
    @pl.when(pl.program_id(3) == 0)
    def _():
        acc_ref[...] = jnp.zeros_like(acc_ref)

    acc_ref[...] += jnp.dot(p_ref[...], w_ref[...],
                            preferred_element_type=jnp.float32)

    @pl.when(pl.program_id(3) == pl.num_programs(3) - 1)
    def _():
        y = acc_ref[...] + b_ref[...]          # folded BatchNorm bias (per column)
        if activation == "relu":
            y = jnp.maximum(y, 0.0)
        elif activation == "tanh":
            y = jnp.tanh(y)
        o_ref[...] = y.astype(o_ref.dtype)


def _pick_tile(dim, max_tile, align):
    """Largest aligned tile <= max_tile that divides `dim`, else the full dim."""
    if dim <= max_tile:
        return dim
    t = (max_tile // align) * align
    while t >= align and dim % t != 0:
        t -= align
    return t if (t >= align and dim % t == 0) else dim


def fused_matmul_bias_act(p, w, bias, activation):
    """p: (P, M, K) bf16, w: (P, K, N) bf16, bias: (1, N) f32 -> (P, M, N) f32."""
    P, M, Kdim = p.shape
    _, _, Ncols = w.shape
    tm = _pick_tile(M, 2048, 8)
    tk = _pick_tile(Kdim, 2048, 128)
    tn = _pick_tile(Ncols, 1024, 128)
    # Remainder-safe by construction; make it explicit (no silent truncation).
    assert M % tm == 0 and Kdim % tk == 0 and Ncols % tn == 0, (M, Kdim, Ncols)

    grid = (P, M // tm, Ncols // tn, Kdim // tk)   # reduction axis last
    kernel = functools.partial(_matmul_bias_act_kernel, activation=activation)
    cost = pl.CostEstimate(
        flops=2 * P * M * Kdim * Ncols,
        transcendentals=P * M * Ncols if activation == "tanh" else 0,
        bytes_accessed=(p.size * p.dtype.itemsize + w.size * w.dtype.itemsize
                        + bias.size * 4 + P * M * Ncols * 4),
    )
    return pl.pallas_call(
        kernel,
        out_shape=jax.ShapeDtypeStruct((P, M, Ncols), jnp.float32),
        grid_spec=pltpu.PrefetchScalarGridSpec(
            num_scalar_prefetch=0,
            grid=grid,
            in_specs=[
                pl.BlockSpec((None, tm, tk), lambda b, i, j, k: (b, i, k)),
                pl.BlockSpec((None, tk, tn), lambda b, i, j, k: (b, k, j)),
                pl.BlockSpec((1, tn), lambda b, i, j, k: (0, j)),
            ],
            out_specs=pl.BlockSpec((None, tm, tn), lambda b, i, j, k: (b, i, j)),
            scratch_shapes=[pltpu.VMEM((tm, tn), jnp.float32)],
        ),
        compiler_params=pltpu.CompilerParams(
            dimension_semantics=("parallel", "parallel", "parallel", "arbitrary")),
        cost_estimate=cost,
    )(p, w, bias)


# ----------------------------------------------------------------------------
# Parameter prep (hoisted out of the forward path): fold BN scale into weights,
# build matmul-layout weights, pad Cout to a multiple of 128, cast to bf16.
# ----------------------------------------------------------------------------
def _pad_cols_to_128(w_mat, b_vec):
    n = w_mat.shape[-1]
    n_pad = ((n + 127) // 128) * 128
    if n_pad != n:
        pads = [(0, 0)] * (w_mat.ndim - 1) + [(0, n_pad - n)]
        w_mat = jnp.pad(w_mat, pads)
        b_vec = jnp.pad(b_vec, (0, n_pad - n))
    return w_mat, b_vec


def _prep_layer0(w, scale, bias):
    # w: torch ConvTranspose2d layout (Cin=nz, Cout, KH, KW). 1x1 input, stride 1,
    # pad 0  =>  y[n, oy, ox, co] = sum_ci z[n, ci] * w[ci, co, oy, ox].
    cin, cout = w.shape[0], w.shape[1]
    w_mat = jnp.transpose(w, (0, 2, 3, 1)).reshape(cin, K * K * cout)  # cols=(oy,ox,co)
    w_mat = w_mat * jnp.tile(scale, K * K)[None, :]                    # fold BN scale
    b_vec = jnp.tile(bias, K * K)
    w_mat, b_vec = _pad_cols_to_128(w_mat[None], b_vec)
    return w_mat.astype(jnp.bfloat16), b_vec.reshape(1, -1).astype(jnp.float32)


def _prep_subpixel(w, scale, bias):
    # stride-2 / pad-1 ConvTranspose2d as 4 parity 2x2 convolutions:
    #   y[n, 2iy+ry, 2ix+rx, co] =
    #     sum_{a,b,ci} xpad[n, iy+ry+a, ix+rx+b, ci] * w[ci, co, 3-(ry+2a), 3-(rx+2b)]
    cin, cout = w.shape[0], w.shape[1]
    mats = []
    for ry in range(2):
        for rx in range(2):
            taps = [w[:, :, 3 - (ry + 2 * a), 3 - (rx + 2 * b)]
                    for a in range(2) for b in range(2)]      # each (Cin, Cout)
            mats.append(jnp.stack(taps, axis=0).reshape(4 * cin, cout))
    w_par = jnp.stack(mats, axis=0)                           # (4, 4*Cin, Cout)
    w_par = w_par * scale[None, None, :]                      # fold BN scale
    w_par, b_vec = _pad_cols_to_128(w_par, bias)
    return w_par.astype(jnp.bfloat16), b_vec.reshape(1, -1).astype(jnp.float32)


def init_params(key):
    # TODO(synk): training-mode BatchNorm (batch statistics) is not implemented;
    # eval-mode running stats are folded into a per-channel scale/bias.
    chans = [nz, ngf * 8, ngf * 4, ngf * 2, ngf, nc]
    params = []
    for li in range(5):
        cin, cout = chans[li], chans[li + 1]
        key, kw, kg, kb, km, kv = jax.random.split(key, 6)
        w = 0.02 * jax.random.normal(kw, (cin, cout, K, K), jnp.float32)
        if li < 4:
            gamma = 1.0 + 0.02 * jax.random.normal(kg, (cout,), jnp.float32)
            beta = 0.02 * jax.random.normal(kb, (cout,), jnp.float32)
            rmean = 0.01 * jax.random.normal(km, (cout,), jnp.float32)
            rvar = 1.0 + 0.1 * jnp.abs(jax.random.normal(kv, (cout,), jnp.float32))
            scale = gamma / jnp.sqrt(rvar + BN_EPS)
            bias = beta - rmean * scale
            act = "relu"
        else:
            scale = jnp.ones((cout,), jnp.float32)
            bias = jnp.zeros((cout,), jnp.float32)
            act = "tanh"
        stride, padding = (1, 0) if li == 0 else (2, 1)
        params.append(dict(w=w, scale=scale, bias=bias,
                           stride=stride, padding=padding, act=act))
    return params


def prepare_params(params):
    prepped = []
    for li, p in enumerate(params):
        cout = p["w"].shape[1]
        if li == 0:
            w_mat, b_vec = _prep_layer0(p["w"], p["scale"], p["bias"])
        else:
            w_mat, b_vec = _prep_subpixel(p["w"], p["scale"], p["bias"])
        prepped.append(dict(w=w_mat, bias=b_vec, cout=cout, act=p["act"]))
    return prepped


# ----------------------------------------------------------------------------
# Forward pass (activations kept NHWC internally; public interface is NCHW)
# ----------------------------------------------------------------------------
def _layer0_forward(z2d, layer):
    n = z2d.shape[0]
    p = z2d.reshape(1, n, -1).astype(jnp.bfloat16)
    y = fused_matmul_bias_act(p, layer["w"], layer["bias"], layer["act"])
    cout = layer["cout"]
    return y[0, :, :K * K * cout].reshape(n, K, K, cout)      # (N, 4, 4, Cout)


def _subpixel_forward(x, layer):
    # x: (N, H, W, Cin) -> (N, 2H, 2W, Cout). No zero-insertion; 4-tap patches only.
    n, h, w, cin = x.shape
    cout = layer["cout"]
    xp = jnp.pad(x, ((0, 0), (1, 1), (1, 1), (0, 0))).astype(jnp.bfloat16)
    # 3x3 grid of shifted HxW views of the padded input, shared by the 4 parities.
    shift = {(d, e): xp[:, d:d + h, e:e + w, :] for d in range(3) for e in range(3)}
    pats = []
    for ry in range(2):
        for rx in range(2):
            taps = [shift[(ry + a, rx + b)] for a in range(2) for b in range(2)]
            pats.append(jnp.stack(taps, axis=3).reshape(n * h * w, 4 * cin))
    p = jnp.stack(pats, axis=0)                               # (4, N*H*W, 4*Cin)
    y = fused_matmul_bias_act(p, layer["w"], layer["bias"], layer["act"])
    y = y[:, :, :cout].reshape(2, 2, n, h, w, cout)           # (ry, rx, n, iy, ix, c)
    y = jnp.transpose(y, (2, 3, 0, 4, 1, 5)).reshape(n, 2 * h, 2 * w, cout)
    return y


def generator_forward(z_nchw, prepped):
    n = z_nchw.shape[0]
    x = _layer0_forward(z_nchw.reshape(n, nz), prepped[0])
    for layer in prepped[1:]:
        x = _subpixel_forward(x, layer)
    return jnp.transpose(x, (0, 3, 1, 2))                     # NHWC -> NCHW


def generator_reference(z_nchw, params):
    # Pure-JAX reference (XLA conv, f32, HIGHEST precision) for correctness check.
    x = jnp.transpose(z_nchw, (0, 2, 3, 1))
    for p in params:
        w_conv = jnp.transpose(p["w"][:, :, ::-1, ::-1], (2, 3, 0, 1))  # HWIO
        pad_eff = K - 1 - p["padding"]
        y = jax.lax.conv_general_dilated(
            x, w_conv, window_strides=(1, 1),
            padding=[(pad_eff, pad_eff), (pad_eff, pad_eff)],
            lhs_dilation=(p["stride"], p["stride"]),
            dimension_numbers=("NHWC", "HWIO", "NHWC"),
            precision=jax.lax.Precision.HIGHEST)
        y = y * p["scale"] + p["bias"]
        y = jnp.maximum(y, 0.0) if p["act"] == "relu" else jnp.tanh(y)
        x = y
    return jnp.transpose(x, (0, 3, 1, 2))


if __name__ == "__main__":
    key = jax.random.PRNGKey(0)
    key, kz = jax.random.split(key)
    params = init_params(key)
    prepped = prepare_params(params)

    batch = 2
    z = jax.random.normal(kz, (batch, nz, 1, 1), jnp.float32)   # PyTorch NCHW input

    fwd = jax.jit(lambda zz: generator_forward(zz, prepped))
    out = jax.block_until_ready(fwd(z))

    assert out.shape == (batch, nc, 64, 64), out.shape
    assert bool(jnp.all(jnp.isfinite(out)))
    ref = generator_reference(z, params)
    max_err = float(jnp.max(jnp.abs(out - ref)))
    assert jnp.allclose(out, ref, atol=3e-2, rtol=3e-2), max_err

    print("KERNEL_OK")
</pallas_src>

<mosaic_0001>
module attributes {stable_mosaic.version = 11 : i64} {
  func.func @_matmul_bias_act_kernel(%arg0: i32, %arg1: i32, %arg2: i32, %arg3: i32, %arg4: memref<1x2x100xbf16, #tpu.memory_space<vmem>>, %arg5: memref<1x100x1024xbf16, #tpu.memory_space<vmem>>, %arg6: memref<1x1024xf32, #tpu.memory_space<vmem>>, %arg7: memref<1x2x1024xf32, #tpu.memory_space<vmem>>, %arg8: memref<2x1024xf32, #tpu.memory_space<vmem>>) attributes {dimension_semantics = [#tpu.dimension_semantics<parallel>, #tpu.dimension_semantics<parallel>, #tpu.dimension_semantics<parallel>, #tpu.dimension_semantics<arbitrary>], iteration_bounds = array<i64: 1, 1, 8, 1>, scalar_prefetch = 0 : i64, scratch_operands = 1 : i64, tpu.core_type = #tpu.core_type<tc>, window_params = [{transform_indices = @transform_0, window_bounds = array<i64: 1, 2, 100>}, {transform_indices = @transform_1, window_bounds = array<i64: 1, 100, 1024>}, {transform_indices = @transform_2, window_bounds = array<i64: 1, 1024>}, {transform_indices = @transform_3, window_bounds = array<i64: 1, 2, 1024>}]} {
    %c0_i32 = arith.constant 0 : i32
    %0 = arith.cmpi eq, %arg3, %c0_i32 : i32
    %1 = arith.extui %0 : i1 to i32
    %c0_i32_0 = arith.constant 0 : i32
    %2 = arith.cmpi ne, %1, %c0_i32_0 : i32
    scf.if %2 {
      %cst_12 = arith.constant 0.000000e+00 : f32
      %14 = vector.broadcast %cst_12 : f32 to vector<2x1024xf32>
      %c0_13 = arith.constant 0 : index
      %c0_14 = arith.constant 0 : index
      %15 = vector.load %arg8[%c0_13, %c0_14] : memref<2x1024xf32, #tpu.memory_space<vmem>>, vector<2x1024xf32>
      tpu.vector_store %arg8[%c0_13, %c0_14], %14 {strides = array<i32>} : memref<2x1024xf32, #tpu.memory_space<vmem>>, vector<2x1024xf32>,
    } else {
    }
    %c0 = arith.constant 0 : index
    %c0_1 = arith.constant 0 : index
    %3 = vector.load %arg8[%c0, %c0_1] : memref<2x1024xf32, #tpu.memory_space<vmem>>, vector<2x1024xf32>
    %c0_2 = arith.constant 0 : index
    %c0_3 = arith.constant 0 : index
    %c0_4 = arith.constant 0 : index
    %4 = vector.load %arg4[%c0_2, %c0_3, %c0_4] : memref<1x2x100xbf16, #tpu.memory_space<vmem>>, vector<1x2x100xbf16>
    %5 = vector.shape_cast %4 : vector<1x2x100xbf16> to vector<2x100xbf16>
    %c0_5 = arith.constant 0 : index
    %c0_6 = arith.constant 0 : index
    %c0_7 = arith.constant 0 : index
    %6 = vector.load %arg5[%c0_5, %c0_6, %c0_7] : memref<1x100x1024xbf16, #tpu.memory_space<vmem>>, vector<1x100x1024xbf16>
    %7 = vector.shape_cast %6 : vector<1x100x1024xbf16> to vector<100x1024xbf16>
    %cst = arith.constant dense<0.000000e+00> : vector<2x1024xf32>
    %8 = tpu.matmul %5, %7, %cst {dimension_numbers = #tpu.dot_dimension_numbers<[1], [0], [0], [1], [0, 0, 1, 1], [], []>} : vector<2x100xbf16>, vector<100x1024xbf16>, vector<2x1024xf32> -> vector<2x1024xf32>
    %9 = arith.addf %3, %8 : vector<2x1024xf32>
    %c0_8 = arith.constant 0 : index
    %c0_9 = arith.constant 0 : index
    %10 = vector.load %arg8[%c0_8, %c0_9] : memref<2x1024xf32, #tpu.memory_space<vmem>>, vector<2x1024xf32>
    tpu.vector_store %arg8[%c0_8, %c0_9], %9 {strides = array<i32>} : memref<2x1024xf32, #tpu.memory_space<vmem>>, vector<2x1024xf32>,
    %c0_i32_10 = arith.constant 0 : i32
    %11 = arith.cmpi eq, %arg3, %c0_i32_10 : i32
    %12 = arith.extui %11 : i1 to i32
    %c0_i32_11 = arith.constant 0 : i32
    %13 = arith.cmpi ne, %12, %c0_i32_11 : i32
    scf.if %13 {
      %c0_12 = arith.constant 0 : index
      %c0_13 = arith.constant 0 : index
      %14 = vector.load %arg8[%c0_12, %c0_13] : memref<2x1024xf32, #tpu.memory_space<vmem>>, vector<2x1024xf32>
      %c0_14 = arith.constant 0 : index
      %c0_15 = arith.constant 0 : index
      %15 = vector.load %arg6[%c0_14, %c0_15] : memref<1x1024xf32, #tpu.memory_space<vmem>>, vector<1x1024xf32>
      %16 = vector.broadcast %15 : vector<1x1024xf32> to vector<2x1024xf32>
      %17 = arith.addf %14, %16 : vector<2x1024xf32>
      %cst_16 = arith.constant 0.000000e+00 : f32
      %18 = vector.broadcast %cst_16 : f32 to vector<2x1024xf32>
      %19 = arith.maximumf %17, %18 : vector<2x1024xf32>
      %c0_17 = arith.constant 0 : index
      %c0_18 = arith.constant 0 : index
      %c0_19 = arith.constant 0 : index
      %20 = vector.load %arg7[%c0_17, %c0_18, %c0_19] : memref<1x2x1024xf32, #tpu.memory_space<vmem>>, vector<1x2x1024xf32>
      %21 = vector.shape_cast %20 : vector<1x2x1024xf32> to vector<2x1024xf32>
      %22 = vector.shape_cast %19 : vector<2x1024xf32> to vector<1x2x1024xf32>
      tpu.vector_store %arg7[%c0_17, %c0_18, %c0_19], %22 {strides = array<i32>} : memref<1x2x1024xf32, #tpu.memory_space<vmem>>, vector<1x2x1024xf32>,
    } else {
    }
    return
  }
  func.func @transform_0(%arg0: i32, %arg1: i32, %arg2: i32, %arg3: i32) -> (i32, i32, i32) {
    %c0_i32 = arith.constant 0 : i32
    return %arg0, %arg1, %arg3 : i32, i32, i32
  }
  func.func @transform_1(%arg0: i32, %arg1: i32, %arg2: i32, %arg3: i32) -> (i32, i32, i32) {
    %c0_i32 = arith.constant 0 : i32
    return %arg0, %arg3, %arg2 : i32, i32, i32
  }
  func.func @transform_2(%arg0: i32, %arg1: i32, %arg2: i32, %arg3: i32) -> (i32, i32) {
    %c0_i32 = arith.constant 0 : i32
    %c0_i32_0 = arith.constant 0 : i32
    return %c0_i32, %arg2 : i32, i32
  }
  func.func @transform_3(%arg0: i32, %arg1: i32, %arg2: i32, %arg3: i32) -> (i32, i32, i32) {
    %c0_i32 = arith.constant 0 : i32
    return %arg0, %arg1, %arg2 : i32, i32, i32
  }
}

module attributes {stable_mosaic.version = 11 : i64} {
  func.func @_matmul_bias_act_kernel(%arg0: i32, %arg1: i32, %arg2: i32, %arg3: i32, %arg4: memref<1x32x2048xbf16, #tpu.memory_space<vmem>>, %arg5: memref<1x2048x256xbf16, #tpu.memory_space<vmem>>, %arg6: memref<1x256xf32, #tpu.memory_space<vmem>>, %arg7: memref<1x32x256xf32, #tpu.memory_space<vmem>>, %arg8: memref<32x256xf32, #tpu.memory_space<vmem>>) attributes {dimension_semantics = [#tpu.dimension_semantics<parallel>, #tpu.dimension_semantics<parallel>, #tpu.dimension_semantics<parallel>, #tpu.dimension_semantics<arbitrary>], iteration_bounds = array<i64: 4, 1, 1, 1>, scalar_prefetch = 0 : i64, scratch_operands = 1 : i64, tpu.core_type = #tpu.core_type<tc>, window_params = [{transform_indices = @transform_0, window_bounds = array<i64: 1, 32, 2048>}, {transform_indices = @transform_1, window_bounds = array<i64: 1, 2048, 256>}, {transform_indices = @transform_2, window_bounds = array<i64: 1, 256>}, {transform_indices = @transform_3, window_bounds = array<i64: 1, 32, 256>}]} {
    %c0_i32 = arith.constant 0 : i32
    %0 = arith.cmpi eq, %arg3, %c0_i32 : i32
    %1 = arith.extui %0 : i1 to i32
    %c0_i32_0 = arith.constant 0 : i32
    %2 = arith.cmpi ne, %1, %c0_i32_0 : i32
    scf.if %2 {
      %cst_12 = arith.constant 0.000000e+00 : f32
      %14 = vector.broadcast %cst_12 : f32 to vector<32x256xf32>
      %c0_13 = arith.constant 0 : index
      %c0_14 = arith.constant 0 : index
      %15 = vector.load %arg8[%c0_13, %c0_14] : memref<32x256xf32, #tpu.memory_space<vmem>>, vector<32x256xf32>
      tpu.vector_store %arg8[%c0_13, %c0_14], %14 {strides = array<i32>} : memref<32x256xf32, #tpu.memory_space<vmem>>, vector<32x256xf32>,
    } else {
    }
    %c0 = arith.constant 0 : index
    %c0_1 = arith.constant 0 : index
    %3 = vector.load %arg8[%c0, %c0_1] : memref<32x256xf32, #tpu.memory_space<vmem>>, vector<32x256xf32>
    %c0_2 = arith.constant 0 : index
    %c0_3 = arith.constant 0 : index
    %c0_4 = arith.constant 0 : index
    %4 = vector.load %arg4[%c0_2, %c0_3, %c0_4] : memref<1x32x2048xbf16, #tpu.memory_space<vmem>>, vector<1x32x2048xbf16>
    %5 = vector.shape_cast %4 : vector<1x32x2048xbf16> to vector<32x2048xbf16>
    %c0_5 = arith.constant 0 : index
    %c0_6 = arith.constant 0 : index
    %c0_7 = arith.constant 0 : index
    %6 = vector.load %arg5[%c0_5, %c0_6, %c0_7] : memref<1x2048x256xbf16, #tpu.memory_space<vmem>>, vector<1x2048x256xbf16>
    %7 = vector.shape_cast %6 : vector<1x2048x256xbf16> to vector<2048x256xbf16>
    %cst = arith.constant dense<0.000000e+00> : vector<32x256xf32>
    %8 = tpu.matmul %5, %7, %cst {dimension_numbers = #tpu.dot_dimension_numbers<[1], [0], [0], [1], [0, 0, 1, 1], [], []>} : vector<32x2048xbf16>, vector<2048x256xbf16>, vector<32x256xf32> -> vector<32x256xf32>
    %9 = arith.addf %3, %8 : vector<32x256xf32>
    %c0_8 = arith.constant 0 : index
    %c0_9 = arith.constant 0 : index
    %10 = vector.load %arg8[%c0_8, %c0_9] : memref<32x256xf32, #tpu.memory_space<vmem>>, vector<32x256xf32>
    tpu.vector_store %arg8[%c0_8, %c0_9], %9 {strides = array<i32>} : memref<32x256xf32, #tpu.memory_space<vmem>>, vector<32x256xf32>,
    %c0_i32_10 = arith.constant 0 : i32
    %11 = arith.cmpi eq, %arg3, %c0_i32_10 : i32
    %12 = arith.extui %11 : i1 to i32
    %c0_i32_11 = arith.constant 0 : i32
    %13 = arith.cmpi ne, %12, %c0_i32_11 : i32
    scf.if %13 {
      %c0_12 = arith.constant 0 : index
      %c0_13 = arith.constant 0 : index
      %14 = vector.load %arg8[%c0_12, %c0_13] : memref<32x256xf32, #tpu.memory_space<vmem>>, vector<32x256xf32>
      %c0_14 = arith.constant 0 : index
      %c0_15 = arith.constant 0 : index
      %15 = vector.load %arg6[%c0_14, %c0_15] : memref<1x256xf32, #tpu.memory_space<vmem>>, vector<1x256xf32>
      %16 = vector.broadcast %15 : vector<1x256xf32> to vector<32x256xf32>
      %17 = arith.addf %14, %16 : vector<32x256xf32>
      %cst_16 = arith.constant 0.000000e+00 : f32
      %18 = vector.broadcast %cst_16 : f32 to vector<32x256xf32>
      %19 = arith.maximumf %17, %18 : vector<32x256xf32>
      %c0_17 = arith.constant 0 : index
      %c0_18 = arith.constant 0 : index
      %c0_19 = arith.constant 0 : index
      %20 = vector.load %arg7[%c0_17, %c0_18, %c0_19] : memref<1x32x256xf32, #tpu.memory_space<vmem>>, vector<1x32x256xf32>
      %21 = vector.shape_cast %20 : vector<1x32x256xf32> to vector<32x256xf32>
      %22 = vector.shape_cast %19 : vector<32x256xf32> to vector<1x32x256xf32>
      tpu.vector_store %arg7[%c0_17, %c0_18, %c0_19], %22 {strides = array<i32>} : memref<1x32x256xf32, #tpu.memory_space<vmem>>, vector<1x32x256xf32>,
    } else {
    }
    return
  }
  func.func @transform_0(%arg0: i32, %arg1: i32, %arg2: i32, %arg3: i32) -> (i32, i32, i32) {
    %c0_i32 = arith.constant 0 : i32
    return %arg0, %arg1, %arg3 : i32, i32, i32
  }
  func.func @transform_1(%arg0: i32, %arg1: i32, %arg2: i32, %arg3: i32) -> (i32, i32, i32) {
    %c0_i32 = arith.constant 0 : i32
    return %arg0, %arg3, %arg2 : i32, i32, i32
  }
  func.func @transform_2(%arg0: i32, %arg1: i32, %arg2: i32, %arg3: i32) -> (i32, i32) {
    %c0_i32 = arith.constant 0 : i32
    %c0_i32_0 = arith.constant 0 : i32
    return %c0_i32, %arg2 : i32, i32
  }
  func.func @transform_3(%arg0: i32, %arg1: i32, %arg2: i32, %arg3: i32) -> (i32, i32, i32) {
    %c0_i32 = arith.constant 0 : i32
    return %arg0, %arg1, %arg2 : i32, i32, i32
  }
}

module attributes {stable_mosaic.version = 11 : i64} {
  func.func @_matmul_bias_act_kernel(%arg0: i32, %arg1: i32, %arg2: i32, %arg3: i32, %arg4: memref<1x128x1024xbf16, #tpu.memory_space<vmem>>, %arg5: memref<1x1024x128xbf16, #tpu.memory_space<vmem>>, %arg6: memref<1x128xf32, #tpu.memory_space<vmem>>, %arg7: memref<1x128x128xf32, #tpu.memory_space<vmem>>, %arg8: memref<128x128xf32, #tpu.memory_space<vmem>>) attributes {dimension_semantics = [#tpu.dimension_semantics<parallel>, #tpu.dimension_semantics<parallel>, #tpu.dimension_semantics<parallel>, #tpu.dimension_semantics<arbitrary>], iteration_bounds = array<i64: 4, 1, 1, 1>, scalar_prefetch = 0 : i64, scratch_operands = 1 : i64, tpu.core_type = #tpu.core_type<tc>, window_params = [{transform_indices = @transform_0, window_bounds = array<i64: 1, 128, 1024>}, {transform_indices = @transform_1, window_bounds = array<i64: 1, 1024, 128>}, {transform_indices = @transform_2, window_bounds = array<i64: 1, 128>}, {transform_indices = @transform_3, window_bounds = array<i64: 1, 128, 128>}]} {
    %c0_i32 = arith.constant 0 : i32
    %0 = arith.cmpi eq, %arg3, %c0_i32 : i32
    %1 = arith.extui %0 : i1 to i32
    %c0_i32_0 = arith.constant 0 : i32
    %2 = arith.cmpi ne, %1, %c0_i32_0 : i32
    scf.if %2 {
      %cst_12 = arith.constant 0.000000e+00 : f32
      %14 = vector.broadcast %cst_12 : f32 to vector<128x128xf32>
      %c0_13 = arith.constant 0 : index
      %c0_14 = arith.constant 0 : index
      %15 = vector.load %arg8[%c0_13, %c0_14] : memref<128x128xf32, #tpu.memory_space<vmem>>, vector<128x128xf32>
      tpu.vector_store %arg8[%c0_13, %c0_14], %14 {strides = array<i32>} : memref<128x128xf32, #tpu.memory_space<vmem>>, vector<128x128xf32>,
    } else {
    }
    %c0 = arith.constant 0 : index
    %c0_1 = arith.constant 0 : index
    %3 = vector.load %arg8[%c0, %c0_1] : memref<128x128xf32, #tpu.memory_space<vmem>>, vector<128x128xf32>
    %c0_2 = arith.constant 0 : index
    %c0_3 = arith.constant 0 : index
    %c0_4 = arith.constant 0 : index
    %4 = vector.load %arg4[%c0_2, %c0_3, %c0_4] : memref<1x128x1024xbf16, #tpu.memory_space<vmem>>, vector<1x128x1024xbf16>
    %5 = vector.shape_cast %4 : vector<1x128x1024xbf16> to vector<128x1024xbf16>
    %c0_5 = arith.constant 0 : index
    %c0_6 = arith.constant 0 : index
    %c0_7 = arith.constant 0 : index
    %6 = vector.load %arg5[%c0_5, %c0_6, %c0_7] : memref<1x1024x128xbf16, #tpu.memory_space<vmem>>, vector<1x1024x128xbf16>
    %7 = vector.shape_cast %6 : vector<1x1024x128xbf16> to vector<1024x128xbf16>
    %cst = arith.constant dense<0.000000e+00> : vector<128x128xf32>
    %8 = tpu.matmul %5, %7, %cst {dimension_numbers = #tpu.dot_dimension_numbers<[1], [0], [0], [1], [0, 0, 1, 1], [], []>} : vector<128x1024xbf16>, vector<1024x128xbf16>, vector<128x128xf32> -> vector<128x128xf32>
    %9 = arith.addf %3, %8 : vector<128x128xf32>
    %c0_8 = arith.constant 0 : index
    %c0_9 = arith.constant 0 : index
    %10 = vector.load %arg8[%c0_8, %c0_9] : memref<128x128xf32, #tpu.memory_space<vmem>>, vector<128x128xf32>
    tpu.vector_store %arg8[%c0_8, %c0_9], %9 {strides = array<i32>} : memref<128x128xf32, #tpu.memory_space<vmem>>, vector<128x128xf32>,
    %c0_i32_10 = arith.constant 0 : i32
    %11 = arith.cmpi eq, %arg3, %c0_i32_10 : i32
    %12 = arith.extui %11 : i1 to i32
    %c0_i32_11 = arith.constant 0 : i32
    %13 = arith.cmpi ne, %12, %c0_i32_11 : i32
    scf.if %13 {
      %c0_12 = arith.constant 0 : index
      %c0_13 = arith.constant 0 : index
      %14 = vector.load %arg8[%c0_12, %c0_13] : memref<128x128xf32, #tpu.memory_space<vmem>>, vector<128x128xf32>
      %c0_14 = arith.constant 0 : index
      %c0_15 = arith.constant 0 : index
      %15 = vector.load %arg6[%c0_14, %c0_15] : memref<1x128xf32, #tpu.memory_space<vmem>>, vector<1x128xf32>
      %16 = vector.broadcast %15 : vector<1x128xf32> to vector<128x128xf32>
      %17 = arith.addf %14, %16 : vector<128x128xf32>
      %cst_16 = arith.constant 0.000000e+00 : f32
      %18 = vector.broadcast %cst_16 : f32 to vector<128x128xf32>
      %19 = arith.maximumf %17, %18 : vector<128x128xf32>
      %c0_17 = arith.constant 0 : index
      %c0_18 = arith.constant 0 : index
      %c0_19 = arith.constant 0 : index
      %20 = vector.load %arg7[%c0_17, %c0_18, %c0_19] : memref<1x128x128xf32, #tpu.memory_space<vmem>>, vector<1x128x128xf32>
      %21 = vector.shape_cast %20 : vector<1x128x128xf32> to vector<128x128xf32>
      %22 = vector.shape_cast %19 : vector<128x128xf32> to vector<1x128x128xf32>
      tpu.vector_store %arg7[%c0_17, %c0_18, %c0_19], %22 {strides = array<i32>} : memref<1x128x128xf32, #tpu.memory_space<vmem>>, vector<1x128x128xf32>,
    } else {
    }
    return
  }
  func.func @transform_0(%arg0: i32, %arg1: i32, %arg2: i32, %arg3: i32) -> (i32, i32, i32) {
    %c0_i32 = arith.constant 0 : i32
    return %arg0, %arg1, %arg3 : i32, i32, i32
  }
  func.func @transform_1(%arg0: i32, %arg1: i32, %arg2: i32, %arg3: i32) -> (i32, i32, i32) {
    %c0_i32 = arith.constant 0 : i32
    return %arg0, %arg3, %arg2 : i32, i32, i32
  }
  func.func @transform_2(%arg0: i32, %arg1: i32, %arg2: i32, %arg3: i32) -> (i32, i32) {
    %c0_i32 = arith.constant 0 : i32
    %c0_i32_0 = arith.constant 0 : i32
    return %c0_i32, %arg2 : i32, i32
  }
  func.func @transform_3(%arg0: i32, %arg1: i32, %arg2: i32, %arg3: i32) -> (i32, i32, i32) {
    %c0_i32 = arith.constant 0 : i32
    return %arg0, %arg1, %arg2 : i32, i32, i32
  }
}

module attributes {stable_mosaic.version = 11 : i64} {
  func.func @_matmul_bias_act_kernel(%arg0: i32, %arg1: i32, %arg2: i32, %arg3: i32, %arg4: memref<1x512x512xbf16, #tpu.memory_space<vmem>>, %arg5: memref<1x512x128xbf16, #tpu.memory_space<vmem>>, %arg6: memref<1x128xf32, #tpu.memory_space<vmem>>, %arg7: memref<1x512x128xf32, #tpu.memory_space<vmem>>, %arg8: memref<512x128xf32, #tpu.memory_space<vmem>>) attributes {dimension_semantics = [#tpu.dimension_semantics<parallel>, #tpu.dimension_semantics<parallel>, #tpu.dimension_semantics<parallel>, #tpu.dimension_semantics<arbitrary>], iteration_bounds = array<i64: 4, 1, 1, 1>, scalar_prefetch = 0 : i64, scratch_operands = 1 : i64, tpu.core_type = #tpu.core_type<tc>, window_params = [{transform_indices = @transform_0, window_bounds = array<i64: 1, 512, 512>}, {transform_indices = @transform_1, window_bounds = array<i64: 1, 512, 128>}, {transform_indices = @transform_2, window_bounds = array<i64: 1, 128>}, {transform_indices = @transform_3, window_bounds = array<i64: 1, 512, 128>}]} {
    %c0_i32 = arith.constant 0 : i32
    %0 = arith.cmpi eq, %arg3, %c0_i32 : i32
    %1 = arith.extui %0 : i1 to i32
    %c0_i32_0 = arith.constant 0 : i32
    %2 = arith.cmpi ne, %1, %c0_i32_0 : i32
    scf.if %2 {
      %cst_12 = arith.constant 0.000000e+00 : f32
      %14 = vector.broadcast %cst_12 : f32 to vector<512x128xf32>
      %c0_13 = arith.constant 0 : index
      %c0_14 = arith.constant 0 : index
      %15 = vector.load %arg8[%c0_13, %c0_14] : memref<512x128xf32, #tpu.memory_space<vmem>>, vector<512x128xf32>
      tpu.vector_store %arg8[%c0_13, %c0_14], %14 {strides = array<i32>} : memref<512x128xf32, #tpu.memory_space<vmem>>, vector<512x128xf32>,
    } else {
    }
    %c0 = arith.constant 0 : index
    %c0_1 = arith.constant 0 : index
    %3 = vector.load %arg8[%c0, %c0_1] : memref<512x128xf32, #tpu.memory_space<vmem>>, vector<512x128xf32>
    %c0_2 = arith.constant 0 : index
    %c0_3 = arith.constant 0 : index
    %c0_4 = arith.constant 0 : index
    %4 = vector.load %arg4[%c0_2, %c0_3, %c0_4] : memref<1x512x512xbf16, #tpu.memory_space<vmem>>, vector<1x512x512xbf16>
    %5 = vector.shape_cast %4 : vector<1x512x512xbf16> to vector<512x512xbf16>
    %c0_5 = arith.constant 0 : index
    %c0_6 = arith.constant 0 : index
    %c0_7 = arith.constant 0 : index
    %6 = vector.load %arg5[%c0_5, %c0_6, %c0_7] : memref<1x512x128xbf16, #tpu.memory_space<vmem>>, vector<1x512x128xbf16>
    %7 = vector.shape_cast %6 : vector<1x512x128xbf16> to vector<512x128xbf16>
    %cst = arith.constant dense<0.000000e+00> : vector<512x128xf32>
    %8 = tpu.matmul %5, %7, %cst {dimension_numbers = #tpu.dot_dimension_numbers<[1], [0], [0], [1], [0, 0, 1, 1], [], []>} : vector<512x512xbf16>, vector<512x128xbf16>, vector<512x128xf32> -> vector<512x128xf32>
    %9 = arith.addf %3, %8 : vector<512x128xf32>
    %c0_8 = arith.constant 0 : index
    %c0_9 = arith.constant 0 : index
    %10 = vector.load %arg8[%c0_8, %c0_9] : memref<512x128xf32, #tpu.memory_space<vmem>>, vector<512x128xf32>
    tpu.vector_store %arg8[%c0_8, %c0_9], %9 {strides = array<i32>} : memref<512x128xf32, #tpu.memory_space<vmem>>, vector<512x128xf32>,
    %c0_i32_10 = arith.constant 0 : i32
    %11 = arith.cmpi eq, %arg3, %c0_i32_10 : i32
    %12 = arith.extui %11 : i1 to i32
    %c0_i32_11 = arith.constant 0 : i32
    %13 = arith.cmpi ne, %12, %c0_i32_11 : i32
    scf.if %13 {
      %c0_12 = arith.constant 0 : index
      %c0_13 = arith.constant 0 : index
      %14 = vector.load %arg8[%c0_12, %c0_13] : memref<512x128xf32, #tpu.memory_space<vmem>>, vector<512x128xf32>
      %c0_14 = arith.constant 0 : index
      %c0_15 = arith.constant 0 : index
      %15 = vector.load %arg6[%c0_14, %c0_15] : memref<1x128xf32, #tpu.memory_space<vmem>>, vector<1x128xf32>
      %16 = vector.broadcast %15 : vector<1x128xf32> to vector<512x128xf32>
      %17 = arith.addf %14, %16 : vector<512x128xf32>
      %cst_16 = arith.constant 0.000000e+00 : f32
      %18 = vector.broadcast %cst_16 : f32 to vector<512x128xf32>
      %19 = arith.maximumf %17, %18 : vector<512x128xf32>
      %c0_17 = arith.constant 0 : index
      %c0_18 = arith.constant 0 : index
      %c0_19 = arith.constant 0 : index
      %20 = vector.load %arg7[%c0_17, %c0_18, %c0_19] : memref<1x512x128xf32, #tpu.memory_space<vmem>>, vector<1x512x128xf32>
      %21 = vector.shape_cast %20 : vector<1x512x128xf32> to vector<512x128xf32>
      %22 = vector.shape_cast %19 : vector<512x128xf32> to vector<1x512x128xf32>
      tpu.vector_store %arg7[%c0_17, %c0_18, %c0_19], %22 {strides = array<i32>} : memref<1x512x128xf32, #tpu.memory_space<vmem>>, vector<1x512x128xf32>,
    } else {
    }
    return
  }
  func.func @transform_0(%arg0: i32, %arg1: i32, %arg2: i32, %arg3: i32) -> (i32, i32, i32) {
    %c0_i32 = arith.constant 0 : i32
    return %arg0, %arg1, %arg3 : i32, i32, i32
  }
  func.func @transform_1(%arg0: i32, %arg1: i32, %arg2: i32, %arg3: i32) -> (i32, i32, i32) {
    %c0_i32 = arith.constant 0 : i32
    return %arg0, %arg3, %arg2 : i32, i32, i32
  }
  func.func @transform_2(%arg0: i32, %arg1: i32, %arg2: i32, %arg3: i32) -> (i32, i32) {
    %c0_i32 = arith.constant 0 : i32
    %c0_i32_0 = arith.constant 0 : i32
    return %c0_i32, %arg2 : i32, i32
  }
  func.func @transform_3(%arg0: i32, %arg1: i32, %arg2: i32, %arg3: i32) -> (i32, i32, i32) {
    %c0_i32 = arith.constant 0 : i32
    return %arg0, %arg1, %arg2 : i32, i32, i32
  }
}

module attributes {stable_mosaic.version = 11 : i64} {
  func.func @_matmul_bias_act_kernel(%arg0: i32, %arg1: i32, %arg2: i32, %arg3: i32, %arg4: memref<1x2048x256xbf16, #tpu.memory_space<vmem>>, %arg5: memref<1x256x128xbf16, #tpu.memory_space<vmem>>, %arg6: memref<1x128xf32, #tpu.memory_space<vmem>>, %arg7: memref<1x2048x128xf32, #tpu.memory_space<vmem>>, %arg8: memref<2048x128xf32, #tpu.memory_space<vmem>>) attributes {dimension_semantics = [#tpu.dimension_semantics<parallel>, #tpu.dimension_semantics<parallel>, #tpu.dimension_semantics<parallel>, #tpu.dimension_semantics<arbitrary>], iteration_bounds = array<i64: 4, 1, 1, 1>, scalar_prefetch = 0 : i64, scratch_operands = 1 : i64, tpu.core_type = #tpu.core_type<tc>, window_params = [{transform_indices = @transform_0, window_bounds = array<i64: 1, 2048, 256>}, {transform_indices = @transform_1, window_bounds = array<i64: 1, 256, 128>}, {transform_indices = @transform_2, window_bounds = array<i64: 1, 128>}, {transform_indices = @transform_3, window_bounds = array<i64: 1, 2048, 128>}]} {
    %c0_i32 = arith.constant 0 : i32
    %0 = arith.cmpi eq, %arg3, %c0_i32 : i32
    %1 = arith.extui %0 : i1 to i32
    %c0_i32_0 = arith.constant 0 : i32
    %2 = arith.cmpi ne, %1, %c0_i32_0 : i32
    scf.if %2 {
      %cst_12 = arith.constant 0.000000e+00 : f32
      %14 = vector.broadcast %cst_12 : f32 to vector<2048x128xf32>
      %c0_13 = arith.constant 0 : index
      %c0_14 = arith.constant 0 : index
      %15 = vector.load %arg8[%c0_13, %c0_14] : memref<2048x128xf32, #tpu.memory_space<vmem>>, vector<2048x128xf32>
      tpu.vector_store %arg8[%c0_13, %c0_14], %14 {strides = array<i32>} : memref<2048x128xf32, #tpu.memory_space<vmem>>, vector<2048x128xf32>,
    } else {
    }
    %c0 = arith.constant 0 : index
    %c0_1 = arith.constant 0 : index
    %3 = vector.load %arg8[%c0, %c0_1] : memref<2048x128xf32, #tpu.memory_space<vmem>>, vector<2048x128xf32>
    %c0_2 = arith.constant 0 : index
    %c0_3 = arith.constant 0 : index
    %c0_4 = arith.constant 0 : index
    %4 = vector.load %arg4[%c0_2, %c0_3, %c0_4] : memref<1x2048x256xbf16, #tpu.memory_space<vmem>>, vector<1x2048x256xbf16>
    %5 = vector.shape_cast %4 : vector<1x2048x256xbf16> to vector<2048x256xbf16>
    %c0_5 = arith.constant 0 : index
    %c0_6 = arith.constant 0 : index
    %c0_7 = arith.constant 0 : index
    %6 = vector.load %arg5[%c0_5, %c0_6, %c0_7] : memref<1x256x128xbf16, #tpu.memory_space<vmem>>, vector<1x256x128xbf16>
    %7 = vector.shape_cast %6 : vector<1x256x128xbf16> to vector<256x128xbf16>
    %cst = arith.constant dense<0.000000e+00> : vector<2048x128xf32>
    %8 = tpu.matmul %5, %7, %cst {dimension_numbers = #tpu.dot_dimension_numbers<[1], [0], [0], [1], [0, 0, 1, 1], [], []>} : vector<2048x256xbf16>, vector<256x128xbf16>, vector<2048x128xf32> -> vector<2048x128xf32>
    %9 = arith.addf %3, %8 : vector<2048x128xf32>
    %c0_8 = arith.constant 0 : index
    %c0_9 = arith.constant 0 : index
    %10 = vector.load %arg8[%c0_8, %c0_9] : memref<2048x128xf32, #tpu.memory_space<vmem>>, vector<2048x128xf32>
    tpu.vector_store %arg8[%c0_8, %c0_9], %9 {strides = array<i32>} : memref<2048x128xf32, #tpu.memory_space<vmem>>, vector<2048x128xf32>,
    %c0_i32_10 = arith.constant 0 : i32
    %11 = arith.cmpi eq, %arg3, %c0_i32_10 : i32
    %12 = arith.extui %11 : i1 to i32
    %c0_i32_11 = arith.constant 0 : i32
    %13 = arith.cmpi ne, %12, %c0_i32_11 : i32
    scf.if %13 {
      %c0_12 = arith.constant 0 : index
      %c0_13 = arith.constant 0 : index
      %14 = vector.load %arg8[%c0_12, %c0_13] : memref<2048x128xf32, #tpu.memory_space<vmem>>, vector<2048x128xf32>
      %c0_14 = arith.constant 0 : index
      %c0_15 = arith.constant 0 : index
      %15 = vector.load %arg6[%c0_14, %c0_15] : memref<1x128xf32, #tpu.memory_space<vmem>>, vector<1x128xf32>
      %16 = vector.broadcast %15 : vector<1x128xf32> to vector<2048x128xf32>
      %17 = arith.addf %14, %16 : vector<2048x128xf32>
      %18 = math.tanh %17 : vector<2048x128xf32>
      %c0_16 = arith.constant 0 : index
      %c0_17 = arith.constant 0 : index
      %c0_18 = arith.constant 0 : index
      %19 = vector.load %arg7[%c0_16, %c0_17, %c0_18] : memref<1x2048x128xf32, #tpu.memory_space<vmem>>, vector<1x2048x128xf32>
      %20 = vector.shape_cast %19 : vector<1x2048x128xf32> to vector<2048x128xf32>
      %21 = vector.shape_cast %18 : vector<2048x128xf32> to vector<1x2048x128xf32>
      tpu.vector_store %arg7[%c0_16, %c0_17, %c0_18], %21 {strides = array<i32>} : memref<1x2048x128xf32, #tpu.memory_space<vmem>>, vector<1x2048x128xf32>,
    } else {
    }
    return
  }
  func.func @transform_0(%arg0: i32, %arg1: i32, %arg2: i32, %arg3: i32) -> (i32, i32, i32) {
    %c0_i32 = arith.constant 0 : i32
    return %arg0, %arg1, %arg3 : i32, i32, i32
  }
  func.func @transform_1(%arg0: i32, %arg1: i32, %arg2: i32, %arg3: i32) -> (i32, i32, i32) {
    %c0_i32 = arith.constant 0 : i32
    return %arg0, %arg3, %arg2 : i32, i32, i32
  }
  func.func @transform_2(%arg0: i32, %arg1: i32, %arg2: i32, %arg3: i32) -> (i32, i32) {
    %c0_i32 = arith.constant 0 : i32
    %c0_i32_0 = arith.constant 0 : i32
    return %c0_i32, %arg2 : i32, i32
  }
  func.func @transform_3(%arg0: i32, %arg1: i32, %arg2: i32, %arg3: i32) -> (i32, i32, i32) {
    %c0_i32 = arith.constant 0 : i32
    return %arg0, %arg1, %arg2 : i32, i32, i32
  }
}

</mosaic_0001>

<bundles_post_ra>
// kernel: squeeze.0
= control target key start
LH: loop header
LB: loop body
LE: loop exit
PB: predicated region body
PF: predicated region fallthrough
CT: control target
= control target key end

     0   :  { %s2183_s0 = inlined_call_operand.vmem [shape: bf16[1,2,8192], index: 0, kind: input, shape index: {}]   ;;  %s2184_s1 = inlined_call_operand.vmem [shape: bf16[2,4,4,512], index: 1, kind: output, shape index: {}]  }
   0x1   :  { %v1757_v0 = vld [vmem:[%s2183_s0 + $0x3f] sm:$0x1]  ;;  %v1758_v1 = vld [vmem:[%s2183_s0 + $0x3e] sm:$0x1]  ;;  %v1759_v2 = vld [vmem:[%s2183_s0 + $0x3d] sm:$0x1] }
   0x2   :  { %v18_v3 = vunpack.c.l.bf16 %v1757_v0  ;;  %v34_v4 = vunpack.c.l.bf16 %v1758_v1  ;;  %v50_v5 = vunpack.c.l.bf16 %v1759_v2  ;;  %v1760_v6 = vld [vmem:[%s2183_s0 + $0x3c] sm:$0x1]  ;;  %v1761_v7 = vld [vmem:[%s2183_s0 + $0x3b] sm:$0x1]  ;;  %v1762_v8 = vld [vmem:[%s2183_s0 + $0x3a] sm:$0x1] }
   0x3   :  { %v66_v9 = vunpack.c.l.bf16 %v1760_v6  ;;  %v82_v10 = vunpack.c.l.bf16 %v1761_v7  ;;  %v98_v11 = vunpack.c.l.bf16 %v1762_v8  ;;  %v1763_v12 = vld [vmem:[%s2183_s0 + $0x39] sm:$0x1]  ;;  %v1764_v13 = vld [vmem:[%s2183_s0 + $0x38] sm:$0x1]  ;;  %v1765_v14 = vld [vmem:[%s2183_s0 + $0x37] sm:$0x1] }
   0x4   :  { %21 = vst [vmem:[#allocation1 + $0x148] sm:$0x3] %v18_v3  ;;  %37 = vst [vmem:[#allocation1 + $0x48] sm:$0x3] %v34_v4  ;;  %v114_v15 = vunpack.c.l.bf16 %v1763_v12  ;;  %v130_v16 = vunpack.c.l.bf16 %v1764_v13  ;;  %v146_v17 = vunpack.c.l.bf16 %v1765_v14  ;;  %v1766_v18 = vld [vmem:[%s2183_s0 + $0x36] sm:$0x1] }
   0x5   :  { %53 = vst [vmem:[#allocation1 + $0x120] sm:$0x3] %v50_v5  ;;  %v1767_v19 = vld [vmem:[%s2183_s0 + $0x35] sm:$0x1]  ;;  %v1768_v20 = vld [vmem:[%s2183_s0 + $0x34] sm:$0x1]  ;;  %v162_v21 = vunpack.c.l.bf16 %v1766_v18 }
   0x6   :  { %69 = vst [vmem:[#allocation1 + $0x1e0] sm:$0x3] %v66_v9  ;;  %85 = vst [vmem:[#allocation1 + $0x1a8] sm:$0x3] %v82_v10  ;;  %v178_v22 = vunpack.c.l.bf16 %v1767_v19  ;;  %v194_v23 = vunpack.c.l.bf16 %v1768_v20  ;;  %v1769_v24 = vld [vmem:[%s2183_s0 + $0x33] sm:$0x1] }
   0x7   :  { %101 = vst [vmem:[#allocation1 + $0x90] sm:$0x3] %v98_v11  ;;  %v1770_v25 = vld [vmem:[%s2183_s0 + $0x32] sm:$0x1]  ;;  %v1771_v26 = vld [vmem:[%s2183_s0 + $0x31] sm:$0x1]  ;;  %v210_v27 = vunpack.c.l.bf16 %v1769_v24 }
   0x8   :  { %117 = vst [vmem:[#allocation1 + $0xc8] sm:$0x3] %v114_v15  ;;  %133 = vst [vmem:[#allocation1 + $0x1b0] sm:$0x3] %v130_v16  ;;  %v226_v28 = vunpack.c.l.bf16 %v1770_v25  ;;  %v242_v29 = vunpack.c.l.bf16 %v1771_v26  ;;  %v1772_v30 = vld [vmem:[%s2183_s0 + $0x30] sm:$0x1] }
   0x9   :  { %149 = vst [vmem:[#allocation1 + $0x78] sm:$0x3] %v146_v17  ;;  %v1773_v31 = vld [vmem:[%s2183_s0 + $0x2f] sm:$0x1]  ;;  %v1774_v32 = vld [vmem:[%s2183_s0 + $0x2e] sm:$0x1]  ;;  %v258_v33 = vunpack.c.l.bf16 %v1772_v30 }
   0xa   :  { %165 = vst [vmem:[#allocation1 + $0xe8] sm:$0x3] %v162_v21  ;;  %181 = vst [vmem:[#allocation1 + $0xe0] sm:$0x3] %v178_v22  ;;  %v274_v34 = vunpack.c.l.bf16 %v1773_v31  ;;  %v290_v35 = vunpack.c.l.bf16 %v1774_v32  ;;  %v1775_v36 = vld [vmem:[%s2183_s0 + $0x2d] sm:$0x1] }
   0xb   :  { %197 = vst [vmem:[#allocation1 + $0x160] sm:$0x3] %v194_v23  ;;  %v1776_v37 = vld [vmem:[%s2183_s0 + $0x2c] sm:$0x1]  ;;  %v1777_v38 = vld [vmem:[%s2183_s0 + $0x2b] sm:$0x1]  ;;  %v306_v39 = vunpack.c.l.bf16 %v1775_v36 }
   0xc   :  { %213 = vst [vmem:[#allocation1 + $0xd8] sm:$0x3] %v210_v27  ;;  %229 = vst [vmem:[#allocation1 + $0xa8] sm:$0x3] %v226_v28  ;;  %v322_v40 = vunpack.c.l.bf16 %v1776_v37  ;;  %v338_v41 = vunpack.c.l.bf16 %v1777_v38  ;;  %v1778_v42 = vld [vmem:[%s2183_s0 + $0x2a] sm:$0x1] }
   0xd   :  { %245 = vst [vmem:[#allocation1 + $0xf0] sm:$0x3] %v242_v29  ;;  %v1779_v43 = vld [vmem:[%s2183_s0 + $0x29] sm:$0x1]  ;;  %v1780_v44 = vld [vmem:[%s2183_s0 + $0x28] sm:$0x1]  ;;  %v354_v45 = vunpack.c.l.bf16 %v1778_v42 }
   0xe   :  { %261 = vst [vmem:[#allocation1 + $0x198] sm:$0x3] %v258_v33  ;;  %277 = vst [vmem:[#allocation1 + $0x118] sm:$0x3] %v274_v34  ;;  %v370_v46 = vunpack.c.l.bf16 %v1779_v43  ;;  %v386_v47 = vunpack.c.l.bf16 %v1780_v44  ;;  %v1781_v48 = vld [vmem:[%s2183_s0 + $0x27] sm:$0x1] }
   0xf   :  { %293 = vst [vmem:[#allocation1 + $0x70] sm:$0x3] %v290_v35  ;;  %v1782_v49 = vld [vmem:[%s2183_s0 + $0x26] sm:$0x1]  ;;  %v1783_v50 = vld [vmem:[%s2183_s0 + $0x25] sm:$0x1]  ;;  %v402_v51 = vunpack.c.l.bf16 %v1781_v48 }
  0x10   :  { %309 = vst [vmem:[#allocation1 + $0xc0] sm:$0x3] %v306_v39  ;;  %325 = vst [vmem:[#allocation1 + $0xb8] sm:$0x3] %v322_v40  ;;  %v418_v52 = vunpack.c.l.bf16 %v1782_v49  ;;  %v434_v53 = vunpack.c.l.bf16 %v1783_v50  ;;  %v1784_v54 = vld [vmem:[%s2183_s0 + $0x24] sm:$0x1] }
  0x11   :  { %341 = vst [vmem:[#allocation1 + $0x178] sm:$0x3] %v338_v41  ;;  %v1785_v55 = vld [vmem:[%s2183_s0 + $0x23] sm:$0x1]  ;;  %v1786_v56 = vld [vmem:[%s2183_s0 + $0x22] sm:$0x1]  ;;  %v450_v57 = vunpack.c.l.bf16 %v1784_v54 }
  0x12   :  { %357 = vst [vmem:[#allocation1 + $0x50] sm:$0x3] %v354_v45  ;;  %373 = vst [vmem:[#allocation1 + $0x40] sm:$0x3] %v370_v46  ;;  %v466_v58 = vunpack.c.l.bf16 %v1785_v55  ;;  %v482_v59 = vunpack.c.l.bf16 %v1786_v56  ;;  %v1787_v60 = vld [vmem:[%s2183_s0 + $0x21] sm:$0x1] }
  0x13   :  { %389 = vst [vmem:[#allocation1 + $0x1d0] sm:$0x3] %v386_v47  ;;  %v1788_v61 = vld [vmem:[%s2183_s0 + $0x20] sm:$0x1]  ;;  %v1789_v62 = vld [vmem:[%s2183_s0 + $0x1f] sm:$0x1]  ;;  %v498_v63 = vunpack.c.l.bf16 %v1787_v60 }
  0x14   :  { %405 = vst [vmem:[#allocation1 + $0x10] sm:$0x3] %v402_v51  ;;  %421 = vst [vmem:[#allocation1 + $0x100] sm:$0x3] %v418_v52  ;;  %v514_v0 = vunpack.c.l.bf16 %v1788_v61  ;;  %v530_v1 = vunpack.c.l.bf16 %v1789_v62  ;;  %v1790_v2 = vld [vmem:[%s2183_s0 + $0x1e] sm:$0x1] }
  0x15   :  { %437 = vst [vmem:[#allocation1 + $0x98] sm:$0x3] %v434_v53  ;;  %v1791_v3 = vld [vmem:[%s2183_s0 + $0x1d] sm:$0x1]  ;;  %v1792_v4 = vld [vmem:[%s2183_s0 + $0x1c] sm:$0x1]  ;;  %v546_v5 = vunpack.c.l.bf16 %v1790_v2 }
  0x16   :  { %453 = vst [vmem:[#allocation1 + $0x1c8] sm:$0x3] %v450_v57  ;;  %469 = vst [vmem:[#allocation1 + $0x18] sm:$0x3] %v466_v58  ;;  %v562_v6 = vunpack.c.l.bf16 %v1791_v3  ;;  %v578_v7 = vunpack.c.l.bf16 %v1792_v4  ;;  %v1793_v8 = vld [vmem:[%s2183_s0 + $0x1b] sm:$0x1] }
  0x17   :  { %485 = vst [vmem:[#allocation1 + $0x1f8] sm:$0x3] %v482_v59  ;;  %v1794_v9 = vld [vmem:[%s2183_s0 + $0x1a] sm:$0x1]  ;;  %v1795_v10 = vld [vmem:[%s2183_s0 + $0x19] sm:$0x1]  ;;  %v594_v11 = vunpack.c.l.bf16 %v1793_v8 }
  0x18   :  { %501 = vst [vmem:[#allocation1 + $0x108] sm:$0x3] %v498_v63  ;;  %517 = vst [vmem:[#allocation1 + $0x1f0] sm:$0x3] %v514_v0  ;;  %v610_v12 = vunpack.c.l.bf16 %v1794_v9  ;;  %v626_v13 = vunpack.c.l.bf16 %v1795_v10  ;;  %v1796_v14 = vld [vmem:[%s2183_s0 + $0x18] sm:$0x1] }
  0x19   :  { %533 = vst [vmem:[#allocation1 + $0xb0] sm:$0x3] %v530_v1  ;;  %v1797_v15 = vld [vmem:[%s2183_s0 + $0x17] sm:$0x1]  ;;  %v1798_v16 = vld [vmem:[%s2183_s0 + $0x16] sm:$0x1]  ;;  %v642_v17 = vunpack.c.l.bf16 %v1796_v14 }
  0x1a   :  { %549 = vst [vmem:[#allocation1 + $0x28] sm:$0x3] %v546_v5  ;;  %565 = vst [vmem:[#allocation1 + $0xf8] sm:$0x3] %v562_v6  ;;  %v658_v18 = vunpack.c.l.bf16 %v1797_v15  ;;  %v674_v19 = vunpack.c.l.bf16 %v1798_v16  ;;  %v1799_v20 = vld [vmem:[%s2183_s0 + $0x15] sm:$0x1] }
  0x1b   :  { %581 = vst [vmem:[#allocation1 + $0x130] sm:$0x3] %v578_v7  ;;  %v1800_v21 = vld [vmem:[%s2183_s0 + $0x14] sm:$0x1]  ;;  %v1801_v22 = vld [vmem:[%s2183_s0 + $0x13] sm:$0x1]  ;;  %v690_v23 = vunpack.c.l.bf16 %v1799_v20 }
  0x1c   :  { %597 = vst [vmem:[#allocation1 + $0x1b8] sm:$0x3] %v594_v11  ;;  %613 = vst [vmem:[#allocation1] sm:$0x3] %v610_v12  ;;  %v706_v24 = vunpack.c.l.bf16 %v1800_v21  ;;  %v722_v25 = vunpack.c.l.bf16 %v1801_v22  ;;  %v1802_v26 = vld [vmem:[%s2183_s0 + $0x12] sm:$0x1] }
  0x1d   :  { %629 = vst [vmem:[#allocation1 + $0x1d8] sm:$0x3] %v626_v13  ;;  %v1803_v27 = vld [vmem:[%s2183_s0 + $0x11] sm:$0x1]  ;;  %v1804_v28 = vld [vmem:[%s2183_s0 + $0x10] sm:$0x1]  ;;  %v738_v29 = vunpack.c.l.bf16 %v1802_v26 }
  0x1e   :  { %645 = vst [vmem:[#allocation1 + $0xd0] sm:$0x3] %v642_v17  ;;  %661 = vst [vmem:[#allocation1 + $0x58] sm:$0x3] %v658_v18  ;;  %v754_v30 = vunpack.c.l.bf16 %v1803_v27  ;;  %v770_v31 = vunpack.c.l.bf16 %v1804_v28  ;;  %v1805_v32 = vld [vmem:[%s2183_s0 + $0xf] sm:$0x1] }
  0x1f   :  { %677 = vst [vmem:[#allocation1 + $0x8] sm:$0x3] %v674_v19  ;;  %v1806_v33 = vld [vmem:[%s2183_s0 + $0xe] sm:$0x1]  ;;  %v1807_v34 = vld [vmem:[%s2183_s0 + $0xd] sm:$0x1]  ;;  %v786_v35 = vunpack.c.l.bf16 %v1805_v32 }
  0x20   :  { %693 = vst [vmem:[#allocation1 + $0x110] sm:$0x3] %v690_v23  ;;  %709 = vst [vmem:[#allocation1 + $0x180] sm:$0x3] %v706_v24  ;;  %v802_v36 = vunpack.c.l.bf16 %v1806_v33  ;;  %v818_v37 = vunpack.c.l.bf16 %v1807_v34  ;;  %v1808_v38 = vld [vmem:[%s2183_s0 + $0xc] sm:$0x1] }
  0x21   :  { %725 = vst [vmem:[#allocation1 + $0x188] sm:$0x3] %v722_v25  ;;  %v1809_v39 = vld [vmem:[%s2183_s0 + $0xb] sm:$0x1]  ;;  %v1810_v40 = vld [vmem:[%s2183_s0 + $0xa] sm:$0x1]  ;;  %v834_v41 = vunpack.c.l.bf16 %v1808_v38 }
  0x22   :  { %741 = vst [vmem:[#allocation1 + $0x168] sm:$0x3] %v738_v29  ;;  %757 = vst [vmem:[#allocation1 + $0x20] sm:$0x3] %v754_v30  ;;  %v850_v42 = vunpack.c.l.bf16 %v1809_v39  ;;  %v866_v43 = vunpack.c.l.bf16 %v1810_v40  ;;  %v1811_v44 = vld [vmem:[%s2183_s0 + $0x9] sm:$0x1] }
  0x23   :  { %773 = vst [vmem:[#allocation1 + $0x128] sm:$0x3] %v770_v31  ;;  %v1812_v45 = vld [vmem:[%s2183_s0 + $0x8] sm:$0x1]  ;;  %v1813_v46 = vld [vmem:[%s2183_s0 + $0x7] sm:$0x1]  ;;  %v882_v47 = vunpack.c.l.bf16 %v1811_v44 }
  0x24   :  { %789 = vst [vmem:[#allocation1 + $0x140] sm:$0x3] %v786_v35  ;;  %805 = vst [vmem:[#allocation1 + $0x170] sm:$0x3] %v802_v36  ;;  %v898_v48 = vunpack.c.l.bf16 %v1812_v45  ;;  %v914_v49 = vunpack.c.l.bf16 %v1813_v46  ;;  %v1814_v50 = vld [vmem:[%s2183_s0 + $0x6] sm:$0x1] }
  0x25   :  { %821 = vst [vmem:[#allocation1 + $0x150] sm:$0x3] %v818_v37  ;;  %v1815_v51 = vld [vmem:[%s2183_s0 + $0x5] sm:$0x1]  ;;  %v1816_v52 = vld [vmem:[%s2183_s0 + $0x4] sm:$0x1]  ;;  %v930_v53 = vunpack.c.l.bf16 %v1814_v50 }
  0x26   :  { %837 = vst [vmem:[#allocation1 + $0x30] sm:$0x3] %v834_v41  ;;  %853 = vst [vmem:[#allocation1 + $0x88] sm:$0x3] %v850_v42  ;;  %v946_v54 = vunpack.c.l.bf16 %v1815_v51  ;;  %v962_v55 = vunpack.c.l.bf16 %v1816_v52  ;;  %v1817_v56 = vld [vmem:[%s2183_s0 + $0x3] sm:$0x1] }
  0x27   :  { %869 = vst [vmem:[#allocation1 + $0x80] sm:$0x3] %v866_v43  ;;  %v1818_v57 = vld [vmem:[%s2183_s0 + $0x2] sm:$0x1]  ;;  %v1819_v58 = vld [vmem:[%s2183_s0 + $0x1] sm:$0x1]  ;;  %v978_v59 = vunpack.c.l.bf16 %v1817_v56 }
  0x28   :  { %885 = vst [vmem:[#allocation1 + $0x190] sm:$0x3] %v882_v47  ;;  %901 = vst [vmem:[#allocation1 + $0x68] sm:$0x3] %v898_v48  ;;  %v994_v60 = vunpack.c.l.bf16 %v1818_v57  ;;  %v1009_v61 = vunpack.c.l.bf16 %v1819_v58  ;;  %v1022_v62 = vld [vmem:[%s2183_s0] sm:$0x1] }
  0x29   :  { %917 = vst [vmem:[#allocation1 + $0x60] sm:$0x3] %v914_v49  ;;  %v1193_v63 = vld [vmem:[#allocation1 + $0x130] sm:$0x3]   ;;  %v1199_v0 = vld [vmem:[#allocation1 + $0xf8] sm:$0x3]   ;;  %v1023_v1 = vunpack.c.l.bf16 %v1022_v62 }
  0x2a   :  { %933 = vst [vmem:[#allocation1 + $0x1c0] sm:$0x3] %v930_v53  ;;  %949 = vst [vmem:[#allocation1 + $0x138] sm:$0x3] %v946_v54  ;;  %v1175_v2 = vld [vmem:[#allocation1 + $0x1d8] sm:$0x3]  }
  0x2b   :  { %965 = vst [vmem:[#allocation1 + $0x38] sm:$0x3] %v962_v55  ;;  %v1181_v3 = vld [vmem:[#allocation1] sm:$0x3]   ;;  %v1187_v4 = vld [vmem:[#allocation1 + $0x1b8] sm:$0x3]  }
  0x2c   :  { %1195 = vst [vmem:[#allocation0 + $0x23] sm:$0x1] %v1193_v63   ;;  %1197 = vst [vmem:[#allocation0 + $0xa2] sm:$0x2] %v1193_v63   ;;  %v1157_v5 = vld [vmem:[#allocation1 + $0x8] sm:$0x3]  }
  0x2d   :  { %1201 = vst [vmem:[#allocation0 + $0x2b] sm:$0x1] %v1199_v0   ;;  %1203 = vst [vmem:[#allocation0 + $0xaa] sm:$0x2] %v1199_v0   ;;  %v1163_v6 = vld [vmem:[#allocation1 + $0x58] sm:$0x3]  }
  0x2e   :  { %981 = vst [vmem:[#allocation1 + $0xa0] sm:$0x3] %v978_v59  ;;  %997 = vst [vmem:[#allocation1 + $0x1e8] sm:$0x3] %v994_v60  ;;  %v1169_v7 = vld [vmem:[#allocation1 + $0xd0] sm:$0x3]  }
  0x2f   :  { %1012 = vst [vmem:[#allocation1 + $0x1a0] sm:$0x3] %v1009_v61  ;;  %1177 = vst [vmem:[#allocation0 + $0x2a] sm:$0x1] %v1175_v2   ;;  %v1139_v8 = vld [vmem:[#allocation1 + $0x188] sm:$0x3]  }
  0x30   :  { %1179 = vst [vmem:[#allocation0 + $0xa9] sm:$0x2] %v1175_v2   ;;  %1183 = vst [vmem:[#allocation0 + $0x32] sm:$0x1] %v1181_v3   ;;  %v1145_v9 = vld [vmem:[#allocation1 + $0x180] sm:$0x3]  }
  0x31   :  { %1185 = vst [vmem:[#allocation0 + $0xb1] sm:$0x2] %v1181_v3   ;;  %1189 = vst [vmem:[#allocation0 + $0x3a] sm:$0x1] %v1187_v4   ;;  %v1151_v10 = vld [vmem:[#allocation1 + $0x110] sm:$0x3]  }
  0x32   :  { %1191 = vst [vmem:[#allocation0 + $0xb9] sm:$0x2] %v1187_v4   ;;  %1025 = vst [vmem:[#allocation1 + $0x158] sm:$0x3] %v1023_v1  ;;  %v1121_v11 = vld [vmem:[#allocation1 + $0x128] sm:$0x3]  }
  0x33   :  { %1159 = vst [vmem:[#allocation0 + $0x31] sm:$0x1] %v1157_v5   ;;  %1161 = vst [vmem:[#allocation0 + $0xb0] sm:$0x2] %v1157_v5   ;;  %v1127_v12 = vld [vmem:[#allocation1 + $0x20] sm:$0x3]  }
  0x34   :  { %1165 = vst [vmem:[#allocation0 + $0x39] sm:$0x1] %v1163_v6   ;;  %1167 = vst [vmem:[#allocation0 + $0xb8] sm:$0x2] %v1163_v6   ;;  %v1133_v13 = vld [vmem:[#allocation1 + $0x168] sm:$0x3]  }
  0x35   :  { %1171 = vst [vmem:[#allocation0 + $0x22] sm:$0x1] %v1169_v7   ;;  %1173 = vst [vmem:[#allocation0 + $0xa1] sm:$0x2] %v1169_v7   ;;  %v1103_v14 = vld [vmem:[#allocation1 + $0x150] sm:$0x3]  }
  0x36   :  { %1141 = vst [vmem:[#allocation0 + $0x38] sm:$0x1] %v1139_v8   ;;  %1143 = vst [vmem:[#allocation0 + $0xb7] sm:$0x2] %v1139_v8   ;;  %v1109_v15 = vld [vmem:[#allocation1 + $0x170] sm:$0x3]  }
  0x37   :  { %1147 = vst [vmem:[#allocation0 + $0x21] sm:$0x1] %v1145_v9   ;;  %1149 = vst [vmem:[#allocation0 + $0xa0] sm:$0x2] %v1145_v9   ;;  %v1115_v16 = vld [vmem:[#allocation1 + $0x140] sm:$0x3]  }
  0x38   :  { %1153 = vst [vmem:[#allocation0 + $0x29] sm:$0x1] %v1151_v10   ;;  %1155 = vst [vmem:[#allocation0 + $0xa8] sm:$0x2] %v1151_v10   ;;  %v1085_v17 = vld [vmem:[#allocation1 + $0x80] sm:$0x3]  }
  0x39   :  { %1123 = vst [vmem:[#allocation0 + $0x20] sm:$0x1] %v1121_v11   ;;  %1125 = vst [vmem:[#allocation0 + $0x9f] sm:$0x2] %v1121_v11   ;;  %v1091_v18 = vld [vmem:[#allocation1 + $0x88] sm:$0x3]  }
  0x3a   :  { %1129 = vst [vmem:[#allocation0 + $0x28] sm:$0x1] %v1127_v12   ;;  %1131 = vst [vmem:[#allocation0 + $0xa7] sm:$0x2] %v1127_v12   ;;  %v1097_v19 = vld [vmem:[#allocation1 + $0x30] sm:$0x3]  }
  0x3b   :  { %1135 = vst [vmem:[#allocation0 + $0x30] sm:$0x1] %v1133_v13   ;;  %1137 = vst [vmem:[#allocation0 + $0xaf] sm:$0x2] %v1133_v13   ;;  %v1067_v20 = vld [vmem:[#allocation1 + $0x60] sm:$0x3]  }
  0x3c   :  { %1105 = vst [vmem:[#allocation0 + $0xb] sm:$0x1] %v1103_v14   ;;  %1107 = vst [vmem:[#allocation0 + $0x8a] sm:$0x2] %v1103_v14   ;;  %v1073_v21 = vld [vmem:[#allocation1 + $0x68] sm:$0x3]  }
  0x3d   :  { %1111 = vst [vmem:[#allocation0 + $0x13] sm:$0x1] %v1109_v15   ;;  %1113 = vst [vmem:[#allocation0 + $0x92] sm:$0x2] %v1109_v15   ;;  %v1079_v22 = vld [vmem:[#allocation1 + $0x190] sm:$0x3]  }
  0x3e   :  { %1117 = vst [vmem:[#allocation0 + $0x1b] sm:$0x1] %v1115_v16   ;;  %1119 = vst [vmem:[#allocation0 + $0x9a] sm:$0x2] %v1115_v16   ;;  %v1049_v23 = vld [vmem:[#allocation1 + $0x38] sm:$0x3]  }
  0x3f   :  { %1087 = vst [vmem:[#allocation0 + $0x12] sm:$0x1] %v1085_v17   ;;  %1089 = vst [vmem:[#allocation0 + $0x91] sm:$0x2] %v1085_v17   ;;  %v1055_v24 = vld [vmem:[#allocation1 + $0x138] sm:$0x3]  }
  0x40   :  { %1093 = vst [vmem:[#allocation0 + $0x1a] sm:$0x1] %v1091_v18   ;;  %1095 = vst [vmem:[#allocation0 + $0x99] sm:$0x2] %v1091_v18   ;;  %v1061_v25 = vld [vmem:[#allocation1 + $0x1c0] sm:$0x3]  }
  0x41   :  { %1099 = vst [vmem:[#allocation0 + $0x3] sm:$0x1] %v1097_v19   ;;  %1101 = vst [vmem:[#allocation0 + $0x82] sm:$0x2] %v1097_v19   ;;  %v1031_v26 = vld [vmem:[#allocation1 + $0x1a0] sm:$0x3]  }
  0x42   :  { %1069 = vst [vmem:[#allocation0 + $0x19] sm:$0x1] %v1067_v20   ;;  %1071 = vst [vmem:[#allocation0 + $0x98] sm:$0x2] %v1067_v20   ;;  %v1037_v27 = vld [vmem:[#allocation1 + $0x1e8] sm:$0x3]  }
  0x43   :  { %1075 = vst [vmem:[#allocation0 + $0x2] sm:$0x1] %v1073_v21   ;;  %1077 = vst [vmem:[#allocation0 + $0x81] sm:$0x2] %v1073_v21   ;;  %v1043_v28 = vld [vmem:[#allocation1 + $0xa0] sm:$0x3]  }
  0x44   :  { %1081 = vst [vmem:[#allocation0 + $0xa] sm:$0x1] %v1079_v22   ;;  %1083 = vst [vmem:[#allocation0 + $0x89] sm:$0x2] %v1079_v22   ;;  %v1026_v29 = vld [vmem:[#allocation1 + $0x158] sm:$0x3]  }
  0x45   :  { %1051 = vst [vmem:[#allocation0 + $0x1] sm:$0x1] %v1049_v23   ;;  %1053 = vst [vmem:[#allocation0 + $0x80] sm:$0x2] %v1049_v23   ;;  %v1205_v30 = vld [vmem:[#allocation1 + $0x28] sm:$0x3]  }
  0x46   :  { %1057 = vst [vmem:[#allocation0 + $0x9] sm:$0x1] %v1055_v24   ;;  %1059 = vst [vmem:[#allocation0 + $0x88] sm:$0x2] %v1055_v24   ;;  %v1211_v31 = vld [vmem:[#allocation1 + $0xb0] sm:$0x3]  }
  0x47   :  { %1063 = vst [vmem:[#allocation0 + $0x11] sm:$0x1] %v1061_v25   ;;  %1065 = vst [vmem:[#allocation0 + $0x90] sm:$0x2] %v1061_v25   ;;  %v1217_v32 = vld [vmem:[#allocation1 + $0x1f0] sm:$0x3]  }
  0x48   :  { %1033 = vst [vmem:[#allocation0 + $0x8] sm:$0x1] %v1031_v26   ;;  %1035 = vst [vmem:[#allocation0 + $0x87] sm:$0x2] %v1031_v26   ;;  %v1223_v33 = vld [vmem:[#allocation1 + $0x108] sm:$0x3]  }
  0x49   :  { %1039 = vst [vmem:[#allocation0 + $0x10] sm:$0x1] %v1037_v27   ;;  %1041 = vst [vmem:[#allocation0 + $0x8f] sm:$0x2] %v1037_v27   ;;  %v1229_v34 = vld [vmem:[#allocation1 + $0x1f8] sm:$0x3]  }
  0x4a   :  { %1045 = vst [vmem:[#allocation0 + $0x18] sm:$0x1] %v1043_v28   ;;  %1047 = vst [vmem:[#allocation0 + $0x97] sm:$0x2] %v1043_v28   ;;  %v1235_v35 = vld [vmem:[#allocation1 + $0x18] sm:$0x3]  }
  0x4b   :  { %1027 = vst [vmem:[#allocation0] sm:$0x1] %v1026_v29   ;;  %1029 = vst [vmem:[#allocation0 + $0x7f] sm:$0x2] %v1026_v29   ;;  %v1241_v36 = vld [vmem:[#allocation1 + $0x1c8] sm:$0x3]  }
  0x4c   :  { %1207 = vst [vmem:[#allocation0 + $0x33] sm:$0x1] %v1205_v30   ;;  %1209 = vst [vmem:[#allocation0 + $0xb2] sm:$0x2] %v1205_v30   ;;  %v1247_v37 = vld [vmem:[#allocation1 + $0x98] sm:$0x3]  }
  0x4d   :  { %1213 = vst [vmem:[#allocation0 + $0x3b] sm:$0x1] %v1211_v31   ;;  %1215 = vst [vmem:[#allocation0 + $0xba] sm:$0x2] %v1211_v31   ;;  %v1253_v38 = vld [vmem:[#allocation1 + $0x100] sm:$0x3]  }
  0x4e   :  { %1219 = vst [vmem:[#allocation0 + $0x40] sm:$0x1] %v1217_v32   ;;  %1221 = vst [vmem:[#allocation0 + $0xbf] sm:$0x2] %v1217_v32   ;;  %v1259_v39 = vld [vmem:[#allocation1 + $0x10] sm:$0x3]  }
  0x4f   :  { %1225 = vst [vmem:[#allocation0 + $0x48] sm:$0x1] %v1223_v33   ;;  %1227 = vst [vmem:[#allocation0 + $0xc7] sm:$0x2] %v1223_v33   ;;  %v1265_v40 = vld [vmem:[#allocation1 + $0x1d0] sm:$0x3]  }
  0x50   :  { %1231 = vst [vmem:[#allocation0 + $0x50] sm:$0x1] %v1229_v34   ;;  %1233 = vst [vmem:[#allocation0 + $0xcf] sm:$0x2] %v1229_v34   ;;  %v1271_v41 = vld [vmem:[#allocation1 + $0x40] sm:$0x3]  }
  0x51   :  { %1237 = vst [vmem:[#allocation0 + $0x58] sm:$0x1] %v1235_v35   ;;  %1239 = vst [vmem:[#allocation0 + $0xd7] sm:$0x2] %v1235_v35   ;;  %v1277_v42 = vld [vmem:[#allocation1 + $0x50] sm:$0x3]  }
  0x52   :  { %1243 = vst [vmem:[#allocation0 + $0x41] sm:$0x1] %v1241_v36   ;;  %1245 = vst [vmem:[#allocation0 + $0xc0] sm:$0x2] %v1241_v36   ;;  %v1283_v43 = vld [vmem:[#allocation1 + $0x178] sm:$0x3]  }
  0x53   :  { %1249 = vst [vmem:[#allocation0 + $0x49] sm:$0x1] %v1247_v37   ;;  %1251 = vst [vmem:[#allocation0 + $0xc8] sm:$0x2] %v1247_v37   ;;  %v1289_v44 = vld [vmem:[#allocation1 + $0xb8] sm:$0x3]  }
  0x54   :  { %1255 = vst [vmem:[#allocation0 + $0x51] sm:$0x1] %v1253_v38   ;;  %1257 = vst [vmem:[#allocation0 + $0xd0] sm:$0x2] %v1253_v38   ;;  %v1295_v45 = vld [vmem:[#allocation1 + $0xc0] sm:$0x3]  }
  0x55   :  { %1261 = vst [vmem:[#allocation0 + $0x59] sm:$0x1] %v1259_v39   ;;  %1263 = vst [vmem:[#allocation0 + $0xd8] sm:$0x2] %v1259_v39   ;;  %v1301_v46 = vld [vmem:[#allocation1 + $0x70] sm:$0x3]  }
  0x56   :  { %1267 = vst [vmem:[#allocation0 + $0x42] sm:$0x1] %v1265_v40   ;;  %1269 = vst [vmem:[#allocation0 + $0xc1] sm:$0x2] %v1265_v40   ;;  %v1307_v47 = vld [vmem:[#allocation1 + $0x118] sm:$0x3]  }
  0x57   :  { %1273 = vst [vmem:[#allocation0 + $0x4a] sm:$0x1] %v1271_v41   ;;  %1275 = vst [vmem:[#allocation0 + $0xc9] sm:$0x2] %v1271_v41   ;;  %v1313_v48 = vld [vmem:[#allocation1 + $0x198] sm:$0x3]  }
  0x58   :  { %1279 = vst [vmem:[#allocation0 + $0x52] sm:$0x1] %v1277_v42   ;;  %1281 = vst [vmem:[#allocation0 + $0xd1] sm:$0x2] %v1277_v42   ;;  %v1319_v49 = vld [vmem:[#allocation1 + $0xf0] sm:$0x3]  }
  0x59   :  { %1285 = vst [vmem:[#allocation0 + $0x5a] sm:$0x1] %v1283_v43   ;;  %1287 = vst [vmem:[#allocation0 + $0xd9] sm:$0x2] %v1283_v43   ;;  %v1325_v50 = vld [vmem:[#allocation1 + $0xa8] sm:$0x3]  }
  0x5a   :  { %1291 = vst [vmem:[#allocation0 + $0x43] sm:$0x1] %v1289_v44   ;;  %1293 = vst [vmem:[#allocation0 + $0xc2] sm:$0x2] %v1289_v44   ;;  %v1331_v51 = vld [vmem:[#allocation1 + $0xd8] sm:$0x3]  }
  0x5b   :  { %1297 = vst [vmem:[#allocation0 + $0x4b] sm:$0x1] %v1295_v45   ;;  %1299 = vst [vmem:[#allocation0 + $0xca] sm:$0x2] %v1295_v45   ;;  %v1337_v52 = vld [vmem:[#allocation1 + $0x160] sm:$0x3]  }
  0x5c   :  { %1303 = vst [vmem:[#allocation0 + $0x53] sm:$0x1] %v1301_v46   ;;  %1305 = vst [vmem:[#allocation0 + $0xd2] sm:$0x2] %v1301_v46   ;;  %v1343_v53 = vld [vmem:[#allocation1 + $0xe0] sm:$0x3]  }
  0x5d   :  { %1309 = vst [vmem:[#allocation0 + $0x5b] sm:$0x1] %v1307_v47   ;;  %1311 = vst [vmem:[#allocation0 + $0xda] sm:$0x2] %v1307_v47   ;;  %v1349_v54 = vld [vmem:[#allocation1 + $0xe8] sm:$0x3]  }
  0x5e   :  { %1315 = vst [vmem:[#allocation0 + $0x60] sm:$0x1] %v1313_v48   ;;  %1317 = vst [vmem:[#allocation0 + $0xdf] sm:$0x2] %v1313_v48   ;;  %v1355_v55 = vld [vmem:[#allocation1 + $0x78] sm:$0x3]  }
  0x5f   :  { %1321 = vst [vmem:[#allocation0 + $0x68] sm:$0x1] %v1319_v49   ;;  %1323 = vst [vmem:[#allocation0 + $0xe7] sm:$0x2] %v1319_v49   ;;  %v1361_v56 = vld [vmem:[#allocation1 + $0x1b0] sm:$0x3]  }
  0x60   :  { %1327 = vst [vmem:[#allocation0 + $0x70] sm:$0x1] %v1325_v50   ;;  %1329 = vst [vmem:[#allocation0 + $0xef] sm:$0x2] %v1325_v50   ;;  %v1367_v57 = vld [vmem:[#allocation1 + $0xc8] sm:$0x3]  }
  0x61   :  { %1333 = vst [vmem:[#allocation0 + $0x78] sm:$0x1] %v1331_v51   ;;  %1335 = vst [vmem:[#allocation0 + $0xf7] sm:$0x2] %v1331_v51   ;;  %v1373_v58 = vld [vmem:[#allocation1 + $0x90] sm:$0x3]  }
  0x62   :  { %1339 = vst [vmem:[#allocation0 + $0x61] sm:$0x1] %v1337_v52   ;;  %1341 = vst [vmem:[#allocation0 + $0xe0] sm:$0x2] %v1337_v52   ;;  %v1379_v59 = vld [vmem:[#allocation1 + $0x1a8] sm:$0x3]  }
  0x63   :  { %1345 = vst [vmem:[#allocation0 + $0x69] sm:$0x1] %v1343_v53   ;;  %1347 = vst [vmem:[#allocation0 + $0xe8] sm:$0x2] %v1343_v53   ;;  %v1385_v60 = vld [vmem:[#allocation1 + $0x1e0] sm:$0x3]  }
  0x64   :  { %1351 = vst [vmem:[#allocation0 + $0x71] sm:$0x1] %v1349_v54   ;;  %1353 = vst [vmem:[#allocation0 + $0xf0] sm:$0x2] %v1349_v54   ;;  %v1391_v61 = vld [vmem:[#allocation1 + $0x120] sm:$0x3]  }
  0x65   :  { %1357 = vst [vmem:[#allocation0 + $0x79] sm:$0x1] %v1355_v55   ;;  %1359 = vst [vmem:[#allocation0 + $0xf8] sm:$0x2] %v1355_v55   ;;  %v1397_v62 = vld [vmem:[#allocation1 + $0x48] sm:$0x3]  }
  0x66   :  { %1363 = vst [vmem:[#allocation0 + $0x62] sm:$0x1] %v1361_v56   ;;  %1365 = vst [vmem:[#allocation0 + $0xe1] sm:$0x2] %v1361_v56   ;;  %v1403_v63 = vld [vmem:[#allocation1 + $0x148] sm:$0x3]  }
  0x67   :  { %1369 = vst [vmem:[#allocation0 + $0x6a] sm:$0x1] %v1367_v57   ;;  %1371 = vst [vmem:[#allocation0 + $0xe9] sm:$0x2] %v1367_v57   ;;  %v1413_v0 = vld [vmem:[#allocation0] sm:$0xf] }
  0x68   :  { %1375 = vst [vmem:[#allocation0 + $0x72] sm:$0x1] %v1373_v58   ;;  %1377 = vst [vmem:[#allocation0 + $0xf1] sm:$0x2] %v1373_v58   ;;  %v1419_v1 = vld [vmem:[#allocation0 + $0x8] sm:$0xf] }
  0x69   :  { %1381 = vst [vmem:[#allocation0 + $0x7a] sm:$0x1] %v1379_v59   ;;  %1383 = vst [vmem:[#allocation0 + $0xf9] sm:$0x2] %v1379_v59   ;;  %v1426_v2 = vld [vmem:[#allocation0 + $0x10] sm:$0xf] }
  0x6a   :  { %1387 = vst [vmem:[#allocation0 + $0x63] sm:$0x1] %v1385_v60   ;;  %1389 = vst [vmem:[#allocation0 + $0xe2] sm:$0x2] %v1385_v60   ;;  %v1852_v3 = vmov 0.0  }
  0x6b   :  { %1393 = vst [vmem:[#allocation0 + $0x6b] sm:$0x1] %v1391_v61   ;;  %1395 = vst [vmem:[#allocation0 + $0xea] sm:$0x2] %v1391_v61   ;;  %v1414_v4 = vpack.c.bf16 %v1852_v3, %v1413_v0  ;;  %v1420_v5 = vpack.c.bf16 %v1852_v3, %v1419_v1  ;;  %v1427_v6 = vpack.c.bf16 %v1852_v3, %v1426_v2  ;;  %v1434_v7 = vld [vmem:[#allocation0 + $0x18] sm:$0xf] }
  0x6c   :  { %1399 = vst [vmem:[#allocation0 + $0x73] sm:$0x1] %v1397_v62   ;;  %1401 = vst [vmem:[#allocation0 + $0xf2] sm:$0x2] %v1397_v62   ;;  %v1442_v8 = vld [vmem:[#allocation0 + $0x20] sm:$0xf]  ;;  %v1435_v10 = vpack.c.bf16 %v1852_v3, %v1434_v7 }
  0x6d   :  { %1405 = vst [vmem:[#allocation0 + $0x7b] sm:$0x1] %v1403_v63   ;;  %1407 = vst [vmem:[#allocation0 + $0xfa] sm:$0x2] %v1403_v63   ;;  %v1450_v9 = vld [vmem:[#allocation0 + $0x28] sm:$0xf]  ;;  %v1443_v11 = vpack.c.bf16 %v1852_v3, %v1442_v8 }
  0x6e   :  { %v1451_v12 = vpack.c.bf16 %v1852_v3, %v1450_v9  ;;  %v1458_v13 = vld [vmem:[#allocation0 + $0x30] sm:$0xf]  ;;  %v1466_v14 = vld [vmem:[#allocation0 + $0x38] sm:$0xf]  ;;  %v1474_v15 = vld [vmem:[#allocation0 + $0x40] sm:$0xf] }
  0x6f   :  { %1417 = vst [vmem:[%s2184_s1] sm:$0x3] %v1414_v4  ;;  %1820 = vst [vmem:[%s2184_s1 + $0x2] sm:$0x3] %v1420_v5  ;;  %v1459_v16 = vpack.c.bf16 %v1852_v3, %v1458_v13  ;;  %v1467_v17 = vpack.c.bf16 %v1852_v3, %v1466_v14  ;;  %v1475_v18 = vpack.c.bf16 %v1852_v3, %v1474_v15  ;;  %v1482_v19 = vld [vmem:[#allocation0 + $0x48] sm:$0xf] }
  0x70   :  { %1821 = vst [vmem:[%s2184_s1 + $0x4] sm:$0x3] %v1427_v6  ;;  %v1490_v20 = vld [vmem:[#allocation0 + $0x50] sm:$0xf]  ;;  %v1498_v21 = vld [vmem:[#allocation0 + $0x58] sm:$0xf]  ;;  %v1483_v22 = vpack.c.bf16 %v1852_v3, %v1482_v19 }
  0x71   :  { %1822 = vst [vmem:[%s2184_s1 + $0x6] sm:$0x3] %v1435_v10  ;;  %1823 = vst [vmem:[%s2184_s1 + $0x8] sm:$0x3] %v1443_v11  ;;  %v1491_v23 = vpack.c.bf16 %v1852_v3, %v1490_v20  ;;  %v1499_v24 = vpack.c.bf16 %v1852_v3, %v1498_v21  ;;  %v1538_v25 = vld [vmem:[#allocation0 + $0x80] sm:$0xf] }
  0x72   :  { %1824 = vst [vmem:[%s2184_s1 + $0xa] sm:$0x3] %v1451_v12  ;;  %v1546_v26 = vld [vmem:[#allocation0 + $0x88] sm:$0xf]  ;;  %v1554_v27 = vld [vmem:[#allocation0 + $0x90] sm:$0xf]  ;;  %v1539_v28 = vpack.c.bf16 %v1852_v3, %v1538_v25 }
  0x73   :  { %1825 = vst [vmem:[%s2184_s1 + $0xc] sm:$0x3] %v1459_v16  ;;  %1826 = vst [vmem:[%s2184_s1 + $0xe] sm:$0x3] %v1467_v17  ;;  %v1547_v29 = vpack.c.bf16 %v1852_v3, %v1546_v26  ;;  %v1555_v30 = vpack.c.bf16 %v1852_v3, %v1554_v27  ;;  %v1562_v31 = vld [vmem:[#allocation0 + $0x98] sm:$0xf] }
  0x74   :  { %1827 = vst [vmem:[%s2184_s1 + $0x10] sm:$0x3] %v1475_v18  ;;  %v1570_v32 = vld [vmem:[#allocation0 + $0xa0] sm:$0xf]  ;;  %v1578_v33 = vld [vmem:[#allocation0 + $0xa8] sm:$0xf]  ;;  %v1563_v36 = vpack.c.bf16 %v1852_v3, %v1562_v31 }
  0x75   :  { %1828 = vst [vmem:[%s2184_s1 + $0x12] sm:$0x3] %v1483_v22  ;;  %1829 = vst [vmem:[%s2184_s1 + $0x14] sm:$0x3] %v1491_v23  ;;  %v1506_v34 = vld [vmem:[#allocation0 + $0x60] sm:$0xf]  ;;  %v1571_v37 = vpack.c.bf16 %v1852_v3, %v1570_v32  ;;  %v1579_v38 = vpack.c.bf16 %v1852_v3, %v1578_v33 }
  0x76   :  { %1830 = vst [vmem:[%s2184_s1 + $0x16] sm:$0x3] %v1499_v24  ;;  %v1514_v35 = vld [vmem:[#allocation0 + $0x68] sm:$0xf]  ;;  %v1586_v39 = vld [vmem:[#allocation0 + $0xb0] sm:$0xf]  ;;  %v1507_v40 = vpack.c.bf16 %v1852_v3, %v1506_v34 }
  0x77   :  { %v1515_v41 = vpack.c.bf16 %v1852_v3, %v1514_v35  ;;  %v1522_v42 = vld [vmem:[#allocation0 + $0x70] sm:$0xf]  ;;  %v1530_v43 = vld [vmem:[#allocation0 + $0x78] sm:$0xf]  ;;  %1835 = vst [vmem:[%s2184_s1 + $0x20] sm:$0x3] %v1539_v28  ;;  %v1587_v44 = vpack.c.bf16 %v1852_v3, %v1586_v39 }
  0x78   :  { %1836 = vst [vmem:[%s2184_s1 + $0x22] sm:$0x3] %v1547_v29  ;;  %1837 = vst [vmem:[%s2184_s1 + $0x24] sm:$0x3] %v1555_v30  ;;  %v1594_v45 = vld [vmem:[#allocation0 + $0xb8] sm:$0xf]  ;;  %v1523_v46 = vpack.c.bf16 %v1852_v3, %v1522_v42  ;;  %v1531_v47 = vpack.c.bf16 %v1852_v3, %v1530_v43 }
  0x79   :  { %1838 = vst [vmem:[%s2184_s1 + $0x26] sm:$0x3] %v1563_v36  ;;  %1839 = vst [vmem:[%s2184_s1 + $0x28] sm:$0x3] %v1571_v37  ;;  %v1595_v48 = vpack.c.bf16 %v1852_v3, %v1594_v45  ;;  %v1602_v49 = vld [vmem:[#allocation0 + $0xc0] sm:$0xf] }
  0x7a   :  { %1840 = vst [vmem:[%s2184_s1 + $0x2a] sm:$0x3] %v1579_v38  ;;  %v1610_v50 = vld [vmem:[#allocation0 + $0xc8] sm:$0xf]  ;;  %v1618_v51 = vld [vmem:[#allocation0 + $0xd0] sm:$0xf]  ;;  %v1603_v52 = vpack.c.bf16 %v1852_v3, %v1602_v49 }
  0x7b   :  { %1831 = vst [vmem:[%s2184_s1 + $0x18] sm:$0x3] %v1507_v40  ;;  %1832 = vst [vmem:[%s2184_s1 + $0x1a] sm:$0x3] %v1515_v41  ;;  %v1611_v53 = vpack.c.bf16 %v1852_v3, %v1610_v50  ;;  %v1619_v54 = vpack.c.bf16 %v1852_v3, %v1618_v51  ;;  %v1626_v55 = vld [vmem:[#allocation0 + $0xd8] sm:$0xf] }
  0x7c   :  { %1841 = vst [vmem:[%s2184_s1 + $0x2c] sm:$0x3] %v1587_v44  ;;  %v1634_v56 = vld [vmem:[#allocation0 + $0xe0] sm:$0xf]  ;;  %v1642_v57 = vld [vmem:[#allocation0 + $0xe8] sm:$0xf]  ;;  %v1627_v58 = vpack.c.bf16 %v1852_v3, %v1626_v55 }
  0x7d   :  { %1833 = vst [vmem:[%s2184_s1 + $0x1c] sm:$0x3] %v1523_v46  ;;  %1834 = vst [vmem:[%s2184_s1 + $0x1e] sm:$0x3] %v1531_v47  ;;  %v1635_v59 = vpack.c.bf16 %v1852_v3, %v1634_v56  ;;  %v1643_v60 = vpack.c.bf16 %v1852_v3, %v1642_v57  ;;  %v1650_v61 = vld [vmem:[#allocation0 + $0xf0] sm:$0xf] }
  0x7e   :  { %1842 = vst [vmem:[%s2184_s1 + $0x2e] sm:$0x3] %v1595_v48  ;;  %v1658_v62 = vld [vmem:[#allocation0 + $0xf8] sm:$0xf]  ;;  %1843 = vst [vmem:[%s2184_s1 + $0x30] sm:$0x3] %v1603_v52  ;;  %v1651_v63 = vpack.c.bf16 %v1852_v3, %v1650_v61 }
  0x7f   :  { %1844 = vst [vmem:[%s2184_s1 + $0x32] sm:$0x3] %v1611_v53  ;;  %1845 = vst [vmem:[%s2184_s1 + $0x34] sm:$0x3] %v1619_v54  ;;  %v1659_v0 = vpack.c.bf16 %v1852_v3, %v1658_v62 }
  0x80   :  { %1846 = vst [vmem:[%s2184_s1 + $0x36] sm:$0x3] %v1627_v58  ;;  %1847 = vst [vmem:[%s2184_s1 + $0x38] sm:$0x3] %v1635_v59 }
  0x81   :  { %1848 = vst [vmem:[%s2184_s1 + $0x3a] sm:$0x3] %v1643_v60  ;;  %1849 = vst [vmem:[%s2184_s1 + $0x3c] sm:$0x3] %v1651_v63 }
  0x82   :  { %1850 = vst [vmem:[%s2184_s1 + $0x3e] sm:$0x3] %v1659_v0 }

// kernel: _lambda_.5
= control target key start
LH: loop header
LB: loop body
LE: loop exit
PB: predicated region body
PF: predicated region fallthrough
CT: control target
= control target key end

     0   :  { %8 = vsyncpa [#allocation4], 0  ;;  %s1629_s0 = inlined_call_operand.vmem [shape: bf16[1,2,100], index: 0, kind: input, shape index: {}]   ;;  %s1630_s1 = inlined_call_operand.hbm [shape: bf16[1,100,8192], index: 1, kind: input, shape index: {}]   ;;  %s1631_s2 = inlined_call_operand.hbm [shape: f32[1,8192], index: 2, kind: input, shape index: {}]   ;;  %s1632_s3 = inlined_call_operand.vmem [shape: f32[1,2,8192], index: 3, kind: output, shape index: {}]  }
   0x1   :  { %10 = vsyncpa [#allocation4 + $0x1], 0 }
   0x2   :  { %11 = vsyncpa [#allocation6], 0 }
   0x3   :  { %13 = vsyncpa [#allocation6 + $0x1], 0  ;;  %s1424_s12 = smov 0   ;;  %s1426_s13 = smov 0  }
   0x4   :  { %s1428_s14 = smov 0   ;;  %s1430_s15 = smov 0  }
   0x5   :  { %s1432_s16 = smov 0   ;;  %s1434_s17 = smov 0  }
   0x6 LB: > { %s1128_s18 = sadd.s32 4294967295, %s1395_s17   ;;  %s37_s19 = sadd.s32 1, %s1391_s16  ;;  %s1395_s17 = sphi %s1434_s17, %s19_s17   ;;  %s1391_s16 = sphi %s1432_s16, %s1640_s16   ;;  %s1387_s15 = sphi %s1430_s15, %s1639_s15   ;;  %s1383_s14 = sphi %s1428_s14, %s1638_s14   ;;  %s1379_s13 = sphi %s1426_s13, %s1637_s13   ;;  %s1375_s12 = sphi %s1424_s12, %s1636_s12  }
   0x7   : > { %p39_p0 = scmp.ge.s32.totalorder %s37_s19, 8  ;;  %s86_s20 = sadd.s32 1, %s1383_s14 }
   0x8   : > { %p93_p1 = scmp.ne.s32.totalorder %s1383_s14, %s1379_s13  ;;  %p94_p2 = scmp.eq.s32.totalorder %s1395_s17, 0 }
   0x9   : > { %s1642_s19 = smov (%p39_p0, %s37_s19), 0  ;;  %p99_p4 = scmp.ne.s32.totalorder %s1379_s13, %s1375_s12 }
   0xa   : > { %p95_p3 = por %p94_p2, %p93_p1  ;;  %s82_s21 = ssub.s32 %s1391_s16, %s1642_s19 }
   0xb   : > { %p100_p5 = scmp.eq.s32.totalorder %s1128_s18, 0  ;;  %p84_p6 = scmp.eq.s32.totalorder %s82_s21, 0 }
   0xc   : > { %p1223_p8 = scmp.lt.s32.totalorder %s1395_s17, 8  ;;  %s1472_s24 = sand.u32 1, %s1383_s14  }
   0xd   : > { %p1463_p7 = por %p100_p5, %p99_p4  ;;  %s1208_s25 = sshll.u32 %s1391_s16, 9 }
   0xe   : > { %s1469_s23 = scalar_select %p84_p6, %s1383_s14, %s86_s20  }
   0xf   : > { %s1210_s26 = smul.u32 416, %s1472_s24  ;;  %s206_s29 = scalar_lea.hbm %s1630_s1, %s1208_s25 }
  0x10   : > { %p1479_p9 = pnand %p1223_p8, %p95_p3  ;;  %p1138_p10 = scmp.ge.s32.totalorder %s1395_s17, 1 }
  0x11   : > { %s195_s4 = scalar_lea.vmem [#allocation3], %s1210_s26  ;;  %s192_s6 = scalar_lea.sflag [#allocation4], %s1472_s24 }
  0x12   : > { %s207_s5 = sshll.u32 %s195_s4, 4  ;;  %p1287_p11 = pneg %p1479_p9  ;;  %s208_s5 = int_to_ptr.vmem [resolvable:$true] %s207_s5 }
  0x13   : > { %s1298_s7 = scalar_lea.vmem %s208_s5, 6656  ;;  %s1397_s8 = smov [#allocation3]  }
  0x14   : > { %p1299_p12 = scmp.ne.s32.totalorder %s208_s5, %s1298_s7  ;;  %s1303_s9 = sshll.u32 %s1397_s8, 4  ;;  %s1304_s9 = int_to_ptr.vmem [resolvable:$false] %s1303_s9 }
  0x15   : > { %s1305_s10 = scalar_lea.vmem %s1304_s9, 13312  ;;  %p1306_p1 = scmp.lt.s32.totalorder %s208_s5, %s1304_s9 }
  0x16   : > { %p1301_p13 = pnand %p1299_p12, %p1287_p11  ;;  %p1307_p2 = scmp.lt.s32.totalorder %s1305_s10, %s1298_s7 }
  0x18   : > { %p1302_p0 = pneg %p1301_p13  ;;  %p1308_p3 = por %p1307_p2, %p1306_p1 }
  0x1a   : > { %p1309_p4 = pnand %p1308_p3, %p1302_p0 }
  0x1c   : > { %1312 = shalt.err (!%p1309_p4)
}
  0x1d   : > { %s1398_s11 = smov 4096   ;;  %s1399_s12 = smov 512  }
  0x1e   : > { %s1400_s18 = smov 32   ;;  %p234_p5 = scmp.lt.s32.totalorder %s1395_s17, 9 }
  0x1f   : > { %1219 = dma.hbm_to_vmem [thread:$0]  (!%p1479_p9), %s206_s29, 6656, %s208_s5, %s192_s6, %s1398_s11, %s1399_s12, %s1400_s18  }
  0x20   : > { %s1135_s20 = sshll.u32 %s1472_s24, 3  ;;  %s1209_s21 = sshll.u32 %s1391_s16, 7 }
  0x21   : > { %p1497_p6 = pnand %p1138_p10, %p234_p5  ;;  %s227_s28 = scalar_lea.hbm %s1631_s2, %s1209_s21 }
  0x22   : > { %s221_s4 = scalar_lea.vmem [#allocation5], %s1135_s20  ;;  %s218_s8 = scalar_lea.sflag [#allocation6], %s1472_s24 }
  0x23   : > { %s229_s7 = sshll.u32 %s221_s4, 4  ;;  %s1401_s29 = smov [#allocation5]   ;;  %s230_s7 = int_to_ptr.vmem [resolvable:$true] %s229_s7 }
  0x24   : > { %s1326_s9 = scalar_lea.vmem %s230_s7, 128  ;;  %s1331_s5 = sshll.u32 %s1401_s29, 4  ;;  %s1332_s5 = int_to_ptr.vmem [resolvable:$false] %s1331_s5 }
  0x25   : > { %p1327_p8 = scmp.ne.s32.totalorder %s230_s7, %s1326_s9  ;;  %s1333_s6 = scalar_lea.vmem %s1332_s5, 256 }
  0x26   : > { %p1334_p10 = scmp.lt.s32.totalorder %s230_s7, %s1332_s5  ;;  %p1335_p0 = scmp.lt.s32.totalorder %s1333_s6, %s1326_s9 }
  0x27   : > { %p1329_p12 = pnand %p1327_p8, %p1287_p11 }
  0x28   : > { %p1336_p1 = por %p1335_p0, %p1334_p10 }
  0x29   : > { %p1330_p13 = pneg %p1329_p12 }
  0x2b   : > { %p1337_p2 = pnand %p1336_p1, %p1330_p13 }
  0x2d   : > { %1340 = shalt.err (!%p1337_p2)
}
  0x2e   : > { %1222 = dma.hbm_to_vmem [thread:$0]  (!%p1479_p9), %s227_s28, 128, %s230_s7, %s218_s8  }
  0x2f   : > { %238 = sbr.rel (%p1497_p6) target bundleno = 322 (0x142), region = 32  ;;  %s240_s24 = sand.u32 (!%p1497_p6), 1, %s1379_s13  }
  0x30   : > { %s1211_s10 = smul.u32 (!%p1497_p6), 416, %s240_s24  ;;  %s241_s11 = scalar_lea.sflag (!%p1497_p6), [#allocation4], %s240_s24 }
  0x32   : > { %s1513_s12 = scalar_lea.vmem (!%p1497_p6), [#allocation3], %s1211_s10 }
  0x34   : > { %1366 = dma.done.wait (%p1463_p7), %s241_s11, 6656  }
  0x35   : > { %1368 = vsyncadd (%p1463_p7), %s241_s11, 4294960640  ;;  %s1139_s18 = sshll.u32 %s240_s24, 3  ;;  %s250_s20 = scalar_lea.sflag [#allocation6], %s240_s24 }
  0x36   : > { %s1519_s30 = scalar_lea.vmem [#allocation5], %s1139_s18 }
  0x37   : > { %1370 = dma.done.wait (%p1463_p7), %s250_s20, 128  }
  0x38   : > { %1372 = vsyncadd (%p1463_p7), %s250_s20, 4294967168  ;;  %v1402_v0 = vmov 0   ;;  %v382_v1 = vld [vmem:[%s1513_s12 + $0x180] sm:$0x33]  ;;  %vm650_vm0 = vcmask 1041408   ;;  %v375_v9 = vld [vmem:[%s1513_s12 + $0x148] sm:$0xff] }
  0x39   : > { %707 = vmatprep.mubr.bf16.mxu0 %v1402_v0  ;;  %748 = vmatprep.mubr.bf16.mxu1 %v1402_v0  ;;  %v383_v2 = vld [vmem:[%s1513_s12 + $0x188] sm:$0x33]  ;;  %v374_v3 = vld [vmem:[%s1513_s12 + $0x140] sm:$0xff]  ;;  %v1191_v4 = vcombine.high %v382_v1, %v382_v1  ;;  %v1190_v6 = vcombine.low %v382_v1, %v382_v1  ;;  %v384_v55 = vld [vmem:[%s1513_s12 + $0x190] sm:$0x33]  ;;  %vm646_vm1 = vcmask 818176  }
  0x3a   : > { %v1193_v5 = vcombine.high %v383_v2, %v383_v2  ;;  %v1192_v7 = vcombine.low %v383_v2, %v383_v2  ;;  %v378_v8 = vld [vmem:[%s1513_s12 + $0x160] sm:$0xff]  ;;  %v379_v10 = vld [vmem:[%s1513_s12 + $0x168] sm:$0xff]  ;;  %v385_v56 = vld [vmem:[%s1513_s12 + $0x198] sm:$0x33]  ;;  %v1195_v59 = vcombine.high %v384_v55, %v384_v55  ;;  %v1194_v61 = vcombine.low %v384_v55, %v384_v55  ;;  %s1140_s25 = sshll.u32 %s1387_s15, 3 }
  0x3b   : > { %v1183_v11 = vcombine.high %v374_v3, %v378_v8  ;;  %v1185_v12 = vcombine.high %v375_v9, %v379_v10  ;;  %v366_v13 = vld [vmem:[%s1513_s12 + $0x100] sm:$0xff]  ;;  %v367_v15 = vld [vmem:[%s1513_s12 + $0x108] sm:$0xff]  ;;  %1198 = vmatprep.subr.msk.bf16.mxu0 %vm650_vm0, %v1191_v4  ;;  %v652_v16 = vsel %vm650_vm0, %v1190_v6, 0  ;;  %v1182_v19 = vcombine.low %v374_v3, %v378_v8  ;;  %v376_v63 = vld [vmem:[%s1513_s12 + $0x150] sm:$0xff]  ;;  %p315_p7 = scmp.lt.s32.totalorder %s1140_s25, 63 }
  0x3c   : > { %v370_v14 = vld [vmem:[%s1513_s12 + $0x120] sm:$0xff]  ;;  %1200 = vmatprep.subr.msk.bf16.mxu1 %vm650_vm0, %v1193_v5  ;;  %v658_v17 = vsel %vm650_vm0, %v1192_v7, 0  ;;  %v371_v18 = vld [vmem:[%s1513_s12 + $0x128] sm:$0xff]  ;;  %678 = vmatpush1.bf16.msra.mxu0 %v652_v16  ;;  %v1184_v20 = vcombine.low %v375_v9, %v379_v10  ;;  %v1197_v60 = vcombine.high %v385_v56, %v385_v56  ;;  %v1196_v62 = vcombine.low %v385_v56, %v385_v56  ;;  %v380_v1 = vld [vmem:[%s1513_s12 + $0x170] sm:$0xff] }
  0x3d   : > { %719 = vmatpush1.bf16.msra.mxu1 %v658_v17  ;;  %679 = vmatprep.subr.bf16.mxu0 %v1183_v11  ;;  %v1175_v21 = vcombine.high %v366_v13, %v370_v14  ;;  %v1177_v22 = vcombine.high %v367_v15, %v371_v18  ;;  %v358_v23 = vld [vmem:[%s1513_s12 + $0xc0] sm:$0xff]  ;;  %v359_v25 = vld [vmem:[%s1513_s12 + $0xc8] sm:$0xff]  ;;  %v1174_v27 = vcombine.low %v366_v13, %v370_v14  ;;  %v377_v2 = vld [vmem:[%s1513_s12 + $0x158] sm:$0xff]  ;;  %v664_v5 = vsel %vm650_vm0, %v1194_v61, 0  ;;  %s1644_s25 = smov (!%p315_p7, %s1140_s25), 63 }
  0x3e   : > { %720 = vmatprep.subr.bf16.mxu1 %v1185_v12  ;;  %v362_v24 = vld [vmem:[%s1513_s12 + $0xe0] sm:$0xff]  ;;  %v363_v26 = vld [vmem:[%s1513_s12 + $0xe8] sm:$0xff]  ;;  %v1176_v28 = vcombine.low %v367_v15, %v371_v18  ;;  %v381_v3 = vld [vmem:[%s1513_s12 + $0x178] sm:$0xff]  ;;  %v670_v6 = vsel %vm650_vm0, %v1196_v62, 0  ;;  %v1187_v7 = vcombine.high %v376_v63, %v380_v1  ;;  %v1186_v13 = vcombine.low %v376_v63, %v380_v1  ;;  %s1141_s15 = sshll.u32 %s1644_s25, 1 }
  0x3f   : > { %v1167_v29 = vcombine.high %v358_v23, %v362_v24  ;;  %v1169_v30 = vcombine.high %v359_v25, %v363_v26  ;;  %v350_v31 = vld [vmem:[%s1513_s12 + $0x80] sm:$0xff]  ;;  %v351_v33 = vld [vmem:[%s1513_s12 + $0x88] sm:$0xff]  ;;  %v1166_v35 = vcombine.low %v358_v23, %v362_v24  ;;  %v1168_v36 = vcombine.low %v359_v25, %v363_v26  ;;  %v368_v9 = vld [vmem:[%s1513_s12 + $0x110] sm:$0xff]  ;;  %s1607_s28 = scalar_lea.vmem %s1632_s3, %s1141_s15 }
  0x40   : > { %680 = vmatpush1.bf16.msra.mxu0 %v1182_v19  ;;  %v354_v32 = vld [vmem:[%s1513_s12 + $0xa0] sm:$0xff]  ;;  %v355_v34 = vld [vmem:[%s1513_s12 + $0xa8] sm:$0xff]  ;;  %v1189_v8 = vcombine.high %v377_v2, %v381_v3  ;;  %v372_v10 = vld [vmem:[%s1513_s12 + $0x130] sm:$0xff]  ;;  %v1188_v14 = vcombine.low %v377_v2, %v381_v3 }
  0x41   : > { %721 = vmatpush1.bf16.msra.mxu1 %v1184_v20  ;;  %681 = vmatprep.subr.bf16.mxu0 %v1175_v21  ;;  %v1159_v37 = vcombine.high %v350_v31, %v354_v32  ;;  %v1161_v38 = vcombine.high %v351_v33, %v355_v34  ;;  %v342_v39 = vld [vmem:[%s1513_s12 + $0x40] sm:$0xff]  ;;  %v343_v41 = vld [vmem:[%s1513_s12 + $0x48] sm:$0xff]  ;;  %v1158_v43 = vcombine.low %v350_v31, %v354_v32  ;;  %v369_v11 = vld [vmem:[%s1513_s12 + $0x118] sm:$0xff] }
  0x42   : > { %722 = vmatprep.subr.bf16.mxu1 %v1177_v22  ;;  %v346_v40 = vld [vmem:[%s1513_s12 + $0x60] sm:$0xff]  ;;  %v347_v42 = vld [vmem:[%s1513_s12 + $0x68] sm:$0xff]  ;;  %v1160_v44 = vcombine.low %v351_v33, %v355_v34  ;;  %v373_v12 = vld [vmem:[%s1513_s12 + $0x138] sm:$0xff]  ;;  %v1179_v15 = vcombine.high %v368_v9, %v372_v10  ;;  %v1178_v21 = vcombine.low %v368_v9, %v372_v10 }
  0x43   : > { %v1151_v45 = vcombine.high %v342_v39, %v346_v40  ;;  %v1153_v46 = vcombine.high %v343_v41, %v347_v42  ;;  %v334_v47 = vld [vmem:[%s1513_s12] sm:$0xff]  ;;  %v335_v49 = vld [vmem:[%s1513_s12 + $0x8] sm:$0xff]  ;;  %v1150_v51 = vcombine.low %v342_v39, %v346_v40  ;;  %v1152_v52 = vcombine.low %v343_v41, %v347_v42  ;;  %v360_v17 = vld [vmem:[%s1513_s12 + $0xd0] sm:$0xff] }
  0x44   : > { %682 = vmatpush1.bf16.msra.mxu0 %v1174_v27  ;;  %v338_v48 = vld [vmem:[%s1513_s12 + $0x20] sm:$0xff]  ;;  %v339_v50 = vld [vmem:[%s1513_s12 + $0x28] sm:$0xff]  ;;  %v1181_v16 = vcombine.high %v369_v11, %v373_v12  ;;  %v364_v18 = vld [vmem:[%s1513_s12 + $0xf0] sm:$0xff]  ;;  %v1180_v22 = vcombine.low %v369_v11, %v373_v12 }
  0x45   : > { %723 = vmatpush1.bf16.msra.mxu1 %v1176_v28  ;;  %683 = vmatprep.subr.bf16.mxu0 %v1167_v29  ;;  %v1143_v53 = vcombine.high %v334_v47, %v338_v48  ;;  %v1145_v54 = vcombine.high %v335_v49, %v339_v50  ;;  %v1142_v57 = vcombine.low %v334_v47, %v338_v48  ;;  %v1566_v4 = vld [vmem:[%s1629_s0] sm:$0x1]  ;;  %v361_v19 = vld [vmem:[%s1513_s12 + $0xd8] sm:$0xff]  ;;  %v352_v25 = vld [vmem:[%s1513_s12 + $0x90] sm:$0xff] }
  0x46   : > { %724 = vmatprep.subr.bf16.mxu1 %v1169_v30  ;;  %v1144_v58 = vcombine.low %v335_v49, %v339_v50  ;;  %v365_v20 = vld [vmem:[%s1513_s12 + $0xf8] sm:$0xff]  ;;  %v1171_v23 = vcombine.high %v360_v17, %v364_v18  ;;  %v356_v26 = vld [vmem:[%s1513_s12 + $0xb0] sm:$0xff]  ;;  %v1170_v29 = vcombine.low %v360_v17, %v364_v18  ;;  %v852_v50 = vlaneseq }
  0x47   : > { %v1173_v24 = vcombine.high %v361_v19, %v365_v20  ;;  %v353_v27 = vld [vmem:[%s1513_s12 + $0x98] sm:$0xff]  ;;  %v1163_v30 = vcombine.high %v352_v25, %v356_v26  ;;  %v344_v32 = vld [vmem:[%s1513_s12 + $0x50] sm:$0xff] }
  0x48   : > { %684 = vmatpush1.bf16.msra.mxu0 %v1166_v35  ;;  %v357_v28 = vld [vmem:[%s1513_s12 + $0xb8] sm:$0xff]  ;;  %v348_v33 = vld [vmem:[%s1513_s12 + $0x70] sm:$0xff] }
  0x49   : > { %725 = vmatpush1.bf16.msra.mxu1 %v1168_v36  ;;  %685 = vmatprep.subr.bf16.mxu0 %v1159_v37  ;;  %v1165_v31 = vcombine.high %v353_v27, %v357_v28  ;;  %v345_v34 = vld [vmem:[%s1513_s12 + $0x58] sm:$0xff]  ;;  %v1162_v36 = vcombine.low %v352_v25, %v356_v26  ;;  %v1164_v37 = vcombine.low %v353_v27, %v357_v28  ;;  %v336_v40 = vld [vmem:[%s1513_s12 + $0x10] sm:$0xff] }
  0x4a   : > { %726 = vmatprep.subr.bf16.mxu1 %v1161_v38  ;;  %v349_v35 = vld [vmem:[%s1513_s12 + $0x78] sm:$0xff]  ;;  %v1155_v38 = vcombine.high %v344_v32, %v348_v33  ;;  %v340_v41 = vld [vmem:[%s1513_s12 + $0x30] sm:$0xff] }
  0x4b   : > { %v1157_v39 = vcombine.high %v345_v34, %v349_v35  ;;  %v337_v42 = vld [vmem:[%s1513_s12 + $0x18] sm:$0xff]  ;;  %v1146_v48 = vcombine.low %v336_v40, %v340_v41 }
  0x4c   : > { %686 = vmatpush1.bf16.msra.mxu0 %v1158_v43  ;;  %v341_v43 = vld [vmem:[%s1513_s12 + $0x38] sm:$0xff] }
  0x4d   : > { %727 = vmatpush1.bf16.msra.mxu1 %v1160_v44  ;;  %687 = vmatprep.subr.bf16.mxu0 %v1151_v45  ;;  %v1154_v44 = vcombine.low %v344_v32, %v348_v33  ;;  %v1156_v45 = vcombine.low %v345_v34, %v349_v35  ;;  %v1149_v47 = vcombine.high %v337_v42, %v341_v43 }
  0x4e   : > { %728 = vmatprep.subr.bf16.mxu1 %v1153_v46  ;;  %v1147_v46 = vcombine.high %v336_v40, %v340_v41  ;;  %v1148_v49 = vcombine.low %v337_v42, %v341_v43 }
  0x50   : > { %688 = vmatpush1.bf16.msra.mxu0 %v1150_v51  ;;  %v853_v51 = vshrl.u32 %v852_v50, 7 }
  0x51   : > { %729 = vmatpush1.bf16.msra.mxu1 %v1152_v52  ;;  %689 = vmatprep.subr.bf16.mxu0 %v1143_v53  ;;  %v1403_v52 = vmov 1983009808  }
  0x52   : > { %730 = vmatprep.subr.bf16.mxu1 %v1145_v54  ;;  %v850_v53 = vunpack.c.l.s4 %v1403_v52  ;;  %v896_v54 = vsub.s32 0, %v853_v51  ;;  %v900_v55 = vsub.s32 1, %v853_v51  ;;  %v904_v56 = vsub.s32 2, %v853_v51 }
  0x53   : > { %v924_v25 = vsub.s32 7, %v853_v51 }
  0x54   : > { %690 = vmatpush1.bf16.msra.mxu0 %v1142_v57  ;;  %v908_v57 = vsub.s32 3, %v853_v51 }
  0x55   : > { %731 = vmatpush1.bf16.msra.mxu1 %v1144_v58  ;;  %1202 = vmatprep.subr.msk.bf16.mxu0 %vm650_vm0, %v1195_v59  ;;  %v892_v58 = vld [vmem:[%s1519_s30] sm:$0xff]  ;;  %v851_v59 = vunpack.c.0.s8 %v850_v53 }
  0x56   : > { %1204 = vmatprep.subr.msk.bf16.mxu1 %vm650_vm0, %v1197_v60  ;;  %v897_v60 = vrot.slane %v892_v58, %v896_v54  ;;  %v901_v61 = vrot.slane %v892_v58, %v900_v55  ;;  %v905_v62 = vrot.slane %v892_v58, %v904_v56  ;;  %v909_v63 = vrot.slane %v892_v58, %v908_v57 }
  0x57   : > { %1199 = vmatmul.mubr.msk.bf16.vlgmr.msra.gmra.mxu0 %vm646_vm1, %v1566_v4  ;;  %v854_v1 = vsub.s32 %v851_v59, %v853_v51 }
  0x58   : > { %1201 = vmatmul.mubr.msk.bf16.vlgmr.msra.gmra.mxu1 %vm646_vm1, %v1566_v4  ;;  %760 = vmatpush1.bf16.msra.mxu0 %v664_v5  ;;  %v926_v2 = vcombine.low %v897_v60, %v901_v61  ;;  %v927_v3 = vcombine.low %v905_v62, %v909_v63 }
  0x59   : > { %801 = vmatpush1.bf16.msra.mxu1 %v670_v6  ;;  %761 = vmatprep.subr.bf16.mxu0 %v1187_v7 }
  0x5a   : > { %802 = vmatprep.subr.bf16.mxu1 %v1189_v8  ;;  %789 = vmatprep.mubr.bf16.mxu0 %v1402_v0  ;;  %v934_v6 = vrot.slane %v926_v2, %v854_v1  ;;  %v941_v7 = vrot.slane %v927_v3, %v854_v1 }
  0x5b   : > { %830 = vmatprep.mubr.bf16.mxu1 %v1402_v0  ;;  %v1172_v0 = vcombine.low %v361_v19, %v365_v20 }
  0x5c   : > { %762 = vmatpush1.bf16.msra.mxu0 %v1186_v13 }
  0x5d   : > { %803 = vmatpush1.bf16.msra.mxu1 %v1188_v14  ;;  %763 = vmatprep.subr.bf16.mxu0 %v1179_v15 }
  0x5e   : > { %804 = vmatprep.subr.bf16.mxu1 %v1181_v16  ;;  %v942_v16 = vcombine.low %v934_v6, %v941_v7 }
  0x60   : > { %764 = vmatpush1.bf16.msra.mxu0 %v1178_v21 }
  0x61   : > { %805 = vmatpush1.bf16.msra.mxu1 %v1180_v22  ;;  %765 = vmatprep.subr.bf16.mxu0 %v1171_v23  ;;  %v912_v22 = vsub.s32 4, %v853_v51  ;;  %v916_v23 = vsub.s32 5, %v853_v51 }
  0x62   : > { %806 = vmatprep.subr.bf16.mxu1 %v1173_v24  ;;  %v920_v24 = vsub.s32 6, %v853_v51 }
  0x63   : > { %v913_v26 = vrot.slane %v892_v58, %v912_v22  ;;  %v917_v27 = vrot.slane %v892_v58, %v916_v23 }
  0x64   : > { %766 = vmatpush1.bf16.msra.mxu0 %v1170_v29  ;;  %v921_v28 = vrot.slane %v892_v58, %v920_v24  ;;  %v925_v29 = vrot.slane %v892_v58, %v924_v25 }
  0x65   : > { %807 = vmatpush1.bf16.msra.mxu1 %v1172_v0  ;;  %767 = vmatprep.subr.bf16.mxu0 %v1163_v30  ;;  %v943_v0 = vcombine.low %v913_v26, %v917_v27 }
  0x66   : > { %808 = vmatprep.subr.bf16.mxu1 %v1165_v31  ;;  %v944_v30 = vcombine.low %v921_v28, %v925_v29 }
  0x67   : > { %v951_v33 = vrot.slane %v943_v0, %v854_v1 }
  0x68   : > { %768 = vmatpush1.bf16.msra.mxu0 %v1162_v36  ;;  %v958_v34 = vrot.slane %v944_v30, %v854_v1 }
  0x69   : > { %809 = vmatpush1.bf16.msra.mxu1 %v1164_v37  ;;  %769 = vmatprep.subr.bf16.mxu0 %v1155_v38 }
  0x6a   : > { %810 = vmatprep.subr.bf16.mxu1 %v1157_v39  ;;  %v959_v43 = vcombine.low %v951_v33, %v958_v34 }
  0x6c   : > { %770 = vmatpush1.bf16.msra.mxu0 %v1154_v44 }
  0x6d   : > { %811 = vmatpush1.bf16.msra.mxu1 %v1156_v45  ;;  %771 = vmatprep.subr.bf16.mxu0 %v1147_v46 }
  0x6e   : > { %812 = vmatprep.subr.bf16.mxu1 %v1149_v47 }
  0x70   : > { %772 = vmatpush1.bf16.msra.mxu0 %v1146_v48 }
  0x71   : > { %813 = vmatpush1.bf16.msra.mxu1 %v1148_v49 }
  0x73   : > { %1203 = vmatmul.mubr.msk.bf16.vlgmr.msra.gmra.mxu0 %vm646_vm1, %v1566_v4 }
  0x74   : > { %1205 = vmatmul.mubr.msk.bf16.vlgmr.msra.gmra.mxu1 %vm646_vm1, %v1566_v4 }
 0x117   : > { %v709_v4 = vpop.f32.mrf.mxu0 }
 0x118   : > { %v750_v5 = vpop.f32.mrf.mxu1 }
 0x119   : > { %v711_v8 = vpop.f32.mrf.mxu0 }
 0x11a   : > { %v752_v9 = vpop.f32.mrf.mxu1  ;;  %v847_v10 = vcombine.low %v709_v4, %v711_v8 }
 0x11b   : > { %v848_v11 = vcombine.low %v750_v5, %v752_v9  ;;  %v713_v12 = vpop.f32.mrf.mxu0 }
 0x11c   : > { %v754_v13 = vpop.f32.mrf.mxu1  ;;  %v855_v14 = vrot.slane %v847_v10, %v854_v1 }
 0x11d   : > { %v862_v15 = vrot.slane %v848_v11, %v854_v1  ;;  %v714_v17 = vpop.f32.mrf.mxu0 }
 0x11e   : > { %v755_v18 = vpop.f32.mrf.mxu1 }
 0x11f   : > { %v863_v19 = vcombine.low %v855_v14, %v862_v15 }
 0x121   : > { %v962_v20 = vadd.f32 %v942_v16, %v863_v19 }
 0x123   : > { %v964_v21 = vmax.f32 %v962_v20, 0.0 }
 0x125   : > { %966 = vst [vmem:[%s1607_s28] sm:$0xff] %v964_v21 }
 0x133   : > { %v791_v31 = vpop.f32.mrf.mxu0 }
 0x134   : > { %v832_v32 = vpop.f32.mrf.mxu1 }
 0x135   : > { %v793_v35 = vpop.f32.mrf.mxu0 }
 0x136   : > { %v834_v36 = vpop.f32.mrf.mxu1  ;;  %v864_v37 = vcombine.low %v791_v31, %v793_v35 }
 0x137   : > { %v865_v38 = vcombine.low %v832_v32, %v834_v36  ;;  %v795_v39 = vpop.f32.mrf.mxu0 }
 0x138   : > { %v836_v40 = vpop.f32.mrf.mxu1  ;;  %v872_v41 = vrot.slane %v864_v37, %v854_v1 }
 0x139   : > { %v879_v42 = vrot.slane %v865_v38, %v854_v1  ;;  %v796_v44 = vpop.f32.mrf.mxu0 }
 0x13a   : > { %v837_v45 = vpop.f32.mrf.mxu1 }
 0x13b   : > { %v880_v46 = vcombine.low %v872_v41, %v879_v42 }
 0x13d   : > { %v963_v47 = vadd.f32 %v959_v43, %v880_v46 }
 0x13f   : > { %v965_v48 = vmax.f32 %v963_v47, 0.0 }
 0x141   : > { %967 = vst [vmem:[%s1607_s28 + $0x8] sm:$0xff] %v965_v48 }
 0x142 PF: > { %s19_s17 = sadd.s32 1, %s1395_s17   ;;  %s1636_s12 = smov %s1379_s13 }
 0x143   : > { %p16_p9 = scmp.ge.s32.totalorder %s19_s17, 10   ;;  %s1637_s13 = smov %s1383_s14 }
 0x144   : > { %s1638_s14 = smov %s1469_s23  ;;  %s1639_s15 = smov %s1391_s16 }
 0x145   : > { %s1640_s16 = smov %s1642_s19  ;;  %18 = sbr.rel (!%p16_p9) target bundleno = 6 (0x6), region = 96 }
 0x14a   :  { %1006 = vsyncpa [#allocation4], 1 }
 0x14b   :  { %1008 = vsyncpa [#allocation4 + $0x1], 1 }
 0x14c   :  { %1009 = vsyncpa [#allocation6], 1 }
 0x14d   :  { %1011 = vsyncpa [#allocation6 + $0x1], 1 }

// kernel: _lambda_.6
= control target key start
LH: loop header
LB: loop body
LE: loop exit
PB: predicated region body
PF: predicated region fallthrough
CT: control target
= control target key end

     0   :  { %s3476_s12 = smov 0   ;;  %s3478_s13 = smov 0   ;;  %s3888_s0 = inlined_call_operand.vmem [shape: bf16[4,32,2048], index: 0, kind: input, shape index: {}]   ;;  %s3889_s1 = inlined_call_operand.vmem [shape: bf16[4,2048,256], index: 1, kind: input, shape index: {}]   ;;  %s3890_s2 = inlined_call_operand.vmem [shape: f32[1,256], index: 2, kind: input, shape index: {}]   ;;  %s3891_s3 = inlined_call_operand.vmem [shape: f32[4,32,256], index: 3, kind: output, shape index: {}]  }
   0x1   :  { %s3480_s14 = smov 0  }
   0x2 LB: > { %s39_s15 = sadd.s32 1, %s3450_s13  ;;  %p2724_p0 = scmp.ge.s32.totalorder %s3454_s14, 1  ;;  %s3454_s14 = sphi %s3480_s14, %s13_s14   ;;  %s3450_s13 = sphi %s3478_s13, %s3893_s13   ;;  %s3446_s12 = sphi %s3476_s12, %s3892_s12  }
   0x3   : > { %p41_p1 = scmp.ge.s32.totalorder %s39_s15, 4  ;;  %p217_p2 = scmp.lt.s32.totalorder %s3454_s14, 5 }
   0x5   : > { %s3895_s15 = smov (%p41_p1, %s39_s15), 0  ;;  %p218_p3 = pnand %p2724_p0, %p217_p2 }
   0x6   : > { %p279_p4 = scmp.lt.s32.totalorder (!%p218_p3), %s3446_s12, 3 }
   0x7   : > { %221 = sbr.rel (%p218_p3) target bundleno = 488 (0x1e8), region = 32 }
   0xc   : > { %s3897_s12 = smov (!%p279_p4, %s3446_s12), 3 }
   0xd   : > { %s3022_s16 = sshll.u32 %s3897_s12, 11  ;;  %s3021_s20 = sshll.u32 %s3897_s12, 8 }
   0xe   : > { %s3500_s19 = scalar_lea.vmem %s3889_s1, %s3022_s16  ;;  %s3550_s23 = scalar_lea.vmem %s3888_s0, %s3021_s20 }
   0xf   : > { %v3048_v0 = vld [vmem:[%s3500_s19 + $0x74] ss:$8 sps:$4 sm:$0xff]   ;;  %v3052_v2 = vld [vmem:[%s3500_s19 + $0x70] ss:$8 sps:$4 sm:$0xff]   ;;  %v3054_v4 = vld [vmem:[%s3500_s19 + $0x64] ss:$8 sps:$4 sm:$0xff]  }
  0x10   : > { %v3050_v1 = vld [vmem:[%s3500_s19 + $0x174] ss:$8 sps:$4 sm:$0xff]   ;;  %2078 = vmatprep.subr.bf16.mxu0 %v3048_v0  ;;  %v3053_v3 = vld [vmem:[%s3500_s19 + $0x170] ss:$8 sps:$4 sm:$0xff]   ;;  %v3056_v5 = vld [vmem:[%s3500_s19 + $0x164] ss:$8 sps:$4 sm:$0xff]  }
  0x11   : > { %2131 = vmatprep.subr.bf16.mxu1 %v3050_v1  ;;  %2079 = vmatpush1.bf16.msra.mxu0 %v3052_v2  ;;  %v3058_v6 = vld [vmem:[%s3500_s19 + $0x60] ss:$8 sps:$4 sm:$0xff]   ;;  %v3060_v8 = vld [vmem:[%s3500_s19 + $0x54] ss:$8 sps:$4 sm:$0xff]   ;;  %v3064_v10 = vld [vmem:[%s3500_s19 + $0x50] ss:$8 sps:$4 sm:$0xff]  }
  0x12   : > { %2132 = vmatpush1.bf16.msra.mxu1 %v3053_v3  ;;  %2080 = vmatprep.subr.bf16.mxu0 %v3054_v4  ;;  %v3059_v7 = vld [vmem:[%s3500_s19 + $0x160] ss:$8 sps:$4 sm:$0xff]   ;;  %v3062_v9 = vld [vmem:[%s3500_s19 + $0x154] ss:$8 sps:$4 sm:$0xff]   ;;  %v3065_v11 = vld [vmem:[%s3500_s19 + $0x150] ss:$8 sps:$4 sm:$0xff]  }
  0x13   : > { %2133 = vmatprep.subr.bf16.mxu1 %v3056_v5  ;;  %v3066_v12 = vld [vmem:[%s3500_s19 + $0x44] ss:$8 sps:$4 sm:$0xff]   ;;  %v3070_v14 = vld [vmem:[%s3500_s19 + $0x40] ss:$8 sps:$4 sm:$0xff]   ;;  %v3072_v16 = vld [vmem:[%s3500_s19 + $0x34] ss:$8 sps:$4 sm:$0xff]  }
  0x14   : > { %v3068_v13 = vld [vmem:[%s3500_s19 + $0x144] ss:$8 sps:$4 sm:$0xff]   ;;  %v3071_v15 = vld [vmem:[%s3500_s19 + $0x140] ss:$8 sps:$4 sm:$0xff]   ;;  %v3074_v17 = vld [vmem:[%s3500_s19 + $0x134] ss:$8 sps:$4 sm:$0xff]  }
  0x15   : > { %2081 = vmatpush1.bf16.msra.mxu0 %v3058_v6  ;;  %v3076_v18 = vld [vmem:[%s3500_s19 + $0x30] ss:$8 sps:$4 sm:$0xff]   ;;  %v3078_v20 = vld [vmem:[%s3500_s19 + $0x24] ss:$8 sps:$4 sm:$0xff]   ;;  %v3082_v22 = vld [vmem:[%s3500_s19 + $0x20] ss:$8 sps:$4 sm:$0xff]  }
  0x16   : > { %2134 = vmatpush1.bf16.msra.mxu1 %v3059_v7  ;;  %2082 = vmatprep.subr.bf16.mxu0 %v3060_v8  ;;  %v3077_v19 = vld [vmem:[%s3500_s19 + $0x130] ss:$8 sps:$4 sm:$0xff]   ;;  %v3080_v21 = vld [vmem:[%s3500_s19 + $0x124] ss:$8 sps:$4 sm:$0xff]   ;;  %v3083_v23 = vld [vmem:[%s3500_s19 + $0x120] ss:$8 sps:$4 sm:$0xff]  }
  0x17   : > { %2135 = vmatprep.subr.bf16.mxu1 %v3062_v9  ;;  %v3084_v24 = vld [vmem:[%s3500_s19 + $0x14] ss:$8 sps:$4 sm:$0xff]   ;;  %v3088_v26 = vld [vmem:[%s3500_s19 + $0x10] ss:$8 sps:$4 sm:$0xff]   ;;  %v3090_v28 = vld [vmem:[%s3500_s19 + $0x4] ss:$8 sps:$4 sm:$0xff]  }
  0x18   : > { %v3086_v25 = vld [vmem:[%s3500_s19 + $0x114] ss:$8 sps:$4 sm:$0xff]   ;;  %v3089_v27 = vld [vmem:[%s3500_s19 + $0x110] ss:$8 sps:$4 sm:$0xff]   ;;  %v3092_v29 = vld [vmem:[%s3500_s19 + $0x104] ss:$8 sps:$4 sm:$0xff]  }
  0x19   : > { %2083 = vmatpush1.bf16.msra.mxu0 %v3064_v10  ;;  %v3094_v30 = vld [vmem:[%s3500_s19] ss:$8 sps:$4 sm:$0xff]   ;;  %v3096_v32 = vld [vmem:[%s3500_s19 + $0xf4] ss:$8 sps:$4 sm:$0xff]   ;;  %v3100_v34 = vld [vmem:[%s3500_s19 + $0xf0] ss:$8 sps:$4 sm:$0xff]  }
  0x1a   : > { %2136 = vmatpush1.bf16.msra.mxu1 %v3065_v11  ;;  %2084 = vmatprep.subr.bf16.mxu0 %v3066_v12  ;;  %v3095_v31 = vld [vmem:[%s3500_s19 + $0x100] ss:$8 sps:$4 sm:$0xff]   ;;  %v3098_v33 = vld [vmem:[%s3500_s19 + $0x1f4] ss:$8 sps:$4 sm:$0xff]   ;;  %v3101_v35 = vld [vmem:[%s3500_s19 + $0x1f0] ss:$8 sps:$4 sm:$0xff]  }
  0x1b   : > { %2137 = vmatprep.subr.bf16.mxu1 %v3068_v13  ;;  %v3102_v36 = vld [vmem:[%s3500_s19 + $0xe4] ss:$8 sps:$4 sm:$0xff]   ;;  %v3106_v38 = vld [vmem:[%s3500_s19 + $0xe0] ss:$8 sps:$4 sm:$0xff]   ;;  %v3108_v40 = vld [vmem:[%s3500_s19 + $0xd4] ss:$8 sps:$4 sm:$0xff]  }
  0x1c   : > { %v3104_v37 = vld [vmem:[%s3500_s19 + $0x1e4] ss:$8 sps:$4 sm:$0xff]   ;;  %v3107_v39 = vld [vmem:[%s3500_s19 + $0x1e0] ss:$8 sps:$4 sm:$0xff]   ;;  %v3110_v41 = vld [vmem:[%s3500_s19 + $0x1d4] ss:$8 sps:$4 sm:$0xff]  }
  0x1d   : > { %2085 = vmatpush1.bf16.msra.mxu0 %v3070_v14  ;;  %v3112_v42 = vld [vmem:[%s3500_s19 + $0xd0] ss:$8 sps:$4 sm:$0xff]   ;;  %v3114_v44 = vld [vmem:[%s3500_s19 + $0xc4] ss:$8 sps:$4 sm:$0xff]   ;;  %v3118_v46 = vld [vmem:[%s3500_s19 + $0xc0] ss:$8 sps:$4 sm:$0xff]  }
  0x1e   : > { %2138 = vmatpush1.bf16.msra.mxu1 %v3071_v15  ;;  %2086 = vmatprep.subr.bf16.mxu0 %v3072_v16  ;;  %v3113_v43 = vld [vmem:[%s3500_s19 + $0x1d0] ss:$8 sps:$4 sm:$0xff]   ;;  %v3116_v45 = vld [vmem:[%s3500_s19 + $0x1c4] ss:$8 sps:$4 sm:$0xff]   ;;  %v3119_v47 = vld [vmem:[%s3500_s19 + $0x1c0] ss:$8 sps:$4 sm:$0xff]  }
  0x1f   : > { %2139 = vmatprep.subr.bf16.mxu1 %v3074_v17  ;;  %v350_v48 = vld [vmem:[%s3550_s23] sm:$0xff]  ;;  %v351_v50 = vld [vmem:[%s3550_s23 + $0x8] sm:$0xff]  ;;  %v3120_v52 = vld [vmem:[%s3500_s19 + $0xb4] ss:$8 sps:$4 sm:$0xff]   ;;  %s3023_s26 = sshll.u32 %s3897_s12, 6 }
  0x20   : > { %v358_v49 = vld [vmem:[%s3550_s23 + $0x40] sm:$0xff]  ;;  %v359_v51 = vld [vmem:[%s3550_s23 + $0x48] sm:$0xff]  ;;  %v3122_v54 = vld [vmem:[%s3500_s19 + $0x1b4] ss:$8 sps:$4 sm:$0xff]   ;;  %s3864_s29 = scalar_lea.vmem %s3891_s3, %s3023_s26 }
  0x21   : > { %2087 = vmatpush1.bf16.msra.mxu0 %v3076_v18  ;;  %v2732_v53 = vcombine.high %v350_v48, %v358_v49  ;;  %v2734_v55 = vcombine.high %v351_v50, %v359_v51  ;;  %v3124_v56 = vld [vmem:[%s3500_s19 + $0xb0] ss:$8 sps:$4 sm:$0xff]   ;;  %v3126_v58 = vld [vmem:[%s3500_s19 + $0xa4] ss:$8 sps:$4 sm:$0xff]   ;;  %v3130_v60 = vld [vmem:[%s3500_s19 + $0xa0] ss:$8 sps:$4 sm:$0xff]   ;;  %v2731_v8 = vcombine.low %v350_v48, %v358_v49  ;;  %v2733_v9 = vcombine.low %v351_v50, %v359_v51 }
  0x22   : > { %2140 = vmatpush1.bf16.msra.mxu1 %v3077_v19  ;;  %2088 = vmatprep.subr.bf16.mxu0 %v3078_v20  ;;  %v3125_v57 = vld [vmem:[%s3500_s19 + $0x1b0] ss:$8 sps:$4 sm:$0xff]   ;;  %v3128_v59 = vld [vmem:[%s3500_s19 + $0x1a4] ss:$8 sps:$4 sm:$0xff]   ;;  %v3131_v61 = vld [vmem:[%s3500_s19 + $0x1a0] ss:$8 sps:$4 sm:$0xff]  }
  0x23   : > { %2141 = vmatprep.subr.bf16.mxu1 %v3080_v21  ;;  %2110 = vmatprep.mubr.bf16.mxu0 %v2732_v53  ;;  %v3132_v62 = vld [vmem:[%s3500_s19 + $0x94] ss:$8 sps:$4 sm:$0xff]   ;;  %v3136_v0 = vld [vmem:[%s3500_s19 + $0x90] ss:$8 sps:$4 sm:$0xff]   ;;  %v3138_v2 = vld [vmem:[%s3500_s19 + $0x84] ss:$8 sps:$4 sm:$0xff]  }
  0x24   : > { %2163 = vmatprep.mubr.bf16.mxu1 %v2734_v55  ;;  %v3134_v63 = vld [vmem:[%s3500_s19 + $0x194] ss:$8 sps:$4 sm:$0xff]   ;;  %v3137_v1 = vld [vmem:[%s3500_s19 + $0x190] ss:$8 sps:$4 sm:$0xff]   ;;  %v3140_v3 = vld [vmem:[%s3500_s19 + $0x184] ss:$8 sps:$4 sm:$0xff]  }
  0x25   : > { %2089 = vmatpush1.bf16.msra.mxu0 %v3082_v22  ;;  %v3142_v4 = vld [vmem:[%s3500_s19 + $0x80] ss:$8 sps:$4 sm:$0xff]   ;;  %v3146_v6 = vld [vmem:[%s3500_s19 + $0x274] ss:$8 sps:$4 sm:$0xff]   ;;  %v3144_v10 = vld [vmem:[%s3500_s19 + $0x270] ss:$8 sps:$4 sm:$0xff]  }
  0x26   : > { %2142 = vmatpush1.bf16.msra.mxu1 %v3083_v23  ;;  %2090 = vmatprep.subr.bf16.mxu0 %v3084_v24  ;;  %v3143_v5 = vld [vmem:[%s3500_s19 + $0x180] ss:$8 sps:$4 sm:$0xff]   ;;  %v3149_v7 = vld [vmem:[%s3500_s19 + $0x374] ss:$8 sps:$4 sm:$0xff]   ;;  %v3147_v11 = vld [vmem:[%s3500_s19 + $0x370] ss:$8 sps:$4 sm:$0xff]  }
  0x27   : > { %2143 = vmatprep.subr.bf16.mxu1 %v3086_v25  ;;  %v3152_v12 = vld [vmem:[%s3500_s19 + $0x264] ss:$8 sps:$4 sm:$0xff]   ;;  %v3150_v14 = vld [vmem:[%s3500_s19 + $0x260] ss:$8 sps:$4 sm:$0xff]   ;;  %v3158_v16 = vld [vmem:[%s3500_s19 + $0x254] ss:$8 sps:$4 sm:$0xff]  }
  0x28   : > { %v3155_v13 = vld [vmem:[%s3500_s19 + $0x364] ss:$8 sps:$4 sm:$0xff]   ;;  %v3153_v15 = vld [vmem:[%s3500_s19 + $0x360] ss:$8 sps:$4 sm:$0xff]   ;;  %v3161_v17 = vld [vmem:[%s3500_s19 + $0x354] ss:$8 sps:$4 sm:$0xff]  }
  0x29   : > { %2091 = vmatpush1.bf16.msra.mxu0 %v3088_v26  ;;  %v3156_v18 = vld [vmem:[%s3500_s19 + $0x250] ss:$8 sps:$4 sm:$0xff]   ;;  %v3164_v20 = vld [vmem:[%s3500_s19 + $0x244] ss:$8 sps:$4 sm:$0xff]   ;;  %v3162_v22 = vld [vmem:[%s3500_s19 + $0x240] ss:$8 sps:$4 sm:$0xff]  }
  0x2a   : > { %2144 = vmatpush1.bf16.msra.mxu1 %v3089_v27  ;;  %2092 = vmatprep.subr.bf16.mxu0 %v3090_v28  ;;  %v3159_v19 = vld [vmem:[%s3500_s19 + $0x350] ss:$8 sps:$4 sm:$0xff]   ;;  %v3167_v21 = vld [vmem:[%s3500_s19 + $0x344] ss:$8 sps:$4 sm:$0xff]   ;;  %v3165_v23 = vld [vmem:[%s3500_s19 + $0x340] ss:$8 sps:$4 sm:$0xff]  }
  0x2b   : > { %2145 = vmatprep.subr.bf16.mxu1 %v3092_v29  ;;  %v3170_v24 = vld [vmem:[%s3500_s19 + $0x234] ss:$8 sps:$4 sm:$0xff]   ;;  %v3168_v26 = vld [vmem:[%s3500_s19 + $0x230] ss:$8 sps:$4 sm:$0xff]   ;;  %v366_v28 = vld [vmem:[%s3550_s23 + $0x80] sm:$0xff] }
  0x2c   : > { %v3173_v25 = vld [vmem:[%s3500_s19 + $0x334] ss:$8 sps:$4 sm:$0xff]   ;;  %v3171_v27 = vld [vmem:[%s3500_s19 + $0x330] ss:$8 sps:$4 sm:$0xff]   ;;  %v374_v29 = vld [vmem:[%s3550_s23 + $0xc0] sm:$0xff] }
  0x2d   : > { %2093 = vmatpush1.bf16.msra.mxu0 %v3094_v30  ;;  %v367_v30 = vld [vmem:[%s3550_s23 + $0x88] sm:$0xff]  ;;  %v3617_v48 = vld [vmem:[%s3550_s23 + $0x18] sm:$0xff] }
  0x2e   : > { %2146 = vmatpush1.bf16.msra.mxu1 %v3095_v31  ;;  %2094 = vmatprep.subr.bf16.mxu0 %v3096_v32  ;;  %v375_v31 = vld [vmem:[%s3550_s23 + $0xc8] sm:$0xff]  ;;  %v3622_v50 = vld [vmem:[%s3550_s23 + $0x58] sm:$0xff] }
  0x2f   : > { %2147 = vmatprep.subr.bf16.mxu1 %v3098_v33  ;;  %v3176_v32 = vld [vmem:[%s3500_s19 + $0x224] ss:$8 sps:$4 sm:$0xff]   ;;  %v2748_v33 = vcombine.high %v366_v28, %v374_v29  ;;  %v2738_v51 = vcombine.high %v3617_v48, %v3622_v50  ;;  %v3189_v53 = vld [vmem:[%s3500_s19 + $0x300] ss:$8 sps:$4 sm:$0xff]   ;;  %v3197_v55 = vld [vmem:[%s3500_s19 + $0x3f4] ss:$8 sps:$4 sm:$0xff]  }
  0x31   : > { %2095 = vmatpush2.bf16.msra.mxu0 %v3100_v34  ;;  %v2750_v34 = vcombine.high %v367_v30, %v375_v31 }
  0x32   : > { %2148 = vmatpush2.bf16.msra.mxu1 %v3101_v35  ;;  %2096 = vmatprep.subr.bf16.mxu0 %v3102_v36  ;;  %v2747_v35 = vcombine.low %v366_v28, %v374_v29  ;;  %v3179_v36 = vld [vmem:[%s3500_s19 + $0x324] ss:$8 sps:$4 sm:$0xff]   ;;  %v2737_v29 = vcombine.low %v3617_v48, %v3622_v50 }
  0x33   : > { %2149 = vmatprep.subr.bf16.mxu1 %v3104_v37  ;;  %v2749_v37 = vcombine.low %v367_v30, %v375_v31  ;;  %v369_v30 = vld [vmem:[%s3550_s23 + $0x98] sm:$0xff]  ;;  %v3260_v48 = vld [vmem:[%s3500_s19 + $0x444] ss:$8 sps:$4 sm:$0xff]  }
  0x34   : > { %v377_v31 = vld [vmem:[%s3550_s23 + $0xd8] sm:$0xff] }
  0x35   : > { %2097 = vmatpush2.bf16.msra.mxu0 %v3106_v38  ;;  %v3174_v38 = vld [vmem:[%s3500_s19 + $0x220] ss:$8 sps:$4 sm:$0xff]  }
  0x36   : > { %2150 = vmatpush2.bf16.msra.mxu1 %v3107_v39  ;;  %2098 = vmatprep.subr.bf16.mxu0 %v3108_v40  ;;  %v3177_v39 = vld [vmem:[%s3500_s19 + $0x320] ss:$8 sps:$4 sm:$0xff]   ;;  %v3182_v40 = vld [vmem:[%s3500_s19 + $0x214] ss:$8 sps:$4 sm:$0xff]  }
  0x37   : > { %2151 = vmatprep.subr.bf16.mxu1 %v3110_v41  ;;  %v3185_v41 = vld [vmem:[%s3500_s19 + $0x314] ss:$8 sps:$4 sm:$0xff]  }
  0x39   : > { %2099 = vmatpush2.bf16.msra.mxu0 %v3112_v42  ;;  %v3180_v42 = vld [vmem:[%s3500_s19 + $0x210] ss:$8 sps:$4 sm:$0xff]  }
  0x3a   : > { %2152 = vmatpush2.bf16.msra.mxu1 %v3113_v43  ;;  %2100 = vmatprep.subr.bf16.mxu0 %v3114_v44  ;;  %v3183_v43 = vld [vmem:[%s3500_s19 + $0x310] ss:$8 sps:$4 sm:$0xff]   ;;  %v3188_v44 = vld [vmem:[%s3500_s19 + $0x204] ss:$8 sps:$4 sm:$0xff]  }
  0x3b   : > { %2153 = vmatprep.subr.bf16.mxu1 %v3116_v45  ;;  %v3191_v45 = vld [vmem:[%s3500_s19 + $0x304] ss:$8 sps:$4 sm:$0xff]  }
  0x3d   : > { %2101 = vmatpush2.bf16.msra.mxu0 %v3118_v46  ;;  %v3611_v46 = vld [vmem:[%s3550_s23 + $0x10] sm:$0xff] }
  0x3e   : > { %2154 = vmatpush2.bf16.msra.mxu1 %v3119_v47  ;;  %2102 = vmatprep.subr.bf16.mxu0 %v3120_v52  ;;  %v3614_v47 = vld [vmem:[%s3550_s23 + $0x50] sm:$0xff]  ;;  %v3186_v52 = vld [vmem:[%s3500_s19 + $0x200] ss:$8 sps:$4 sm:$0xff]  }
  0x3f   : > { %2155 = vmatprep.subr.bf16.mxu1 %v3122_v54  ;;  %v2736_v49 = vcombine.high %v3611_v46, %v3614_v47  ;;  %v3194_v54 = vld [vmem:[%s3500_s19 + $0x2f4] ss:$8 sps:$4 sm:$0xff]   ;;  %v2735_v28 = vcombine.low %v3611_v46, %v3614_v47  ;;  %v3687_v46 = vld [vmem:[%s3550_s23 + $0x28] sm:$0xff] }
  0x40   : > { %v3690_v47 = vld [vmem:[%s3550_s23 + $0x68] sm:$0xff] }
  0x41   : > { %2103 = vmatpush2.bf16.msra.mxu0 %v3124_v56  ;;  %v3192_v56 = vld [vmem:[%s3500_s19 + $0x2f0] ss:$8 sps:$4 sm:$0xff]  }
  0x42   : > { %2156 = vmatpush2.bf16.msra.mxu1 %v3125_v57  ;;  %2104 = vmatprep.subr.bf16.mxu0 %v3126_v58  ;;  %v3195_v57 = vld [vmem:[%s3500_s19 + $0x3f0] ss:$8 sps:$4 sm:$0xff]   ;;  %v3200_v58 = vld [vmem:[%s3500_s19 + $0x2e4] ss:$8 sps:$4 sm:$0xff]  }
  0x43   : > { %2157 = vmatprep.subr.bf16.mxu1 %v3128_v59  ;;  %v3203_v59 = vld [vmem:[%s3500_s19 + $0x3e4] ss:$8 sps:$4 sm:$0xff]  }
  0x45   : > { %2105 = vmatpush2.bf16.msra.mxu0 %v3130_v60  ;;  %v3198_v60 = vld [vmem:[%s3500_s19 + $0x2e0] ss:$8 sps:$4 sm:$0xff]  }
  0x46   : > { %2158 = vmatpush2.bf16.msra.mxu1 %v3131_v61  ;;  %2106 = vmatprep.subr.bf16.mxu0 %v3132_v62  ;;  %v3201_v61 = vld [vmem:[%s3500_s19 + $0x3e0] ss:$8 sps:$4 sm:$0xff]   ;;  %v3206_v62 = vld [vmem:[%s3500_s19 + $0x2d4] ss:$8 sps:$4 sm:$0xff]  }
  0x47   : > { %2159 = vmatprep.subr.bf16.mxu1 %v3134_v63  ;;  %v3209_v63 = vld [vmem:[%s3500_s19 + $0x3d4] ss:$8 sps:$4 sm:$0xff]  }
  0x49   : > { %2107 = vmatpush2.bf16.msra.mxu0 %v3136_v0  ;;  %v3204_v0 = vld [vmem:[%s3500_s19 + $0x2d0] ss:$8 sps:$4 sm:$0xff]  }
  0x4a   : > { %2160 = vmatpush2.bf16.msra.mxu1 %v3137_v1  ;;  %2108 = vmatprep.subr.bf16.mxu0 %v3138_v2  ;;  %v3207_v1 = vld [vmem:[%s3500_s19 + $0x3d0] ss:$8 sps:$4 sm:$0xff]   ;;  %v3212_v2 = vld [vmem:[%s3500_s19 + $0x2c4] ss:$8 sps:$4 sm:$0xff]  }
  0x4b   : > { %2161 = vmatprep.subr.bf16.mxu1 %v3140_v3  ;;  %v3215_v3 = vld [vmem:[%s3500_s19 + $0x3c4] ss:$8 sps:$4 sm:$0xff]  }
  0x4d   : > { %2109 = vmatpush2.bf16.msra.mxu0 %v3142_v4  ;;  %v3210_v4 = vld [vmem:[%s3500_s19 + $0x2c0] ss:$8 sps:$4 sm:$0xff]  }
  0x4e   : > { %2162 = vmatpush2.bf16.msra.mxu1 %v3143_v5  ;;  %2184 = vmatprep.subr.bf16.mxu0 %v3146_v6  ;;  %v3213_v5 = vld [vmem:[%s3500_s19 + $0x3c0] ss:$8 sps:$4 sm:$0xff]   ;;  %v3218_v6 = vld [vmem:[%s3500_s19 + $0x2b4] ss:$8 sps:$4 sm:$0xff]  }
  0x4f   : > { %2237 = vmatprep.subr.bf16.mxu1 %v3149_v7  ;;  %v3221_v7 = vld [vmem:[%s3500_s19 + $0x3b4] ss:$8 sps:$4 sm:$0xff]  }
  0x50   : > { %2111 = vmatmul.mubr.bf16.vlgmr.msra.gmra.mxu0 %v2731_v8  ;;  %v3216_v8 = vld [vmem:[%s3500_s19 + $0x2b0] ss:$8 sps:$4 sm:$0xff]  }
  0x51   : > { %2164 = vmatmul.mubr.bf16.vlgmr.msra.gmra.mxu1 %v2733_v9  ;;  %2185 = vmatpush1.bf16.msra.mxu0 %v3144_v10  ;;  %v3219_v9 = vld [vmem:[%s3500_s19 + $0x3b0] ss:$8 sps:$4 sm:$0xff]   ;;  %v3224_v10 = vld [vmem:[%s3500_s19 + $0x2a4] ss:$8 sps:$4 sm:$0xff]  }
  0x52   : > { %2238 = vmatpush1.bf16.msra.mxu1 %v3147_v11  ;;  %2186 = vmatprep.subr.bf16.mxu0 %v3152_v12  ;;  %v3227_v11 = vld [vmem:[%s3500_s19 + $0x3a4] ss:$8 sps:$4 sm:$0xff]   ;;  %v3222_v12 = vld [vmem:[%s3500_s19 + $0x2a0] ss:$8 sps:$4 sm:$0xff]  }
  0x53   : > { %2239 = vmatprep.subr.bf16.mxu1 %v3155_v13  ;;  %2120 = vmatprep.mubr.bf16.mxu0 %v2748_v33  ;;  %v3225_v13 = vld [vmem:[%s3500_s19 + $0x3a0] ss:$8 sps:$4 sm:$0xff]   ;;  %v3251_v33 = vld [vmem:[%s3500_s19 + $0x564] ss:$8 sps:$4 sm:$0xff]  }
  0x54   : > { %2173 = vmatprep.mubr.bf16.mxu1 %v2750_v34 }
  0x55   : > { %2187 = vmatpush1.bf16.msra.mxu0 %v3150_v14  ;;  %v3230_v14 = vld [vmem:[%s3500_s19 + $0x294] ss:$8 sps:$4 sm:$0xff]  }
  0x56   : > { %2240 = vmatpush1.bf16.msra.mxu1 %v3153_v15  ;;  %2188 = vmatprep.subr.bf16.mxu0 %v3158_v16  ;;  %v3233_v15 = vld [vmem:[%s3500_s19 + $0x394] ss:$8 sps:$4 sm:$0xff]   ;;  %v3228_v16 = vld [vmem:[%s3500_s19 + $0x290] ss:$8 sps:$4 sm:$0xff]  }
  0x57   : > { %2241 = vmatprep.subr.bf16.mxu1 %v3161_v17  ;;  %v3231_v17 = vld [vmem:[%s3500_s19 + $0x390] ss:$8 sps:$4 sm:$0xff]  }
  0x58   : > { %2121 = vmatmul.mubr.bf16.gmra.mxu0 %v2747_v35  ;;  %v2754_v35 = vcombine.high %v369_v30, %v377_v31 }
  0x59   : > { %2189 = vmatpush1.bf16.msra.mxu0 %v3156_v18  ;;  %2174 = vmatmul.mubr.bf16.gmra.mxu1 %v2749_v37  ;;  %v3236_v18 = vld [vmem:[%s3500_s19 + $0x284] ss:$8 sps:$4 sm:$0xff]   ;;  %v3249_v37 = vld [vmem:[%s3500_s19 + $0x560] ss:$8 sps:$4 sm:$0xff]  }
  0x5a   : > { %2242 = vmatpush1.bf16.msra.mxu1 %v3159_v19  ;;  %2190 = vmatprep.subr.bf16.mxu0 %v3164_v20  ;;  %v3239_v19 = vld [vmem:[%s3500_s19 + $0x384] ss:$8 sps:$4 sm:$0xff]   ;;  %v3234_v20 = vld [vmem:[%s3500_s19 + $0x280] ss:$8 sps:$4 sm:$0xff]  }
  0x5b   : > { %2243 = vmatprep.subr.bf16.mxu1 %v3167_v21  ;;  %2216 = vmatprep.mubr.bf16.mxu0 %v2736_v49  ;;  %v3237_v21 = vld [vmem:[%s3500_s19 + $0x380] ss:$8 sps:$4 sm:$0xff]   ;;  %v3263_v49 = vld [vmem:[%s3500_s19 + $0x544] ss:$8 sps:$4 sm:$0xff]  }
  0x5c   : > { %2269 = vmatprep.mubr.bf16.mxu1 %v2738_v51  ;;  %v2742_v51 = vcombine.high %v3687_v46, %v3690_v47 }
  0x5d   : > { %2191 = vmatpush1.bf16.msra.mxu0 %v3162_v22  ;;  %v3242_v22 = vld [vmem:[%s3500_s19 + $0x474] ss:$8 sps:$4 sm:$0xff]  }
  0x5e   : > { %2244 = vmatpush1.bf16.msra.mxu1 %v3165_v23  ;;  %2192 = vmatprep.subr.bf16.mxu0 %v3170_v24  ;;  %v3245_v23 = vld [vmem:[%s3500_s19 + $0x574] ss:$8 sps:$4 sm:$0xff]   ;;  %v3240_v24 = vld [vmem:[%s3500_s19 + $0x470] ss:$8 sps:$4 sm:$0xff]  }
  0x5f   : > { %2245 = vmatprep.subr.bf16.mxu1 %v3173_v25  ;;  %v3243_v25 = vld [vmem:[%s3500_s19 + $0x570] ss:$8 sps:$4 sm:$0xff]  }
  0x61   : > { %2193 = vmatpush1.bf16.msra.mxu0 %v3168_v26  ;;  %v368_v26 = vld [vmem:[%s3550_s23 + $0x90] sm:$0xff] }
  0x62   : > { %2246 = vmatpush1.bf16.msra.mxu1 %v3171_v27  ;;  %2194 = vmatprep.subr.bf16.mxu0 %v3176_v32  ;;  %v376_v27 = vld [vmem:[%s3550_s23 + $0xd0] sm:$0xff]  ;;  %v3248_v32 = vld [vmem:[%s3500_s19 + $0x464] ss:$8 sps:$4 sm:$0xff]  }
  0x63   : > { %2247 = vmatprep.subr.bf16.mxu1 %v3179_v36  ;;  %v2752_v34 = vcombine.high %v368_v26, %v376_v27  ;;  %v3246_v36 = vld [vmem:[%s3500_s19 + $0x460] ss:$8 sps:$4 sm:$0xff]  }
  0x65   : > { %2195 = vmatpush1.bf16.msra.mxu0 %v3174_v38  ;;  %v3254_v38 = vld [vmem:[%s3500_s19 + $0x454] ss:$8 sps:$4 sm:$0xff]  }
  0x66   : > { %2248 = vmatpush1.bf16.msra.mxu1 %v3177_v39  ;;  %2196 = vmatprep.subr.bf16.mxu0 %v3182_v40  ;;  %v3257_v39 = vld [vmem:[%s3500_s19 + $0x554] ss:$8 sps:$4 sm:$0xff]   ;;  %v3252_v40 = vld [vmem:[%s3500_s19 + $0x450] ss:$8 sps:$4 sm:$0xff]  }
  0x67   : > { %2249 = vmatprep.subr.bf16.mxu1 %v3185_v41  ;;  %v3255_v41 = vld [vmem:[%s3500_s19 + $0x550] ss:$8 sps:$4 sm:$0xff]  }
  0x69   : > { %2197 = vmatpush1.bf16.msra.mxu0 %v3180_v42  ;;  %v3681_v42 = vld [vmem:[%s3550_s23 + $0x20] sm:$0xff] }
  0x6a   : > { %2250 = vmatpush1.bf16.msra.mxu1 %v3183_v43  ;;  %2198 = vmatprep.subr.bf16.mxu0 %v3188_v44  ;;  %v3684_v43 = vld [vmem:[%s3550_s23 + $0x60] sm:$0xff]  ;;  %v2751_v44 = vcombine.low %v368_v26, %v376_v27 }
  0x6b   : > { %2251 = vmatprep.subr.bf16.mxu1 %v3191_v45  ;;  %v2753_v45 = vcombine.low %v369_v30, %v377_v31  ;;  %v2740_v50 = vcombine.high %v3681_v42, %v3684_v43  ;;  %v3320_v26 = vld [vmem:[%s3500_s19 + $0x4a4] ss:$8 sps:$4 sm:$0xff]   ;;  %v3326_v30 = vld [vmem:[%s3500_s19 + $0x494] ss:$8 sps:$4 sm:$0xff]  }
  0x6c   : > { %v3323_v27 = vld [vmem:[%s3500_s19 + $0x5a4] ss:$8 sps:$4 sm:$0xff]   ;;  %v3329_v31 = vld [vmem:[%s3500_s19 + $0x594] ss:$8 sps:$4 sm:$0xff]  }
  0x6d   : > { %2199 = vmatpush1.bf16.msra.mxu0 %v3186_v52  ;;  %v3258_v52 = vld [vmem:[%s3500_s19 + $0x440] ss:$8 sps:$4 sm:$0xff]  }
  0x6e   : > { %2252 = vmatpush1.bf16.msra.mxu1 %v3189_v53  ;;  %2200 = vmatprep.subr.bf16.mxu0 %v3194_v54  ;;  %v3261_v53 = vld [vmem:[%s3500_s19 + $0x540] ss:$8 sps:$4 sm:$0xff]   ;;  %v3266_v54 = vld [vmem:[%s3500_s19 + $0x434] ss:$8 sps:$4 sm:$0xff]  }
  0x6f   : > { %2253 = vmatprep.subr.bf16.mxu1 %v3197_v55  ;;  %v3269_v55 = vld [vmem:[%s3500_s19 + $0x534] ss:$8 sps:$4 sm:$0xff]  }
  0x71   : > { %2201 = vmatpush2.bf16.msra.mxu0 %v3192_v56  ;;  %v3264_v56 = vld [vmem:[%s3500_s19 + $0x430] ss:$8 sps:$4 sm:$0xff]  }
  0x72   : > { %2254 = vmatpush2.bf16.msra.mxu1 %v3195_v57  ;;  %2202 = vmatprep.subr.bf16.mxu0 %v3200_v58  ;;  %v3267_v57 = vld [vmem:[%s3500_s19 + $0x530] ss:$8 sps:$4 sm:$0xff]   ;;  %v3272_v58 = vld [vmem:[%s3500_s19 + $0x424] ss:$8 sps:$4 sm:$0xff]  }
  0x73   : > { %2255 = vmatprep.subr.bf16.mxu1 %v3203_v59  ;;  %v3275_v59 = vld [vmem:[%s3500_s19 + $0x524] ss:$8 sps:$4 sm:$0xff]  }
  0x75   : > { %2203 = vmatpush2.bf16.msra.mxu0 %v3198_v60  ;;  %v3270_v60 = vld [vmem:[%s3500_s19 + $0x420] ss:$8 sps:$4 sm:$0xff]  }
  0x76   : > { %2256 = vmatpush2.bf16.msra.mxu1 %v3201_v61  ;;  %2204 = vmatprep.subr.bf16.mxu0 %v3206_v62  ;;  %v3273_v61 = vld [vmem:[%s3500_s19 + $0x520] ss:$8 sps:$4 sm:$0xff]   ;;  %v3278_v62 = vld [vmem:[%s3500_s19 + $0x414] ss:$8 sps:$4 sm:$0xff]  }
  0x77   : > { %2257 = vmatprep.subr.bf16.mxu1 %v3209_v63  ;;  %v3281_v63 = vld [vmem:[%s3500_s19 + $0x514] ss:$8 sps:$4 sm:$0xff]  }
  0x79   : > { %2205 = vmatpush2.bf16.msra.mxu0 %v3204_v0  ;;  %v3276_v0 = vld [vmem:[%s3500_s19 + $0x410] ss:$8 sps:$4 sm:$0xff]  }
  0x7a   : > { %2258 = vmatpush2.bf16.msra.mxu1 %v3207_v1  ;;  %2206 = vmatprep.subr.bf16.mxu0 %v3212_v2  ;;  %v3279_v1 = vld [vmem:[%s3500_s19 + $0x510] ss:$8 sps:$4 sm:$0xff]   ;;  %v3284_v2 = vld [vmem:[%s3500_s19 + $0x404] ss:$8 sps:$4 sm:$0xff]  }
  0x7b   : > { %2259 = vmatprep.subr.bf16.mxu1 %v3215_v3  ;;  %v3287_v3 = vld [vmem:[%s3500_s19 + $0x504] ss:$8 sps:$4 sm:$0xff]  }
  0x7d   : > { %2207 = vmatpush2.bf16.msra.mxu0 %v3210_v4  ;;  %v3282_v4 = vld [vmem:[%s3500_s19 + $0x400] ss:$8 sps:$4 sm:$0xff]  }
  0x7e   : > { %2260 = vmatpush2.bf16.msra.mxu1 %v3213_v5  ;;  %2208 = vmatprep.subr.bf16.mxu0 %v3218_v6  ;;  %v3285_v5 = vld [vmem:[%s3500_s19 + $0x500] ss:$8 sps:$4 sm:$0xff]   ;;  %v3290_v6 = vld [vmem:[%s3500_s19 + $0x4f4] ss:$8 sps:$4 sm:$0xff]  }
  0x7f   : > { %2261 = vmatprep.subr.bf16.mxu1 %v3221_v7  ;;  %v3293_v7 = vld [vmem:[%s3500_s19 + $0x5f4] ss:$8 sps:$4 sm:$0xff]  }
  0x81   : > { %2209 = vmatpush2.bf16.msra.mxu0 %v3216_v8  ;;  %v3288_v8 = vld [vmem:[%s3500_s19 + $0x4f0] ss:$8 sps:$4 sm:$0xff]  }
  0x82   : > { %2262 = vmatpush2.bf16.msra.mxu1 %v3219_v9  ;;  %2210 = vmatprep.subr.bf16.mxu0 %v3224_v10  ;;  %v3291_v9 = vld [vmem:[%s3500_s19 + $0x5f0] ss:$8 sps:$4 sm:$0xff]   ;;  %v3296_v10 = vld [vmem:[%s3500_s19 + $0x4e4] ss:$8 sps:$4 sm:$0xff]  }
  0x83   : > { %2263 = vmatprep.subr.bf16.mxu1 %v3227_v11  ;;  %v3299_v11 = vld [vmem:[%s3500_s19 + $0x5e4] ss:$8 sps:$4 sm:$0xff]  }
  0x85   : > { %2211 = vmatpush2.bf16.msra.mxu0 %v3222_v12  ;;  %v3294_v12 = vld [vmem:[%s3500_s19 + $0x4e0] ss:$8 sps:$4 sm:$0xff]  }
  0x86   : > { %2264 = vmatpush2.bf16.msra.mxu1 %v3225_v13  ;;  %2212 = vmatprep.subr.bf16.mxu0 %v3230_v14  ;;  %v3297_v13 = vld [vmem:[%s3500_s19 + $0x5e0] ss:$8 sps:$4 sm:$0xff]   ;;  %v3302_v14 = vld [vmem:[%s3500_s19 + $0x4d4] ss:$8 sps:$4 sm:$0xff]  }
  0x87   : > { %2265 = vmatprep.subr.bf16.mxu1 %v3233_v15  ;;  %v3305_v15 = vld [vmem:[%s3500_s19 + $0x5d4] ss:$8 sps:$4 sm:$0xff]  }
  0x89   : > { %2213 = vmatpush2.bf16.msra.mxu0 %v3228_v16  ;;  %v3300_v16 = vld [vmem:[%s3500_s19 + $0x4d0] ss:$8 sps:$4 sm:$0xff]  }
  0x8a   : > { %2266 = vmatpush2.bf16.msra.mxu1 %v3231_v17  ;;  %2214 = vmatprep.subr.bf16.mxu0 %v3236_v18  ;;  %v3303_v17 = vld [vmem:[%s3500_s19 + $0x5d0] ss:$8 sps:$4 sm:$0xff]   ;;  %v3308_v18 = vld [vmem:[%s3500_s19 + $0x4c4] ss:$8 sps:$4 sm:$0xff]  }
  0x8b   : > { %2267 = vmatprep.subr.bf16.mxu1 %v3239_v19  ;;  %v3311_v19 = vld [vmem:[%s3500_s19 + $0x5c4] ss:$8 sps:$4 sm:$0xff]  }
  0x8d   : > { %2215 = vmatpush2.bf16.msra.mxu0 %v3234_v20  ;;  %v3306_v20 = vld [vmem:[%s3500_s19 + $0x4c0] ss:$8 sps:$4 sm:$0xff]  }
  0x8e   : > { %2268 = vmatpush2.bf16.msra.mxu1 %v3237_v21  ;;  %2290 = vmatprep.subr.bf16.mxu0 %v3242_v22  ;;  %v3309_v21 = vld [vmem:[%s3500_s19 + $0x5c0] ss:$8 sps:$4 sm:$0xff]   ;;  %v3314_v22 = vld [vmem:[%s3500_s19 + $0x4b4] ss:$8 sps:$4 sm:$0xff]  }
  0x8f   : > { %2343 = vmatprep.subr.bf16.mxu1 %v3245_v23  ;;  %v3317_v23 = vld [vmem:[%s3500_s19 + $0x5b4] ss:$8 sps:$4 sm:$0xff]  }
  0x90   : > { %2217 = vmatmul.mubr.bf16.vlgmr.msra.gmra.mxu0 %v2735_v28  ;;  %v3318_v28 = vld [vmem:[%s3500_s19 + $0x4a0] ss:$8 sps:$4 sm:$0xff]  }
  0x91   : > { %2270 = vmatmul.mubr.bf16.vlgmr.msra.gmra.mxu1 %v2737_v29  ;;  %2291 = vmatpush1.bf16.msra.mxu0 %v3240_v24  ;;  %v3312_v24 = vld [vmem:[%s3500_s19 + $0x4b0] ss:$8 sps:$4 sm:$0xff]   ;;  %v3321_v29 = vld [vmem:[%s3500_s19 + $0x5a0] ss:$8 sps:$4 sm:$0xff]  }
  0x92   : > { %2344 = vmatpush1.bf16.msra.mxu1 %v3243_v25  ;;  %2292 = vmatprep.subr.bf16.mxu0 %v3248_v32  ;;  %v3315_v25 = vld [vmem:[%s3500_s19 + $0x5b0] ss:$8 sps:$4 sm:$0xff]  }
  0x93   : > { %2345 = vmatprep.subr.bf16.mxu1 %v3251_v33  ;;  %2226 = vmatprep.mubr.bf16.mxu0 %v2752_v34  ;;  %v3324_v32 = vld [vmem:[%s3500_s19 + $0x490] ss:$8 sps:$4 sm:$0xff]   ;;  %v3332_v34 = vld [vmem:[%s3500_s19 + $0x484] ss:$8 sps:$4 sm:$0xff]  }
  0x94   : > { %2279 = vmatprep.mubr.bf16.mxu1 %v2754_v35  ;;  %v3327_v33 = vld [vmem:[%s3500_s19 + $0x590] ss:$8 sps:$4 sm:$0xff]   ;;  %v3335_v35 = vld [vmem:[%s3500_s19 + $0x584] ss:$8 sps:$4 sm:$0xff]  }
  0x95   : > { %2293 = vmatpush1.bf16.msra.mxu0 %v3246_v36  ;;  %v3330_v36 = vld [vmem:[%s3500_s19 + $0x480] ss:$8 sps:$4 sm:$0xff]  }
  0x96   : > { %2346 = vmatpush1.bf16.msra.mxu1 %v3249_v37  ;;  %2294 = vmatprep.subr.bf16.mxu0 %v3254_v38  ;;  %v3333_v37 = vld [vmem:[%s3500_s19 + $0x580] ss:$8 sps:$4 sm:$0xff]   ;;  %v3338_v38 = vld [vmem:[%s3500_s19 + $0x674] ss:$8 sps:$4 sm:$0xff]  }
  0x97   : > { %2347 = vmatprep.subr.bf16.mxu1 %v3257_v39  ;;  %v3341_v39 = vld [vmem:[%s3500_s19 + $0x774] ss:$8 sps:$4 sm:$0xff]  }
  0x98   : > { %2227 = vmatmul.mubr.bf16.gmra.mxu0 %v2751_v44  ;;  %v2741_v44 = vcombine.low %v3687_v46, %v3690_v47  ;;  %v3342_v46 = vld [vmem:[%s3500_s19 + $0x660] ss:$8 sps:$4 sm:$0xff]  }
  0x99   : > { %2280 = vmatmul.mubr.bf16.gmra.mxu1 %v2753_v45  ;;  %2295 = vmatpush1.bf16.msra.mxu0 %v3252_v40  ;;  %v370_v40 = vld [vmem:[%s3550_s23 + $0xa0] sm:$0xff] }
  0x9a   : > { %2348 = vmatpush1.bf16.msra.mxu1 %v3255_v41  ;;  %2296 = vmatprep.subr.bf16.mxu0 %v3260_v48  ;;  %v2739_v41 = vcombine.low %v3681_v42, %v3684_v43  ;;  %v378_v45 = vld [vmem:[%s3550_s23 + $0xe0] sm:$0xff]  ;;  %v371_v48 = vld [vmem:[%s3550_s23 + $0xa8] sm:$0xff] }
  0x9b   : > { %2349 = vmatprep.subr.bf16.mxu1 %v3263_v49  ;;  %2322 = vmatprep.mubr.bf16.mxu0 %v2740_v50  ;;  %v379_v49 = vld [vmem:[%s3550_s23 + $0xe8] sm:$0xff]  ;;  %v3336_v50 = vld [vmem:[%s3500_s19 + $0x670] ss:$8 sps:$4 sm:$0xff]   ;;  %v2756_v42 = vcombine.high %v370_v40, %v378_v45 }
  0x9c   : > { %2375 = vmatprep.mubr.bf16.mxu1 %v2742_v51  ;;  %v3339_v51 = vld [vmem:[%s3500_s19 + $0x770] ss:$8 sps:$4 sm:$0xff]   ;;  %v2758_v43 = vcombine.high %v371_v48, %v379_v49  ;;  %v3345_v47 = vld [vmem:[%s3500_s19 + $0x760] ss:$8 sps:$4 sm:$0xff]  }
  0x9d   : > { %2297 = vmatpush1.bf16.msra.mxu0 %v3258_v52  ;;  %v3344_v52 = vld [vmem:[%s3500_s19 + $0x664] ss:$8 sps:$4 sm:$0xff]  }
  0x9e   : > { %2350 = vmatpush1.bf16.msra.mxu1 %v3261_v53  ;;  %2298 = vmatprep.subr.bf16.mxu0 %v3266_v54  ;;  %v3347_v53 = vld [vmem:[%s3500_s19 + $0x764] ss:$8 sps:$4 sm:$0xff]   ;;  %v3350_v54 = vld [vmem:[%s3500_s19 + $0x654] ss:$8 sps:$4 sm:$0xff]  }
  0x9f   : > { %2351 = vmatprep.subr.bf16.mxu1 %v3269_v55  ;;  %v3353_v55 = vld [vmem:[%s3500_s19 + $0x754] ss:$8 sps:$4 sm:$0xff]  }
  0xa1   : > { %2299 = vmatpush1.bf16.msra.mxu0 %v3264_v56  ;;  %v3767_v56 = vld [vmem:[%s3550_s23 + $0x30] sm:$0xff] }
  0xa2   : > { %2352 = vmatpush1.bf16.msra.mxu1 %v3267_v57  ;;  %2300 = vmatprep.subr.bf16.mxu0 %v3272_v58  ;;  %v2755_v57 = vcombine.low %v370_v40, %v378_v45  ;;  %v2757_v58 = vcombine.low %v371_v48, %v379_v49  ;;  %v3408_v40 = vld [vmem:[%s3500_s19 + $0x6b0] ss:$8 sps:$4 sm:$0xff]   ;;  %v3419_v45 = vld [vmem:[%s3500_s19 + $0x7a4] ss:$8 sps:$4 sm:$0xff]   ;;  %v3414_v48 = vld [vmem:[%s3500_s19 + $0x6a0] ss:$8 sps:$4 sm:$0xff]  }
  0xa3   : > { %2353 = vmatprep.subr.bf16.mxu1 %v3275_v59  ;;  %v3770_v59 = vld [vmem:[%s3550_s23 + $0x70] sm:$0xff]  ;;  %v3417_v49 = vld [vmem:[%s3500_s19 + $0x7a0] ss:$8 sps:$4 sm:$0xff]  }
  0xa5   : > { %2301 = vmatpush1.bf16.msra.mxu0 %v3270_v60  ;;  %v3773_v60 = vld [vmem:[%s3550_s23 + $0x38] sm:$0xff] }
  0xa6   : > { %2354 = vmatpush1.bf16.msra.mxu1 %v3273_v61  ;;  %2302 = vmatprep.subr.bf16.mxu0 %v3278_v62  ;;  %v3776_v61 = vld [vmem:[%s3550_s23 + $0x78] sm:$0xff] }
  0xa7   : > { %2355 = vmatprep.subr.bf16.mxu1 %v3281_v63  ;;  %v3348_v62 = vld [vmem:[%s3500_s19 + $0x650] ss:$8 sps:$4 sm:$0xff]  }
  0xa8   : > { %v3351_v63 = vld [vmem:[%s3500_s19 + $0x750] ss:$8 sps:$4 sm:$0xff]  }
  0xa9   : > { %2303 = vmatpush1.bf16.msra.mxu0 %v3276_v0  ;;  %v3356_v0 = vld [vmem:[%s3500_s19 + $0x644] ss:$8 sps:$4 sm:$0xff]  }
  0xaa   : > { %2356 = vmatpush1.bf16.msra.mxu1 %v3279_v1  ;;  %2304 = vmatprep.subr.bf16.mxu0 %v3284_v2  ;;  %v3359_v1 = vld [vmem:[%s3500_s19 + $0x744] ss:$8 sps:$4 sm:$0xff]   ;;  %v2744_v2 = vcombine.high %v3767_v56, %v3770_v59 }
  0xab   : > { %2357 = vmatprep.subr.bf16.mxu1 %v3287_v3  ;;  %v2746_v3 = vcombine.high %v3773_v60, %v3776_v61 }
  0xad   : > { %2305 = vmatpush1.bf16.msra.mxu0 %v3282_v4  ;;  %v3354_v4 = vld [vmem:[%s3500_s19 + $0x640] ss:$8 sps:$4 sm:$0xff]  }
  0xae   : > { %2358 = vmatpush1.bf16.msra.mxu1 %v3285_v5  ;;  %2306 = vmatprep.subr.bf16.mxu0 %v3290_v6  ;;  %v3357_v5 = vld [vmem:[%s3500_s19 + $0x740] ss:$8 sps:$4 sm:$0xff]   ;;  %v3362_v6 = vld [vmem:[%s3500_s19 + $0x634] ss:$8 sps:$4 sm:$0xff]  }
  0xaf   : > { %2359 = vmatprep.subr.bf16.mxu1 %v3293_v7  ;;  %v3365_v7 = vld [vmem:[%s3500_s19 + $0x734] ss:$8 sps:$4 sm:$0xff]  }
  0xb1   : > { %2307 = vmatpush2.bf16.msra.mxu0 %v3288_v8  ;;  %v3360_v8 = vld [vmem:[%s3500_s19 + $0x630] ss:$8 sps:$4 sm:$0xff]  }
  0xb2   : > { %2360 = vmatpush2.bf16.msra.mxu1 %v3291_v9  ;;  %2308 = vmatprep.subr.bf16.mxu0 %v3296_v10  ;;  %v3363_v9 = vld [vmem:[%s3500_s19 + $0x730] ss:$8 sps:$4 sm:$0xff]   ;;  %v3368_v10 = vld [vmem:[%s3500_s19 + $0x624] ss:$8 sps:$4 sm:$0xff]  }
  0xb3   : > { %2361 = vmatprep.subr.bf16.mxu1 %v3299_v11  ;;  %v3371_v11 = vld [vmem:[%s3500_s19 + $0x724] ss:$8 sps:$4 sm:$0xff]  }
  0xb5   : > { %2309 = vmatpush2.bf16.msra.mxu0 %v3294_v12  ;;  %v3366_v12 = vld [vmem:[%s3500_s19 + $0x620] ss:$8 sps:$4 sm:$0xff]  }
  0xb6   : > { %2362 = vmatpush2.bf16.msra.mxu1 %v3297_v13  ;;  %2310 = vmatprep.subr.bf16.mxu0 %v3302_v14  ;;  %v3369_v13 = vld [vmem:[%s3500_s19 + $0x720] ss:$8 sps:$4 sm:$0xff]   ;;  %v3374_v14 = vld [vmem:[%s3500_s19 + $0x614] ss:$8 sps:$4 sm:$0xff]  }
  0xb7   : > { %2363 = vmatprep.subr.bf16.mxu1 %v3305_v15  ;;  %v3377_v15 = vld [vmem:[%s3500_s19 + $0x714] ss:$8 sps:$4 sm:$0xff]  }
  0xb9   : > { %2311 = vmatpush2.bf16.msra.mxu0 %v3300_v16  ;;  %v3372_v16 = vld [vmem:[%s3500_s19 + $0x610] ss:$8 sps:$4 sm:$0xff]  }
  0xba   : > { %2364 = vmatpush2.bf16.msra.mxu1 %v3303_v17  ;;  %2312 = vmatprep.subr.bf16.mxu0 %v3308_v18  ;;  %v3375_v17 = vld [vmem:[%s3500_s19 + $0x710] ss:$8 sps:$4 sm:$0xff]   ;;  %v3380_v18 = vld [vmem:[%s3500_s19 + $0x604] ss:$8 sps:$4 sm:$0xff]  }
  0xbb   : > { %2365 = vmatprep.subr.bf16.mxu1 %v3311_v19  ;;  %v3383_v19 = vld [vmem:[%s3500_s19 + $0x704] ss:$8 sps:$4 sm:$0xff]  }
  0xbd   : > { %2313 = vmatpush2.bf16.msra.mxu0 %v3306_v20  ;;  %v3378_v20 = vld [vmem:[%s3500_s19 + $0x600] ss:$8 sps:$4 sm:$0xff]  }
  0xbe   : > { %2366 = vmatpush2.bf16.msra.mxu1 %v3309_v21  ;;  %2314 = vmatprep.subr.bf16.mxu0 %v3314_v22  ;;  %v3381_v21 = vld [vmem:[%s3500_s19 + $0x700] ss:$8 sps:$4 sm:$0xff]   ;;  %v3386_v22 = vld [vmem:[%s3500_s19 + $0x6f4] ss:$8 sps:$4 sm:$0xff]  }
  0xbf   : > { %2367 = vmatprep.subr.bf16.mxu1 %v3317_v23  ;;  %v3389_v23 = vld [vmem:[%s3500_s19 + $0x7f4] ss:$8 sps:$4 sm:$0xff]  }
  0xc1   : > { %2315 = vmatpush2.bf16.msra.mxu0 %v3312_v24  ;;  %v3384_v24 = vld [vmem:[%s3500_s19 + $0x6f0] ss:$8 sps:$4 sm:$0xff]  }
  0xc2   : > { %2368 = vmatpush2.bf16.msra.mxu1 %v3315_v25  ;;  %2316 = vmatprep.subr.bf16.mxu0 %v3320_v26  ;;  %v3387_v25 = vld [vmem:[%s3500_s19 + $0x7f0] ss:$8 sps:$4 sm:$0xff]   ;;  %v3392_v26 = vld [vmem:[%s3500_s19 + $0x6e4] ss:$8 sps:$4 sm:$0xff]  }
  0xc3   : > { %2369 = vmatprep.subr.bf16.mxu1 %v3323_v27  ;;  %v3395_v27 = vld [vmem:[%s3500_s19 + $0x7e4] ss:$8 sps:$4 sm:$0xff]  }
  0xc5   : > { %2317 = vmatpush2.bf16.msra.mxu0 %v3318_v28  ;;  %v3390_v28 = vld [vmem:[%s3500_s19 + $0x6e0] ss:$8 sps:$4 sm:$0xff]  }
  0xc6   : > { %2370 = vmatpush2.bf16.msra.mxu1 %v3321_v29  ;;  %2318 = vmatprep.subr.bf16.mxu0 %v3326_v30  ;;  %v3393_v29 = vld [vmem:[%s3500_s19 + $0x7e0] ss:$8 sps:$4 sm:$0xff]   ;;  %v3398_v30 = vld [vmem:[%s3500_s19 + $0x6d4] ss:$8 sps:$4 sm:$0xff]  }
  0xc7   : > { %2371 = vmatprep.subr.bf16.mxu1 %v3329_v31  ;;  %v3401_v31 = vld [vmem:[%s3500_s19 + $0x7d4] ss:$8 sps:$4 sm:$0xff]  }
  0xc9   : > { %2319 = vmatpush2.bf16.msra.mxu0 %v3324_v32  ;;  %v3396_v32 = vld [vmem:[%s3500_s19 + $0x6d0] ss:$8 sps:$4 sm:$0xff]  }
  0xca   : > { %2372 = vmatpush2.bf16.msra.mxu1 %v3327_v33  ;;  %2320 = vmatprep.subr.bf16.mxu0 %v3332_v34  ;;  %v3399_v33 = vld [vmem:[%s3500_s19 + $0x7d0] ss:$8 sps:$4 sm:$0xff]   ;;  %v3404_v34 = vld [vmem:[%s3500_s19 + $0x6c4] ss:$8 sps:$4 sm:$0xff]  }
  0xcb   : > { %2373 = vmatprep.subr.bf16.mxu1 %v3335_v35  ;;  %v3407_v35 = vld [vmem:[%s3500_s19 + $0x7c4] ss:$8 sps:$4 sm:$0xff]  }
  0xcd   : > { %2321 = vmatpush2.bf16.msra.mxu0 %v3330_v36  ;;  %v3402_v36 = vld [vmem:[%s3500_s19 + $0x6c0] ss:$8 sps:$4 sm:$0xff]  }
  0xce   : > { %2374 = vmatpush2.bf16.msra.mxu1 %v3333_v37  ;;  %2396 = vmatprep.subr.bf16.mxu0 %v3338_v38  ;;  %v3405_v37 = vld [vmem:[%s3500_s19 + $0x7c0] ss:$8 sps:$4 sm:$0xff]   ;;  %v3410_v38 = vld [vmem:[%s3500_s19 + $0x6b4] ss:$8 sps:$4 sm:$0xff]  }
  0xcf   : > { %2449 = vmatprep.subr.bf16.mxu1 %v3341_v39  ;;  %v3413_v39 = vld [vmem:[%s3500_s19 + $0x7b4] ss:$8 sps:$4 sm:$0xff]  }
  0xd0   : > { %2323 = vmatmul.mubr.bf16.vlgmr.msra.gmra.mxu0 %v2739_v41  ;;  %v3411_v41 = vld [vmem:[%s3500_s19 + $0x7b0] ss:$8 sps:$4 sm:$0xff]  }
  0xd1   : > { %2376 = vmatmul.mubr.bf16.vlgmr.msra.gmra.mxu1 %v2741_v44  ;;  %2397 = vmatpush1.bf16.msra.mxu0 %v3336_v50  ;;  %v3416_v44 = vld [vmem:[%s3500_s19 + $0x6a4] ss:$8 sps:$4 sm:$0xff]   ;;  %v3422_v50 = vld [vmem:[%s3500_s19 + $0x694] ss:$8 sps:$4 sm:$0xff]  }
  0xd2   : > { %2450 = vmatpush1.bf16.msra.mxu1 %v3339_v51  ;;  %2398 = vmatprep.subr.bf16.mxu0 %v3344_v52  ;;  %v3425_v51 = vld [vmem:[%s3500_s19 + $0x794] ss:$8 sps:$4 sm:$0xff]   ;;  %v3420_v52 = vld [vmem:[%s3500_s19 + $0x690] ss:$8 sps:$4 sm:$0xff]  }
  0xd3   : > { %2451 = vmatprep.subr.bf16.mxu1 %v3347_v53  ;;  %2332 = vmatprep.mubr.bf16.mxu0 %v2756_v42  ;;  %v3423_v53 = vld [vmem:[%s3500_s19 + $0x790] ss:$8 sps:$4 sm:$0xff]   ;;  %v3428_v42 = vld [vmem:[%s3500_s19 + $0x684] ss:$8 sps:$4 sm:$0xff]  }
  0xd4   : > { %2385 = vmatprep.mubr.bf16.mxu1 %v2758_v43  ;;  %v3431_v43 = vld [vmem:[%s3500_s19 + $0x784] ss:$8 sps:$4 sm:$0xff]  }
  0xd5   : > { %2399 = vmatpush1.bf16.msra.mxu0 %v3342_v46  ;;  %v3426_v46 = vld [vmem:[%s3500_s19 + $0x680] ss:$8 sps:$4 sm:$0xff]  }
  0xd6   : > { %2452 = vmatpush1.bf16.msra.mxu1 %v3345_v47  ;;  %2400 = vmatprep.subr.bf16.mxu0 %v3350_v54  ;;  %v3429_v47 = vld [vmem:[%s3500_s19 + $0x780] ss:$8 sps:$4 sm:$0xff]   ;;  %v372_v54 = vld [vmem:[%s3550_s23 + $0xb0] sm:$0xff] }
  0xd7   : > { %2453 = vmatprep.subr.bf16.mxu1 %v3353_v55  ;;  %v380_v55 = vld [vmem:[%s3550_s23 + $0xf0] sm:$0xff] }
  0xd8   : > { %2333 = vmatmul.mubr.bf16.gmra.mxu0 %v2755_v57  ;;  %v373_v57 = vld [vmem:[%s3550_s23 + $0xb8] sm:$0xff] }
  0xd9   : > { %2386 = vmatmul.mubr.bf16.gmra.mxu1 %v2757_v58  ;;  %2401 = vmatpush1.bf16.msra.mxu0 %v3348_v62  ;;  %v381_v58 = vld [vmem:[%s3550_s23 + $0xf8] sm:$0xff]  ;;  %v2743_v62 = vcombine.low %v3767_v56, %v3770_v59 }
  0xda   : > { %2454 = vmatpush1.bf16.msra.mxu1 %v3351_v63  ;;  %2402 = vmatprep.subr.bf16.mxu0 %v3356_v0  ;;  %v2745_v63 = vcombine.low %v3773_v60, %v3776_v61  ;;  %v2760_v0 = vcombine.high %v372_v54, %v380_v55 }
  0xdb   : > { %2455 = vmatprep.subr.bf16.mxu1 %v3359_v1  ;;  %2428 = vmatprep.mubr.bf16.mxu0 %v2744_v2  ;;  %v2762_v1 = vcombine.high %v373_v57, %v381_v58  ;;  %v2759_v2 = vcombine.low %v372_v54, %v380_v55 }
  0xdc   : > { %2481 = vmatprep.mubr.bf16.mxu1 %v2746_v3  ;;  %v2761_v3 = vcombine.low %v373_v57, %v381_v58 }
  0xdd   : > { %2403 = vmatpush1.bf16.msra.mxu0 %v3354_v4 }
  0xde   : > { %2456 = vmatpush1.bf16.msra.mxu1 %v3357_v5  ;;  %2404 = vmatprep.subr.bf16.mxu0 %v3362_v6 }
  0xdf   : > { %2457 = vmatprep.subr.bf16.mxu1 %v3365_v7 }
  0xe1   : > { %2405 = vmatpush1.bf16.msra.mxu0 %v3360_v8 }
  0xe2   : > { %2458 = vmatpush1.bf16.msra.mxu1 %v3363_v9  ;;  %2406 = vmatprep.subr.bf16.mxu0 %v3368_v10 }
  0xe3   : > { %2459 = vmatprep.subr.bf16.mxu1 %v3371_v11 }
  0xe5   : > { %2407 = vmatpush1.bf16.msra.mxu0 %v3366_v12 }
  0xe6   : > { %2460 = vmatpush1.bf16.msra.mxu1 %v3369_v13  ;;  %2408 = vmatprep.subr.bf16.mxu0 %v3374_v14 }
  0xe7   : > { %2461 = vmatprep.subr.bf16.mxu1 %v3377_v15 }
  0xe9   : > { %2409 = vmatpush1.bf16.msra.mxu0 %v3372_v16 }
  0xea   : > { %2462 = vmatpush1.bf16.msra.mxu1 %v3375_v17  ;;  %2410 = vmatprep.subr.bf16.mxu0 %v3380_v18 }
  0xeb   : > { %2463 = vmatprep.subr.bf16.mxu1 %v3383_v19 }
  0xed   : > { %2411 = vmatpush1.bf16.msra.mxu0 %v3378_v20 }
  0xee   : > { %2464 = vmatpush1.bf16.msra.mxu1 %v3381_v21  ;;  %2412 = vmatprep.subr.bf16.mxu0 %v3386_v22 }
  0xef   : > { %2465 = vmatprep.subr.bf16.mxu1 %v3389_v23 }
  0xf1   : > { %2413 = vmatpush2.bf16.msra.mxu0 %v3384_v24 }
  0xf2   : > { %2466 = vmatpush2.bf16.msra.mxu1 %v3387_v25  ;;  %2414 = vmatprep.subr.bf16.mxu0 %v3392_v26 }
  0xf3   : > { %2467 = vmatprep.subr.bf16.mxu1 %v3395_v27 }
  0xf5   : > { %2415 = vmatpush2.bf16.msra.mxu0 %v3390_v28 }
  0xf6   : > { %2468 = vmatpush2.bf16.msra.mxu1 %v3393_v29  ;;  %2416 = vmatprep.subr.bf16.mxu0 %v3398_v30 }
  0xf7   : > { %2469 = vmatprep.subr.bf16.mxu1 %v3401_v31 }
  0xf9   : > { %2417 = vmatpush2.bf16.msra.mxu0 %v3396_v32 }
  0xfa   : > { %2470 = vmatpush2.bf16.msra.mxu1 %v3399_v33  ;;  %2418 = vmatprep.subr.bf16.mxu0 %v3404_v34 }
  0xfb   : > { %2471 = vmatprep.subr.bf16.mxu1 %v3407_v35 }
  0xfd   : > { %2419 = vmatpush2.bf16.msra.mxu0 %v3402_v36 }
  0xfe   : > { %2472 = vmatpush2.bf16.msra.mxu1 %v3405_v37  ;;  %2420 = vmatprep.subr.bf16.mxu0 %v3410_v38 }
  0xff   : > { %2473 = vmatprep.subr.bf16.mxu1 %v3413_v39 }
 0x101   : > { %2421 = vmatpush2.bf16.msra.mxu0 %v3408_v40 }
 0x102   : > { %2474 = vmatpush2.bf16.msra.mxu1 %v3411_v41  ;;  %2422 = vmatprep.subr.bf16.mxu0 %v3416_v44 }
 0x103   : > { %2475 = vmatprep.subr.bf16.mxu1 %v3419_v45 }
 0x105   : > { %2423 = vmatpush2.bf16.msra.mxu0 %v3414_v48 }
 0x106   : > { %2476 = vmatpush2.bf16.msra.mxu1 %v3417_v49  ;;  %2424 = vmatprep.subr.bf16.mxu0 %v3422_v50  ;;  %v2531_v49 = vlaneseq }
 0x107   : > { %2477 = vmatprep.subr.bf16.mxu1 %v3425_v51 }
 0x109   : > { %2425 = vmatpush2.bf16.msra.mxu0 %v3420_v52 }
 0x10a   : > { %2478 = vmatpush2.bf16.msra.mxu1 %v3423_v53  ;;  %2426 = vmatprep.subr.bf16.mxu0 %v3428_v42 }
 0x10b   : > { %2479 = vmatprep.subr.bf16.mxu1 %v3431_v43 }
 0x10d   : > { %2427 = vmatpush2.bf16.msra.mxu0 %v3426_v46 }
 0x10e   : > { %2480 = vmatpush2.bf16.msra.mxu1 %v3429_v47  ;;  %v2532_v47 = vshrl.u32 %v2531_v49, 7 }
 0x110   : > { %2429 = vmatmul.mubr.bf16.vlgmr.msra.gmra.mxu0 %v2743_v62  ;;  %v2112_v4 = vpop.f32.mrf.mxu0 }
 0x111   : > { %2482 = vmatmul.mubr.bf16.vlgmr.msra.gmra.mxu1 %v2745_v63  ;;  %2438 = vmatprep.mubr.bf16.mxu0 %v2760_v0  ;;  %v2165_v5 = vpop.f32.mrf.mxu1 }
 0x112   : > { %2491 = vmatprep.mubr.bf16.mxu1 %v2762_v1  ;;  %v2114_v6 = vpop.f32.mrf.mxu0  ;;  %v2166_v44 = vadd.f32 %v2165_v5, %v2112_v4  ;;  %v2533_v4 = vsub.s32 0, %v2532_v47 }
 0x113   : > { %v2167_v7 = vpop.f32.mrf.mxu1 }
 0x114   : > { %v2116_v56 = vpop.f32.mrf.mxu0  ;;  %v2168_v45 = vadd.f32 %v2167_v7, %v2114_v6 }
 0x115   : > { %v2169_v59 = vpop.f32.mrf.mxu1 }
 0x116   : > { %v2118_v8 = vpop.f32.mrf.mxu0  ;;  %v2170_v52 = vadd.f32 %v2169_v59, %v2116_v56  ;;  %v2529_v59 = vld [vmem:[%s3890_s2] sm:$0x3] }
 0x117   : > { %v2171_v61 = vpop.f32.mrf.mxu1 }
 0x118   : > { %2439 = vmatmul.mubr.bf16.gmra.mxu0 %v2759_v2  ;;  %v2122_v60 = vpop.f32.mrf.mxu0  ;;  %v2172_v42 = vadd.f32 %v2171_v61, %v2118_v8 }
 0x119   : > { %2492 = vmatmul.mubr.bf16.gmra.mxu1 %v2761_v3  ;;  %v2175_v9 = vpop.f32.mrf.mxu1 }
 0x11a   : > { %v2124_v10 = vpop.f32.mrf.mxu0  ;;  %v2176_v54 = vadd.f32 %v2175_v9, %v2122_v60  ;;  %v2537_v9 = vsub.s32 1, %v2532_v47 }
 0x11b   : > { %v2177_v11 = vpop.f32.mrf.mxu1 }
 0x11c   : > { %v2126_v12 = vpop.f32.mrf.mxu0  ;;  %v2178_v0 = vadd.f32 %v2177_v11, %v2124_v10 }
 0x11d   : > { %v2179_v13 = vpop.f32.mrf.mxu1 }
 0x11e   : > { %v2128_v14 = vpop.f32.mrf.mxu0  ;;  %v2180_v5 = vadd.f32 %v2179_v13, %v2126_v12  ;;  %v3855_v13 = vrot.slane %v2529_v59, %v2533_v4 }
 0x11f   : > { %v2181_v16 = vpop.f32.mrf.mxu1 }
 0x150   : > { %v2218_v15 = vpop.f32.mrf.mxu0 }
 0x151   : > { %v2271_v17 = vpop.f32.mrf.mxu1  ;;  %v2219_v48 = vadd.f32 %v2218_v15, %v2166_v44  ;;  %v2182_v15 = vadd.f32 %v2181_v16, %v2128_v14 }
 0x152   : > { %v2220_v18 = vpop.f32.mrf.mxu0 }
 0x153   : > { %v2273_v19 = vpop.f32.mrf.mxu1  ;;  %v2221_v53 = vadd.f32 %v2220_v18, %v2168_v45  ;;  %v2272_v43 = vadd.f32 %v2271_v17, %v2219_v48 }
 0x154   : > { %v2222_v20 = vpop.f32.mrf.mxu0 }
 0x155   : > { %v2275_v21 = vpop.f32.mrf.mxu1  ;;  %v2223_v46 = vadd.f32 %v2222_v20, %v2170_v52  ;;  %v2274_v58 = vadd.f32 %v2273_v19, %v2221_v53 }
 0x156   : > { %v2224_v22 = vpop.f32.mrf.mxu0 }
 0x157   : > { %v2277_v23 = vpop.f32.mrf.mxu1  ;;  %v2225_v62 = vadd.f32 %v2224_v22, %v2172_v42  ;;  %v2276_v2 = vadd.f32 %v2275_v21, %v2223_v46 }
 0x158   : > { %v2228_v24 = vpop.f32.mrf.mxu0 }
 0x159   : > { %v2281_v25 = vpop.f32.mrf.mxu1  ;;  %v2229_v1 = vadd.f32 %v2228_v24, %v2176_v54  ;;  %v2278_v8 = vadd.f32 %v2277_v23, %v2225_v62 }
 0x15a   : > { %v2230_v26 = vpop.f32.mrf.mxu0 }
 0x15b   : > { %v2283_v27 = vpop.f32.mrf.mxu1  ;;  %v2231_v6 = vadd.f32 %v2230_v26, %v2178_v0  ;;  %v2282_v17 = vadd.f32 %v2281_v25, %v2229_v1 }
 0x15c   : > { %v2232_v28 = vpop.f32.mrf.mxu0 }
 0x15d   : > { %v3844_v29 = vpop.f32.mrf.mxu1  ;;  %v2233_v10 = vadd.f32 %v2232_v28, %v2180_v5  ;;  %v2284_v21 = vadd.f32 %v2283_v27, %v2231_v6 }
 0x15e   : > { %v2234_v30 = vpop.f32.mrf.mxu0 }
 0x15f   : > { %v3846_v31 = vpop.f32.mrf.mxu1  ;;  %v2235_v22 = vadd.f32 %v2234_v30, %v2182_v15  ;;  %v2286_v14 = vadd.f32 %v3844_v29, %v2233_v10 }
 0x161   : > { %v2288_v27 = vadd.f32 %v3846_v31, %v2235_v22 }
 0x190   : > { %v2324_v32 = vpop.f32.mrf.mxu0 }
 0x191   : > { %v2377_v33 = vpop.f32.mrf.mxu1  ;;  %v2325_v63 = vadd.f32 %v2324_v32, %v2272_v43 }
 0x192   : > { %v2326_v34 = vpop.f32.mrf.mxu0 }
 0x193   : > { %v2379_v35 = vpop.f32.mrf.mxu1  ;;  %v2327_v3 = vadd.f32 %v2326_v34, %v2274_v58  ;;  %v2378_v60 = vadd.f32 %v2377_v33, %v2325_v63 }
 0x194   : > { %v2328_v36 = vpop.f32.mrf.mxu0 }
 0x195   : > { %v2381_v37 = vpop.f32.mrf.mxu1  ;;  %v2329_v61 = vadd.f32 %v2328_v36, %v2276_v2  ;;  %v2380_v19 = vadd.f32 %v2379_v35, %v2327_v3  ;;  %v2538_v36 = vrot.slane %v2529_v59, %v2537_v9 }
 0x196   : > { %v2330_v38 = vpop.f32.mrf.mxu0 }
 0x197   : > { %v2383_v39 = vpop.f32.mrf.mxu1  ;;  %v2331_v20 = vadd.f32 %v2330_v38, %v2278_v8  ;;  %v2382_v23 = vadd.f32 %v2381_v37, %v2329_v61 }
 0x198   : > { %v2334_v40 = vpop.f32.mrf.mxu0 }
 0x199   : > { %v2387_v41 = vpop.f32.mrf.mxu1  ;;  %v2335_v24 = vadd.f32 %v2334_v40, %v2282_v17  ;;  %v2384_v35 = vadd.f32 %v2383_v39, %v2331_v20 }
 0x19a   : > { %v2336_v50 = vpop.f32.mrf.mxu0 }
 0x19b   : > { %v3848_v51 = vpop.f32.mrf.mxu1  ;;  %v2337_v16 = vadd.f32 %v2336_v50, %v2284_v21  ;;  %v2388_v30 = vadd.f32 %v2387_v41, %v2335_v24 }
 0x19c   : > { %v2338_v55 = vpop.f32.mrf.mxu0 }
 0x19d   : > { %v3850_v57 = vpop.f32.mrf.mxu1  ;;  %v2339_v40 = vadd.f32 %v2338_v55, %v2286_v14  ;;  %v2390_v52 = vadd.f32 %v3848_v51, %v2337_v16 }
 0x19e   : > { %v2340_v7 = vpop.f32.mrf.mxu0 }
 0x19f   : > { %v2393_v56 = vpop.f32.mrf.mxu1  ;;  %v2341_v53 = vadd.f32 %v2340_v7, %v2288_v27  ;;  %v2392_v54 = vadd.f32 %v3850_v57, %v2339_v40 }
 0x1a1   : > { %v2394_v1 = vadd.f32 %v2393_v56, %v2341_v53 }
 0x1d0   : > { %v2430_v11 = vpop.f32.mrf.mxu0 }
 0x1d1   : > { %v2483_v18 = vpop.f32.mrf.mxu1  ;;  %v2431_v12 = vadd.f32 %v2430_v11, %v2378_v60 }
 0x1d2   : > { %v2432_v26 = vpop.f32.mrf.mxu0 }
 0x1d3   : > { %v2485_v32 = vpop.f32.mrf.mxu1  ;;  %v2484_v33 = vadd.f32 %v2483_v18, %v2431_v12  ;;  %v2433_v34 = vadd.f32 %v2432_v26, %v2380_v19 }
 0x1d4   : > { %v2434_v25 = vpop.f32.mrf.mxu0 }
 0x1d5   : > { %v2487_v28 = vpop.f32.mrf.mxu1  ;;  %v2541_v38 = vadd.f32 %v3855_v13, %v2484_v33  ;;  %v2486_v44 = vadd.f32 %v2485_v32, %v2433_v34  ;;  %v2435_v45 = vadd.f32 %v2434_v25, %v2382_v23 }
 0x1d6   : > { %v2436_v37 = vpop.f32.mrf.mxu0 }
 0x1d7   : > { %v2489_v29 = vpop.f32.mrf.mxu1  ;;  %v2549_v48 = vmax.f32 %v2541_v38, 0.0  ;;  %v2542_v49 = vadd.f32 %v2538_v36, %v2486_v44  ;;  %v2488_v39 = vadd.f32 %v2487_v28, %v2435_v45  ;;  %v2437_v50 = vadd.f32 %v2436_v37, %v2384_v35 }
 0x1d8   : > { %v2440_v42 = vpop.f32.mrf.mxu0 }
 0x1d9   : > { %v2493_v31 = vpop.f32.mrf.mxu1  ;;  %2557 = vst [vmem:[%s3864_s29] sm:$0xff] %v2549_v48  ;;  %v2550_v41 = vmax.f32 %v2542_v49, 0.0  ;;  %v2543_v43 = vadd.f32 %v3855_v13, %v2488_v39  ;;  %v2490_v46 = vadd.f32 %v2489_v29, %v2437_v50  ;;  %v2441_v47 = vadd.f32 %v2440_v42, %v2388_v30 }
 0x1da   : > { %v2442_v55 = vpop.f32.mrf.mxu0 }
 0x1db   : > { %v2495_v58 = vpop.f32.mrf.mxu1  ;;  %2558 = vst [vmem:[%s3864_s29 + $0x8] sm:$0xff] %v2550_v41  ;;  %v2551_v62 = vmax.f32 %v2543_v43, 0.0  ;;  %v2544_v63 = vadd.f32 %v2538_v36, %v2490_v46  ;;  %v2494_v0 = vadd.f32 %v2493_v31, %v2441_v47  ;;  %v2443_v51 = vadd.f32 %v2442_v55, %v2390_v52 }
 0x1dc   : > { %v2444_v2 = vpop.f32.mrf.mxu0 }
 0x1dd   : > { %v2497_v3 = vpop.f32.mrf.mxu1  ;;  %2559 = vst [vmem:[%s3864_s29 + $0x10] sm:$0xff] %v2551_v62  ;;  %v2552_v4 = vmax.f32 %v2544_v63, 0.0  ;;  %v2545_v5 = vadd.f32 %v3855_v13, %v2494_v0  ;;  %v2496_v6 = vadd.f32 %v2495_v58, %v2443_v51  ;;  %v2445_v57 = vadd.f32 %v2444_v2, %v2392_v54 }
 0x1de   : > { %v2446_v7 = vpop.f32.mrf.mxu0 }
 0x1df   : > { %2560 = vst [vmem:[%s3864_s29 + $0x18] sm:$0xff] %v2552_v4  ;;  %v2553_v59 = vmax.f32 %v2545_v5, 0.0  ;;  %v2546_v8 = vadd.f32 %v2538_v36, %v2496_v6  ;;  %v2498_v60 = vadd.f32 %v2497_v3, %v2445_v57  ;;  %v2447_v61 = vadd.f32 %v2446_v7, %v2394_v1  ;;  %v2499_v9 = vpop.f32.mrf.mxu1 }
 0x1e1   : > { %2561 = vst [vmem:[%s3864_s29 + $0x20] sm:$0xff] %v2553_v59  ;;  %v2554_v56 = vmax.f32 %v2546_v8, 0.0  ;;  %v2547_v15 = vadd.f32 %v3855_v13, %v2498_v60  ;;  %v2500_v17 = vadd.f32 %v2499_v9, %v2447_v61 }
 0x1e3   : > { %2562 = vst [vmem:[%s3864_s29 + $0x28] sm:$0xff] %v2554_v56  ;;  %v2555_v10 = vmax.f32 %v2547_v15, 0.0  ;;  %v2548_v11 = vadd.f32 %v2538_v36, %v2500_v17 }
 0x1e5   : > { %2563 = vst [vmem:[%s3864_s29 + $0x30] sm:$0xff] %v2555_v10  ;;  %v2556_v18 = vmax.f32 %v2548_v11, 0.0 }
 0x1e7   : > { %2564 = vst [vmem:[%s3864_s29 + $0x38] sm:$0xff] %v2556_v18 }
 0x1e8 PF: > { %s13_s14 = sadd.s32 1, %s3454_s14   ;;  %s3892_s12 = smov %s3450_s13 }
 0x1e9   : > { %p10_p5 = scmp.ge.s32.totalorder %s13_s14, 6   ;;  %s3893_s13 = smov %s3895_s15 }
 0x1eb   :  { %12 = sbr.rel (!%p10_p5) target bundleno = 2 (0x2), region = 76 }

// kernel: _lambda_.7
= control target key start
LH: loop header
LB: loop body
LE: loop exit
PB: predicated region body
PF: predicated region fallthrough
CT: control target
= control target key end

     0   :  { %s2415_s12 = smov 0   ;;  %s2417_s13 = smov 0   ;;  %s2816_s0 = inlined_call_operand.vmem [shape: bf16[4,128,1024], index: 0, kind: input, shape index: {}]   ;;  %s2817_s1 = inlined_call_operand.vmem [shape: bf16[4,1024,128], index: 1, kind: input, shape index: {}]   ;;  %s2818_s2 = inlined_call_operand.vmem [shape: f32[1,128], index: 2, kind: input, shape index: {}]   ;;  %s2819_s3 = inlined_call_operand.vmem [shape: f32[4,128,128], index: 3, kind: output, shape index: {}]  }
   0x1   :  { %s2419_s14 = smov 0  }
   0x2 LB: > { %s39_s15 = sadd.s32 1, %s2389_s13  ;;  %p1886_p0 = scmp.ge.s32.totalorder %s2393_s14, 1  ;;  %s2393_s14 = sphi %s2419_s14, %s13_s14   ;;  %s2389_s13 = sphi %s2417_s13, %s2845_s13   ;;  %s2385_s12 = sphi %s2415_s12, %s2844_s12  }
   0x3   : > { %p41_p1 = scmp.ge.s32.totalorder %s39_s15, 4  ;;  %p212_p2 = scmp.lt.s32.totalorder %s2393_s14, 5 }
   0x5   : > { %s2847_s15 = smov (%p41_p1, %s39_s15), 0  ;;  %p213_p3 = pnand %p1886_p0, %p212_p2 }
   0x7   : > { %216 = sbr.rel (%p213_p3) target bundleno = 381 (0x17d), region = 32 }
   0xc   : > { %p269_p4 = scmp.lt.s32.totalorder %s2385_s12, 3 }
   0xe   : > { %s2849_s12 = smov (!%p269_p4, %s2385_s12), 3 }
   0xf   : > { %s2024_s16 = sshll.u32 %s2849_s12, 9  ;;  %s2026_s25 = sshll.u32 %s2849_s12, 7 }
  0x10   : > { %s2441_s19 = scalar_lea.vmem %s2817_s1, %s2024_s16  ;;  %s2478_s22 = scalar_lea.vmem %s2816_s0, %s2024_s16 }
  0x11   : > { %v2307_v0 = vld [vmem:[%s2441_s19 + $0x78] sm:$0xff]   ;;  %v2311_v4 = vld [vmem:[%s2441_s19 + $0x70] sm:$0xff]   ;;  %v2315_v8 = vld [vmem:[%s2441_s19 + $0x68] sm:$0xff]   ;;  %s2724_s28 = scalar_lea.vmem %s2819_s3, %s2026_s25 }
  0x12   : > { %v2308_v1 = vld [vmem:[%s2441_s19 + $0xf8] sm:$0xff]   ;;  %2027 = vmatprep.subr.bf16.mxu0 %v2307_v0  ;;  %v2312_v5 = vld [vmem:[%s2441_s19 + $0xf0] sm:$0xff]   ;;  %v2316_v9 = vld [vmem:[%s2441_s19 + $0xe8] sm:$0xff]  }
  0x13   : > { %v2309_v2 = vld [vmem:[%s2441_s19 + $0x38] sm:$0xff]   ;;  %2091 = vmatprep.subr.bf16.mxu1 %v2308_v1  ;;  %v2313_v6 = vld [vmem:[%s2441_s19 + $0x30] sm:$0xff]   ;;  %v2317_v10 = vld [vmem:[%s2441_s19 + $0x28] sm:$0xff]  }
  0x14   : > { %v2310_v3 = vld [vmem:[%s2441_s19 + $0xb8] sm:$0xff]   ;;  %2028 = vmatpush3.bf16.msra.mxu0 %v2309_v2  ;;  %v2314_v7 = vld [vmem:[%s2441_s19 + $0xb0] sm:$0xff]   ;;  %v2318_v11 = vld [vmem:[%s2441_s19 + $0xa8] sm:$0xff]  }
  0x15   : > { %2092 = vmatpush3.bf16.msra.mxu1 %v2310_v3  ;;  %2029 = vmatprep.subr.bf16.mxu0 %v2311_v4  ;;  %v2319_v12 = vld [vmem:[%s2441_s19 + $0x60] sm:$0xff]   ;;  %v2323_v16 = vld [vmem:[%s2441_s19 + $0x58] sm:$0xff]   ;;  %v2327_v20 = vld [vmem:[%s2441_s19 + $0x50] sm:$0xff]  }
  0x16   : > { %2093 = vmatprep.subr.bf16.mxu1 %v2312_v5  ;;  %v2320_v13 = vld [vmem:[%s2441_s19 + $0xe0] sm:$0xff]   ;;  %v2324_v17 = vld [vmem:[%s2441_s19 + $0xd8] sm:$0xff]   ;;  %v2328_v21 = vld [vmem:[%s2441_s19 + $0xd0] sm:$0xff]  }
  0x17   : > { %v2321_v14 = vld [vmem:[%s2441_s19 + $0x20] sm:$0xff]   ;;  %v2325_v18 = vld [vmem:[%s2441_s19 + $0x18] sm:$0xff]   ;;  %v2329_v22 = vld [vmem:[%s2441_s19 + $0x10] sm:$0xff]  }
  0x18   : > { %2030 = vmatpush3.bf16.msra.mxu0 %v2313_v6  ;;  %v2322_v15 = vld [vmem:[%s2441_s19 + $0xa0] sm:$0xff]   ;;  %v2326_v19 = vld [vmem:[%s2441_s19 + $0x98] sm:$0xff]   ;;  %v2330_v23 = vld [vmem:[%s2441_s19 + $0x90] sm:$0xff]  }
  0x19   : > { %2094 = vmatpush3.bf16.msra.mxu1 %v2314_v7  ;;  %2031 = vmatprep.subr.bf16.mxu0 %v2315_v8  ;;  %v2331_v24 = vld [vmem:[%s2441_s19 + $0x48] sm:$0xff]   ;;  %v2335_v28 = vld [vmem:[%s2441_s19 + $0x40] sm:$0xff]   ;;  %v2339_v40 = vld [vmem:[%s2441_s19 + $0x178] sm:$0xff]  }
  0x1a   : > { %2095 = vmatprep.subr.bf16.mxu1 %v2316_v9  ;;  %v2332_v25 = vld [vmem:[%s2441_s19 + $0xc8] sm:$0xff]   ;;  %v2336_v29 = vld [vmem:[%s2441_s19 + $0xc0] sm:$0xff]   ;;  %v2340_v41 = vld [vmem:[%s2441_s19 + $0x138] sm:$0xff]  }
  0x1b   : > { %v2333_v26 = vld [vmem:[%s2441_s19 + $0x8] sm:$0xff]   ;;  %v2337_v30 = vld [vmem:[%s2441_s19] sm:$0xff]   ;;  %v2341_v42 = vld [vmem:[%s2441_s19 + $0x1f8] sm:$0xff]  }
  0x1c   : > { %2032 = vmatpush3.bf16.msra.mxu0 %v2317_v10  ;;  %v2334_v27 = vld [vmem:[%s2441_s19 + $0x88] sm:$0xff]   ;;  %v2338_v31 = vld [vmem:[%s2441_s19 + $0x80] sm:$0xff]   ;;  %v2342_v43 = vld [vmem:[%s2441_s19 + $0x1b8] sm:$0xff]  }
  0x1d   : > { %2096 = vmatpush3.bf16.msra.mxu1 %v2318_v11  ;;  %2033 = vmatprep.subr.bf16.mxu0 %v2319_v12  ;;  %v349_v32 = vld [vmem:[%s2478_s22] sm:$0xff]  ;;  %v350_v34 = vld [vmem:[%s2478_s22 + $0x8] sm:$0xff]  ;;  %v2343_v50 = vld [vmem:[%s2441_s19 + $0x170] sm:$0xff]  }
  0x1e   : > { %2097 = vmatprep.subr.bf16.mxu1 %v2320_v13  ;;  %v353_v33 = vld [vmem:[%s2478_s22 + $0x20] sm:$0xff]  ;;  %v354_v37 = vld [vmem:[%s2478_s22 + $0x28] sm:$0xff]  ;;  %v2344_v52 = vld [vmem:[%s2441_s19 + $0x130] sm:$0xff]  }
  0x1f   : > { %v1893_v35 = vcombine.low %v349_v32, %v353_v33  ;;  %v1894_v36 = vcombine.high %v349_v32, %v353_v33  ;;  %v1895_v38 = vcombine.low %v350_v34, %v354_v37  ;;  %v1896_v39 = vcombine.high %v350_v34, %v354_v37  ;;  %v357_v44 = vld [vmem:[%s2478_s22 + $0x40] sm:$0xff]  ;;  %v358_v47 = vld [vmem:[%s2478_s22 + $0x48] sm:$0xff]  ;;  %v2345_v54 = vld [vmem:[%s2441_s19 + $0x1f0] sm:$0xff]  }
  0x20   : > { %2034 = vmatpush3.bf16.msra.mxu0 %v2321_v14  ;;  %v361_v45 = vld [vmem:[%s2478_s22 + $0x60] sm:$0xff]  ;;  %v362_v48 = vld [vmem:[%s2478_s22 + $0x68] sm:$0xff]  ;;  %v2346_v55 = vld [vmem:[%s2441_s19 + $0x1b0] sm:$0xff]  }
  0x21   : > { %2098 = vmatpush3.bf16.msra.mxu1 %v2322_v15  ;;  %2035 = vmatprep.subr.bf16.mxu0 %v2323_v16  ;;  %v1902_v46 = vcombine.high %v357_v44, %v361_v45  ;;  %v1904_v49 = vcombine.high %v358_v47, %v362_v48  ;;  %v1901_v51 = vcombine.low %v357_v44, %v361_v45  ;;  %v365_v56 = vld [vmem:[%s2478_s22 + $0x80] sm:$0xff]  ;;  %v366_v58 = vld [vmem:[%s2478_s22 + $0x88] sm:$0xff]  ;;  %v2361_v32 = vld [vmem:[%s2441_s19 + $0x1d0] sm:$0xff]  }
  0x22   : > { %2099 = vmatprep.subr.bf16.mxu1 %v2324_v17  ;;  %1277 = vmatprep.mubr.bf16.mxu0 %v1894_v36  ;;  %v1903_v53 = vcombine.low %v358_v47, %v362_v48  ;;  %v369_v57 = vld [vmem:[%s2478_s22 + $0xa0] sm:$0xff]  ;;  %v370_v59 = vld [vmem:[%s2478_s22 + $0xa8] sm:$0xff]  ;;  %v2362_v33 = vld [vmem:[%s2441_s19 + $0x190] sm:$0xff]  }
  0x23   : > { %1374 = vmatprep.mubr.bf16.mxu1 %v1896_v39  ;;  %v1910_v60 = vcombine.high %v365_v56, %v369_v57  ;;  %v1912_v61 = vcombine.high %v366_v58, %v370_v59  ;;  %v2347_v62 = vld [vmem:[%s2441_s19 + $0x168] sm:$0xff]   ;;  %v1909_v2 = vcombine.low %v365_v56, %v369_v57  ;;  %v373_v3 = vld [vmem:[%s2478_s22 + $0xc0] sm:$0xff]  ;;  %v1911_v6 = vcombine.low %v366_v58, %v370_v59 }
  0x24   : > { %2036 = vmatpush3.bf16.msra.mxu0 %v2325_v18  ;;  %v2348_v63 = vld [vmem:[%s2441_s19 + $0x128] sm:$0xff]   ;;  %v377_v4 = vld [vmem:[%s2478_s22 + $0xe0] sm:$0xff]  ;;  %v2355_v18 = vld [vmem:[%s2441_s19 + $0x158] sm:$0xff]  }
  0x25   : > { %2100 = vmatpush3.bf16.msra.mxu1 %v2326_v19  ;;  %2037 = vmatprep.subr.bf16.mxu0 %v2327_v20  ;;  %v2349_v0 = vld [vmem:[%s2441_s19 + $0x1e8] sm:$0xff]   ;;  %v1918_v7 = vcombine.high %v373_v3, %v377_v4  ;;  %v2351_v10 = vld [vmem:[%s2441_s19 + $0x160] sm:$0xff]   ;;  %v1917_v19 = vcombine.low %v373_v3, %v377_v4  ;;  %v2356_v20 = vld [vmem:[%s2441_s19 + $0x118] sm:$0xff]  }
  0x26   : > { %2101 = vmatprep.subr.bf16.mxu1 %v2328_v21  ;;  %v2350_v1 = vld [vmem:[%s2441_s19 + $0x1a8] sm:$0xff]   ;;  %v2352_v11 = vld [vmem:[%s2441_s19 + $0x120] sm:$0xff]  }
  0x27   : > { %v374_v5 = vld [vmem:[%s2478_s22 + $0xc8] sm:$0xff]  ;;  %v2353_v12 = vld [vmem:[%s2441_s19 + $0x1e0] sm:$0xff]  }
  0x28   : > { %2038 = vmatpush3.bf16.msra.mxu0 %v2329_v22  ;;  %v378_v8 = vld [vmem:[%s2478_s22 + $0xe8] sm:$0xff]  ;;  %v2354_v13 = vld [vmem:[%s2441_s19 + $0x1a0] sm:$0xff]  }
  0x29   : > { %2102 = vmatpush3.bf16.msra.mxu1 %v2330_v23  ;;  %2039 = vmatprep.subr.bf16.mxu0 %v2331_v24  ;;  %v1920_v9 = vcombine.high %v374_v5, %v378_v8  ;;  %v381_v14 = vld [vmem:[%s2478_s22 + $0x100] sm:$0xff]  ;;  %v382_v16 = vld [vmem:[%s2478_s22 + $0x108] sm:$0xff]  ;;  %v1919_v21 = vcombine.low %v374_v5, %v378_v8  ;;  %v2357_v23 = vld [vmem:[%s2441_s19 + $0x1d8] sm:$0xff]  }
  0x2a   : > { %2103 = vmatprep.subr.bf16.mxu1 %v2332_v25  ;;  %v385_v15 = vld [vmem:[%s2478_s22 + $0x120] sm:$0xff]  ;;  %v386_v17 = vld [vmem:[%s2478_s22 + $0x128] sm:$0xff]  ;;  %v2358_v25 = vld [vmem:[%s2441_s19 + $0x198] sm:$0xff]  }
  0x2b   : > { %v1926_v22 = vcombine.high %v381_v14, %v385_v15  ;;  %v1928_v24 = vcombine.high %v382_v16, %v386_v17  ;;  %v1925_v34 = vcombine.low %v381_v14, %v385_v15  ;;  %v2364_v39 = vld [vmem:[%s2441_s19 + $0x108] sm:$0xff]   ;;  %v2368_v48 = vld [vmem:[%s2441_s19 + $0x100] sm:$0xff]   ;;  %v360_v8 = vld [vmem:[%s2478_s22 + $0x58] sm:$0xff] }
  0x2c   : > { %2040 = vmatpush3.bf16.msra.mxu0 %v2333_v26  ;;  %v389_v26 = vld [vmem:[%s2478_s22 + $0x140] sm:$0xff]  ;;  %v398_v44 = vld [vmem:[%s2478_s22 + $0x188] sm:$0xff]  ;;  %v367_v14 = vld [vmem:[%s2478_s22 + $0x90] sm:$0xff] }
  0x2d   : > { %2104 = vmatpush3.bf16.msra.mxu1 %v2334_v27  ;;  %2041 = vmatprep.subr.bf16.mxu0 %v2335_v28  ;;  %v393_v27 = vld [vmem:[%s2478_s22 + $0x160] sm:$0xff]  ;;  %v2359_v28 = vld [vmem:[%s2441_s19 + $0x150] sm:$0xff]   ;;  %v402_v45 = vld [vmem:[%s2478_s22 + $0x1a8] sm:$0xff] }
  0x2e   : > { %2105 = vmatprep.subr.bf16.mxu1 %v2336_v29  ;;  %v390_v29 = vld [vmem:[%s2478_s22 + $0x148] sm:$0xff]  ;;  %v1934_v36 = vcombine.high %v389_v26, %v393_v27  ;;  %v1933_v47 = vcombine.low %v389_v26, %v393_v27  ;;  %v1943_v59 = vcombine.low %v398_v44, %v402_v45  ;;  %v371_v15 = vld [vmem:[%s2478_s22 + $0xb0] sm:$0xff] }
  0x2f   : > { %v406_v56 = vld [vmem:[%s2478_s22 + $0x1c8] sm:$0xff]  ;;  %v1913_v26 = vcombine.low %v367_v14, %v371_v15 }
  0x30   : > { %2042 = vmatpush3.bf16.msra.mxu0 %v2337_v30  ;;  %v394_v30 = vld [vmem:[%s2478_s22 + $0x168] sm:$0xff] }
  0x31   : > { %2106 = vmatpush3.bf16.msra.mxu1 %v2338_v31  ;;  %2155 = vmatprep.subr.bf16.mxu0 %v2339_v40  ;;  %v2360_v31 = vld [vmem:[%s2441_s19 + $0x110] sm:$0xff]   ;;  %v1936_v37 = vcombine.high %v390_v29, %v394_v30  ;;  %v2365_v40 = vld [vmem:[%s2441_s19 + $0x1c8] sm:$0xff]  }
  0x32   : > { %2219 = vmatprep.subr.bf16.mxu1 %v2341_v42  ;;  %v401_v42 = vld [vmem:[%s2478_s22 + $0x1a0] sm:$0xff]  ;;  %v410_v57 = vld [vmem:[%s2478_s22 + $0x1e8] sm:$0xff] }
  0x33   : > { %1278 = vmatmul.mubr.bf16.vlgmr.msra.gmra.mxu0 %v1893_v35  ;;  %v1927_v35 = vcombine.low %v382_v16, %v386_v17  ;;  %v1951_v3 = vcombine.low %v406_v56, %v410_v57  ;;  %v368_v16 = vld [vmem:[%s2478_s22 + $0x98] sm:$0xff] }
  0x34   : > { %1375 = vmatmul.mubr.bf16.vlgmr.msra.gmra.mxu1 %v1895_v38  ;;  %2156 = vmatpush3.bf16.msra.mxu0 %v2340_v41  ;;  %v2363_v38 = vld [vmem:[%s2441_s19 + $0x148] sm:$0xff]   ;;  %v397_v41 = vld [vmem:[%s2478_s22 + $0x180] sm:$0xff]  ;;  %v372_v17 = vld [vmem:[%s2478_s22 + $0xb8] sm:$0xff] }
  0x35   : > { %2220 = vmatpush3.bf16.msra.mxu1 %v2342_v43  ;;  %1285 = vmatprep.mubr.bf16.mxu0 %v1902_v46  ;;  %v2366_v43 = vld [vmem:[%s2441_s19 + $0x188] sm:$0xff]   ;;  %v2367_v46 = vld [vmem:[%s2441_s19 + $0x140] sm:$0xff]   ;;  %v1941_v58 = vcombine.low %v397_v41, %v401_v42  ;;  %v1915_v27 = vcombine.low %v368_v16, %v372_v17 }
  0x36   : > { %1382 = vmatprep.mubr.bf16.mxu1 %v1904_v49  ;;  %2157 = vmatprep.subr.bf16.mxu0 %v2343_v50  ;;  %v1935_v49 = vcombine.low %v390_v29, %v394_v30  ;;  %v1942_v50 = vcombine.high %v397_v41, %v401_v42  ;;  %v383_v30 = vld [vmem:[%s2478_s22 + $0x110] sm:$0xff]  ;;  %v396_v41 = vld [vmem:[%s2478_s22 + $0x178] sm:$0xff] }
  0x37   : > { %2221 = vmatprep.subr.bf16.mxu1 %v2345_v54  ;;  %v405_v54 = vld [vmem:[%s2478_s22 + $0x1c0] sm:$0xff] }
  0x38   : > { %2158 = vmatpush3.bf16.msra.mxu0 %v2344_v52  ;;  %v1944_v52 = vcombine.high %v398_v44, %v402_v45 }
  0x39   : > { %2222 = vmatpush3.bf16.msra.mxu1 %v2346_v55  ;;  %2159 = vmatprep.subr.bf16.mxu0 %v2347_v62  ;;  %v409_v55 = vld [vmem:[%s2478_s22 + $0x1e0] sm:$0xff]  ;;  %v351_v62 = vld [vmem:[%s2478_s22 + $0x10] sm:$0xff] }
  0x3a   : > { %2223 = vmatprep.subr.bf16.mxu1 %v2349_v0  ;;  %v352_v0 = vld [vmem:[%s2478_s22 + $0x18] sm:$0xff] }
  0x3b   : > { %1286 = vmatmul.mubr.bf16.gmra.mxu0 %v1901_v51  ;;  %v2369_v51 = vld [vmem:[%s2441_s19 + $0x1c0] sm:$0xff]  }
  0x3c   : > { %1383 = vmatmul.mubr.bf16.gmra.mxu1 %v1903_v53  ;;  %1293 = vmatprep.mubr.bf16.mxu0 %v1910_v60  ;;  %v2370_v53 = vld [vmem:[%s2441_s19 + $0x180] sm:$0xff]   ;;  %v1950_v60 = vcombine.high %v405_v54, %v409_v55 }
  0x3d   : > { %1390 = vmatprep.mubr.bf16.mxu1 %v1912_v61  ;;  %2160 = vmatpush3.bf16.msra.mxu0 %v2348_v63  ;;  %v1952_v61 = vcombine.high %v406_v56, %v410_v57  ;;  %v355_v63 = vld [vmem:[%s2478_s22 + $0x30] sm:$0xff]  ;;  %v408_v56 = vld [vmem:[%s2478_s22 + $0x1d8] sm:$0xff] }
  0x3e   : > { %2224 = vmatpush3.bf16.msra.mxu1 %v2350_v1  ;;  %2161 = vmatprep.subr.bf16.mxu0 %v2351_v10  ;;  %v356_v1 = vld [vmem:[%s2478_s22 + $0x38] sm:$0xff]  ;;  %v1898_v4 = vcombine.high %v351_v62, %v355_v63  ;;  %v1897_v10 = vcombine.low %v351_v62, %v355_v63 }
  0x3f   : > { %2225 = vmatprep.subr.bf16.mxu1 %v2353_v12  ;;  %v1900_v5 = vcombine.high %v352_v0, %v356_v1  ;;  %v412_v57 = vld [vmem:[%s2478_s22 + $0x1f8] sm:$0xff] }
  0x40   : > { %v1955_v63 = vcombine.low %v408_v56, %v412_v57 }
  0x41   : > { %2162 = vmatpush3.bf16.msra.mxu0 %v2352_v11  ;;  %v1899_v11 = vcombine.low %v352_v0, %v356_v1 }
  0x42   : > { %2226 = vmatpush3.bf16.msra.mxu1 %v2354_v13  ;;  %2163 = vmatprep.subr.bf16.mxu0 %v2355_v18 }
  0x43   : > { %1294 = vmatmul.mubr.bf16.gmra.mxu0 %v1909_v2  ;;  %2227 = vmatprep.subr.bf16.mxu1 %v2357_v23  ;;  %v1949_v2 = vcombine.low %v405_v54, %v409_v55  ;;  %v379_v23 = vld [vmem:[%s2478_s22 + $0xf0] sm:$0xff] }
  0x44   : > { %1391 = vmatmul.mubr.bf16.gmra.mxu1 %v1911_v6  ;;  %1301 = vmatprep.mubr.bf16.mxu0 %v1918_v7  ;;  %v359_v6 = vld [vmem:[%s2478_s22 + $0x50] sm:$0xff] }
  0x45   : > { %1398 = vmatprep.mubr.bf16.mxu1 %v1920_v9  ;;  %2164 = vmatpush3.bf16.msra.mxu0 %v2356_v20  ;;  %v363_v7 = vld [vmem:[%s2478_s22 + $0x70] sm:$0xff]  ;;  %v364_v9 = vld [vmem:[%s2478_s22 + $0x78] sm:$0xff]  ;;  %v1914_v20 = vcombine.high %v367_v14, %v371_v15 }
  0x46   : > { %2228 = vmatpush3.bf16.msra.mxu1 %v2358_v25  ;;  %2165 = vmatprep.subr.bf16.mxu0 %v2359_v28  ;;  %v1906_v12 = vcombine.high %v359_v6, %v363_v7  ;;  %v1908_v13 = vcombine.high %v360_v8, %v364_v9  ;;  %v1905_v18 = vcombine.low %v359_v6, %v363_v7  ;;  %v380_v25 = vld [vmem:[%s2478_s22 + $0xf8] sm:$0xff]  ;;  %v407_v54 = vld [vmem:[%s2478_s22 + $0x1d0] sm:$0xff] }
  0x47   : > { %2229 = vmatprep.subr.bf16.mxu1 %v2361_v32  ;;  %v384_v32 = vld [vmem:[%s2478_s22 + $0x118] sm:$0xff]  ;;  %v411_v55 = vld [vmem:[%s2478_s22 + $0x1f0] sm:$0xff] }
  0x48   : > { %v1953_v62 = vcombine.low %v407_v54, %v411_v55 }
  0x49   : > { %2166 = vmatpush3.bf16.msra.mxu0 %v2360_v31  ;;  %v387_v31 = vld [vmem:[%s2478_s22 + $0x130] sm:$0xff] }
  0x4a   : > { %2230 = vmatpush3.bf16.msra.mxu1 %v2362_v33  ;;  %2167 = vmatprep.subr.bf16.mxu0 %v2363_v38  ;;  %v388_v33 = vld [vmem:[%s2478_s22 + $0x138] sm:$0xff]  ;;  %v391_v38 = vld [vmem:[%s2478_s22 + $0x150] sm:$0xff]  ;;  %v1929_v42 = vcombine.low %v383_v30, %v387_v31 }
  0x4b   : > { %1302 = vmatmul.mubr.bf16.gmra.mxu0 %v1917_v19  ;;  %2231 = vmatprep.subr.bf16.mxu1 %v2365_v40  ;;  %v1907_v19 = vcombine.low %v360_v8, %v364_v9  ;;  %v392_v40 = vld [vmem:[%s2478_s22 + $0x158] sm:$0xff] }
  0x4c   : > { %1399 = vmatmul.mubr.bf16.gmra.mxu1 %v1919_v21  ;;  %1309 = vmatprep.mubr.bf16.mxu0 %v1926_v22  ;;  %v1916_v21 = vcombine.high %v368_v16, %v372_v17  ;;  %v375_v22 = vld [vmem:[%s2478_s22 + $0xd0] sm:$0xff]  ;;  %v1940_v45 = vcombine.high %v392_v40, %v396_v41 }
  0x4d   : > { %1406 = vmatprep.mubr.bf16.mxu1 %v1928_v24  ;;  %2168 = vmatpush3.bf16.msra.mxu0 %v2364_v39  ;;  %v376_v24 = vld [vmem:[%s2478_s22 + $0xd8] sm:$0xff]  ;;  %v1922_v28 = vcombine.high %v375_v22, %v379_v23  ;;  %v395_v39 = vld [vmem:[%s2478_s22 + $0x170] sm:$0xff] }
  0x4e   : > { %2232 = vmatpush3.bf16.msra.mxu1 %v2366_v43  ;;  %2169 = vmatprep.subr.bf16.mxu0 %v2367_v46  ;;  %v1924_v29 = vcombine.high %v376_v24, %v380_v25  ;;  %v1931_v43 = vcombine.low %v384_v32, %v388_v33  ;;  %v1938_v44 = vcombine.high %v391_v38, %v395_v39  ;;  %v399_v46 = vld [vmem:[%s2478_s22 + $0x190] sm:$0xff] }
  0x4f   : > { %2233 = vmatprep.subr.bf16.mxu1 %v2369_v51  ;;  %v1939_v51 = vcombine.low %v392_v40, %v396_v41 }
  0x51   : > { %2170 = vmatpush3.bf16.msra.mxu0 %v2368_v48  ;;  %v400_v48 = vld [vmem:[%s2478_s22 + $0x198] sm:$0xff] }
  0x52   : > { %2234 = vmatpush3.bf16.msra.mxu1 %v2370_v53 }
  0x53   : > { %1310 = vmatmul.mubr.bf16.gmra.mxu0 %v1925_v34  ;;  %v1921_v34 = vcombine.low %v375_v22, %v379_v23 }
  0x54   : > { %1407 = vmatmul.mubr.bf16.gmra.mxu1 %v1927_v35  ;;  %1317 = vmatprep.mubr.bf16.mxu0 %v1934_v36  ;;  %v1923_v35 = vcombine.low %v376_v24, %v380_v25  ;;  %v1930_v36 = vcombine.high %v383_v30, %v387_v31 }
  0x55   : > { %1414 = vmatprep.mubr.bf16.mxu1 %v1936_v37  ;;  %v1932_v37 = vcombine.high %v384_v32, %v388_v33 }
  0x5b   : > { %1318 = vmatmul.mubr.bf16.gmra.mxu0 %v1933_v47  ;;  %v403_v47 = vld [vmem:[%s2478_s22 + $0x1b0] sm:$0xff] }
  0x5c   : > { %1415 = vmatmul.mubr.bf16.gmra.mxu1 %v1935_v49  ;;  %1325 = vmatprep.mubr.bf16.mxu0 %v1942_v50  ;;  %v404_v49 = vld [vmem:[%s2478_s22 + $0x1b8] sm:$0xff]  ;;  %v1937_v50 = vcombine.low %v391_v38, %v395_v39 }
  0x5d   : > { %1422 = vmatprep.mubr.bf16.mxu1 %v1944_v52  ;;  %v1946_v52 = vcombine.high %v399_v46, %v403_v47  ;;  %v1948_v53 = vcombine.high %v400_v48, %v404_v49 }
  0x63   : > { %1326 = vmatmul.mubr.bf16.gmra.mxu0 %v1941_v58  ;;  %v1945_v58 = vcombine.low %v399_v46, %v403_v47 }
  0x64   : > { %1423 = vmatmul.mubr.bf16.gmra.mxu1 %v1943_v59  ;;  %1333 = vmatprep.mubr.bf16.mxu0 %v1950_v60  ;;  %v1947_v59 = vcombine.low %v400_v48, %v404_v49  ;;  %v1954_v60 = vcombine.high %v407_v54, %v411_v55 }
  0x65   : > { %1430 = vmatprep.mubr.bf16.mxu1 %v1952_v61  ;;  %v1956_v61 = vcombine.high %v408_v56, %v412_v57 }
  0x6b   : > { %1334 = vmatmul.mubr.bf16.gmra.mxu0 %v1949_v2 }
  0x6c   : > { %1431 = vmatmul.mubr.bf16.gmra.mxu1 %v1951_v3  ;;  %1471 = vmatprep.mubr.bf16.mxu0 %v1898_v4 }
  0x6d   : > { %1568 = vmatprep.mubr.bf16.mxu1 %v1900_v5 }
  0x73   : > { %1472 = vmatmul.mubr.bf16.vlgmr.msra.gmra.mxu0 %v1897_v10 }
  0x74   : > { %1569 = vmatmul.mubr.bf16.vlgmr.msra.gmra.mxu1 %v1899_v11  ;;  %1479 = vmatprep.mubr.bf16.mxu0 %v1906_v12 }
  0x75   : > { %1576 = vmatprep.mubr.bf16.mxu1 %v1908_v13 }
  0x7b   : > { %1480 = vmatmul.mubr.bf16.gmra.mxu0 %v1905_v18 }
  0x7c   : > { %1577 = vmatmul.mubr.bf16.gmra.mxu1 %v1907_v19  ;;  %1487 = vmatprep.mubr.bf16.mxu0 %v1914_v20 }
  0x7d   : > { %1584 = vmatprep.mubr.bf16.mxu1 %v1916_v21 }
  0x83   : > { %1488 = vmatmul.mubr.bf16.gmra.mxu0 %v1913_v26 }
  0x84   : > { %1585 = vmatmul.mubr.bf16.gmra.mxu1 %v1915_v27  ;;  %1495 = vmatprep.mubr.bf16.mxu0 %v1922_v28 }
  0x85   : > { %1592 = vmatprep.mubr.bf16.mxu1 %v1924_v29 }
  0x8b   : > { %1496 = vmatmul.mubr.bf16.gmra.mxu0 %v1921_v34 }
  0x8c   : > { %1593 = vmatmul.mubr.bf16.gmra.mxu1 %v1923_v35  ;;  %1503 = vmatprep.mubr.bf16.mxu0 %v1930_v36 }
  0x8d   : > { %1600 = vmatprep.mubr.bf16.mxu1 %v1932_v37 }
  0x93   : > { %1504 = vmatmul.mubr.bf16.gmra.mxu0 %v1929_v42 }
  0x94   : > { %1601 = vmatmul.mubr.bf16.gmra.mxu1 %v1931_v43  ;;  %1511 = vmatprep.mubr.bf16.mxu0 %v1938_v44 }
  0x95   : > { %1608 = vmatprep.mubr.bf16.mxu1 %v1940_v45 }
  0x9b   : > { %1512 = vmatmul.mubr.bf16.gmra.mxu0 %v1937_v50 }
  0x9c   : > { %1609 = vmatmul.mubr.bf16.gmra.mxu1 %v1939_v51  ;;  %1519 = vmatprep.mubr.bf16.mxu0 %v1946_v52 }
  0x9d   : > { %1616 = vmatprep.mubr.bf16.mxu1 %v1948_v53 }
  0xa3   : > { %1520 = vmatmul.mubr.bf16.gmra.mxu0 %v1945_v58 }
  0xa4   : > { %1617 = vmatmul.mubr.bf16.gmra.mxu1 %v1947_v59  ;;  %1527 = vmatprep.mubr.bf16.mxu0 %v1954_v60 }
  0xa5   : > { %1624 = vmatprep.mubr.bf16.mxu1 %v1956_v61 }
  0xab   : > { %1528 = vmatmul.mubr.bf16.gmra.mxu0 %v1953_v62 }
  0xac   : > { %1625 = vmatmul.mubr.bf16.gmra.mxu1 %v1955_v63 }
  0xf3   : > { %v2578_v0 = vpop.f32.mrf.mxu0 }
  0xf4   : > { %v2580_v1 = vpop.f32.mrf.mxu1 }
  0xf5   : > { %v2044_v2 = vpop.f32.mrf.mxu0 }
  0xf6   : > { %v2108_v3 = vpop.f32.mrf.mxu1  ;;  %v2045_v63 = vadd.f32 %v2044_v2, %v2578_v0 }
  0xf7   : > { %v2582_v4 = vpop.f32.mrf.mxu0 }
  0xf8   : > { %v2584_v5 = vpop.f32.mrf.mxu1 }
  0xf9   : > { %v2586_v6 = vpop.f32.mrf.mxu0 }
  0xfa   : > { %v2588_v7 = vpop.f32.mrf.mxu1 }
  0xfb   : > { %v2590_v8 = vpop.f32.mrf.mxu0 }
  0xfc   : > { %v2592_v9 = vpop.f32.mrf.mxu1 }
  0xfd   : > { %v2594_v10 = vpop.f32.mrf.mxu0 }
  0xfe   : > { %v2596_v11 = vpop.f32.mrf.mxu1 }
  0xff   : > { %v2598_v12 = vpop.f32.mrf.mxu0 }
 0x100   : > { %v2600_v13 = vpop.f32.mrf.mxu1 }
 0x101   : > { %v2602_v14 = vpop.f32.mrf.mxu0 }
 0x102   : > { %v2604_v15 = vpop.f32.mrf.mxu1 }
 0x103   : > { %v2606_v16 = vpop.f32.mrf.mxu0 }
 0x104   : > { %v2608_v17 = vpop.f32.mrf.mxu1 }
 0x105   : > { %v2610_v18 = vpop.f32.mrf.mxu0 }
 0x106   : > { %v2612_v19 = vpop.f32.mrf.mxu1 }
 0x107   : > { %v2614_v20 = vpop.f32.mrf.mxu0 }
 0x108   : > { %v2616_v21 = vpop.f32.mrf.mxu1 }
 0x109   : > { %v2618_v22 = vpop.f32.mrf.mxu0 }
 0x10a   : > { %v2620_v23 = vpop.f32.mrf.mxu1 }
 0x10b   : > { %v2622_v24 = vpop.f32.mrf.mxu0 }
 0x10c   : > { %v2624_v25 = vpop.f32.mrf.mxu1 }
 0x10d   : > { %v2626_v26 = vpop.f32.mrf.mxu0 }
 0x10e   : > { %v2628_v27 = vpop.f32.mrf.mxu1 }
 0x10f   : > { %v2630_v28 = vpop.f32.mrf.mxu0 }
 0x110   : > { %v2632_v29 = vpop.f32.mrf.mxu1 }
 0x111   : > { %v2634_v30 = vpop.f32.mrf.mxu0 }
 0x112   : > { %v2636_v31 = vpop.f32.mrf.mxu1 }
 0x113   : > { %v2638_v32 = vpop.f32.mrf.mxu0 }
 0x114   : > { %v2640_v33 = vpop.f32.mrf.mxu1 }
 0x115   : > { %v2642_v34 = vpop.f32.mrf.mxu0 }
 0x116   : > { %v2644_v35 = vpop.f32.mrf.mxu1 }
 0x117   : > { %v2646_v36 = vpop.f32.mrf.mxu0 }
 0x118   : > { %v2648_v37 = vpop.f32.mrf.mxu1 }
 0x119   : > { %v2650_v38 = vpop.f32.mrf.mxu0 }
 0x11a   : > { %v2652_v39 = vpop.f32.mrf.mxu1 }
 0x11b   : > { %v2654_v40 = vpop.f32.mrf.mxu0 }
 0x11c   : > { %v2656_v41 = vpop.f32.mrf.mxu1 }
 0x11d   : > { %v2658_v42 = vpop.f32.mrf.mxu0 }
 0x11e   : > { %v2660_v43 = vpop.f32.mrf.mxu1 }
 0x11f   : > { %v2662_v44 = vpop.f32.mrf.mxu0 }
 0x120   : > { %v2664_v45 = vpop.f32.mrf.mxu1 }
 0x121   : > { %v2666_v46 = vpop.f32.mrf.mxu0 }
 0x122   : > { %v2668_v47 = vpop.f32.mrf.mxu1 }
 0x123   : > { %v2670_v48 = vpop.f32.mrf.mxu0 }
 0x124   : > { %v2672_v49 = vpop.f32.mrf.mxu1 }
 0x125   : > { %v2674_v50 = vpop.f32.mrf.mxu0 }
 0x126   : > { %v2676_v51 = vpop.f32.mrf.mxu1 }
 0x127   : > { %2820 = vst [vmem:[#allocation3_spill] sm:$0xff] %v2676_v51  ;;  %v2678_v52 = vpop.f32.mrf.mxu0 }
 0x128   : > { %2821 = vst [vmem:[#allocation4_spill] sm:$0xff] %v2678_v52  ;;  %v2680_v53 = vpop.f32.mrf.mxu1 }
 0x129   : > { %2822 = vst [vmem:[#allocation5_spill] sm:$0xff] %v2680_v53  ;;  %v2682_v54 = vpop.f32.mrf.mxu0  ;;  %v2109_v53 = vadd.f32 %v2108_v3, %v2580_v1  ;;  %v2051_v1 = vadd.f32 %v2594_v10, %v2590_v8  ;;  %v2115_v3 = vadd.f32 %v2596_v11, %v2592_v9  ;;  %v2054_v9 = vadd.f32 %v2602_v14, %v2598_v12 }
 0x12a   : > { %2823 = vst [vmem:[#allocation6_spill] sm:$0xff] %v2682_v54  ;;  %v2684_v55 = vpop.f32.mrf.mxu1 }
 0x12b   : > { %2824 = vst [vmem:[#allocation7_spill] sm:$0xff] %v2684_v55  ;;  %v2686_v56 = vpop.f32.mrf.mxu0  ;;  %v1377_v52 = vadd.f32 %v2109_v53, %v2045_v63  ;;  %v2715_v53 = vld [vmem:[%s2818_s2] ss:$0 sm:$0xff]  ;;  %v1385_v10 = vadd.f32 %v2115_v3, %v2051_v1  ;;  %v2057_v1 = vadd.f32 %v2610_v18, %v2606_v16  ;;  %v2121_v3 = vadd.f32 %v2612_v19, %v2608_v17 }
 0x12c   : > { %2825 = vst [vmem:[#allocation8_spill] sm:$0xff] %v2686_v56  ;;  %v2688_v57 = vpop.f32.mrf.mxu1  ;;  %v2060_v16 = vadd.f32 %v2618_v22, %v2614_v20  ;;  %v2124_v17 = vadd.f32 %v2620_v23, %v2616_v21  ;;  %v2127_v20 = vadd.f32 %v2628_v27, %v2624_v25  ;;  %v2130_v25 = vadd.f32 %v2636_v31, %v2632_v29 }
 0x12d   : > { %2826 = vst [vmem:[#allocation9_spill] sm:$0xff] %v2688_v57  ;;  %v2690_v58 = vpop.f32.mrf.mxu0 }
 0x12e   : > { %2827 = vst [vmem:[#allocation10_spill] sm:$0xff] %v2690_v58  ;;  %v2692_v59 = vpop.f32.mrf.mxu1  ;;  %v1396_v21 = vadd.f32 %v2124_v17, %v2060_v16 }
 0x12f   : > { %2828 = vst [vmem:[#allocation11_spill] sm:$0xff] %v2692_v59  ;;  %v2694_v60 = vpop.f32.mrf.mxu0  ;;  %v2048_v59 = vadd.f32 %v2586_v6, %v2582_v4 }
 0x130   : > { %2829 = vst [vmem:[#allocation12_spill] sm:$0xff] %v2694_v60  ;;  %v2696_v61 = vpop.f32.mrf.mxu1  ;;  %v2112_v60 = vadd.f32 %v2588_v7, %v2584_v5 }
 0x131   : > { %2830 = vst [vmem:[#allocation13_spill] sm:$0xff] %v2696_v61  ;;  %v2698_v62 = vpop.f32.mrf.mxu0 }
 0x132   : > { %2831 = vst [vmem:[#allocation14_spill] sm:$0xff] %v2698_v62  ;;  %v2702_v54 = vpop.f32.mrf.mxu1  ;;  %v1380_v6 = vadd.f32 %v2112_v60, %v2048_v59 }
 0x133   : > { %v2171_v55 = vpop.f32.mrf.mxu0 }
 0x134   : > { %v2235_v56 = vpop.f32.mrf.mxu1 }
 0x135   : > { %v2172_v57 = vpop.f32.mrf.mxu0 }
 0x136   : > { %v2173_v61 = vadd.f32 %v2172_v57, %v2171_v55  ;;  %v2236_v58 = vpop.f32.mrf.mxu1 }
 0x137   : > { %v2174_v62 = vpop.f32.mrf.mxu0  ;;  %v2237_v0 = vadd.f32 %v2236_v58, %v2235_v56 }
 0x138   : > { %v1474_v51 = vadd.f32 %v2173_v61, %v1377_v52  ;;  %v2238_v2 = vpop.f32.mrf.mxu1 }
 0x139   : > { %v2175_v4 = vpop.f32.mrf.mxu0 }
 0x13a   : > { %v1571_v5 = vadd.f32 %v2237_v0, %v1474_v51  ;;  %v2176_v7 = vadd.f32 %v2175_v4, %v2174_v62  ;;  %v2239_v55 = vpop.f32.mrf.mxu1  ;;  %v2118_v51 = vadd.f32 %v2604_v15, %v2600_v13 }
 0x13b   : > { %v2177_v52 = vpop.f32.mrf.mxu0  ;;  %v2240_v58 = vadd.f32 %v2239_v55, %v2238_v2 }
 0x13c   : > { %v1691_v56 = vadd.f32 %v2715_v53, %v1571_v5  ;;  %v1477_v57 = vadd.f32 %v2176_v7, %v1380_v6  ;;  %v2241_v8 = vpop.f32.mrf.mxu1  ;;  %v1388_v13 = vadd.f32 %v2118_v51, %v2054_v9 }
 0x13d   : > { %v2178_v11 = vpop.f32.mrf.mxu0 }
 0x13e   : > { %v1707_v59 = vmax.f32 %v1691_v56, 0.0  ;;  %v1574_v60 = vadd.f32 %v2240_v58, %v1477_v57  ;;  %v2179_v61 = vadd.f32 %v2178_v11, %v2177_v52  ;;  %v2242_v62 = vpop.f32.mrf.mxu1 }
 0x13f   : > { %v2180_v63 = vpop.f32.mrf.mxu0  ;;  %v2243_v14 = vadd.f32 %v2242_v62, %v2241_v8  ;;  %v1393_v8 = vadd.f32 %v2121_v3, %v2057_v1 }
 0x140   : > { %1723 = vst [vmem:[%s2724_s28] sm:$0xff] %v1707_v59  ;;  %v1692_v0 = vadd.f32 %v2715_v53, %v1574_v60  ;;  %v1482_v12 = vadd.f32 %v2179_v61, %v1385_v10  ;;  %v2244_v2 = vpop.f32.mrf.mxu1 }
 0x141   : > { %v2181_v4 = vpop.f32.mrf.mxu0 }
 0x142   : > { %v1708_v15 = vmax.f32 %v1692_v0, 0.0  ;;  %v1579_v6 = vadd.f32 %v2243_v14, %v1482_v12  ;;  %v2182_v5 = vadd.f32 %v2181_v4, %v2180_v63  ;;  %v2245_v7 = vpop.f32.mrf.mxu1  ;;  %v2063_v63 = vadd.f32 %v2626_v26, %v2622_v24 }
 0x143   : > { %v2183_v55 = vpop.f32.mrf.mxu0  ;;  %v2246_v57 = vadd.f32 %v2245_v7, %v2244_v2  ;;  %v2066_v24 = vadd.f32 %v2634_v30, %v2630_v28  ;;  %v2133_v28 = vadd.f32 %v2644_v35, %v2640_v33  ;;  %v2136_v33 = vadd.f32 %v2652_v39, %v2648_v37 }
 0x144   : > { %1724 = vst [vmem:[%s2724_s28 + $0x8] sm:$0xff] %v1708_v15  ;;  %v1693_v52 = vadd.f32 %v2715_v53, %v1579_v6  ;;  %v1485_v56 = vadd.f32 %v2182_v5, %v1388_v13  ;;  %v2247_v58 = vpop.f32.mrf.mxu1  ;;  %v1401_v15 = vadd.f32 %v2127_v20, %v2063_v63 }
 0x145   : > { %v2184_v18 = vpop.f32.mrf.mxu0  ;;  %v1404_v29 = vadd.f32 %v2130_v25, %v2066_v24 }
 0x146   : > { %v1709_v19 = vmax.f32 %v1693_v52, 0.0  ;;  %v1582_v10 = vadd.f32 %v2246_v57, %v1485_v56  ;;  %v2185_v9 = vadd.f32 %v2184_v18, %v2183_v55  ;;  %v2248_v11 = vpop.f32.mrf.mxu1 }
 0x147   : > { %v2186_v51 = vpop.f32.mrf.mxu0  ;;  %v2249_v61 = vadd.f32 %v2248_v11, %v2247_v58 }
 0x148   : > { %1725 = vst [vmem:[%s2724_s28 + $0x10] sm:$0xff] %v1709_v19  ;;  %v1694_v59 = vadd.f32 %v2715_v53, %v1582_v10  ;;  %v1490_v60 = vadd.f32 %v2185_v9, %v1393_v8  ;;  %v2250_v62 = vpop.f32.mrf.mxu1  ;;  %v2069_v8 = vadd.f32 %v2642_v34, %v2638_v32  ;;  %v2072_v32 = vadd.f32 %v2650_v38, %v2646_v36 }
 0x149   : > { %v2187_v22 = vpop.f32.mrf.mxu0  ;;  %v2139_v36 = vadd.f32 %v2660_v43, %v2656_v41  ;;  %v2142_v41 = vadd.f32 %v2668_v47, %v2664_v45 }
 0x14a   : > { %v1710_v23 = vmax.f32 %v1694_v59, 0.0  ;;  %v1587_v0 = vadd.f32 %v2249_v61, %v1490_v60  ;;  %v2188_v12 = vadd.f32 %v2187_v22, %v2186_v51  ;;  %v2251_v14 = vpop.f32.mrf.mxu1  ;;  %v1409_v59 = vadd.f32 %v2133_v28, %v2069_v8 }
 0x14b   : > { %v2189_v2 = vpop.f32.mrf.mxu0  ;;  %v2252_v4 = vadd.f32 %v2251_v14, %v2250_v62  ;;  %v1412_v37 = vadd.f32 %v2136_v33, %v2072_v32 }
 0x14c   : > { %1726 = vst [vmem:[%s2724_s28 + $0x18] sm:$0xff] %v1710_v23  ;;  %v1695_v1 = vadd.f32 %v2715_v53, %v1587_v0  ;;  %v1493_v3 = vadd.f32 %v2188_v12, %v1396_v21  ;;  %v2253_v13 = vpop.f32.mrf.mxu1  ;;  %v2075_v0 = vadd.f32 %v2658_v42, %v2654_v40  ;;  %v2078_v40 = vadd.f32 %v2666_v46, %v2662_v44  ;;  %v2832_v44 = vld [vmem:[#allocation3_spill] sm:$0xff] }
 0x14d   : > { %v2190_v26 = vpop.f32.mrf.mxu0  ;;  %v2145_v46 = vadd.f32 %v2832_v44, %v2672_v49  ;;  %v2835_v49 = vld [vmem:[#allocation5_spill] sm:$0xff] }
 0x14e   : > { %v1711_v27 = vmax.f32 %v1695_v1, 0.0  ;;  %v1590_v6 = vadd.f32 %v2252_v4, %v1493_v3  ;;  %v2191_v5 = vadd.f32 %v2190_v26, %v2189_v2  ;;  %v2254_v7 = vpop.f32.mrf.mxu1  ;;  %v1417_v24 = vadd.f32 %v2139_v36, %v2075_v0 }
 0x14f   : > { %v2192_v55 = vpop.f32.mrf.mxu0  ;;  %v2255_v57 = vadd.f32 %v2254_v7, %v2253_v13  ;;  %v1420_v45 = vadd.f32 %v2142_v41, %v2078_v40  ;;  %v2842_v40 = vld [vmem:[#allocation14_spill] sm:$0xff] }
 0x150   : > { %1727 = vst [vmem:[%s2724_s28 + $0x20] sm:$0xff] %v1711_v27  ;;  %v1696_v52 = vadd.f32 %v2715_v53, %v1590_v6  ;;  %v1498_v56 = vadd.f32 %v2191_v5, %v1401_v15  ;;  %v2256_v58 = vpop.f32.mrf.mxu1 }
 0x151   : > { %v2193_v30 = vpop.f32.mrf.mxu0 }
 0x152   : > { %v1712_v31 = vmax.f32 %v1696_v52, 0.0  ;;  %v1595_v16 = vadd.f32 %v2255_v57, %v1498_v56  ;;  %v2194_v18 = vadd.f32 %v2193_v30, %v2192_v55  ;;  %v2257_v17 = vpop.f32.mrf.mxu1  ;;  %v2081_v56 = vadd.f32 %v2674_v50, %v2670_v48  ;;  %v2834_v48 = vld [vmem:[#allocation6_spill] sm:$0xff] }
 0x153   : > { %v2195_v19 = vpop.f32.mrf.mxu0  ;;  %v2258_v11 = vadd.f32 %v2257_v17, %v2256_v58 }
 0x154   : > { %1728 = vst [vmem:[%s2724_s28 + $0x28] sm:$0xff] %v1712_v31  ;;  %v1697_v10 = vadd.f32 %v2715_v53, %v1595_v16  ;;  %v1501_v9 = vadd.f32 %v2194_v18, %v1404_v29  ;;  %v2259_v51 = vpop.f32.mrf.mxu1  ;;  %v1425_v17 = vadd.f32 %v2145_v46, %v2081_v56 }
 0x155   : > { %v2196_v34 = vpop.f32.mrf.mxu0 }
 0x156   : > { %v1713_v35 = vmax.f32 %v1697_v10, 0.0  ;;  %v1598_v60 = vadd.f32 %v2258_v11, %v1501_v9  ;;  %v2197_v61 = vadd.f32 %v2196_v34, %v2195_v19  ;;  %v2260_v62 = vpop.f32.mrf.mxu1  ;;  %v2833_v19 = vld [vmem:[#allocation4_spill] sm:$0xff]  ;;  %v2836_v9 = vld [vmem:[#allocation7_spill] sm:$0xff] }
 0x157   : > { %v2198_v63 = vpop.f32.mrf.mxu0  ;;  %v2261_v21 = vadd.f32 %v2260_v62, %v2259_v51  ;;  %v2084_v50 = vadd.f32 %v2834_v48, %v2833_v19  ;;  %v2148_v11 = vadd.f32 %v2836_v9, %v2835_v49 }
 0x158   : > { %1729 = vst [vmem:[%s2724_s28 + $0x30] sm:$0xff] %v1713_v35  ;;  %v1698_v20 = vadd.f32 %v2715_v53, %v1598_v60  ;;  %v1506_v22 = vadd.f32 %v2197_v61, %v1409_v59  ;;  %v2262_v23 = vpop.f32.mrf.mxu1 }
 0x159   : > { %v2199_v38 = vpop.f32.mrf.mxu0 }
 0x15a   : > { %v1714_v39 = vmax.f32 %v1698_v20, 0.0  ;;  %v1603_v12 = vadd.f32 %v2261_v21, %v1506_v22  ;;  %v2200_v14 = vadd.f32 %v2199_v38, %v2198_v63  ;;  %v2263_v2 = vpop.f32.mrf.mxu1  ;;  %v2837_v63 = vld [vmem:[#allocation8_spill] sm:$0xff]  ;;  %v2838_v20 = vld [vmem:[#allocation10_spill] sm:$0xff]  ;;  %v2839_v21 = vld [vmem:[#allocation9_spill] sm:$0xff]  ;;  %v1428_v38 = vadd.f32 %v2148_v11, %v2084_v50 }
 0x15b   : > { %v2201_v1 = vpop.f32.mrf.mxu0  ;;  %v2264_v13 = vadd.f32 %v2263_v2, %v2262_v23  ;;  %v2087_v22 = vadd.f32 %v2838_v20, %v2837_v63  ;;  %v2840_v23 = vld [vmem:[#allocation11_spill] sm:$0xff] }
 0x15c   : > { %1730 = vst [vmem:[%s2724_s28 + $0x38] sm:$0xff] %v1714_v39  ;;  %v1699_v3 = vadd.f32 %v2715_v53, %v1603_v12  ;;  %v1509_v4 = vadd.f32 %v2200_v14, %v1412_v37  ;;  %v2265_v15 = vpop.f32.mrf.mxu1  ;;  %v2151_v0 = vadd.f32 %v2840_v23, %v2839_v21 }
 0x15d   : > { %v2202_v42 = vpop.f32.mrf.mxu0 }
 0x15e   : > { %v1715_v43 = vmax.f32 %v1699_v3, 0.0  ;;  %v1606_v26 = vadd.f32 %v2264_v13, %v1509_v4  ;;  %v2203_v25 = vadd.f32 %v2202_v42, %v2201_v1  ;;  %v2266_v27 = vpop.f32.mrf.mxu1 }
 0x15f   : > { %v2204_v6 = vpop.f32.mrf.mxu0  ;;  %v2267_v55 = vadd.f32 %v2266_v27, %v2265_v15  ;;  %v1433_v15 = vadd.f32 %v2151_v0, %v2087_v22 }
 0x160   : > { %1731 = vst [vmem:[%s2724_s28 + $0x40] sm:$0xff] %v1715_v43  ;;  %v1700_v5 = vadd.f32 %v2715_v53, %v1606_v26  ;;  %v1514_v7 = vadd.f32 %v2203_v25, %v1417_v24  ;;  %v2268_v52 = vpop.f32.mrf.mxu1  ;;  %v2841_v24 = vld [vmem:[#allocation12_spill] sm:$0xff]  ;;  %v2843_v43 = vld [vmem:[#allocation13_spill] sm:$0xff] }
 0x161   : > { %v2205_v57 = vpop.f32.mrf.mxu0  ;;  %v2090_v42 = vadd.f32 %v2842_v40, %v2841_v24  ;;  %v2154_v26 = vadd.f32 %v2702_v54, %v2843_v43 }
 0x162   : > { %v1716_v47 = vmax.f32 %v1700_v5, 0.0  ;;  %v1611_v58 = vadd.f32 %v2267_v55, %v1514_v7  ;;  %v2206_v8 = vadd.f32 %v2205_v57, %v2204_v6  ;;  %v2269_v28 = vpop.f32.mrf.mxu1 }
 0x163   : > { %v2207_v30 = vpop.f32.mrf.mxu0  ;;  %v2270_v16 = vadd.f32 %v2269_v28, %v2268_v52  ;;  %v1436_v57 = vadd.f32 %v2154_v26, %v2090_v42 }
 0x164   : > { %1732 = vst [vmem:[%s2724_s28 + $0x48] sm:$0xff] %v1716_v47  ;;  %v1701_v29 = vadd.f32 %v2715_v53, %v1611_v58  ;;  %v1517_v31 = vadd.f32 %v2206_v8, %v1420_v45  ;;  %v2271_v18 = vpop.f32.mrf.mxu1 }
 0x165   : > { %v2208_v10 = vpop.f32.mrf.mxu0 }
 0x166   : > { %v1717_v51 = vmax.f32 %v1701_v29, 0.0  ;;  %v1614_v59 = vadd.f32 %v2270_v16, %v1517_v31  ;;  %v2209_v32 = vadd.f32 %v2208_v10, %v2207_v30  ;;  %v2272_v34 = vpop.f32.mrf.mxu1 }
 0x167   : > { %v2210_v33 = vpop.f32.mrf.mxu0  ;;  %v2273_v61 = vadd.f32 %v2272_v34, %v2271_v18 }
 0x168   : > { %1733 = vst [vmem:[%s2724_s28 + $0x50] sm:$0xff] %v1717_v51  ;;  %v1702_v35 = vadd.f32 %v2715_v53, %v1614_v59  ;;  %v1522_v60 = vadd.f32 %v2209_v32, %v1425_v17  ;;  %v2274_v62 = vpop.f32.mrf.mxu1 }
 0x169   : > { %v2211_v36 = vpop.f32.mrf.mxu0 }
 0x16a   : > { %v1718_v37 = vmax.f32 %v1702_v35, 0.0  ;;  %v1619_v39 = vadd.f32 %v2273_v61, %v1522_v60  ;;  %v2212_v12 = vadd.f32 %v2211_v36, %v2210_v33  ;;  %v2275_v14 = vpop.f32.mrf.mxu1 }
 0x16b   : > { %v2213_v2 = vpop.f32.mrf.mxu0  ;;  %v2276_v4 = vadd.f32 %v2275_v14, %v2274_v62 }
 0x16c   : > { %1734 = vst [vmem:[%s2724_s28 + $0x58] sm:$0xff] %v1718_v37  ;;  %v1703_v1 = vadd.f32 %v2715_v53, %v1619_v39  ;;  %v1525_v3 = vadd.f32 %v2212_v12, %v1428_v38  ;;  %v2277_v13 = vpop.f32.mrf.mxu1 }
 0x16d   : > { %v2214_v41 = vpop.f32.mrf.mxu0 }
 0x16e   : > { %v1719_v25 = vmax.f32 %v1703_v1, 0.0  ;;  %v1622_v27 = vadd.f32 %v2276_v4, %v1525_v3  ;;  %v2215_v6 = vadd.f32 %v2214_v41, %v2213_v2  ;;  %v2278_v5 = vpop.f32.mrf.mxu1 }
 0x16f   : > { %v2216_v7 = vpop.f32.mrf.mxu0  ;;  %v2279_v56 = vadd.f32 %v2278_v5, %v2277_v13 }
 0x170   : > { %1735 = vst [vmem:[%s2724_s28 + $0x60] sm:$0xff] %v1719_v25  ;;  %v1704_v55 = vadd.f32 %v2715_v53, %v1622_v27  ;;  %v1530_v52 = vadd.f32 %v2215_v6, %v1433_v15  ;;  %v2280_v44 = vpop.f32.mrf.mxu1 }
 0x171   : > { %v2217_v46 = vpop.f32.mrf.mxu0 }
 0x172   : > { %v1720_v45 = vmax.f32 %v1704_v55, 0.0  ;;  %v1627_v47 = vadd.f32 %v2279_v56, %v1530_v52  ;;  %v2218_v58 = vadd.f32 %v2217_v46, %v2216_v7  ;;  %v2281_v54 = vpop.f32.mrf.mxu1 }
 0x173   : > { %v2282_v30 = vadd.f32 %v2281_v54, %v2280_v44 }
 0x174   : > { %1736 = vst [vmem:[%s2724_s28 + $0x68] sm:$0xff] %v1720_v45  ;;  %v1705_v8 = vadd.f32 %v2715_v53, %v1627_v47  ;;  %v1533_v28 = vadd.f32 %v2218_v58, %v1436_v57 }
 0x176   : > { %v1721_v29 = vmax.f32 %v1705_v8, 0.0  ;;  %v1630_v31 = vadd.f32 %v2282_v30, %v1533_v28 }
 0x178   : > { %1737 = vst [vmem:[%s2724_s28 + $0x70] sm:$0xff] %v1721_v29  ;;  %v1706_v16 = vadd.f32 %v2715_v53, %v1630_v31 }
 0x17a   : > { %v1722_v18 = vmax.f32 %v1706_v16, 0.0 }
 0x17c   : > { %1738 = vst [vmem:[%s2724_s28 + $0x78] sm:$0xff] %v1722_v18 }
 0x17d PF: > { %s13_s14 = sadd.s32 1, %s2393_s14   ;;  %s2844_s12 = smov %s2389_s13 }
 0x17e   : > { %p10_p5 = scmp.ge.s32.totalorder %s13_s14, 6   ;;  %s2845_s13 = smov %s2847_s15 }
 0x180   :  { %12 = sbr.rel (!%p10_p5) target bundleno = 2 (0x2), region = 76 }

// kernel: _lambda_.8
= control target key start
LH: loop header
LB: loop body
LE: loop exit
PB: predicated region body
PF: predicated region fallthrough
CT: control target
= control target key end

     0   :  { %s3056_s12 = smov 0   ;;  %s3058_s13 = smov 0   ;;  %s3424_s0 = inlined_call_operand.vmem [shape: bf16[4,512,512], index: 0, kind: input, shape index: {}]   ;;  %s3425_s1 = inlined_call_operand.vmem [shape: bf16[4,512,128], index: 1, kind: input, shape index: {}]   ;;  %s3426_s2 = inlined_call_operand.vmem [shape: f32[1,128], index: 2, kind: input, shape index: {}]   ;;  %s3427_s3 = inlined_call_operand.vmem [shape: f32[4,512,128], index: 3, kind: output, shape index: {}]  }
   0x1   :  { %s3060_s14 = smov 0  }
   0x2 LB: > { %s39_s15 = sadd.s32 1, %s3029_s13  ;;  %p2588_p0 = scmp.ge.s32.totalorder %s3033_s14, 1  ;;  %s3033_s14 = sphi %s3060_s14, %s13_s14   ;;  %s3029_s13 = sphi %s3058_s13, %s3429_s13   ;;  %s3025_s12 = sphi %s3056_s12, %s3428_s12  }
   0x3   : > { %p41_p1 = scmp.ge.s32.totalorder %s39_s15, 4  ;;  %p212_p2 = scmp.lt.s32.totalorder %s3033_s14, 5 }
   0x5   : > { %s3431_s15 = smov (%p41_p1, %s39_s15), 0  ;;  %p213_p3 = pnand %p2588_p0, %p212_p2 }
   0x6   : > { %p269_p4 = scmp.lt.s32.totalorder (!%p213_p3), %s3025_s12, 3 }
   0x7   : > { %216 = sbr.rel (%p213_p3) target bundleno = 532 (0x214), region = 32 }
   0xc   : > { %v3035_v0 = vmov 0   ;;  %s3433_s12 = smov (!%p269_p4, %s3025_s12), 3 }
   0xd   : > { %1469 = vmatprep.subr.bf16.mxu0 %v3035_v0  ;;  %1758 = vmatprep.subr.bf16.mxu1 %v3035_v0  ;;  %s2759_s16 = sshll.u32 %s3433_s12, 8  ;;  %s2758_s20 = sshll.u32 %s3433_s12, 10 }
   0xe   : > { %s3082_s19 = scalar_lea.vmem %s3425_s1, %s2759_s16  ;;  %s3119_s23 = scalar_lea.vmem %s3424_s0, %s2758_s20 }
   0xf   : > { %v2786_v1 = vld [vmem:[%s3082_s19 + $0x38] sm:$0xff]   ;;  %v2788_v3 = vld [vmem:[%s3082_s19 + $0x30] sm:$0xff]   ;;  %v2790_v5 = vld [vmem:[%s3082_s19 + $0x28] sm:$0xff]   ;;  %s2760_s26 = sshll.u32 %s3433_s12, 9 }
  0x10   : > { %v2787_v2 = vld [vmem:[%s3082_s19 + $0xb8] sm:$0xff]   ;;  %1470 = vmatpush1.bf16.msra.mxu0 %v2786_v1  ;;  %v2789_v4 = vld [vmem:[%s3082_s19 + $0xb0] sm:$0xff]   ;;  %v2791_v6 = vld [vmem:[%s3082_s19 + $0xa8] sm:$0xff]   ;;  %s3265_s29 = scalar_lea.vmem %s3427_s3, %s2760_s26 }
  0x11   : > { %1759 = vmatpush1.bf16.msra.mxu1 %v2787_v2  ;;  %1471 = vmatprep.subr.bf16.mxu0 %v3035_v0  ;;  %v2792_v7 = vld [vmem:[%s3082_s19 + $0x20] sm:$0xff]   ;;  %v2794_v9 = vld [vmem:[%s3082_s19 + $0x18] sm:$0xff]   ;;  %v2796_v11 = vld [vmem:[%s3082_s19 + $0x10] sm:$0xff]  }
  0x12   : > { %1760 = vmatprep.subr.bf16.mxu1 %v3035_v0  ;;  %v2793_v8 = vld [vmem:[%s3082_s19 + $0xa0] sm:$0xff]   ;;  %v2795_v10 = vld [vmem:[%s3082_s19 + $0x98] sm:$0xff]   ;;  %v2797_v12 = vld [vmem:[%s3082_s19 + $0x90] sm:$0xff]  }
  0x13   : > { %v2798_v13 = vld [vmem:[%s3082_s19 + $0x8] sm:$0xff]   ;;  %v2800_v15 = vld [vmem:[%s3082_s19] sm:$0xff]   ;;  %v2802_v17 = vld [vmem:[%s3082_s19 + $0x78] sm:$0xff]  }
  0x14   : > { %1472 = vmatpush1.bf16.msra.mxu0 %v2788_v3  ;;  %v2799_v14 = vld [vmem:[%s3082_s19 + $0x88] sm:$0xff]   ;;  %v2801_v16 = vld [vmem:[%s3082_s19 + $0x80] sm:$0xff]   ;;  %v2803_v18 = vld [vmem:[%s3082_s19 + $0xf8] sm:$0xff]  }
  0x15   : > { %1761 = vmatpush1.bf16.msra.mxu1 %v2789_v4  ;;  %1473 = vmatprep.subr.bf16.mxu0 %v3035_v0  ;;  %v2820_v19 = vld [vmem:[%s3119_s23 + $0x4] ss:$16 sps:$4 sm:$0xff]   ;;  %v2823_v21 = vld [vmem:[%s3119_s23 + $0xc] ss:$16 sps:$4 sm:$0xff]   ;;  %v2818_v35 = vld [vmem:[%s3119_s23] ss:$16 sps:$4 sm:$0xff]  }
  0x16   : > { %1762 = vmatprep.subr.bf16.mxu1 %v3035_v0  ;;  %v2804_v20 = vld [vmem:[%s3082_s19 + $0x70] sm:$0xff]   ;;  %1501 = vmatprep.mubr.bf16.mxu0 %v2820_v19  ;;  %v2806_v23 = vld [vmem:[%s3082_s19 + $0x68] sm:$0xff]   ;;  %v2808_v25 = vld [vmem:[%s3082_s19 + $0x60] sm:$0xff]  }
  0x17   : > { %v2805_v22 = vld [vmem:[%s3082_s19 + $0xf0] sm:$0xff]   ;;  %1790 = vmatprep.mubr.bf16.mxu1 %v2823_v21  ;;  %v2807_v24 = vld [vmem:[%s3082_s19 + $0xe8] sm:$0xff]   ;;  %v2809_v26 = vld [vmem:[%s3082_s19 + $0xe0] sm:$0xff]  }
  0x18   : > { %1474 = vmatpush1.bf16.msra.mxu0 %v2790_v5  ;;  %v2810_v27 = vld [vmem:[%s3082_s19 + $0x58] sm:$0xff]   ;;  %v2812_v29 = vld [vmem:[%s3082_s19 + $0x50] sm:$0xff]   ;;  %v2814_v31 = vld [vmem:[%s3082_s19 + $0x48] sm:$0xff]  }
  0x19   : > { %1763 = vmatpush1.bf16.msra.mxu1 %v2791_v6  ;;  %1475 = vmatprep.subr.bf16.mxu0 %v3035_v0  ;;  %v2811_v28 = vld [vmem:[%s3082_s19 + $0xd8] sm:$0xff]   ;;  %v2813_v30 = vld [vmem:[%s3082_s19 + $0xd0] sm:$0xff]   ;;  %v2815_v32 = vld [vmem:[%s3082_s19 + $0xc8] sm:$0xff]  }
  0x1a   : > { %1764 = vmatprep.subr.bf16.mxu1 %v3035_v0  ;;  %v2816_v33 = vld [vmem:[%s3082_s19 + $0x40] sm:$0xff]   ;;  %v2821_v36 = vld [vmem:[%s3119_s23 + $0x8] ss:$16 sps:$4 sm:$0xff]   ;;  %v2826_v38 = vld [vmem:[%s3119_s23 + $0x2c] ss:$16 sps:$4 sm:$0xff]  }
  0x1b   : > { %v2817_v34 = vld [vmem:[%s3082_s19 + $0xc0] sm:$0xff]   ;;  %v2829_v40 = vld [vmem:[%s3119_s23 + $0x28] ss:$16 sps:$4 sm:$0xff]   ;;  %v2832_v42 = vld [vmem:[%s3119_s23 + $0x4c] ss:$16 sps:$4 sm:$0xff]  }
  0x1c   : > { %1476 = vmatpush1.bf16.msra.mxu0 %v2792_v7  ;;  %v2824_v37 = vld [vmem:[%s3119_s23 + $0x24] ss:$16 sps:$4 sm:$0xff]   ;;  %v2828_v39 = vld [vmem:[%s3119_s23 + $0x20] ss:$16 sps:$4 sm:$0xff]   ;;  %v2835_v44 = vld [vmem:[%s3119_s23 + $0x48] ss:$16 sps:$4 sm:$0xff]  }
  0x1d   : > { %1765 = vmatpush1.bf16.msra.mxu1 %v2793_v8  ;;  %1477 = vmatprep.subr.bf16.mxu0 %v3035_v0  ;;  %v2830_v41 = vld [vmem:[%s3119_s23 + $0x44] ss:$16 sps:$4 sm:$0xff]   ;;  %v2834_v43 = vld [vmem:[%s3119_s23 + $0x40] ss:$16 sps:$4 sm:$0xff]   ;;  %v2838_v46 = vld [vmem:[%s3119_s23 + $0x6c] ss:$16 sps:$4 sm:$0xff]  }
  0x1e   : > { %1766 = vmatprep.subr.bf16.mxu1 %v3035_v0  ;;  %v2836_v45 = vld [vmem:[%s3119_s23 + $0x64] ss:$16 sps:$4 sm:$0xff]   ;;  %v2840_v47 = vld [vmem:[%s3119_s23 + $0x60] ss:$16 sps:$4 sm:$0xff]   ;;  %v2841_v48 = vld [vmem:[%s3119_s23 + $0x68] ss:$16 sps:$4 sm:$0xff]  }
  0x1f   : > { %v2842_v49 = vld [vmem:[%s3119_s23 + $0x84] ss:$16 sps:$4 sm:$0xff]   ;;  %v2844_v50 = vld [vmem:[%s3119_s23 + $0x8c] ss:$16 sps:$4 sm:$0xff]   ;;  %v2846_v51 = vld [vmem:[%s3119_s23 + $0x80] ss:$16 sps:$4 sm:$0xff]  }
  0x20   : > { %1478 = vmatpush1.bf16.msra.mxu0 %v2794_v9  ;;  %v2847_v52 = vld [vmem:[%s3119_s23 + $0x88] ss:$16 sps:$4 sm:$0xff]   ;;  %v2848_v53 = vld [vmem:[%s3119_s23 + $0xa4] ss:$16 sps:$4 sm:$0xff]   ;;  %v2850_v54 = vld [vmem:[%s3119_s23 + $0xac] ss:$16 sps:$4 sm:$0xff]  }
  0x21   : > { %1767 = vmatpush1.bf16.msra.mxu1 %v2795_v10  ;;  %1479 = vmatprep.subr.bf16.mxu0 %v3035_v0  ;;  %v2852_v55 = vld [vmem:[%s3119_s23 + $0xa0] ss:$16 sps:$4 sm:$0xff]   ;;  %v2853_v56 = vld [vmem:[%s3119_s23 + $0xa8] ss:$16 sps:$4 sm:$0xff]   ;;  %v2854_v57 = vld [vmem:[%s3119_s23 + $0xc4] ss:$16 sps:$4 sm:$0xff]  }
  0x22   : > { %1768 = vmatprep.subr.bf16.mxu1 %v3035_v0  ;;  %v2856_v58 = vld [vmem:[%s3119_s23 + $0xcc] ss:$16 sps:$4 sm:$0xff]   ;;  %v2858_v59 = vld [vmem:[%s3119_s23 + $0xc0] ss:$16 sps:$4 sm:$0xff]   ;;  %v2859_v60 = vld [vmem:[%s3119_s23 + $0xc8] ss:$16 sps:$4 sm:$0xff]  }
  0x23   : > { %v2860_v61 = vld [vmem:[%s3119_s23 + $0xe4] ss:$16 sps:$4 sm:$0xff]   ;;  %v2862_v62 = vld [vmem:[%s3119_s23 + $0xec] ss:$16 sps:$4 sm:$0xff]   ;;  %v2864_v63 = vld [vmem:[%s3119_s23 + $0xe0] ss:$16 sps:$4 sm:$0xff]  }
  0x24   : > { %1480 = vmatpush1.bf16.msra.mxu0 %v2796_v11  ;;  %v2866_v1 = vld [vmem:[%s3119_s23 + $0x104] ss:$16 sps:$4 sm:$0xff]   ;;  %v2868_v2 = vld [vmem:[%s3119_s23 + $0x10c] ss:$16 sps:$4 sm:$0xff]   ;;  %v2870_v3 = vld [vmem:[%s3119_s23 + $0x100] ss:$16 sps:$4 sm:$0xff]  }
  0x25   : > { %1769 = vmatpush1.bf16.msra.mxu1 %v2797_v12  ;;  %1481 = vmatprep.subr.bf16.mxu0 %v3035_v0  ;;  %v2871_v4 = vld [vmem:[%s3119_s23 + $0x108] ss:$16 sps:$4 sm:$0xff]   ;;  %v2872_v5 = vld [vmem:[%s3119_s23 + $0x124] ss:$16 sps:$4 sm:$0xff]   ;;  %v2874_v6 = vld [vmem:[%s3119_s23 + $0x12c] ss:$16 sps:$4 sm:$0xff]  }
  0x26   : > { %1770 = vmatprep.subr.bf16.mxu1 %v3035_v0  ;;  %v2876_v7 = vld [vmem:[%s3119_s23 + $0x120] ss:$16 sps:$4 sm:$0xff]   ;;  %v2877_v8 = vld [vmem:[%s3119_s23 + $0x128] ss:$16 sps:$4 sm:$0xff]   ;;  %v2878_v9 = vld [vmem:[%s3119_s23 + $0x144] ss:$16 sps:$4 sm:$0xff]  }
  0x27   : > { %v2880_v10 = vld [vmem:[%s3119_s23 + $0x14c] ss:$16 sps:$4 sm:$0xff]   ;;  %v2882_v11 = vld [vmem:[%s3119_s23 + $0x140] ss:$16 sps:$4 sm:$0xff]   ;;  %v2883_v12 = vld [vmem:[%s3119_s23 + $0x148] ss:$16 sps:$4 sm:$0xff]  }
  0x28   : > { %1482 = vmatpush1.bf16.msra.mxu0 %v2798_v13  ;;  %v2884_v13 = vld [vmem:[%s3119_s23 + $0x164] ss:$16 sps:$4 sm:$0xff]   ;;  %v2894_v19 = vld [vmem:[%s3119_s23 + $0x180] ss:$16 sps:$4 sm:$0xff]  }
  0x29   : > { %1771 = vmatpush1.bf16.msra.mxu1 %v2799_v14  ;;  %1483 = vmatprep.subr.bf16.mxu0 %v3035_v0  ;;  %v2886_v14 = vld [vmem:[%s3119_s23 + $0x16c] ss:$16 sps:$4 sm:$0xff]   ;;  %v2896_v21 = vld [vmem:[%s3119_s23 + $0x1a4] ss:$16 sps:$4 sm:$0xff]  }
  0x2a   : > { %1772 = vmatprep.subr.bf16.mxu1 %v3035_v0 }
  0x2c   : > { %1484 = vmatpush1.bf16.msra.mxu0 %v2800_v15  ;;  %v2888_v15 = vld [vmem:[%s3119_s23 + $0x160] ss:$16 sps:$4 sm:$0xff]  }
  0x2d   : > { %1773 = vmatpush1.bf16.msra.mxu1 %v2801_v16  ;;  %1485 = vmatprep.subr.bf16.mxu0 %v3035_v0  ;;  %v2889_v16 = vld [vmem:[%s3119_s23 + $0x168] ss:$16 sps:$4 sm:$0xff]  }
  0x2e   : > { %1774 = vmatprep.subr.bf16.mxu1 %v3035_v0 }
  0x30   : > { %1486 = vmatpush2.bf16.msra.mxu0 %v2802_v17  ;;  %v2890_v17 = vld [vmem:[%s3119_s23 + $0x184] ss:$16 sps:$4 sm:$0xff]  }
  0x31   : > { %1775 = vmatpush2.bf16.msra.mxu1 %v2803_v18  ;;  %1487 = vmatprep.subr.bf16.mxu0 %v3035_v0  ;;  %v2892_v18 = vld [vmem:[%s3119_s23 + $0x18c] ss:$16 sps:$4 sm:$0xff]  }
  0x32   : > { %1776 = vmatprep.subr.bf16.mxu1 %v3035_v0 }
  0x34   : > { %1488 = vmatpush2.bf16.msra.mxu0 %v2804_v20  ;;  %v2895_v20 = vld [vmem:[%s3119_s23 + $0x188] ss:$16 sps:$4 sm:$0xff]  }
  0x35   : > { %1777 = vmatpush2.bf16.msra.mxu1 %v2805_v22  ;;  %1489 = vmatprep.subr.bf16.mxu0 %v3035_v0  ;;  %v2898_v22 = vld [vmem:[%s3119_s23 + $0x1ac] ss:$16 sps:$4 sm:$0xff]  }
  0x36   : > { %1778 = vmatprep.subr.bf16.mxu1 %v3035_v0 }
  0x38   : > { %1490 = vmatpush2.bf16.msra.mxu0 %v2806_v23  ;;  %v2900_v23 = vld [vmem:[%s3119_s23 + $0x1a0] ss:$16 sps:$4 sm:$0xff]  }
  0x39   : > { %1779 = vmatpush2.bf16.msra.mxu1 %v2807_v24  ;;  %1491 = vmatprep.subr.bf16.mxu0 %v3035_v0  ;;  %v2901_v24 = vld [vmem:[%s3119_s23 + $0x1a8] ss:$16 sps:$4 sm:$0xff]  }
  0x3a   : > { %1780 = vmatprep.subr.bf16.mxu1 %v3035_v0 }
  0x3c   : > { %1492 = vmatpush2.bf16.msra.mxu0 %v2808_v25  ;;  %v2902_v25 = vld [vmem:[%s3119_s23 + $0x1c4] ss:$16 sps:$4 sm:$0xff]  }
  0x3d   : > { %1781 = vmatpush2.bf16.msra.mxu1 %v2809_v26  ;;  %1493 = vmatprep.subr.bf16.mxu0 %v3035_v0  ;;  %v2904_v26 = vld [vmem:[%s3119_s23 + $0x1cc] ss:$16 sps:$4 sm:$0xff]  }
  0x3e   : > { %1782 = vmatprep.subr.bf16.mxu1 %v3035_v0 }
  0x40   : > { %1494 = vmatpush2.bf16.msra.mxu0 %v2810_v27  ;;  %v2906_v27 = vld [vmem:[%s3119_s23 + $0x1c0] ss:$16 sps:$4 sm:$0xff]  }
  0x41   : > { %1783 = vmatpush2.bf16.msra.mxu1 %v2811_v28  ;;  %1495 = vmatprep.subr.bf16.mxu0 %v3035_v0  ;;  %v2907_v28 = vld [vmem:[%s3119_s23 + $0x1c8] ss:$16 sps:$4 sm:$0xff]  }
  0x42   : > { %1784 = vmatprep.subr.bf16.mxu1 %v3035_v0 }
  0x44   : > { %1496 = vmatpush2.bf16.msra.mxu0 %v2812_v29  ;;  %v2908_v29 = vld [vmem:[%s3119_s23 + $0x1e4] ss:$16 sps:$4 sm:$0xff]  }
  0x45   : > { %1785 = vmatpush2.bf16.msra.mxu1 %v2813_v30  ;;  %1497 = vmatprep.subr.bf16.mxu0 %v3035_v0  ;;  %v2910_v30 = vld [vmem:[%s3119_s23 + $0x1ec] ss:$16 sps:$4 sm:$0xff]  }
  0x46   : > { %1786 = vmatprep.subr.bf16.mxu1 %v3035_v0 }
  0x48   : > { %1498 = vmatpush2.bf16.msra.mxu0 %v2814_v31  ;;  %v2912_v31 = vld [vmem:[%s3119_s23 + $0x1e0] ss:$16 sps:$4 sm:$0xff]  }
  0x49   : > { %1787 = vmatpush2.bf16.msra.mxu1 %v2815_v32  ;;  %1499 = vmatprep.subr.bf16.mxu0 %v3035_v0  ;;  %v2913_v32 = vld [vmem:[%s3119_s23 + $0x1e8] ss:$16 sps:$4 sm:$0xff]  }
  0x4a   : > { %1788 = vmatprep.subr.bf16.mxu1 %v3035_v0  ;;  %v2865_v0 = vld [vmem:[%s3119_s23 + $0xe8] ss:$16 sps:$4 sm:$0xff]  }
  0x4c   : > { %1500 = vmatpush2.bf16.msra.mxu0 %v2816_v33  ;;  %v2914_v33 = vld [vmem:[%s3119_s23 + $0x204] ss:$16 sps:$4 sm:$0xff]  }
  0x4d   : > { %1789 = vmatpush2.bf16.msra.mxu1 %v2817_v34  ;;  %v2916_v34 = vld [vmem:[%s3119_s23 + $0x20c] ss:$16 sps:$4 sm:$0xff]  }
  0x4f   : > { %1502 = vmatmul.mubr.bf16.vlgmr.msra.gmra.mxu0 %v2818_v35  ;;  %v2918_v35 = vld [vmem:[%s3119_s23 + $0x200] ss:$16 sps:$4 sm:$0xff]  }
  0x50   : > { %1791 = vmatmul.mubr.bf16.vlgmr.msra.gmra.mxu1 %v2821_v36  ;;  %1509 = vmatprep.mubr.bf16.mxu0 %v2824_v37  ;;  %v2919_v36 = vld [vmem:[%s3119_s23 + $0x208] ss:$16 sps:$4 sm:$0xff]   ;;  %v2920_v37 = vld [vmem:[%s3119_s23 + $0x224] ss:$16 sps:$4 sm:$0xff]  }
  0x51   : > { %1798 = vmatprep.mubr.bf16.mxu1 %v2826_v38  ;;  %v2922_v38 = vld [vmem:[%s3119_s23 + $0x22c] ss:$16 sps:$4 sm:$0xff]  }
  0x57   : > { %1510 = vmatmul.mubr.bf16.gmra.mxu0 %v2828_v39  ;;  %v2924_v39 = vld [vmem:[%s3119_s23 + $0x220] ss:$16 sps:$4 sm:$0xff]  }
  0x58   : > { %1799 = vmatmul.mubr.bf16.gmra.mxu1 %v2829_v40  ;;  %1517 = vmatprep.mubr.bf16.mxu0 %v2830_v41  ;;  %v2925_v40 = vld [vmem:[%s3119_s23 + $0x228] ss:$16 sps:$4 sm:$0xff]   ;;  %v2926_v41 = vld [vmem:[%s3119_s23 + $0x244] ss:$16 sps:$4 sm:$0xff]  }
  0x59   : > { %1806 = vmatprep.mubr.bf16.mxu1 %v2832_v42  ;;  %v2928_v42 = vld [vmem:[%s3119_s23 + $0x24c] ss:$16 sps:$4 sm:$0xff]  }
  0x5f   : > { %1518 = vmatmul.mubr.bf16.gmra.mxu0 %v2834_v43  ;;  %v2930_v43 = vld [vmem:[%s3119_s23 + $0x240] ss:$16 sps:$4 sm:$0xff]  }
  0x60   : > { %1807 = vmatmul.mubr.bf16.gmra.mxu1 %v2835_v44  ;;  %1525 = vmatprep.mubr.bf16.mxu0 %v2836_v45  ;;  %v2931_v44 = vld [vmem:[%s3119_s23 + $0x248] ss:$16 sps:$4 sm:$0xff]   ;;  %v2932_v45 = vld [vmem:[%s3119_s23 + $0x264] ss:$16 sps:$4 sm:$0xff]  }
  0x61   : > { %1814 = vmatprep.mubr.bf16.mxu1 %v2838_v46  ;;  %v2934_v46 = vld [vmem:[%s3119_s23 + $0x26c] ss:$16 sps:$4 sm:$0xff]  }
  0x67   : > { %1526 = vmatmul.mubr.bf16.gmra.mxu0 %v2840_v47  ;;  %v2936_v47 = vld [vmem:[%s3119_s23 + $0x260] ss:$16 sps:$4 sm:$0xff]  }
  0x68   : > { %1815 = vmatmul.mubr.bf16.gmra.mxu1 %v2841_v48  ;;  %1533 = vmatprep.mubr.bf16.mxu0 %v2842_v49  ;;  %v2937_v48 = vld [vmem:[%s3119_s23 + $0x268] ss:$16 sps:$4 sm:$0xff]   ;;  %v2938_v49 = vld [vmem:[%s3119_s23 + $0x284] ss:$16 sps:$4 sm:$0xff]  }
  0x69   : > { %1822 = vmatprep.mubr.bf16.mxu1 %v2844_v50  ;;  %v2940_v50 = vld [vmem:[%s3119_s23 + $0x28c] ss:$16 sps:$4 sm:$0xff]  }
  0x6f   : > { %1534 = vmatmul.mubr.bf16.gmra.mxu0 %v2846_v51  ;;  %v2942_v51 = vld [vmem:[%s3119_s23 + $0x280] ss:$16 sps:$4 sm:$0xff]  }
  0x70   : > { %1823 = vmatmul.mubr.bf16.gmra.mxu1 %v2847_v52  ;;  %1541 = vmatprep.mubr.bf16.mxu0 %v2848_v53  ;;  %v2943_v52 = vld [vmem:[%s3119_s23 + $0x288] ss:$16 sps:$4 sm:$0xff]   ;;  %v2944_v53 = vld [vmem:[%s3119_s23 + $0x2a4] ss:$16 sps:$4 sm:$0xff]  }
  0x71   : > { %1830 = vmatprep.mubr.bf16.mxu1 %v2850_v54  ;;  %v2946_v54 = vld [vmem:[%s3119_s23 + $0x2ac] ss:$16 sps:$4 sm:$0xff]  }
  0x77   : > { %1542 = vmatmul.mubr.bf16.gmra.mxu0 %v2852_v55  ;;  %v2948_v55 = vld [vmem:[%s3119_s23 + $0x2a0] ss:$16 sps:$4 sm:$0xff]  }
  0x78   : > { %1831 = vmatmul.mubr.bf16.gmra.mxu1 %v2853_v56  ;;  %1549 = vmatprep.mubr.bf16.mxu0 %v2854_v57  ;;  %v2949_v56 = vld [vmem:[%s3119_s23 + $0x2a8] ss:$16 sps:$4 sm:$0xff]   ;;  %v2950_v57 = vld [vmem:[%s3119_s23 + $0x2c4] ss:$16 sps:$4 sm:$0xff]  }
  0x79   : > { %1838 = vmatprep.mubr.bf16.mxu1 %v2856_v58  ;;  %v2952_v58 = vld [vmem:[%s3119_s23 + $0x2cc] ss:$16 sps:$4 sm:$0xff]  }
  0x7f   : > { %1550 = vmatmul.mubr.bf16.gmra.mxu0 %v2858_v59  ;;  %v2954_v59 = vld [vmem:[%s3119_s23 + $0x2c0] ss:$16 sps:$4 sm:$0xff]  }
  0x80   : > { %1839 = vmatmul.mubr.bf16.gmra.mxu1 %v2859_v60  ;;  %1557 = vmatprep.mubr.bf16.mxu0 %v2860_v61  ;;  %v2955_v60 = vld [vmem:[%s3119_s23 + $0x2c8] ss:$16 sps:$4 sm:$0xff]   ;;  %v2956_v61 = vld [vmem:[%s3119_s23 + $0x2e4] ss:$16 sps:$4 sm:$0xff]  }
  0x81   : > { %1846 = vmatprep.mubr.bf16.mxu1 %v2862_v62  ;;  %v2958_v62 = vld [vmem:[%s3119_s23 + $0x2ec] ss:$16 sps:$4 sm:$0xff]  }
  0x87   : > { %1558 = vmatmul.mubr.bf16.gmra.mxu0 %v2864_v63  ;;  %v2960_v63 = vld [vmem:[%s3119_s23 + $0x2e0] ss:$16 sps:$4 sm:$0xff]  }
  0x88   : > { %1847 = vmatmul.mubr.bf16.gmra.mxu1 %v2865_v0  ;;  %1565 = vmatprep.mubr.bf16.mxu0 %v2866_v1  ;;  %v2961_v0 = vld [vmem:[%s3119_s23 + $0x2e8] ss:$16 sps:$4 sm:$0xff]   ;;  %v2962_v1 = vld [vmem:[%s3119_s23 + $0x304] ss:$16 sps:$4 sm:$0xff]  }
  0x89   : > { %1854 = vmatprep.mubr.bf16.mxu1 %v2868_v2  ;;  %v2964_v2 = vld [vmem:[%s3119_s23 + $0x30c] ss:$16 sps:$4 sm:$0xff]  }
  0x8f   : > { %1566 = vmatmul.mubr.bf16.gmra.mxu0 %v2870_v3  ;;  %v2966_v3 = vld [vmem:[%s3119_s23 + $0x300] ss:$16 sps:$4 sm:$0xff]  }
  0x90   : > { %1855 = vmatmul.mubr.bf16.gmra.mxu1 %v2871_v4  ;;  %1573 = vmatprep.mubr.bf16.mxu0 %v2872_v5  ;;  %v2967_v4 = vld [vmem:[%s3119_s23 + $0x308] ss:$16 sps:$4 sm:$0xff]   ;;  %v2968_v5 = vld [vmem:[%s3119_s23 + $0x324] ss:$16 sps:$4 sm:$0xff]  }
  0x91   : > { %1862 = vmatprep.mubr.bf16.mxu1 %v2874_v6  ;;  %v2970_v6 = vld [vmem:[%s3119_s23 + $0x32c] ss:$16 sps:$4 sm:$0xff]  }
  0x97   : > { %1574 = vmatmul.mubr.bf16.gmra.mxu0 %v2876_v7 }
  0x98   : > { %1863 = vmatmul.mubr.bf16.gmra.mxu1 %v2877_v8  ;;  %1581 = vmatprep.mubr.bf16.mxu0 %v2878_v9  ;;  %v3257_v9 = vld [vmem:[%s3426_s2] ss:$0 sm:$0xff] }
  0x99   : > { %1870 = vmatprep.mubr.bf16.mxu1 %v2880_v10 }
  0x9f   : > { %1582 = vmatmul.mubr.bf16.gmra.mxu0 %v2882_v11 }
  0xa0   : > { %1871 = vmatmul.mubr.bf16.gmra.mxu1 %v2883_v12  ;;  %1589 = vmatprep.mubr.bf16.mxu0 %v2884_v13 }
  0xa1   : > { %1878 = vmatprep.mubr.bf16.mxu1 %v2886_v14 }
  0xa7   : > { %1590 = vmatmul.mubr.bf16.gmra.mxu0 %v2888_v15  ;;  %v2972_v15 = vld [vmem:[%s3119_s23 + $0x320] ss:$16 sps:$4 sm:$0xff]  }
  0xa8   : > { %1879 = vmatmul.mubr.bf16.gmra.mxu1 %v2889_v16  ;;  %1597 = vmatprep.mubr.bf16.mxu0 %v2890_v17  ;;  %v2973_v17 = vld [vmem:[%s3119_s23 + $0x328] ss:$16 sps:$4 sm:$0xff]  }
  0xa9   : > { %1886 = vmatprep.mubr.bf16.mxu1 %v2892_v18  ;;  %v2974_v18 = vld [vmem:[%s3119_s23 + $0x344] ss:$16 sps:$4 sm:$0xff]  }
  0xaf   : > { %1598 = vmatmul.mubr.bf16.gmra.mxu0 %v2894_v19 }
  0xb0   : > { %1887 = vmatmul.mubr.bf16.gmra.mxu1 %v2895_v20  ;;  %1605 = vmatprep.mubr.bf16.mxu0 %v2896_v21 }
  0xb1   : > { %1894 = vmatprep.mubr.bf16.mxu1 %v2898_v22  ;;  %v2976_v22 = vld [vmem:[%s3119_s23 + $0x34c] ss:$16 sps:$4 sm:$0xff]  }
  0xb7   : > { %1606 = vmatmul.mubr.bf16.gmra.mxu0 %v2900_v23 }
  0xb8   : > { %1895 = vmatmul.mubr.bf16.gmra.mxu1 %v2901_v24  ;;  %1613 = vmatprep.mubr.bf16.mxu0 %v2902_v25 }
  0xb9   : > { %1902 = vmatprep.mubr.bf16.mxu1 %v2904_v26 }
  0xbf   : > { %1614 = vmatmul.mubr.bf16.gmra.mxu0 %v2906_v27 }
  0xc0   : > { %1903 = vmatmul.mubr.bf16.gmra.mxu1 %v2907_v28  ;;  %1621 = vmatprep.mubr.bf16.mxu0 %v2908_v29 }
  0xc1   : > { %1910 = vmatprep.mubr.bf16.mxu1 %v2910_v30 }
  0xc7   : > { %1622 = vmatmul.mubr.bf16.gmra.mxu0 %v2912_v31 }
  0xc8   : > { %1911 = vmatmul.mubr.bf16.gmra.mxu1 %v2913_v32  ;;  %1629 = vmatprep.mubr.bf16.mxu0 %v2914_v33  ;;  %v2978_v33 = vld [vmem:[%s3119_s23 + $0x340] ss:$16 sps:$4 sm:$0xff]  }
  0xc9   : > { %1918 = vmatprep.mubr.bf16.mxu1 %v2916_v34 }
  0xcf   : > { %1630 = vmatmul.mubr.bf16.gmra.mxu0 %v2918_v35  ;;  %v2979_v35 = vld [vmem:[%s3119_s23 + $0x348] ss:$16 sps:$4 sm:$0xff]  }
  0xd0   : > { %1919 = vmatmul.mubr.bf16.gmra.mxu1 %v2919_v36  ;;  %1637 = vmatprep.mubr.bf16.mxu0 %v2920_v37  ;;  %v2980_v36 = vld [vmem:[%s3119_s23 + $0x364] ss:$16 sps:$4 sm:$0xff]  }
  0xd1   : > { %1926 = vmatprep.mubr.bf16.mxu1 %v2922_v38 }
  0xd7   : > { %1638 = vmatmul.mubr.bf16.gmra.mxu0 %v2924_v39 }
  0xd8   : > { %1927 = vmatmul.mubr.bf16.gmra.mxu1 %v2925_v40  ;;  %1645 = vmatprep.mubr.bf16.mxu0 %v2926_v41  ;;  %v2982_v40 = vld [vmem:[%s3119_s23 + $0x36c] ss:$16 sps:$4 sm:$0xff]  }
  0xd9   : > { %1934 = vmatprep.mubr.bf16.mxu1 %v2928_v42 }
  0xdf   : > { %1646 = vmatmul.mubr.bf16.gmra.mxu0 %v2930_v43 }
  0xe0   : > { %1935 = vmatmul.mubr.bf16.gmra.mxu1 %v2931_v44  ;;  %1653 = vmatprep.mubr.bf16.mxu0 %v2932_v45 }
  0xe1   : > { %1942 = vmatprep.mubr.bf16.mxu1 %v2934_v46 }
  0xe7   : > { %1654 = vmatmul.mubr.bf16.gmra.mxu0 %v2936_v47 }
  0xe8   : > { %1943 = vmatmul.mubr.bf16.gmra.mxu1 %v2937_v48  ;;  %1661 = vmatprep.mubr.bf16.mxu0 %v2938_v49 }
  0xe9   : > { %1950 = vmatprep.mubr.bf16.mxu1 %v2940_v50 }
  0xef   : > { %1662 = vmatmul.mubr.bf16.gmra.mxu0 %v2942_v51  ;;  %v2984_v51 = vld [vmem:[%s3119_s23 + $0x360] ss:$16 sps:$4 sm:$0xff]  }
  0xf0   : > { %1951 = vmatmul.mubr.bf16.gmra.mxu1 %v2943_v52  ;;  %1669 = vmatprep.mubr.bf16.mxu0 %v2944_v53  ;;  %v2985_v53 = vld [vmem:[%s3119_s23 + $0x368] ss:$16 sps:$4 sm:$0xff]  }
  0xf1   : > { %1958 = vmatprep.mubr.bf16.mxu1 %v2946_v54  ;;  %v2988_v54 = vld [vmem:[%s3119_s23 + $0x384] ss:$16 sps:$4 sm:$0xff]  }
  0xf7   : > { %1670 = vmatmul.mubr.bf16.gmra.mxu0 %v2948_v55 }
  0xf8   : > { %1959 = vmatmul.mubr.bf16.gmra.mxu1 %v2949_v56  ;;  %1677 = vmatprep.mubr.bf16.mxu0 %v2950_v57 }
  0xf9   : > { %1966 = vmatprep.mubr.bf16.mxu1 %v2952_v58  ;;  %v2991_v58 = vld [vmem:[%s3119_s23 + $0x38c] ss:$16 sps:$4 sm:$0xff]  }
  0xff   : > { %1678 = vmatmul.mubr.bf16.gmra.mxu0 %v2954_v59 }
 0x100   : > { %1967 = vmatmul.mubr.bf16.gmra.mxu1 %v2955_v60  ;;  %1685 = vmatprep.mubr.bf16.mxu0 %v2956_v61 }
 0x101   : > { %1974 = vmatprep.mubr.bf16.mxu1 %v2958_v62 }
 0x107   : > { %1686 = vmatmul.mubr.bf16.gmra.mxu0 %v2960_v63 }
 0x108   : > { %1975 = vmatmul.mubr.bf16.gmra.mxu1 %v2961_v0  ;;  %1693 = vmatprep.mubr.bf16.mxu0 %v2962_v1 }
 0x109   : > { %1982 = vmatprep.mubr.bf16.mxu1 %v2964_v2 }
 0x10f   : > { %v1503_v7 = vpop.f32.mrf.mxu0  ;;  %1694 = vmatmul.mubr.bf16.gmra.mxu0 %v2966_v3 }
 0x110   : > { %v1792_v8 = vpop.f32.mrf.mxu1  ;;  %1983 = vmatmul.mubr.bf16.gmra.mxu1 %v2967_v4  ;;  %1701 = vmatprep.mubr.bf16.mxu0 %v2968_v5  ;;  %v2986_v5 = vld [vmem:[%s3119_s23 + $0x380] ss:$16 sps:$4 sm:$0xff]  }
 0x111   : > { %v1793_v10 = vadd.f32 %v1792_v8, %v1503_v7  ;;  %v1505_v11 = vpop.f32.mrf.mxu0  ;;  %1990 = vmatprep.mubr.bf16.mxu1 %v2970_v6  ;;  %v2989_v7 = vld [vmem:[%s3119_s23 + $0x388] ss:$16 sps:$4 sm:$0xff]   ;;  %v2994_v8 = vld [vmem:[%s3119_s23 + $0x3a4] ss:$16 sps:$4 sm:$0xff]  }
 0x112   : > { %v1794_v12 = vpop.f32.mrf.mxu1 }
 0x113   : > { %v2249_v13 = vadd.f32 %v3257_v9, %v1793_v10  ;;  %v1506_v14 = vpop.f32.mrf.mxu0 }
 0x114   : > { %v1795_v16 = vpop.f32.mrf.mxu1 }
 0x115   : > { %v2313_v19 = vmax.f32 %v2249_v13, 0.0  ;;  %v1796_v20 = vadd.f32 %v1795_v16, %v1506_v14  ;;  %v1508_v21 = vpop.f32.mrf.mxu0  ;;  %v2997_v13 = vld [vmem:[%s3119_s23 + $0x3ac] ss:$16 sps:$4 sm:$0xff]  }
 0x116   : > { %v1797_v23 = vpop.f32.mrf.mxu1 }
 0x117   : > { %2377 = vst [vmem:[%s3265_s29] sm:$0xff] %v2313_v19  ;;  %v2250_v24 = vadd.f32 %v3257_v9, %v1796_v20  ;;  %v1511_v25 = vpop.f32.mrf.mxu0  ;;  %1702 = vmatmul.mubr.bf16.gmra.mxu0 %v2972_v15 }
 0x118   : > { %v1800_v26 = vpop.f32.mrf.mxu1  ;;  %1991 = vmatmul.mubr.bf16.gmra.mxu1 %v2973_v17  ;;  %1709 = vmatprep.mubr.bf16.mxu0 %v2974_v18 }
 0x119   : > { %v2314_v27 = vmax.f32 %v2250_v24, 0.0  ;;  %v1801_v28 = vadd.f32 %v1800_v26, %v1511_v25  ;;  %v1513_v29 = vpop.f32.mrf.mxu0  ;;  %1998 = vmatprep.mubr.bf16.mxu1 %v2976_v22  ;;  %v2992_v24 = vld [vmem:[%s3119_s23 + $0x3a0] ss:$16 sps:$4 sm:$0xff]   ;;  %v2995_v26 = vld [vmem:[%s3119_s23 + $0x3a8] ss:$16 sps:$4 sm:$0xff]  }
 0x11a   : > { %v1802_v30 = vpop.f32.mrf.mxu1 }
 0x11b   : > { %2378 = vst [vmem:[%s3265_s29 + $0x8] sm:$0xff] %v2314_v27  ;;  %v2251_v31 = vadd.f32 %v3257_v9, %v1801_v28  ;;  %v1514_v32 = vpop.f32.mrf.mxu0  ;;  %v3000_v27 = vld [vmem:[%s3119_s23 + $0x3c4] ss:$16 sps:$4 sm:$0xff]  }
 0x11c   : > { %v1803_v34 = vpop.f32.mrf.mxu1 }
 0x11d   : > { %v2315_v37 = vmax.f32 %v2251_v31, 0.0  ;;  %v1804_v38 = vadd.f32 %v1803_v34, %v1514_v32  ;;  %v1516_v39 = vpop.f32.mrf.mxu0  ;;  %v3003_v31 = vld [vmem:[%s3119_s23 + $0x3cc] ss:$16 sps:$4 sm:$0xff]  }
 0x11e   : > { %v1805_v41 = vpop.f32.mrf.mxu1 }
 0x11f   : > { %2379 = vst [vmem:[%s3265_s29 + $0x10] sm:$0xff] %v2315_v37  ;;  %v2252_v42 = vadd.f32 %v3257_v9, %v1804_v38  ;;  %v1519_v43 = vpop.f32.mrf.mxu0  ;;  %1710 = vmatmul.mubr.bf16.gmra.mxu0 %v2978_v33 }
 0x120   : > { %v1808_v44 = vpop.f32.mrf.mxu1  ;;  %1999 = vmatmul.mubr.bf16.gmra.mxu1 %v2979_v35  ;;  %1717 = vmatprep.mubr.bf16.mxu0 %v2980_v36 }
 0x121   : > { %v2316_v45 = vmax.f32 %v2252_v42, 0.0  ;;  %v1809_v46 = vadd.f32 %v1808_v44, %v1519_v43  ;;  %v1521_v47 = vpop.f32.mrf.mxu0  ;;  %2006 = vmatprep.mubr.bf16.mxu1 %v2982_v40  ;;  %v2998_v42 = vld [vmem:[%s3119_s23 + $0x3c0] ss:$16 sps:$4 sm:$0xff]   ;;  %v3001_v44 = vld [vmem:[%s3119_s23 + $0x3c8] ss:$16 sps:$4 sm:$0xff]  }
 0x122   : > { %v1810_v48 = vpop.f32.mrf.mxu1 }
 0x123   : > { %2380 = vst [vmem:[%s3265_s29 + $0x18] sm:$0xff] %v2316_v45  ;;  %v2253_v49 = vadd.f32 %v3257_v9, %v1809_v46  ;;  %v1522_v50 = vpop.f32.mrf.mxu0  ;;  %v3006_v45 = vld [vmem:[%s3119_s23 + $0x3e4] ss:$16 sps:$4 sm:$0xff]  }
 0x124   : > { %v1811_v52 = vpop.f32.mrf.mxu1 }
 0x125   : > { %v2317_v55 = vmax.f32 %v2253_v49, 0.0  ;;  %v1812_v56 = vadd.f32 %v1811_v52, %v1522_v50  ;;  %v1524_v57 = vpop.f32.mrf.mxu0  ;;  %v3009_v49 = vld [vmem:[%s3119_s23 + $0x3ec] ss:$16 sps:$4 sm:$0xff]  }
 0x126   : > { %v1813_v59 = vpop.f32.mrf.mxu1 }
 0x127   : > { %2381 = vst [vmem:[%s3265_s29 + $0x20] sm:$0xff] %v2317_v55  ;;  %v2254_v60 = vadd.f32 %v3257_v9, %v1812_v56  ;;  %v1527_v61 = vpop.f32.mrf.mxu0  ;;  %1718 = vmatmul.mubr.bf16.gmra.mxu0 %v2984_v51 }
 0x128   : > { %v1816_v62 = vpop.f32.mrf.mxu1  ;;  %2007 = vmatmul.mubr.bf16.gmra.mxu1 %v2985_v53  ;;  %1725 = vmatprep.mubr.bf16.mxu0 %v2988_v54 }
 0x129   : > { %v2318_v63 = vmax.f32 %v2254_v60, 0.0  ;;  %v1817_v0 = vadd.f32 %v1816_v62, %v1527_v61  ;;  %v1529_v1 = vpop.f32.mrf.mxu0  ;;  %2014 = vmatprep.mubr.bf16.mxu1 %v2991_v58  ;;  %v3004_v60 = vld [vmem:[%s3119_s23 + $0x3e0] ss:$16 sps:$4 sm:$0xff]   ;;  %v3007_v62 = vld [vmem:[%s3119_s23 + $0x3e8] ss:$16 sps:$4 sm:$0xff]  }
 0x12a   : > { %v1818_v2 = vpop.f32.mrf.mxu1 }
 0x12b   : > { %2382 = vst [vmem:[%s3265_s29 + $0x28] sm:$0xff] %v2318_v63  ;;  %v2255_v3 = vadd.f32 %v3257_v9, %v1817_v0  ;;  %v1530_v4 = vpop.f32.mrf.mxu0 }
 0x12c   : > { %v1819_v6 = vpop.f32.mrf.mxu1 }
 0x12d   : > { %v2319_v10 = vmax.f32 %v2255_v3, 0.0  ;;  %v1820_v11 = vadd.f32 %v1819_v6, %v1530_v4  ;;  %v1532_v12 = vpop.f32.mrf.mxu0 }
 0x12e   : > { %v1821_v14 = vpop.f32.mrf.mxu1 }
 0x12f   : > { %2383 = vst [vmem:[%s3265_s29 + $0x30] sm:$0xff] %v2319_v10  ;;  %v2256_v15 = vadd.f32 %v3257_v9, %v1820_v11  ;;  %v1535_v16 = vpop.f32.mrf.mxu0  ;;  %1726 = vmatmul.mubr.bf16.gmra.mxu0 %v2986_v5 }
 0x130   : > { %v1824_v17 = vpop.f32.mrf.mxu1  ;;  %2015 = vmatmul.mubr.bf16.gmra.mxu1 %v2989_v7  ;;  %1733 = vmatprep.mubr.bf16.mxu0 %v2994_v8 }
 0x131   : > { %v2320_v18 = vmax.f32 %v2256_v15, 0.0  ;;  %v1825_v19 = vadd.f32 %v1824_v17, %v1535_v16  ;;  %v1537_v20 = vpop.f32.mrf.mxu0  ;;  %2022 = vmatprep.mubr.bf16.mxu1 %v2997_v13 }
 0x132   : > { %v1826_v21 = vpop.f32.mrf.mxu1 }
 0x133   : > { %2384 = vst [vmem:[%s3265_s29 + $0x38] sm:$0xff] %v2320_v18  ;;  %v2257_v22 = vadd.f32 %v3257_v9, %v1825_v19  ;;  %v1538_v23 = vpop.f32.mrf.mxu0 }
 0x134   : > { %v1827_v25 = vpop.f32.mrf.mxu1 }
 0x135   : > { %v2321_v28 = vmax.f32 %v2257_v22, 0.0  ;;  %v1828_v29 = vadd.f32 %v1827_v25, %v1538_v23  ;;  %v1540_v30 = vpop.f32.mrf.mxu0 }
 0x136   : > { %v1829_v32 = vpop.f32.mrf.mxu1 }
 0x137   : > { %2385 = vst [vmem:[%s3265_s29 + $0x40] sm:$0xff] %v2321_v28  ;;  %v2258_v33 = vadd.f32 %v3257_v9, %v1828_v29  ;;  %v1543_v34 = vpop.f32.mrf.mxu0  ;;  %1734 = vmatmul.mubr.bf16.gmra.mxu0 %v2992_v24 }
 0x138   : > { %v1832_v35 = vpop.f32.mrf.mxu1  ;;  %2023 = vmatmul.mubr.bf16.gmra.mxu1 %v2995_v26  ;;  %1741 = vmatprep.mubr.bf16.mxu0 %v3000_v27 }
 0x139   : > { %v2322_v36 = vmax.f32 %v2258_v33, 0.0  ;;  %v1833_v37 = vadd.f32 %v1832_v35, %v1543_v34  ;;  %v1545_v38 = vpop.f32.mrf.mxu0  ;;  %2030 = vmatprep.mubr.bf16.mxu1 %v3003_v31 }
 0x13a   : > { %v1834_v39 = vpop.f32.mrf.mxu1 }
 0x13b   : > { %2386 = vst [vmem:[%s3265_s29 + $0x48] sm:$0xff] %v2322_v36  ;;  %v2259_v40 = vadd.f32 %v3257_v9, %v1833_v37  ;;  %v1546_v41 = vpop.f32.mrf.mxu0 }
 0x13c   : > { %v1835_v43 = vpop.f32.mrf.mxu1 }
 0x13d   : > { %v2323_v46 = vmax.f32 %v2259_v40, 0.0  ;;  %v1836_v47 = vadd.f32 %v1835_v43, %v1546_v41  ;;  %v1548_v48 = vpop.f32.mrf.mxu0 }
 0x13e   : > { %v1837_v50 = vpop.f32.mrf.mxu1 }
 0x13f   : > { %2387 = vst [vmem:[%s3265_s29 + $0x50] sm:$0xff] %v2323_v46  ;;  %v2260_v51 = vadd.f32 %v3257_v9, %v1836_v47  ;;  %v1551_v52 = vpop.f32.mrf.mxu0  ;;  %1742 = vmatmul.mubr.bf16.gmra.mxu0 %v2998_v42 }
 0x140   : > { %v1840_v53 = vpop.f32.mrf.mxu1  ;;  %2031 = vmatmul.mubr.bf16.gmra.mxu1 %v3001_v44  ;;  %1749 = vmatprep.mubr.bf16.mxu0 %v3006_v45 }
 0x141   : > { %v2324_v54 = vmax.f32 %v2260_v51, 0.0  ;;  %v1841_v55 = vadd.f32 %v1840_v53, %v1551_v52  ;;  %v1553_v56 = vpop.f32.mrf.mxu0  ;;  %2038 = vmatprep.mubr.bf16.mxu1 %v3009_v49 }
 0x142   : > { %v1842_v57 = vpop.f32.mrf.mxu1 }
 0x143   : > { %2388 = vst [vmem:[%s3265_s29 + $0x58] sm:$0xff] %v2324_v54  ;;  %v2261_v58 = vadd.f32 %v3257_v9, %v1841_v55  ;;  %v1554_v59 = vpop.f32.mrf.mxu0 }
 0x144   : > { %v1843_v61 = vpop.f32.mrf.mxu1 }
 0x145   : > { %v2325_v63 = vmax.f32 %v2261_v58, 0.0  ;;  %v1844_v0 = vadd.f32 %v1843_v61, %v1554_v59  ;;  %v1556_v1 = vpop.f32.mrf.mxu0 }
 0x146   : > { %v1845_v2 = vpop.f32.mrf.mxu1 }
 0x147   : > { %2389 = vst [vmem:[%s3265_s29 + $0x60] sm:$0xff] %v2325_v63  ;;  %v2262_v3 = vadd.f32 %v3257_v9, %v1844_v0  ;;  %v1559_v4 = vpop.f32.mrf.mxu0  ;;  %1750 = vmatmul.mubr.bf16.gmra.mxu0 %v3004_v60 }
 0x148   : > { %v1848_v5 = vpop.f32.mrf.mxu1  ;;  %2039 = vmatmul.mubr.bf16.gmra.mxu1 %v3007_v62 }
 0x149   : > { %v2326_v6 = vmax.f32 %v2262_v3, 0.0  ;;  %v1849_v7 = vadd.f32 %v1848_v5, %v1559_v4  ;;  %v1561_v8 = vpop.f32.mrf.mxu0 }
 0x14a   : > { %v1850_v10 = vpop.f32.mrf.mxu1 }
 0x14b   : > { %2390 = vst [vmem:[%s3265_s29 + $0x68] sm:$0xff] %v2326_v6  ;;  %v2263_v11 = vadd.f32 %v3257_v9, %v1849_v7  ;;  %v1562_v12 = vpop.f32.mrf.mxu0 }
 0x14c   : > { %v1851_v13 = vpop.f32.mrf.mxu1 }
 0x14d   : > { %v2327_v14 = vmax.f32 %v2263_v11, 0.0  ;;  %v1852_v15 = vadd.f32 %v1851_v13, %v1562_v12  ;;  %v1564_v16 = vpop.f32.mrf.mxu0 }
 0x14e   : > { %v1853_v17 = vpop.f32.mrf.mxu1 }
 0x14f   : > { %2391 = vst [vmem:[%s3265_s29 + $0x70] sm:$0xff] %v2327_v14  ;;  %v2264_v18 = vadd.f32 %v3257_v9, %v1852_v15  ;;  %v1567_v19 = vpop.f32.mrf.mxu0 }
 0x150   : > { %v1856_v20 = vpop.f32.mrf.mxu1 }
 0x151   : > { %v2328_v21 = vmax.f32 %v2264_v18, 0.0  ;;  %v1857_v22 = vadd.f32 %v1856_v20, %v1567_v19  ;;  %v1569_v23 = vpop.f32.mrf.mxu0 }
 0x152   : > { %v1858_v24 = vpop.f32.mrf.mxu1 }
 0x153   : > { %2392 = vst [vmem:[%s3265_s29 + $0x78] sm:$0xff] %v2328_v21  ;;  %v2265_v25 = vadd.f32 %v3257_v9, %v1857_v22  ;;  %v1570_v26 = vpop.f32.mrf.mxu0 }
 0x154   : > { %v1859_v27 = vpop.f32.mrf.mxu1 }
 0x155   : > { %v2329_v28 = vmax.f32 %v2265_v25, 0.0  ;;  %v1860_v29 = vadd.f32 %v1859_v27, %v1570_v26  ;;  %v1572_v30 = vpop.f32.mrf.mxu0 }
 0x156   : > { %v1861_v31 = vpop.f32.mrf.mxu1 }
 0x157   : > { %2393 = vst [vmem:[%s3265_s29 + $0x80] sm:$0xff] %v2329_v28  ;;  %v2266_v32 = vadd.f32 %v3257_v9, %v1860_v29  ;;  %v1575_v33 = vpop.f32.mrf.mxu0 }
 0x158   : > { %v1864_v34 = vpop.f32.mrf.mxu1 }
 0x159   : > { %v2330_v35 = vmax.f32 %v2266_v32, 0.0  ;;  %v1865_v36 = vadd.f32 %v1864_v34, %v1575_v33  ;;  %v1577_v37 = vpop.f32.mrf.mxu0 }
 0x15a   : > { %v1866_v38 = vpop.f32.mrf.mxu1 }
 0x15b   : > { %2394 = vst [vmem:[%s3265_s29 + $0x88] sm:$0xff] %v2330_v35  ;;  %v2267_v39 = vadd.f32 %v3257_v9, %v1865_v36  ;;  %v1578_v40 = vpop.f32.mrf.mxu0 }
 0x15c   : > { %v1867_v41 = vpop.f32.mrf.mxu1 }
 0x15d   : > { %v2331_v42 = vmax.f32 %v2267_v39, 0.0  ;;  %v1868_v43 = vadd.f32 %v1867_v41, %v1578_v40  ;;  %v1580_v44 = vpop.f32.mrf.mxu0 }
 0x15e   : > { %v1869_v45 = vpop.f32.mrf.mxu1 }
 0x15f   : > { %2395 = vst [vmem:[%s3265_s29 + $0x90] sm:$0xff] %v2331_v42  ;;  %v2268_v46 = vadd.f32 %v3257_v9, %v1868_v43  ;;  %v1583_v47 = vpop.f32.mrf.mxu0 }
 0x160   : > { %v1872_v48 = vpop.f32.mrf.mxu1 }
 0x161   : > { %v2332_v49 = vmax.f32 %v2268_v46, 0.0  ;;  %v1873_v50 = vadd.f32 %v1872_v48, %v1583_v47  ;;  %v1585_v51 = vpop.f32.mrf.mxu0 }
 0x162   : > { %v1874_v52 = vpop.f32.mrf.mxu1 }
 0x163   : > { %2396 = vst [vmem:[%s3265_s29 + $0x98] sm:$0xff] %v2332_v49  ;;  %v2269_v53 = vadd.f32 %v3257_v9, %v1873_v50  ;;  %v1586_v54 = vpop.f32.mrf.mxu0 }
 0x164   : > { %v1875_v55 = vpop.f32.mrf.mxu1 }
 0x165   : > { %v2333_v56 = vmax.f32 %v2269_v53, 0.0  ;;  %v1876_v57 = vadd.f32 %v1875_v55, %v1586_v54  ;;  %v1588_v58 = vpop.f32.mrf.mxu0 }
 0x166   : > { %v1877_v59 = vpop.f32.mrf.mxu1 }
 0x167   : > { %2397 = vst [vmem:[%s3265_s29 + $0xa0] sm:$0xff] %v2333_v56  ;;  %v2270_v60 = vadd.f32 %v3257_v9, %v1876_v57  ;;  %v1591_v61 = vpop.f32.mrf.mxu0 }
 0x168   : > { %v1880_v62 = vpop.f32.mrf.mxu1 }
 0x169   : > { %v2334_v63 = vmax.f32 %v2270_v60, 0.0  ;;  %v1881_v0 = vadd.f32 %v1880_v62, %v1591_v61  ;;  %v1593_v1 = vpop.f32.mrf.mxu0 }
 0x16a   : > { %v1882_v2 = vpop.f32.mrf.mxu1 }
 0x16b   : > { %2398 = vst [vmem:[%s3265_s29 + $0xa8] sm:$0xff] %v2334_v63  ;;  %v2271_v3 = vadd.f32 %v3257_v9, %v1881_v0  ;;  %v1594_v4 = vpop.f32.mrf.mxu0 }
 0x16c   : > { %v1883_v5 = vpop.f32.mrf.mxu1 }
 0x16d   : > { %v2335_v6 = vmax.f32 %v2271_v3, 0.0  ;;  %v1884_v7 = vadd.f32 %v1883_v5, %v1594_v4  ;;  %v1596_v8 = vpop.f32.mrf.mxu0 }
 0x16e   : > { %v1885_v10 = vpop.f32.mrf.mxu1 }
 0x16f   : > { %2399 = vst [vmem:[%s3265_s29 + $0xb0] sm:$0xff] %v2335_v6  ;;  %v2272_v11 = vadd.f32 %v3257_v9, %v1884_v7  ;;  %v1599_v12 = vpop.f32.mrf.mxu0 }
 0x170   : > { %v1888_v13 = vpop.f32.mrf.mxu1 }
 0x171   : > { %v2336_v14 = vmax.f32 %v2272_v11, 0.0  ;;  %v1889_v15 = vadd.f32 %v1888_v13, %v1599_v12  ;;  %v1601_v16 = vpop.f32.mrf.mxu0 }
 0x172   : > { %v1890_v17 = vpop.f32.mrf.mxu1 }
 0x173   : > { %2400 = vst [vmem:[%s3265_s29 + $0xb8] sm:$0xff] %v2336_v14  ;;  %v2273_v18 = vadd.f32 %v3257_v9, %v1889_v15  ;;  %v1602_v19 = vpop.f32.mrf.mxu0 }
 0x174   : > { %v1891_v20 = vpop.f32.mrf.mxu1 }
 0x175   : > { %v2337_v21 = vmax.f32 %v2273_v18, 0.0  ;;  %v1892_v22 = vadd.f32 %v1891_v20, %v1602_v19  ;;  %v1604_v23 = vpop.f32.mrf.mxu0 }
 0x176   : > { %v1893_v24 = vpop.f32.mrf.mxu1 }
 0x177   : > { %2401 = vst [vmem:[%s3265_s29 + $0xc0] sm:$0xff] %v2337_v21  ;;  %v2274_v25 = vadd.f32 %v3257_v9, %v1892_v22  ;;  %v1607_v26 = vpop.f32.mrf.mxu0 }
 0x178   : > { %v1896_v27 = vpop.f32.mrf.mxu1 }
 0x179   : > { %v2338_v28 = vmax.f32 %v2274_v25, 0.0  ;;  %v1897_v29 = vadd.f32 %v1896_v27, %v1607_v26  ;;  %v1609_v30 = vpop.f32.mrf.mxu0 }
 0x17a   : > { %v1898_v31 = vpop.f32.mrf.mxu1 }
 0x17b   : > { %2402 = vst [vmem:[%s3265_s29 + $0xc8] sm:$0xff] %v2338_v28  ;;  %v2275_v32 = vadd.f32 %v3257_v9, %v1897_v29  ;;  %v1610_v33 = vpop.f32.mrf.mxu0 }
 0x17c   : > { %v1899_v34 = vpop.f32.mrf.mxu1 }
 0x17d   : > { %v2339_v35 = vmax.f32 %v2275_v32, 0.0  ;;  %v1900_v36 = vadd.f32 %v1899_v34, %v1610_v33  ;;  %v1612_v37 = vpop.f32.mrf.mxu0 }
 0x17e   : > { %v1901_v38 = vpop.f32.mrf.mxu1 }
 0x17f   : > { %2403 = vst [vmem:[%s3265_s29 + $0xd0] sm:$0xff] %v2339_v35  ;;  %v2276_v39 = vadd.f32 %v3257_v9, %v1900_v36  ;;  %v1615_v40 = vpop.f32.mrf.mxu0 }
 0x180   : > { %v1904_v41 = vpop.f32.mrf.mxu1 }
 0x181   : > { %v2340_v42 = vmax.f32 %v2276_v39, 0.0  ;;  %v1905_v43 = vadd.f32 %v1904_v41, %v1615_v40  ;;  %v1617_v44 = vpop.f32.mrf.mxu0 }
 0x182   : > { %v1906_v45 = vpop.f32.mrf.mxu1 }
 0x183   : > { %2404 = vst [vmem:[%s3265_s29 + $0xd8] sm:$0xff] %v2340_v42  ;;  %v2277_v46 = vadd.f32 %v3257_v9, %v1905_v43  ;;  %v1618_v47 = vpop.f32.mrf.mxu0 }
 0x184   : > { %v1907_v48 = vpop.f32.mrf.mxu1 }
 0x185   : > { %v2341_v49 = vmax.f32 %v2277_v46, 0.0  ;;  %v1908_v50 = vadd.f32 %v1907_v48, %v1618_v47  ;;  %v1620_v51 = vpop.f32.mrf.mxu0 }
 0x186   : > { %v1909_v52 = vpop.f32.mrf.mxu1 }
 0x187   : > { %2405 = vst [vmem:[%s3265_s29 + $0xe0] sm:$0xff] %v2341_v49  ;;  %v2278_v53 = vadd.f32 %v3257_v9, %v1908_v50  ;;  %v1623_v54 = vpop.f32.mrf.mxu0 }
 0x188   : > { %v1912_v55 = vpop.f32.mrf.mxu1 }
 0x189   : > { %v2342_v56 = vmax.f32 %v2278_v53, 0.0  ;;  %v1913_v57 = vadd.f32 %v1912_v55, %v1623_v54  ;;  %v1625_v58 = vpop.f32.mrf.mxu0 }
 0x18a   : > { %v1914_v59 = vpop.f32.mrf.mxu1 }
 0x18b   : > { %2406 = vst [vmem:[%s3265_s29 + $0xe8] sm:$0xff] %v2342_v56  ;;  %v2279_v60 = vadd.f32 %v3257_v9, %v1913_v57  ;;  %v1626_v61 = vpop.f32.mrf.mxu0 }
 0x18c   : > { %v1915_v62 = vpop.f32.mrf.mxu1 }
 0x18d   : > { %v2343_v63 = vmax.f32 %v2279_v60, 0.0  ;;  %v1916_v0 = vadd.f32 %v1915_v62, %v1626_v61  ;;  %v1628_v1 = vpop.f32.mrf.mxu0 }
 0x18e   : > { %v1917_v2 = vpop.f32.mrf.mxu1 }
 0x18f   : > { %2407 = vst [vmem:[%s3265_s29 + $0xf0] sm:$0xff] %v2343_v63  ;;  %v2280_v3 = vadd.f32 %v3257_v9, %v1916_v0  ;;  %v1631_v4 = vpop.f32.mrf.mxu0 }
 0x190   : > { %v1920_v5 = vpop.f32.mrf.mxu1 }
 0x191   : > { %v2344_v6 = vmax.f32 %v2280_v3, 0.0  ;;  %v1921_v7 = vadd.f32 %v1920_v5, %v1631_v4  ;;  %v1633_v8 = vpop.f32.mrf.mxu0 }
 0x192   : > { %v1922_v10 = vpop.f32.mrf.mxu1 }
 0x193   : > { %2408 = vst [vmem:[%s3265_s29 + $0xf8] sm:$0xff] %v2344_v6  ;;  %v2281_v11 = vadd.f32 %v3257_v9, %v1921_v7  ;;  %v1634_v12 = vpop.f32.mrf.mxu0 }
 0x194   : > { %v1923_v13 = vpop.f32.mrf.mxu1 }
 0x195   : > { %v2345_v14 = vmax.f32 %v2281_v11, 0.0  ;;  %v1924_v15 = vadd.f32 %v1923_v13, %v1634_v12  ;;  %v1636_v16 = vpop.f32.mrf.mxu0 }
 0x196   : > { %v1925_v17 = vpop.f32.mrf.mxu1 }
 0x197   : > { %2409 = vst [vmem:[%s3265_s29 + $0x100] sm:$0xff] %v2345_v14  ;;  %v2282_v18 = vadd.f32 %v3257_v9, %v1924_v15  ;;  %v1639_v19 = vpop.f32.mrf.mxu0 }
 0x198   : > { %v1928_v20 = vpop.f32.mrf.mxu1 }
 0x199   : > { %v2346_v21 = vmax.f32 %v2282_v18, 0.0  ;;  %v1929_v22 = vadd.f32 %v1928_v20, %v1639_v19  ;;  %v1641_v23 = vpop.f32.mrf.mxu0 }
 0x19a   : > { %v1930_v24 = vpop.f32.mrf.mxu1 }
 0x19b   : > { %2410 = vst [vmem:[%s3265_s29 + $0x108] sm:$0xff] %v2346_v21  ;;  %v2283_v25 = vadd.f32 %v3257_v9, %v1929_v22  ;;  %v1642_v26 = vpop.f32.mrf.mxu0 }
 0x19c   : > { %v1931_v27 = vpop.f32.mrf.mxu1 }
 0x19d   : > { %v2347_v28 = vmax.f32 %v2283_v25, 0.0  ;;  %v1932_v29 = vadd.f32 %v1931_v27, %v1642_v26  ;;  %v1644_v30 = vpop.f32.mrf.mxu0 }
 0x19e   : > { %v1933_v31 = vpop.f32.mrf.mxu1 }
 0x19f   : > { %2411 = vst [vmem:[%s3265_s29 + $0x110] sm:$0xff] %v2347_v28  ;;  %v2284_v32 = vadd.f32 %v3257_v9, %v1932_v29  ;;  %v1647_v33 = vpop.f32.mrf.mxu0 }
 0x1a0   : > { %v1936_v34 = vpop.f32.mrf.mxu1 }
 0x1a1   : > { %v2348_v35 = vmax.f32 %v2284_v32, 0.0  ;;  %v1937_v36 = vadd.f32 %v1936_v34, %v1647_v33  ;;  %v1649_v37 = vpop.f32.mrf.mxu0 }
 0x1a2   : > { %v1938_v38 = vpop.f32.mrf.mxu1 }
 0x1a3   : > { %2412 = vst [vmem:[%s3265_s29 + $0x118] sm:$0xff] %v2348_v35  ;;  %v2285_v39 = vadd.f32 %v3257_v9, %v1937_v36  ;;  %v1650_v40 = vpop.f32.mrf.mxu0 }
 0x1a4   : > { %v1939_v41 = vpop.f32.mrf.mxu1 }
 0x1a5   : > { %v2349_v42 = vmax.f32 %v2285_v39, 0.0  ;;  %v1940_v43 = vadd.f32 %v1939_v41, %v1650_v40  ;;  %v1652_v44 = vpop.f32.mrf.mxu0 }
 0x1a6   : > { %v1941_v45 = vpop.f32.mrf.mxu1 }
 0x1a7   : > { %2413 = vst [vmem:[%s3265_s29 + $0x120] sm:$0xff] %v2349_v42  ;;  %v2286_v46 = vadd.f32 %v3257_v9, %v1940_v43  ;;  %v1655_v47 = vpop.f32.mrf.mxu0 }
 0x1a8   : > { %v1944_v48 = vpop.f32.mrf.mxu1 }
 0x1a9   : > { %v2350_v49 = vmax.f32 %v2286_v46, 0.0  ;;  %v1945_v50 = vadd.f32 %v1944_v48, %v1655_v47  ;;  %v1657_v51 = vpop.f32.mrf.mxu0 }
 0x1aa   : > { %v1946_v52 = vpop.f32.mrf.mxu1 }
 0x1ab   : > { %2414 = vst [vmem:[%s3265_s29 + $0x128] sm:$0xff] %v2350_v49  ;;  %v2287_v53 = vadd.f32 %v3257_v9, %v1945_v50  ;;  %v1658_v54 = vpop.f32.mrf.mxu0 }
 0x1ac   : > { %v1947_v55 = vpop.f32.mrf.mxu1 }
 0x1ad   : > { %v2351_v56 = vmax.f32 %v2287_v53, 0.0  ;;  %v1948_v57 = vadd.f32 %v1947_v55, %v1658_v54  ;;  %v1660_v58 = vpop.f32.mrf.mxu0 }
 0x1ae   : > { %v1949_v59 = vpop.f32.mrf.mxu1 }
 0x1af   : > { %2415 = vst [vmem:[%s3265_s29 + $0x130] sm:$0xff] %v2351_v56  ;;  %v2288_v60 = vadd.f32 %v3257_v9, %v1948_v57  ;;  %v1663_v61 = vpop.f32.mrf.mxu0 }
 0x1b0   : > { %v1952_v62 = vpop.f32.mrf.mxu1 }
 0x1b1   : > { %v2352_v63 = vmax.f32 %v2288_v60, 0.0  ;;  %v1953_v0 = vadd.f32 %v1952_v62, %v1663_v61  ;;  %v1665_v1 = vpop.f32.mrf.mxu0 }
 0x1b2   : > { %v1954_v2 = vpop.f32.mrf.mxu1 }
 0x1b3   : > { %2416 = vst [vmem:[%s3265_s29 + $0x138] sm:$0xff] %v2352_v63  ;;  %v2289_v3 = vadd.f32 %v3257_v9, %v1953_v0  ;;  %v1666_v4 = vpop.f32.mrf.mxu0 }
 0x1b4   : > { %v1955_v5 = vpop.f32.mrf.mxu1 }
 0x1b5   : > { %v2353_v6 = vmax.f32 %v2289_v3, 0.0  ;;  %v1956_v7 = vadd.f32 %v1955_v5, %v1666_v4  ;;  %v1668_v8 = vpop.f32.mrf.mxu0 }
 0x1b6   : > { %v1957_v10 = vpop.f32.mrf.mxu1 }
 0x1b7   : > { %2417 = vst [vmem:[%s3265_s29 + $0x140] sm:$0xff] %v2353_v6  ;;  %v2290_v11 = vadd.f32 %v3257_v9, %v1956_v7  ;;  %v1671_v12 = vpop.f32.mrf.mxu0 }
 0x1b8   : > { %v1960_v13 = vpop.f32.mrf.mxu1 }
 0x1b9   : > { %v2354_v14 = vmax.f32 %v2290_v11, 0.0  ;;  %v1961_v15 = vadd.f32 %v1960_v13, %v1671_v12  ;;  %v1673_v16 = vpop.f32.mrf.mxu0 }
 0x1ba   : > { %v1962_v17 = vpop.f32.mrf.mxu1 }
 0x1bb   : > { %2418 = vst [vmem:[%s3265_s29 + $0x148] sm:$0xff] %v2354_v14  ;;  %v2291_v18 = vadd.f32 %v3257_v9, %v1961_v15  ;;  %v1674_v19 = vpop.f32.mrf.mxu0 }
 0x1bc   : > { %v1963_v20 = vpop.f32.mrf.mxu1 }
 0x1bd   : > { %v2355_v21 = vmax.f32 %v2291_v18, 0.0  ;;  %v1964_v22 = vadd.f32 %v1963_v20, %v1674_v19  ;;  %v1676_v23 = vpop.f32.mrf.mxu0 }
 0x1be   : > { %v1965_v24 = vpop.f32.mrf.mxu1 }
 0x1bf   : > { %2419 = vst [vmem:[%s3265_s29 + $0x150] sm:$0xff] %v2355_v21  ;;  %v2292_v25 = vadd.f32 %v3257_v9, %v1964_v22  ;;  %v1679_v26 = vpop.f32.mrf.mxu0 }
 0x1c0   : > { %v1968_v27 = vpop.f32.mrf.mxu1 }
 0x1c1   : > { %v2356_v28 = vmax.f32 %v2292_v25, 0.0  ;;  %v1969_v29 = vadd.f32 %v1968_v27, %v1679_v26  ;;  %v1681_v30 = vpop.f32.mrf.mxu0 }
 0x1c2   : > { %v1970_v31 = vpop.f32.mrf.mxu1 }
 0x1c3   : > { %2420 = vst [vmem:[%s3265_s29 + $0x158] sm:$0xff] %v2356_v28  ;;  %v2293_v32 = vadd.f32 %v3257_v9, %v1969_v29  ;;  %v1682_v33 = vpop.f32.mrf.mxu0 }
 0x1c4   : > { %v1971_v34 = vpop.f32.mrf.mxu1 }
 0x1c5   : > { %v2357_v35 = vmax.f32 %v2293_v32, 0.0  ;;  %v1972_v36 = vadd.f32 %v1971_v34, %v1682_v33  ;;  %v1684_v37 = vpop.f32.mrf.mxu0 }
 0x1c6   : > { %v1973_v38 = vpop.f32.mrf.mxu1 }
 0x1c7   : > { %2421 = vst [vmem:[%s3265_s29 + $0x160] sm:$0xff] %v2357_v35  ;;  %v2294_v39 = vadd.f32 %v3257_v9, %v1972_v36  ;;  %v1687_v40 = vpop.f32.mrf.mxu0 }
 0x1c8   : > { %v1976_v41 = vpop.f32.mrf.mxu1 }
 0x1c9   : > { %v2358_v42 = vmax.f32 %v2294_v39, 0.0  ;;  %v1977_v43 = vadd.f32 %v1976_v41, %v1687_v40  ;;  %v1689_v44 = vpop.f32.mrf.mxu0 }
 0x1ca   : > { %v1978_v45 = vpop.f32.mrf.mxu1 }
 0x1cb   : > { %2422 = vst [vmem:[%s3265_s29 + $0x168] sm:$0xff] %v2358_v42  ;;  %v2295_v46 = vadd.f32 %v3257_v9, %v1977_v43  ;;  %v1690_v47 = vpop.f32.mrf.mxu0 }
 0x1cc   : > { %v1979_v48 = vpop.f32.mrf.mxu1 }
 0x1cd   : > { %v2359_v49 = vmax.f32 %v2295_v46, 0.0  ;;  %v1980_v50 = vadd.f32 %v1979_v48, %v1690_v47  ;;  %v1692_v51 = vpop.f32.mrf.mxu0 }
 0x1ce   : > { %v1981_v52 = vpop.f32.mrf.mxu1 }
 0x1cf   : > { %2423 = vst [vmem:[%s3265_s29 + $0x170] sm:$0xff] %v2359_v49  ;;  %v2296_v53 = vadd.f32 %v3257_v9, %v1980_v50  ;;  %v1695_v54 = vpop.f32.mrf.mxu0 }
 0x1d0   : > { %v1984_v55 = vpop.f32.mrf.mxu1 }
 0x1d1   : > { %v2360_v56 = vmax.f32 %v2296_v53, 0.0  ;;  %v1985_v57 = vadd.f32 %v1984_v55, %v1695_v54  ;;  %v1697_v58 = vpop.f32.mrf.mxu0 }
 0x1d2   : > { %v1986_v59 = vpop.f32.mrf.mxu1 }
 0x1d3   : > { %2424 = vst [vmem:[%s3265_s29 + $0x178] sm:$0xff] %v2360_v56  ;;  %v2297_v60 = vadd.f32 %v3257_v9, %v1985_v57  ;;  %v1698_v61 = vpop.f32.mrf.mxu0 }
 0x1d4   : > { %v1987_v62 = vpop.f32.mrf.mxu1 }
 0x1d5   : > { %v2361_v63 = vmax.f32 %v2297_v60, 0.0  ;;  %v1988_v0 = vadd.f32 %v1987_v62, %v1698_v61  ;;  %v1700_v1 = vpop.f32.mrf.mxu0  ;;  %v3010_v60 = vld [vmem:[%s3426_s2] ss:$0 sm:$0xff] }
 0x1d6   : > { %v1989_v2 = vpop.f32.mrf.mxu1 }
 0x1d7   : > { %2425 = vst [vmem:[%s3265_s29 + $0x180] sm:$0xff] %v2361_v63  ;;  %v2298_v3 = vadd.f32 %v3257_v9, %v1988_v0  ;;  %v1703_v4 = vpop.f32.mrf.mxu0 }
 0x1d8   : > { %v1992_v5 = vpop.f32.mrf.mxu1 }
 0x1d9   : > { %v2362_v6 = vmax.f32 %v2298_v3, 0.0  ;;  %v1993_v7 = vadd.f32 %v1992_v5, %v1703_v4  ;;  %v1705_v8 = vpop.f32.mrf.mxu0 }
 0x1da   : > { %v1994_v10 = vpop.f32.mrf.mxu1 }
 0x1db   : > { %2426 = vst [vmem:[%s3265_s29 + $0x188] sm:$0xff] %v2362_v6  ;;  %v2299_v11 = vadd.f32 %v3257_v9, %v1993_v7  ;;  %v1706_v12 = vpop.f32.mrf.mxu0 }
 0x1dc   : > { %v1995_v13 = vpop.f32.mrf.mxu1 }
 0x1dd   : > { %v2363_v14 = vmax.f32 %v2299_v11, 0.0  ;;  %v1996_v15 = vadd.f32 %v1995_v13, %v1706_v12  ;;  %v1708_v16 = vpop.f32.mrf.mxu0 }
 0x1de   : > { %v1997_v17 = vpop.f32.mrf.mxu1 }
 0x1df   : > { %2427 = vst [vmem:[%s3265_s29 + $0x190] sm:$0xff] %v2363_v14  ;;  %v2300_v18 = vadd.f32 %v3257_v9, %v1996_v15  ;;  %v1711_v19 = vpop.f32.mrf.mxu0 }
 0x1e0   : > { %v2000_v20 = vpop.f32.mrf.mxu1 }
 0x1e1   : > { %v2364_v21 = vmax.f32 %v2300_v18, 0.0  ;;  %v2001_v22 = vadd.f32 %v2000_v20, %v1711_v19  ;;  %v1713_v23 = vpop.f32.mrf.mxu0 }
 0x1e2   : > { %v2002_v24 = vpop.f32.mrf.mxu1 }
 0x1e3   : > { %2428 = vst [vmem:[%s3265_s29 + $0x198] sm:$0xff] %v2364_v21  ;;  %v2301_v25 = vadd.f32 %v3257_v9, %v2001_v22  ;;  %v1714_v26 = vpop.f32.mrf.mxu0 }
 0x1e4   : > { %v2003_v27 = vpop.f32.mrf.mxu1 }
 0x1e5   : > { %v2365_v28 = vmax.f32 %v2301_v25, 0.0  ;;  %v2004_v29 = vadd.f32 %v2003_v27, %v1714_v26  ;;  %v1716_v30 = vpop.f32.mrf.mxu0 }
 0x1e6   : > { %v2005_v31 = vpop.f32.mrf.mxu1 }
 0x1e7   : > { %2429 = vst [vmem:[%s3265_s29 + $0x1a0] sm:$0xff] %v2365_v28  ;;  %v2302_v32 = vadd.f32 %v3257_v9, %v2004_v29  ;;  %v1719_v33 = vpop.f32.mrf.mxu0 }
 0x1e8   : > { %v2008_v34 = vpop.f32.mrf.mxu1 }
 0x1e9   : > { %v2366_v35 = vmax.f32 %v2302_v32, 0.0  ;;  %v2009_v36 = vadd.f32 %v2008_v34, %v1719_v33  ;;  %v1721_v37 = vpop.f32.mrf.mxu0 }
 0x1ea   : > { %v2010_v38 = vpop.f32.mrf.mxu1 }
 0x1eb   : > { %2430 = vst [vmem:[%s3265_s29 + $0x1a8] sm:$0xff] %v2366_v35  ;;  %v2303_v39 = vadd.f32 %v3257_v9, %v2009_v36  ;;  %v1722_v40 = vpop.f32.mrf.mxu0 }
 0x1ec   : > { %v2011_v41 = vpop.f32.mrf.mxu1 }
 0x1ed   : > { %v2367_v42 = vmax.f32 %v2303_v39, 0.0  ;;  %v2012_v43 = vadd.f32 %v2011_v41, %v1722_v40  ;;  %v1724_v44 = vpop.f32.mrf.mxu0 }
 0x1ee   : > { %v2013_v45 = vpop.f32.mrf.mxu1 }
 0x1ef   : > { %2431 = vst [vmem:[%s3265_s29 + $0x1b0] sm:$0xff] %v2367_v42  ;;  %v2304_v46 = vadd.f32 %v3257_v9, %v2012_v43  ;;  %v1727_v47 = vpop.f32.mrf.mxu0 }
 0x1f0   : > { %v2016_v48 = vpop.f32.mrf.mxu1 }
 0x1f1   : > { %v2368_v49 = vmax.f32 %v2304_v46, 0.0  ;;  %v2017_v50 = vadd.f32 %v2016_v48, %v1727_v47  ;;  %v1729_v51 = vpop.f32.mrf.mxu0 }
 0x1f2   : > { %v2018_v52 = vpop.f32.mrf.mxu1 }
 0x1f3   : > { %2432 = vst [vmem:[%s3265_s29 + $0x1b8] sm:$0xff] %v2368_v49  ;;  %v2305_v53 = vadd.f32 %v3257_v9, %v2017_v50  ;;  %v1730_v54 = vpop.f32.mrf.mxu0 }
 0x1f4   : > { %v2019_v55 = vpop.f32.mrf.mxu1 }
 0x1f5   : > { %v2369_v56 = vmax.f32 %v2305_v53, 0.0  ;;  %v2020_v57 = vadd.f32 %v2019_v55, %v1730_v54  ;;  %v1732_v58 = vpop.f32.mrf.mxu0 }
 0x1f6   : > { %v2021_v59 = vpop.f32.mrf.mxu1 }
 0x1f7   : > { %2433 = vst [vmem:[%s3265_s29 + $0x1c0] sm:$0xff] %v2369_v56  ;;  %v2306_v61 = vadd.f32 %v3010_v60, %v2020_v57  ;;  %v1735_v62 = vpop.f32.mrf.mxu0 }
 0x1f8   : > { %v2024_v63 = vpop.f32.mrf.mxu1 }
 0x1f9   : > { %v2370_v0 = vmax.f32 %v2306_v61, 0.0  ;;  %v2025_v1 = vadd.f32 %v2024_v63, %v1735_v62  ;;  %v1737_v2 = vpop.f32.mrf.mxu0 }
 0x1fa   : > { %v2026_v9 = vpop.f32.mrf.mxu1 }
 0x1fb   : > { %2434 = vst [vmem:[%s3265_s29 + $0x1c8] sm:$0xff] %v2370_v0  ;;  %v2307_v3 = vadd.f32 %v3010_v60, %v2025_v1  ;;  %v1738_v4 = vpop.f32.mrf.mxu0 }
 0x1fc   : > { %v2027_v5 = vpop.f32.mrf.mxu1 }
 0x1fd   : > { %v2371_v6 = vmax.f32 %v2307_v3, 0.0  ;;  %v2028_v7 = vadd.f32 %v2027_v5, %v1738_v4  ;;  %v1740_v8 = vpop.f32.mrf.mxu0 }
 0x1fe   : > { %v2029_v10 = vpop.f32.mrf.mxu1 }
 0x1ff   : > { %2435 = vst [vmem:[%s3265_s29 + $0x1d0] sm:$0xff] %v2371_v6  ;;  %v2308_v11 = vadd.f32 %v3010_v60, %v2028_v7  ;;  %v1743_v12 = vpop.f32.mrf.mxu0 }
 0x200   : > { %v2032_v13 = vpop.f32.mrf.mxu1 }
 0x201   : > { %v2372_v14 = vmax.f32 %v2308_v11, 0.0  ;;  %v2033_v15 = vadd.f32 %v2032_v13, %v1743_v12  ;;  %v1745_v16 = vpop.f32.mrf.mxu0 }
 0x202   : > { %v2034_v17 = vpop.f32.mrf.mxu1 }
 0x203   : > { %2436 = vst [vmem:[%s3265_s29 + $0x1d8] sm:$0xff] %v2372_v14  ;;  %v2309_v18 = vadd.f32 %v3010_v60, %v2033_v15  ;;  %v1746_v19 = vpop.f32.mrf.mxu0 }
 0x204   : > { %v2035_v20 = vpop.f32.mrf.mxu1 }
 0x205   : > { %v2373_v21 = vmax.f32 %v2309_v18, 0.0  ;;  %v2036_v22 = vadd.f32 %v2035_v20, %v1746_v19  ;;  %v1748_v23 = vpop.f32.mrf.mxu0 }
 0x206   : > { %v2037_v24 = vpop.f32.mrf.mxu1 }
 0x207   : > { %2437 = vst [vmem:[%s3265_s29 + $0x1e0] sm:$0xff] %v2373_v21  ;;  %v2310_v25 = vadd.f32 %v3010_v60, %v2036_v22  ;;  %v1751_v26 = vpop.f32.mrf.mxu0 }
 0x208   : > { %v2040_v27 = vpop.f32.mrf.mxu1 }
 0x209   : > { %v2374_v28 = vmax.f32 %v2310_v25, 0.0  ;;  %v2041_v29 = vadd.f32 %v2040_v27, %v1751_v26  ;;  %v1753_v30 = vpop.f32.mrf.mxu0 }
 0x20a   : > { %v2042_v31 = vpop.f32.mrf.mxu1 }
 0x20b   : > { %2438 = vst [vmem:[%s3265_s29 + $0x1e8] sm:$0xff] %v2374_v28  ;;  %v2311_v32 = vadd.f32 %v3010_v60, %v2041_v29  ;;  %v1754_v33 = vpop.f32.mrf.mxu0 }
 0x20c   : > { %v2043_v34 = vpop.f32.mrf.mxu1 }
 0x20d   : > { %v2375_v35 = vmax.f32 %v2311_v32, 0.0  ;;  %v2044_v36 = vadd.f32 %v2043_v34, %v1754_v33  ;;  %v1756_v37 = vpop.f32.mrf.mxu0 }
 0x20e   : > { %v2045_v38 = vpop.f32.mrf.mxu1 }
 0x20f   : > { %2439 = vst [vmem:[%s3265_s29 + $0x1f0] sm:$0xff] %v2375_v35  ;;  %v2312_v39 = vadd.f32 %v3010_v60, %v2044_v36 }
 0x211   : > { %v2376_v40 = vmax.f32 %v2312_v39, 0.0 }
 0x213   : > { %2440 = vst [vmem:[%s3265_s29 + $0x1f8] sm:$0xff] %v2376_v40 }
 0x214 PF: > { %s13_s14 = sadd.s32 1, %s3033_s14   ;;  %s3428_s12 = smov %s3029_s13 }
 0x215   : > { %p10_p5 = scmp.ge.s32.totalorder %s13_s14, 6   ;;  %s3429_s13 = smov %s3431_s15 }
 0x217   :  { %12 = sbr.rel (!%p10_p5) target bundleno = 2 (0x2), region = 76 }

// kernel: _lambda_.9
= control target key start
LH: loop header
LB: loop body
LE: loop exit
PB: predicated region body
PF: predicated region fallthrough
CT: control target
= control target key end

     0   :  { %s6545_s12 = smov 0   ;;  %s6547_s13 = smov 0   ;;  %s7431_s0 = inlined_call_operand.vmem [shape: bf16[4,2048,256], index: 0, kind: input, shape index: {}]   ;;  %s7432_s1 = inlined_call_operand.vmem [shape: bf16[4,256,128], index: 1, kind: input, shape index: {}]   ;;  %s7433_s2 = inlined_call_operand.vmem [shape: f32[1,128], index: 2, kind: input, shape index: {}]   ;;  %s7434_s3 = inlined_call_operand.vmem [shape: f32[4,2048,128], index: 3, kind: output, shape index: {}]  }
   0x1   :  { %s6549_s14 = smov 0  }
   0x2 LB: > { %s39_s15 = sadd.s32 1, %s6518_s13  ;;  %p5243_p0 = scmp.ge.s32.totalorder %s6522_s14, 1  ;;  %s6522_s14 = sphi %s6549_s14, %s13_s14   ;;  %s6518_s13 = sphi %s6547_s13, %s7436_s13   ;;  %s6514_s12 = sphi %s6545_s12, %s7435_s12  }
   0x3   : > { %p41_p1 = scmp.ge.s32.totalorder %s39_s15, 4  ;;  %p212_p2 = scmp.lt.s32.totalorder %s6522_s14, 5 }
   0x5   : > { %s7438_s15 = smov (%p41_p1, %s39_s15), 0  ;;  %p213_p3 = pnand %p5243_p0, %p212_p2 }
   0x6   : > { %p269_p4 = scmp.lt.s32.totalorder (!%p213_p3), %s6514_s12, 3 }
   0x7   : > { %216 = sbr.rel (%p213_p3) target bundleno = 798 (0x31e), region = 32 }
   0xc   : > { %v6524_v0 = vmov 0   ;;  %s7440_s12 = smov (!%p269_p4, %s6514_s12), 3 }
   0xd   : > { %2493 = vmatprep.subr.bf16.mxu0 %v6524_v0  ;;  %5528 = vmatprep.subr.bf16.mxu1 %v6524_v0  ;;  %s5526_s16 = sshll.u32 %s7440_s12, 7  ;;  %s5525_s20 = sshll.u32 %s7440_s12, 11 }
   0xe   : > { %s6571_s19 = scalar_lea.vmem %s7432_s1, %s5526_s16  ;;  %s6590_s23 = scalar_lea.vmem %s7431_s0, %s5525_s20 }
   0xf   : > { %v5585_v1 = vld [vmem:[%s6571_s19 + $0x38] sm:$0xff]   ;;  %v5586_v2 = vld [vmem:[%s6571_s19 + $0x30] sm:$0xff]   ;;  %v5587_v3 = vld [vmem:[%s6571_s19 + $0x28] sm:$0xff]   ;;  %s6755_s28 = scalar_lea.vmem %s7434_s3, %s5525_s20 }
  0x10   : > { %2494 = vmatpush1.bf16.msra.mxu0 %v5585_v1  ;;  %5544 = vmatpush1.bf16.msra.mxu1 %v5585_v1  ;;  %v5588_v4 = vld [vmem:[%s6571_s19 + $0x20] sm:$0xff]   ;;  %v5589_v5 = vld [vmem:[%s6571_s19 + $0x18] sm:$0xff]   ;;  %v5590_v7 = vld [vmem:[%s6571_s19 + $0x10] sm:$0xff]  }
  0x11   : > { %2495 = vmatprep.subr.bf16.mxu0 %v6524_v0  ;;  %5529 = vmatprep.subr.bf16.mxu1 %v6524_v0  ;;  %v5603_v6 = vld [vmem:[%s6590_s23 + $0x4] ss:$8 sps:$4 sm:$0xff]   ;;  %v5593_v11 = vld [vmem:[%s6571_s19 + $0x78] sm:$0xff]   ;;  %v5594_v12 = vld [vmem:[%s6571_s19 + $0x70] sm:$0xff]  }
  0x12   : > { %v5606_v8 = vld [vmem:[%s6590_s23 + $0x404] ss:$8 sps:$4 sm:$0xff]   ;;  %2525 = vmatprep.mubr.bf16.mxu0 %v5603_v6  ;;  %v5597_v15 = vld [vmem:[%s6571_s19 + $0x58] sm:$0xff]   ;;  %v5598_v16 = vld [vmem:[%s6571_s19 + $0x50] sm:$0xff]  }
  0x13   : > { %3037 = vmatprep.mubr.bf16.mxu1 %v5606_v8  ;;  %v5591_v9 = vld [vmem:[%s6571_s19 + $0x8] sm:$0xff]   ;;  %v5592_v10 = vld [vmem:[%s6571_s19] sm:$0xff]   ;;  %v5607_v21 = vld [vmem:[%s6590_s23 + $0x14] ss:$8 sps:$4 sm:$0xff]  }
  0x14   : > { %2496 = vmatpush1.bf16.msra.mxu0 %v5586_v2  ;;  %5545 = vmatpush1.bf16.msra.mxu1 %v5586_v2  ;;  %v5595_v13 = vld [vmem:[%s6571_s19 + $0x68] sm:$0xff]   ;;  %v5596_v14 = vld [vmem:[%s6571_s19 + $0x60] sm:$0xff]   ;;  %v5609_v22 = vld [vmem:[%s6590_s23 + $0x414] ss:$8 sps:$4 sm:$0xff]  }
  0x15   : > { %2497 = vmatprep.subr.bf16.mxu0 %v6524_v0  ;;  %5530 = vmatprep.subr.bf16.mxu1 %v6524_v0  ;;  %v5599_v17 = vld [vmem:[%s6571_s19 + $0x48] sm:$0xff]   ;;  %v5600_v18 = vld [vmem:[%s6571_s19 + $0x40] sm:$0xff]   ;;  %v5611_v23 = vld [vmem:[%s6590_s23 + $0x10] ss:$8 sps:$4 sm:$0xff]  }
  0x16   : > { %v5601_v19 = vld [vmem:[%s6590_s23] ss:$8 sps:$4 sm:$0xff]   ;;  %v5612_v24 = vld [vmem:[%s6590_s23 + $0x410] ss:$8 sps:$4 sm:$0xff]   ;;  %v5613_v25 = vld [vmem:[%s6590_s23 + $0x24] ss:$8 sps:$4 sm:$0xff]  }
  0x17   : > { %v5604_v20 = vld [vmem:[%s6590_s23 + $0x400] ss:$8 sps:$4 sm:$0xff]   ;;  %v5615_v26 = vld [vmem:[%s6590_s23 + $0x424] ss:$8 sps:$4 sm:$0xff]   ;;  %v5619_v29 = vld [vmem:[%s6590_s23 + $0x34] ss:$8 sps:$4 sm:$0xff]  }
  0x18   : > { %2498 = vmatpush1.bf16.msra.mxu0 %v5587_v3  ;;  %5546 = vmatpush1.bf16.msra.mxu1 %v5587_v3  ;;  %v5617_v27 = vld [vmem:[%s6590_s23 + $0x20] ss:$8 sps:$4 sm:$0xff]   ;;  %v5621_v30 = vld [vmem:[%s6590_s23 + $0x434] ss:$8 sps:$4 sm:$0xff]   ;;  %v5623_v31 = vld [vmem:[%s6590_s23 + $0x30] ss:$8 sps:$4 sm:$0xff]  }
  0x19   : > { %2499 = vmatprep.subr.bf16.mxu0 %v6524_v0  ;;  %5531 = vmatprep.subr.bf16.mxu1 %v6524_v0  ;;  %v5618_v28 = vld [vmem:[%s6590_s23 + $0x420] ss:$8 sps:$4 sm:$0xff]   ;;  %v5624_v32 = vld [vmem:[%s6590_s23 + $0x430] ss:$8 sps:$4 sm:$0xff]   ;;  %v5625_v33 = vld [vmem:[%s6590_s23 + $0x44] ss:$8 sps:$4 sm:$0xff]  }
  0x1a   : > { %v5627_v34 = vld [vmem:[%s6590_s23 + $0x444] ss:$8 sps:$4 sm:$0xff]   ;;  %v5629_v35 = vld [vmem:[%s6590_s23 + $0x40] ss:$8 sps:$4 sm:$0xff]   ;;  %v5631_v37 = vld [vmem:[%s6590_s23 + $0x54] ss:$8 sps:$4 sm:$0xff]  }
  0x1b   : > { %v5630_v36 = vld [vmem:[%s6590_s23 + $0x440] ss:$8 sps:$4 sm:$0xff]   ;;  %v5633_v38 = vld [vmem:[%s6590_s23 + $0x454] ss:$8 sps:$4 sm:$0xff]   ;;  %v5635_v39 = vld [vmem:[%s6590_s23 + $0x50] ss:$8 sps:$4 sm:$0xff]  }
  0x1c   : > { %2500 = vmatpush1.bf16.msra.mxu0 %v5588_v4  ;;  %5547 = vmatpush1.bf16.msra.mxu1 %v5588_v4  ;;  %v5636_v40 = vld [vmem:[%s6590_s23 + $0x450] ss:$8 sps:$4 sm:$0xff]   ;;  %v5637_v41 = vld [vmem:[%s6590_s23 + $0x64] ss:$8 sps:$4 sm:$0xff]   ;;  %v5641_v43 = vld [vmem:[%s6590_s23 + $0x60] ss:$8 sps:$4 sm:$0xff]  }
  0x1d   : > { %2501 = vmatprep.subr.bf16.mxu0 %v6524_v0  ;;  %5532 = vmatprep.subr.bf16.mxu1 %v6524_v0  ;;  %v5639_v42 = vld [vmem:[%s6590_s23 + $0x464] ss:$8 sps:$4 sm:$0xff]   ;;  %v5642_v44 = vld [vmem:[%s6590_s23 + $0x460] ss:$8 sps:$4 sm:$0xff]   ;;  %v5643_v45 = vld [vmem:[%s6590_s23 + $0x74] ss:$8 sps:$4 sm:$0xff]  }
  0x1e   : > { %v5645_v46 = vld [vmem:[%s6590_s23 + $0x474] ss:$8 sps:$4 sm:$0xff]   ;;  %v5647_v47 = vld [vmem:[%s6590_s23 + $0x70] ss:$8 sps:$4 sm:$0xff]   ;;  %v5649_v49 = vld [vmem:[%s6590_s23 + $0x84] ss:$8 sps:$4 sm:$0xff]  }
  0x1f   : > { %v5648_v48 = vld [vmem:[%s6590_s23 + $0x470] ss:$8 sps:$4 sm:$0xff]   ;;  %v5651_v50 = vld [vmem:[%s6590_s23 + $0x484] ss:$8 sps:$4 sm:$0xff]   ;;  %v5653_v51 = vld [vmem:[%s6590_s23 + $0x80] ss:$8 sps:$4 sm:$0xff]  }
  0x20   : > { %2502 = vmatpush1.bf16.msra.mxu0 %v5589_v5  ;;  %5548 = vmatpush1.bf16.msra.mxu1 %v5589_v5  ;;  %v5654_v52 = vld [vmem:[%s6590_s23 + $0x480] ss:$8 sps:$4 sm:$0xff]   ;;  %v5655_v53 = vld [vmem:[%s6590_s23 + $0x94] ss:$8 sps:$4 sm:$0xff]   ;;  %v5659_v55 = vld [vmem:[%s6590_s23 + $0x90] ss:$8 sps:$4 sm:$0xff]  }
  0x21   : > { %2503 = vmatprep.subr.bf16.mxu0 %v6524_v0  ;;  %5533 = vmatprep.subr.bf16.mxu1 %v6524_v0  ;;  %v5657_v54 = vld [vmem:[%s6590_s23 + $0x494] ss:$8 sps:$4 sm:$0xff]   ;;  %v5660_v56 = vld [vmem:[%s6590_s23 + $0x490] ss:$8 sps:$4 sm:$0xff]   ;;  %v5661_v57 = vld [vmem:[%s6590_s23 + $0xa4] ss:$8 sps:$4 sm:$0xff]  }
  0x22   : > { %v5663_v58 = vld [vmem:[%s6590_s23 + $0x4a4] ss:$8 sps:$4 sm:$0xff]   ;;  %v5665_v59 = vld [vmem:[%s6590_s23 + $0xa0] ss:$8 sps:$4 sm:$0xff]   ;;  %v5667_v61 = vld [vmem:[%s6590_s23 + $0xb4] ss:$8 sps:$4 sm:$0xff]  }
  0x23   : > { %v5666_v60 = vld [vmem:[%s6590_s23 + $0x4a0] ss:$8 sps:$4 sm:$0xff]   ;;  %v5669_v62 = vld [vmem:[%s6590_s23 + $0x4b4] ss:$8 sps:$4 sm:$0xff]   ;;  %v5671_v63 = vld [vmem:[%s6590_s23 + $0xb0] ss:$8 sps:$4 sm:$0xff]  }
  0x24   : > { %2504 = vmatpush1.bf16.msra.mxu0 %v5590_v7  ;;  %5549 = vmatpush1.bf16.msra.mxu1 %v5590_v7  ;;  %v5673_v1 = vld [vmem:[%s6590_s23 + $0xc4] ss:$8 sps:$4 sm:$0xff]   ;;  %v5677_v3 = vld [vmem:[%s6590_s23 + $0xc0] ss:$8 sps:$4 sm:$0xff]   ;;  %v5679_v5 = vld [vmem:[%s6590_s23 + $0xd4] ss:$8 sps:$4 sm:$0xff]  }
  0x25   : > { %2505 = vmatprep.subr.bf16.mxu0 %v6524_v0  ;;  %5534 = vmatprep.subr.bf16.mxu1 %v6524_v0  ;;  %v5675_v2 = vld [vmem:[%s6590_s23 + $0x4c4] ss:$8 sps:$4 sm:$0xff]   ;;  %v5678_v4 = vld [vmem:[%s6590_s23 + $0x4c0] ss:$8 sps:$4 sm:$0xff]   ;;  %v5681_v6 = vld [vmem:[%s6590_s23 + $0x4d4] ss:$8 sps:$4 sm:$0xff]  }
  0x26   : > { %v5683_v7 = vld [vmem:[%s6590_s23 + $0xd0] ss:$8 sps:$4 sm:$0xff]  }
  0x27   : > { %v5684_v8 = vld [vmem:[%s6590_s23 + $0x4d0] ss:$8 sps:$4 sm:$0xff]  }
  0x28   : > { %2506 = vmatpush1.bf16.msra.mxu0 %v5591_v9  ;;  %5550 = vmatpush1.bf16.msra.mxu1 %v5591_v9  ;;  %v5685_v9 = vld [vmem:[%s6590_s23 + $0xe4] ss:$8 sps:$4 sm:$0xff]  }
  0x29   : > { %2507 = vmatprep.subr.bf16.mxu0 %v6524_v0  ;;  %5535 = vmatprep.subr.bf16.mxu1 %v6524_v0 }
  0x2c   : > { %2508 = vmatpush1.bf16.msra.mxu0 %v5592_v10  ;;  %5551 = vmatpush1.bf16.msra.mxu1 %v5592_v10  ;;  %v5687_v10 = vld [vmem:[%s6590_s23 + $0x4e4] ss:$8 sps:$4 sm:$0xff]  }
  0x2d   : > { %2509 = vmatprep.subr.bf16.mxu0 %v6524_v0  ;;  %5536 = vmatprep.subr.bf16.mxu1 %v6524_v0 }
  0x30   : > { %2510 = vmatpush2.bf16.msra.mxu0 %v5593_v11  ;;  %5552 = vmatpush2.bf16.msra.mxu1 %v5593_v11  ;;  %v5689_v11 = vld [vmem:[%s6590_s23 + $0xe0] ss:$8 sps:$4 sm:$0xff]  }
  0x31   : > { %2511 = vmatprep.subr.bf16.mxu0 %v6524_v0  ;;  %5537 = vmatprep.subr.bf16.mxu1 %v6524_v0 }
  0x34   : > { %2512 = vmatpush2.bf16.msra.mxu0 %v5594_v12  ;;  %5553 = vmatpush2.bf16.msra.mxu1 %v5594_v12  ;;  %v5690_v12 = vld [vmem:[%s6590_s23 + $0x4e0] ss:$8 sps:$4 sm:$0xff]  }
  0x35   : > { %2513 = vmatprep.subr.bf16.mxu0 %v6524_v0  ;;  %5538 = vmatprep.subr.bf16.mxu1 %v6524_v0 }
  0x38   : > { %2514 = vmatpush2.bf16.msra.mxu0 %v5595_v13  ;;  %5554 = vmatpush2.bf16.msra.mxu1 %v5595_v13  ;;  %v5691_v13 = vld [vmem:[%s6590_s23 + $0xf4] ss:$8 sps:$4 sm:$0xff]  }
  0x39   : > { %2515 = vmatprep.subr.bf16.mxu0 %v6524_v0  ;;  %5539 = vmatprep.subr.bf16.mxu1 %v6524_v0 }
  0x3c   : > { %2516 = vmatpush2.bf16.msra.mxu0 %v5596_v14  ;;  %5555 = vmatpush2.bf16.msra.mxu1 %v5596_v14  ;;  %v5693_v14 = vld [vmem:[%s6590_s23 + $0x4f4] ss:$8 sps:$4 sm:$0xff]  }
  0x3d   : > { %2517 = vmatprep.subr.bf16.mxu0 %v6524_v0  ;;  %5540 = vmatprep.subr.bf16.mxu1 %v6524_v0 }
  0x40   : > { %2518 = vmatpush2.bf16.msra.mxu0 %v5597_v15  ;;  %5556 = vmatpush2.bf16.msra.mxu1 %v5597_v15  ;;  %v5695_v15 = vld [vmem:[%s6590_s23 + $0xf0] ss:$8 sps:$4 sm:$0xff]  }
  0x41   : > { %2519 = vmatprep.subr.bf16.mxu0 %v6524_v0  ;;  %5541 = vmatprep.subr.bf16.mxu1 %v6524_v0 }
  0x44   : > { %2520 = vmatpush2.bf16.msra.mxu0 %v5598_v16  ;;  %5557 = vmatpush2.bf16.msra.mxu1 %v5598_v16  ;;  %v5696_v16 = vld [vmem:[%s6590_s23 + $0x4f0] ss:$8 sps:$4 sm:$0xff]  }
  0x45   : > { %2521 = vmatprep.subr.bf16.mxu0 %v6524_v0  ;;  %5542 = vmatprep.subr.bf16.mxu1 %v6524_v0 }
  0x48   : > { %2522 = vmatpush2.bf16.msra.mxu0 %v5599_v17  ;;  %5558 = vmatpush2.bf16.msra.mxu1 %v5599_v17  ;;  %v5697_v17 = vld [vmem:[%s6590_s23 + $0x104] ss:$8 sps:$4 sm:$0xff]  }
  0x49   : > { %2523 = vmatprep.subr.bf16.mxu0 %v6524_v0  ;;  %5543 = vmatprep.subr.bf16.mxu1 %v6524_v0  ;;  %v5672_v0 = vld [vmem:[%s6590_s23 + $0x4b0] ss:$8 sps:$4 sm:$0xff]  }
  0x4c   : > { %2524 = vmatpush2.bf16.msra.mxu0 %v5600_v18  ;;  %5559 = vmatpush2.bf16.msra.mxu1 %v5600_v18  ;;  %v5699_v18 = vld [vmem:[%s6590_s23 + $0x504] ss:$8 sps:$4 sm:$0xff]  }
  0x4f   : > { %2526 = vmatmul.mubr.bf16.vlgmr.msra.gmra.mxu0 %v5601_v19  ;;  %3038 = vmatmul.mubr.bf16.vlgmr.msra.gmra.mxu1 %v5604_v20  ;;  %v5701_v19 = vld [vmem:[%s6590_s23 + $0x100] ss:$8 sps:$4 sm:$0xff]  }
  0x50   : > { %2533 = vmatprep.mubr.bf16.mxu0 %v5607_v21  ;;  %3045 = vmatprep.mubr.bf16.mxu1 %v5609_v22  ;;  %v5702_v20 = vld [vmem:[%s6590_s23 + $0x500] ss:$8 sps:$4 sm:$0xff]   ;;  %v5703_v21 = vld [vmem:[%s6590_s23 + $0x114] ss:$8 sps:$4 sm:$0xff]  }
  0x51   : > { %v5705_v22 = vld [vmem:[%s6590_s23 + $0x514] ss:$8 sps:$4 sm:$0xff]  }
  0x57   : > { %2534 = vmatmul.mubr.bf16.gmra.mxu0 %v5611_v23  ;;  %3046 = vmatmul.mubr.bf16.gmra.mxu1 %v5612_v24  ;;  %v5707_v23 = vld [vmem:[%s6590_s23 + $0x110] ss:$8 sps:$4 sm:$0xff]  }
  0x58   : > { %2541 = vmatprep.mubr.bf16.mxu0 %v5613_v25  ;;  %3053 = vmatprep.mubr.bf16.mxu1 %v5615_v26  ;;  %v5708_v24 = vld [vmem:[%s6590_s23 + $0x510] ss:$8 sps:$4 sm:$0xff]   ;;  %v5709_v25 = vld [vmem:[%s6590_s23 + $0x124] ss:$8 sps:$4 sm:$0xff]  }
  0x59   : > { %v5711_v26 = vld [vmem:[%s6590_s23 + $0x524] ss:$8 sps:$4 sm:$0xff]  }
  0x5f   : > { %2542 = vmatmul.mubr.bf16.gmra.mxu0 %v5617_v27  ;;  %3054 = vmatmul.mubr.bf16.gmra.mxu1 %v5618_v28  ;;  %v5713_v27 = vld [vmem:[%s6590_s23 + $0x120] ss:$8 sps:$4 sm:$0xff]  }
  0x60   : > { %2549 = vmatprep.mubr.bf16.mxu0 %v5619_v29  ;;  %3061 = vmatprep.mubr.bf16.mxu1 %v5621_v30  ;;  %v5714_v28 = vld [vmem:[%s6590_s23 + $0x520] ss:$8 sps:$4 sm:$0xff]   ;;  %v5715_v29 = vld [vmem:[%s6590_s23 + $0x134] ss:$8 sps:$4 sm:$0xff]  }
  0x61   : > { %v5717_v30 = vld [vmem:[%s6590_s23 + $0x534] ss:$8 sps:$4 sm:$0xff]  }
  0x67   : > { %2550 = vmatmul.mubr.bf16.gmra.mxu0 %v5623_v31  ;;  %3062 = vmatmul.mubr.bf16.gmra.mxu1 %v5624_v32  ;;  %v5719_v31 = vld [vmem:[%s6590_s23 + $0x130] ss:$8 sps:$4 sm:$0xff]  }
  0x68   : > { %2557 = vmatprep.mubr.bf16.mxu0 %v5625_v33  ;;  %3069 = vmatprep.mubr.bf16.mxu1 %v5627_v34  ;;  %v5720_v32 = vld [vmem:[%s6590_s23 + $0x530] ss:$8 sps:$4 sm:$0xff]   ;;  %v5721_v33 = vld [vmem:[%s6590_s23 + $0x144] ss:$8 sps:$4 sm:$0xff]  }
  0x69   : > { %v5723_v34 = vld [vmem:[%s6590_s23 + $0x544] ss:$8 sps:$4 sm:$0xff]  }
  0x6f   : > { %2558 = vmatmul.mubr.bf16.gmra.mxu0 %v5629_v35  ;;  %3070 = vmatmul.mubr.bf16.gmra.mxu1 %v5630_v36  ;;  %v5725_v35 = vld [vmem:[%s6590_s23 + $0x140] ss:$8 sps:$4 sm:$0xff]  }
  0x70   : > { %2565 = vmatprep.mubr.bf16.mxu0 %v5631_v37  ;;  %3077 = vmatprep.mubr.bf16.mxu1 %v5633_v38  ;;  %v5726_v36 = vld [vmem:[%s6590_s23 + $0x540] ss:$8 sps:$4 sm:$0xff]   ;;  %v5727_v37 = vld [vmem:[%s6590_s23 + $0x154] ss:$8 sps:$4 sm:$0xff]  }
  0x71   : > { %v5729_v38 = vld [vmem:[%s6590_s23 + $0x554] ss:$8 sps:$4 sm:$0xff]  }
  0x77   : > { %2566 = vmatmul.mubr.bf16.gmra.mxu0 %v5635_v39  ;;  %3078 = vmatmul.mubr.bf16.gmra.mxu1 %v5636_v40  ;;  %v5731_v39 = vld [vmem:[%s6590_s23 + $0x150] ss:$8 sps:$4 sm:$0xff]  }
  0x78   : > { %2573 = vmatprep.mubr.bf16.mxu0 %v5637_v41  ;;  %3085 = vmatprep.mubr.bf16.mxu1 %v5639_v42  ;;  %v5732_v40 = vld [vmem:[%s6590_s23 + $0x550] ss:$8 sps:$4 sm:$0xff]   ;;  %v5733_v41 = vld [vmem:[%s6590_s23 + $0x164] ss:$8 sps:$4 sm:$0xff]  }
  0x79   : > { %v5735_v42 = vld [vmem:[%s6590_s23 + $0x564] ss:$8 sps:$4 sm:$0xff]  }
  0x7f   : > { %2574 = vmatmul.mubr.bf16.gmra.mxu0 %v5641_v43  ;;  %3086 = vmatmul.mubr.bf16.gmra.mxu1 %v5642_v44  ;;  %v5737_v43 = vld [vmem:[%s6590_s23 + $0x160] ss:$8 sps:$4 sm:$0xff]  }
  0x80   : > { %2581 = vmatprep.mubr.bf16.mxu0 %v5643_v45  ;;  %3093 = vmatprep.mubr.bf16.mxu1 %v5645_v46  ;;  %v5738_v44 = vld [vmem:[%s6590_s23 + $0x560] ss:$8 sps:$4 sm:$0xff]   ;;  %v5739_v45 = vld [vmem:[%s6590_s23 + $0x174] ss:$8 sps:$4 sm:$0xff]  }
  0x81   : > { %v5741_v46 = vld [vmem:[%s6590_s23 + $0x574] ss:$8 sps:$4 sm:$0xff]  }
  0x87   : > { %2582 = vmatmul.mubr.bf16.gmra.mxu0 %v5647_v47  ;;  %3094 = vmatmul.mubr.bf16.gmra.mxu1 %v5648_v48  ;;  %v5743_v47 = vld [vmem:[%s6590_s23 + $0x170] ss:$8 sps:$4 sm:$0xff]  }
  0x88   : > { %2589 = vmatprep.mubr.bf16.mxu0 %v5649_v49  ;;  %3101 = vmatprep.mubr.bf16.mxu1 %v5651_v50  ;;  %v5744_v48 = vld [vmem:[%s6590_s23 + $0x570] ss:$8 sps:$4 sm:$0xff]   ;;  %v5745_v49 = vld [vmem:[%s6590_s23 + $0x184] ss:$8 sps:$4 sm:$0xff]  }
  0x89   : > { %v5747_v50 = vld [vmem:[%s6590_s23 + $0x584] ss:$8 sps:$4 sm:$0xff]  }
  0x8f   : > { %2590 = vmatmul.mubr.bf16.gmra.mxu0 %v5653_v51  ;;  %3102 = vmatmul.mubr.bf16.gmra.mxu1 %v5654_v52  ;;  %v5749_v51 = vld [vmem:[%s6590_s23 + $0x180] ss:$8 sps:$4 sm:$0xff]  }
  0x90   : > { %2597 = vmatprep.mubr.bf16.mxu0 %v5655_v53  ;;  %3109 = vmatprep.mubr.bf16.mxu1 %v5657_v54  ;;  %v5750_v52 = vld [vmem:[%s6590_s23 + $0x580] ss:$8 sps:$4 sm:$0xff]   ;;  %v5751_v53 = vld [vmem:[%s6590_s23 + $0x194] ss:$8 sps:$4 sm:$0xff]  }
  0x91   : > { %v5753_v54 = vld [vmem:[%s6590_s23 + $0x594] ss:$8 sps:$4 sm:$0xff]  }
  0x97   : > { %2598 = vmatmul.mubr.bf16.gmra.mxu0 %v5659_v55  ;;  %3110 = vmatmul.mubr.bf16.gmra.mxu1 %v5660_v56  ;;  %v6732_v55 = vld [vmem:[%s7433_s2] ss:$0 sm:$0xff] }
  0x98   : > { %2605 = vmatprep.mubr.bf16.mxu0 %v5661_v57  ;;  %3117 = vmatprep.mubr.bf16.mxu1 %v5663_v58 }
  0x9f   : > { %2606 = vmatmul.mubr.bf16.gmra.mxu0 %v5665_v59  ;;  %3118 = vmatmul.mubr.bf16.gmra.mxu1 %v5666_v60 }
  0xa0   : > { %2613 = vmatprep.mubr.bf16.mxu0 %v5667_v61  ;;  %3125 = vmatprep.mubr.bf16.mxu1 %v5669_v62 }
  0xa7   : > { %2614 = vmatmul.mubr.bf16.gmra.mxu0 %v5671_v63  ;;  %3126 = vmatmul.mubr.bf16.gmra.mxu1 %v5672_v0  ;;  %v5755_v0 = vld [vmem:[%s6590_s23 + $0x190] ss:$8 sps:$4 sm:$0xff]  }
  0xa8   : > { %2621 = vmatprep.mubr.bf16.mxu0 %v5673_v1  ;;  %3133 = vmatprep.mubr.bf16.mxu1 %v5675_v2  ;;  %v5756_v1 = vld [vmem:[%s6590_s23 + $0x590] ss:$8 sps:$4 sm:$0xff]  }
  0xaf   : > { %2622 = vmatmul.mubr.bf16.gmra.mxu0 %v5677_v3  ;;  %3134 = vmatmul.mubr.bf16.gmra.mxu1 %v5678_v4  ;;  %v5757_v4 = vld [vmem:[%s6590_s23 + $0x1a4] ss:$8 sps:$4 sm:$0xff]  }
  0xb0   : > { %2629 = vmatprep.mubr.bf16.mxu0 %v5679_v5  ;;  %3141 = vmatprep.mubr.bf16.mxu1 %v5681_v6  ;;  %v5759_v5 = vld [vmem:[%s6590_s23 + $0x5a4] ss:$8 sps:$4 sm:$0xff]  }
  0xb7   : > { %2630 = vmatmul.mubr.bf16.gmra.mxu0 %v5683_v7  ;;  %3142 = vmatmul.mubr.bf16.gmra.mxu1 %v5684_v8 }
  0xb8   : > { %2637 = vmatprep.mubr.bf16.mxu0 %v5685_v9  ;;  %3149 = vmatprep.mubr.bf16.mxu1 %v5687_v10 }
  0xbf   : > { %2638 = vmatmul.mubr.bf16.gmra.mxu0 %v5689_v11  ;;  %3150 = vmatmul.mubr.bf16.gmra.mxu1 %v5690_v12 }
  0xc0   : > { %2645 = vmatprep.mubr.bf16.mxu0 %v5691_v13  ;;  %3157 = vmatprep.mubr.bf16.mxu1 %v5693_v14 }
  0xc7   : > { %2646 = vmatmul.mubr.bf16.gmra.mxu0 %v5695_v15  ;;  %3158 = vmatmul.mubr.bf16.gmra.mxu1 %v5696_v16  ;;  %v5761_v16 = vld [vmem:[%s6590_s23 + $0x1a0] ss:$8 sps:$4 sm:$0xff]  }
  0xc8   : > { %2653 = vmatprep.mubr.bf16.mxu0 %v5697_v17  ;;  %3165 = vmatprep.mubr.bf16.mxu1 %v5699_v18  ;;  %v5762_v17 = vld [vmem:[%s6590_s23 + $0x5a0] ss:$8 sps:$4 sm:$0xff]  }
  0xcf   : > { %2654 = vmatmul.mubr.bf16.gmra.mxu0 %v5701_v19  ;;  %3166 = vmatmul.mubr.bf16.gmra.mxu1 %v5702_v20  ;;  %v5763_v20 = vld [vmem:[%s6590_s23 + $0x1b4] ss:$8 sps:$4 sm:$0xff]  }
  0xd0   : > { %2661 = vmatprep.mubr.bf16.mxu0 %v5703_v21  ;;  %3173 = vmatprep.mubr.bf16.mxu1 %v5705_v22  ;;  %v5765_v21 = vld [vmem:[%s6590_s23 + $0x5b4] ss:$8 sps:$4 sm:$0xff]  }
  0xd7   : > { %2662 = vmatmul.mubr.bf16.gmra.mxu0 %v5707_v23  ;;  %3174 = vmatmul.mubr.bf16.gmra.mxu1 %v5708_v24 }
  0xd8   : > { %2669 = vmatprep.mubr.bf16.mxu0 %v5709_v25  ;;  %3181 = vmatprep.mubr.bf16.mxu1 %v5711_v26 }
  0xdf   : > { %2670 = vmatmul.mubr.bf16.gmra.mxu0 %v5713_v27  ;;  %3182 = vmatmul.mubr.bf16.gmra.mxu1 %v5714_v28 }
  0xe0   : > { %2677 = vmatprep.mubr.bf16.mxu0 %v5715_v29  ;;  %3189 = vmatprep.mubr.bf16.mxu1 %v5717_v30 }
  0xe7   : > { %2678 = vmatmul.mubr.bf16.gmra.mxu0 %v5719_v31  ;;  %3190 = vmatmul.mubr.bf16.gmra.mxu1 %v5720_v32 }
  0xe8   : > { %2685 = vmatprep.mubr.bf16.mxu0 %v5721_v33  ;;  %3197 = vmatprep.mubr.bf16.mxu1 %v5723_v34 }
  0xef   : > { %2686 = vmatmul.mubr.bf16.gmra.mxu0 %v5725_v35  ;;  %3198 = vmatmul.mubr.bf16.gmra.mxu1 %v5726_v36  ;;  %v5767_v35 = vld [vmem:[%s6590_s23 + $0x1b0] ss:$8 sps:$4 sm:$0xff]  }
  0xf0   : > { %2693 = vmatprep.mubr.bf16.mxu0 %v5727_v37  ;;  %3205 = vmatprep.mubr.bf16.mxu1 %v5729_v38  ;;  %v5768_v36 = vld [vmem:[%s6590_s23 + $0x5b0] ss:$8 sps:$4 sm:$0xff]  }
  0xf7   : > { %2694 = vmatmul.mubr.bf16.gmra.mxu0 %v5731_v39  ;;  %3206 = vmatmul.mubr.bf16.gmra.mxu1 %v5732_v40  ;;  %v5771_v40 = vld [vmem:[%s6590_s23 + $0x1c4] ss:$8 sps:$4 sm:$0xff]  }
  0xf8   : > { %2701 = vmatprep.mubr.bf16.mxu0 %v5733_v41  ;;  %3213 = vmatprep.mubr.bf16.mxu1 %v5735_v42  ;;  %v5774_v41 = vld [vmem:[%s6590_s23 + $0x5c4] ss:$8 sps:$4 sm:$0xff]  }
  0xff   : > { %2702 = vmatmul.mubr.bf16.gmra.mxu0 %v5737_v43  ;;  %3214 = vmatmul.mubr.bf16.gmra.mxu1 %v5738_v44 }
 0x100   : > { %2709 = vmatprep.mubr.bf16.mxu0 %v5739_v45  ;;  %3221 = vmatprep.mubr.bf16.mxu1 %v5741_v46 }
 0x107   : > { %2710 = vmatmul.mubr.bf16.gmra.mxu0 %v5743_v47  ;;  %3222 = vmatmul.mubr.bf16.gmra.mxu1 %v5744_v48 }
 0x108   : > { %2717 = vmatprep.mubr.bf16.mxu0 %v5745_v49  ;;  %3229 = vmatprep.mubr.bf16.mxu1 %v5747_v50 }
 0x10f   : > { %v2527_v56 = vpop.f32.mrf.mxu0  ;;  %2718 = vmatmul.mubr.bf16.gmra.mxu0 %v5749_v51  ;;  %v3039_v57 = vpop.f32.mrf.mxu1  ;;  %3230 = vmatmul.mubr.bf16.gmra.mxu1 %v5750_v52 }
 0x110   : > { %v4328_v58 = vadd.f32 %v6732_v55, %v2527_v56  ;;  %v4456_v59 = vadd.f32 %v6732_v55, %v3039_v57  ;;  %2725 = vmatprep.mubr.bf16.mxu0 %v5751_v53  ;;  %3237 = vmatprep.mubr.bf16.mxu1 %v5753_v54  ;;  %v5769_v56 = vld [vmem:[%s6590_s23 + $0x1c0] ss:$8 sps:$4 sm:$0xff]  }
 0x111   : > { %v2529_v60 = vpop.f32.mrf.mxu0  ;;  %v3041_v61 = vpop.f32.mrf.mxu1  ;;  %v5772_v57 = vld [vmem:[%s6590_s23 + $0x5c0] ss:$8 sps:$4 sm:$0xff]  }
 0x112   : > { %5985 = vtanh.f32 %v4328_v58  ;;  %v5777_v61 = vld [vmem:[%s6590_s23 + $0x1d4] ss:$8 sps:$4 sm:$0xff]  }
 0x113   : > { %5987 = vtanh.f32 %v4456_v59  ;;  %v2530_v62 = vpop.f32.mrf.mxu0  ;;  %v3042_v63 = vpop.f32.mrf.mxu1 }
 0x114   : > { %v4329_v2 = vadd.f32 %v6732_v55, %v2530_v62  ;;  %v4457_v3 = vadd.f32 %v6732_v55, %v3042_v63  ;;  %v5780_v62 = vld [vmem:[%s6590_s23 + $0x5d4] ss:$8 sps:$4 sm:$0xff]  }
 0x115   : > { %v2532_v6 = vpop.f32.mrf.mxu0  ;;  %v3044_v7 = vpop.f32.mrf.mxu1 }
 0x116   : > { %5989 = vtanh.f32 %v4329_v2 }
 0x117   : > { %5991 = vtanh.f32 %v4457_v3  ;;  %v2535_v8 = vpop.f32.mrf.mxu0  ;;  %2726 = vmatmul.mubr.bf16.gmra.mxu0 %v5755_v0  ;;  %v3047_v9 = vpop.f32.mrf.mxu1  ;;  %3238 = vmatmul.mubr.bf16.gmra.mxu1 %v5756_v1 }
 0x118   : > { %v4330_v10 = vadd.f32 %v6732_v55, %v2535_v8  ;;  %v4458_v11 = vadd.f32 %v6732_v55, %v3047_v9  ;;  %2733 = vmatprep.mubr.bf16.mxu0 %v5757_v4  ;;  %3245 = vmatprep.mubr.bf16.mxu1 %v5759_v5 }
 0x119   : > { %v2537_v12 = vpop.f32.mrf.mxu0  ;;  %v3049_v13 = vpop.f32.mrf.mxu1 }
 0x11a   : > { %5993 = vtanh.f32 %v4330_v10  ;;  %v5775_v12 = vld [vmem:[%s6590_s23 + $0x1d0] ss:$8 sps:$4 sm:$0xff]  }
 0x11b   : > { %5995 = vtanh.f32 %v4458_v11  ;;  %v2538_v14 = vpop.f32.mrf.mxu0  ;;  %v3050_v15 = vpop.f32.mrf.mxu1  ;;  %v5778_v13 = vld [vmem:[%s6590_s23 + $0x5d0] ss:$8 sps:$4 sm:$0xff]  }
 0x11c   : > { %v4331_v18 = vadd.f32 %v6732_v55, %v2538_v14  ;;  %v4459_v19 = vadd.f32 %v6732_v55, %v3050_v15 }
 0x11d   : > { %v2540_v22 = vpop.f32.mrf.mxu0  ;;  %v3052_v23 = vpop.f32.mrf.mxu1 }
 0x11e   : > { %5997 = vtanh.f32 %v4331_v18  ;;  %v5786_v18 = vld [vmem:[%s6590_s23 + $0x5e4] ss:$8 sps:$4 sm:$0xff]  }
 0x11f   : > { %v5986_v24 = vpop.eup %5985  ;;  %5999 = vtanh.f32 %v4459_v19  ;;  %v2543_v25 = vpop.f32.mrf.mxu0  ;;  %2734 = vmatmul.mubr.bf16.gmra.mxu0 %v5761_v16  ;;  %3246 = vmatmul.mubr.bf16.gmra.mxu1 %v5762_v17  ;;  %v5783_v17 = vld [vmem:[%s6590_s23 + $0x1e4] ss:$8 sps:$4 sm:$0xff]  }
 0x120   : > { %v3055_v26 = vpop.f32.mrf.mxu1  ;;  %v5988_v27 = vpop.eup %5987  ;;  %4840 = vst [vmem:[%s6755_s28] sm:$0xff] %v5986_v24  ;;  %v4332_v28 = vadd.f32 %v6732_v55, %v2543_v25  ;;  %2741 = vmatprep.mubr.bf16.mxu0 %v5763_v20  ;;  %3253 = vmatprep.mubr.bf16.mxu1 %v5765_v21 }
 0x121   : > { %v4460_v29 = vadd.f32 %v6732_v55, %v3055_v26  ;;  %4968 = vst [vmem:[%s6755_s28 + $0x400] sm:$0xff] %v5988_v27  ;;  %v2545_v30 = vpop.f32.mrf.mxu0 }
 0x122   : > { %v3057_v31 = vpop.f32.mrf.mxu1  ;;  %6001 = vtanh.f32 %v4332_v28 }
 0x123   : > { %v5990_v32 = vpop.eup %5989  ;;  %6003 = vtanh.f32 %v4460_v29  ;;  %v2546_v33 = vpop.f32.mrf.mxu0 }
 0x124   : > { %v3058_v34 = vpop.f32.mrf.mxu1  ;;  %v5992_v37 = vpop.eup %5991  ;;  %4841 = vst [vmem:[%s6755_s28 + $0x8] sm:$0xff] %v5990_v32  ;;  %v4333_v38 = vadd.f32 %v6732_v55, %v2546_v33  ;;  %v5781_v32 = vld [vmem:[%s6590_s23 + $0x1e0] ss:$8 sps:$4 sm:$0xff]  }
 0x125   : > { %v4461_v39 = vadd.f32 %v6732_v55, %v3058_v34  ;;  %4969 = vst [vmem:[%s6755_s28 + $0x408] sm:$0xff] %v5992_v37  ;;  %v2548_v42 = vpop.f32.mrf.mxu0  ;;  %v5784_v33 = vld [vmem:[%s6590_s23 + $0x5e0] ss:$8 sps:$4 sm:$0xff]   ;;  %v5789_v37 = vld [vmem:[%s6590_s23 + $0x1f4] ss:$8 sps:$4 sm:$0xff]  }
 0x126   : > { %v3060_v43 = vpop.f32.mrf.mxu1  ;;  %6005 = vtanh.f32 %v4333_v38  ;;  %v5792_v38 = vld [vmem:[%s6590_s23 + $0x5f4] ss:$8 sps:$4 sm:$0xff]  }
 0x127   : > { %v5994_v44 = vpop.eup %5993  ;;  %6007 = vtanh.f32 %v4461_v39  ;;  %v2551_v45 = vpop.f32.mrf.mxu0  ;;  %2742 = vmatmul.mubr.bf16.gmra.mxu0 %v5767_v35  ;;  %3254 = vmatmul.mubr.bf16.gmra.mxu1 %v5768_v36 }
 0x128   : > { %v3063_v46 = vpop.f32.mrf.mxu1  ;;  %v5996_v47 = vpop.eup %5995  ;;  %4842 = vst [vmem:[%s6755_s28 + $0x10] sm:$0xff] %v5994_v44  ;;  %v4334_v48 = vadd.f32 %v6732_v55, %v2551_v45  ;;  %2749 = vmatprep.mubr.bf16.mxu0 %v5771_v40  ;;  %3261 = vmatprep.mubr.bf16.mxu1 %v5774_v41 }
 0x129   : > { %v4462_v49 = vadd.f32 %v6732_v55, %v3063_v46  ;;  %4970 = vst [vmem:[%s6755_s28 + $0x410] sm:$0xff] %v5996_v47  ;;  %v2553_v50 = vpop.f32.mrf.mxu0 }
 0x12a   : > { %v3065_v51 = vpop.f32.mrf.mxu1  ;;  %6009 = vtanh.f32 %v4334_v48 }
 0x12b   : > { %v5998_v52 = vpop.eup %5997  ;;  %6011 = vtanh.f32 %v4462_v49  ;;  %v2554_v53 = vpop.f32.mrf.mxu0 }
 0x12c   : > { %v3066_v54 = vpop.f32.mrf.mxu1  ;;  %v6000_v58 = vpop.eup %5999  ;;  %4843 = vst [vmem:[%s6755_s28 + $0x18] sm:$0xff] %v5998_v52  ;;  %v4335_v59 = vadd.f32 %v6732_v55, %v2554_v53  ;;  %v5787_v52 = vld [vmem:[%s6590_s23 + $0x1f0] ss:$8 sps:$4 sm:$0xff]  }
 0x12d   : > { %v4463_v60 = vadd.f32 %v6732_v55, %v3066_v54  ;;  %4971 = vst [vmem:[%s6755_s28 + $0x418] sm:$0xff] %v6000_v58  ;;  %v2556_v63 = vpop.f32.mrf.mxu0  ;;  %v5790_v53 = vld [vmem:[%s6590_s23 + $0x5f0] ss:$8 sps:$4 sm:$0xff]   ;;  %v5795_v58 = vld [vmem:[%s6590_s23 + $0x204] ss:$8 sps:$4 sm:$0xff]  }
 0x12e   : > { %v3068_v0 = vpop.f32.mrf.mxu1  ;;  %6013 = vtanh.f32 %v4335_v59  ;;  %v5798_v59 = vld [vmem:[%s6590_s23 + $0x604] ss:$8 sps:$4 sm:$0xff]  }
 0x12f   : > { %v6002_v1 = vpop.eup %6001  ;;  %6015 = vtanh.f32 %v4463_v60  ;;  %v2559_v2 = vpop.f32.mrf.mxu0  ;;  %2750 = vmatmul.mubr.bf16.gmra.mxu0 %v5769_v56  ;;  %3262 = vmatmul.mubr.bf16.gmra.mxu1 %v5772_v57 }
 0x130   : > { %v3071_v3 = vpop.f32.mrf.mxu1  ;;  %v6004_v4 = vpop.eup %6003  ;;  %4844 = vst [vmem:[%s6755_s28 + $0x20] sm:$0xff] %v6002_v1  ;;  %v4336_v5 = vadd.f32 %v6732_v55, %v2559_v2  ;;  %2757 = vmatprep.mubr.bf16.mxu0 %v5777_v61  ;;  %3269 = vmatprep.mubr.bf16.mxu1 %v5780_v62 }
 0x131   : > { %v4464_v6 = vadd.f32 %v6732_v55, %v3071_v3  ;;  %4972 = vst [vmem:[%s6755_s28 + $0x420] sm:$0xff] %v6004_v4  ;;  %v2561_v7 = vpop.f32.mrf.mxu0 }
 0x132   : > { %v3073_v8 = vpop.f32.mrf.mxu1  ;;  %6017 = vtanh.f32 %v4336_v5 }
 0x133   : > { %v6006_v9 = vpop.eup %6005  ;;  %6019 = vtanh.f32 %v4464_v6  ;;  %v2562_v10 = vpop.f32.mrf.mxu0 }
 0x134   : > { %v3074_v11 = vpop.f32.mrf.mxu1  ;;  %v6008_v14 = vpop.eup %6007  ;;  %4845 = vst [vmem:[%s6755_s28 + $0x28] sm:$0xff] %v6006_v9  ;;  %v4337_v15 = vadd.f32 %v6732_v55, %v2562_v10  ;;  %v5793_v9 = vld [vmem:[%s6590_s23 + $0x200] ss:$8 sps:$4 sm:$0xff]  }
 0x135   : > { %v4465_v16 = vadd.f32 %v6732_v55, %v3074_v11  ;;  %4973 = vst [vmem:[%s6755_s28 + $0x428] sm:$0xff] %v6008_v14  ;;  %v2564_v19 = vpop.f32.mrf.mxu0  ;;  %v5796_v10 = vld [vmem:[%s6590_s23 + $0x600] ss:$8 sps:$4 sm:$0xff]   ;;  %v5801_v14 = vld [vmem:[%s6590_s23 + $0x214] ss:$8 sps:$4 sm:$0xff]  }
 0x136   : > { %v3076_v20 = vpop.f32.mrf.mxu1  ;;  %6021 = vtanh.f32 %v4337_v15  ;;  %v5804_v15 = vld [vmem:[%s6590_s23 + $0x614] ss:$8 sps:$4 sm:$0xff]  }
 0x137   : > { %v6010_v21 = vpop.eup %6009  ;;  %6023 = vtanh.f32 %v4465_v16  ;;  %v2567_v22 = vpop.f32.mrf.mxu0  ;;  %2758 = vmatmul.mubr.bf16.gmra.mxu0 %v5775_v12  ;;  %3270 = vmatmul.mubr.bf16.gmra.mxu1 %v5778_v13 }
 0x138   : > { %v3079_v23 = vpop.f32.mrf.mxu1  ;;  %v6012_v24 = vpop.eup %6011  ;;  %4846 = vst [vmem:[%s6755_s28 + $0x30] sm:$0xff] %v6010_v21  ;;  %v4338_v25 = vadd.f32 %v6732_v55, %v2567_v22  ;;  %2765 = vmatprep.mubr.bf16.mxu0 %v5783_v17  ;;  %3277 = vmatprep.mubr.bf16.mxu1 %v5786_v18 }
 0x139   : > { %v4466_v26 = vadd.f32 %v6732_v55, %v3079_v23  ;;  %4974 = vst [vmem:[%s6755_s28 + $0x430] sm:$0xff] %v6012_v24  ;;  %v2569_v27 = vpop.f32.mrf.mxu0 }
 0x13a   : > { %v3081_v28 = vpop.f32.mrf.mxu1  ;;  %6025 = vtanh.f32 %v4338_v25 }
 0x13b   : > { %v6014_v29 = vpop.eup %6013  ;;  %6027 = vtanh.f32 %v4466_v26  ;;  %v2570_v30 = vpop.f32.mrf.mxu0 }
 0x13c   : > { %v3082_v31 = vpop.f32.mrf.mxu1  ;;  %v6016_v34 = vpop.eup %6015  ;;  %4847 = vst [vmem:[%s6755_s28 + $0x38] sm:$0xff] %v6014_v29  ;;  %v4339_v35 = vadd.f32 %v6732_v55, %v2570_v30  ;;  %v5799_v29 = vld [vmem:[%s6590_s23 + $0x210] ss:$8 sps:$4 sm:$0xff]  }
 0x13d   : > { %v4467_v36 = vadd.f32 %v6732_v55, %v3082_v31  ;;  %4975 = vst [vmem:[%s6755_s28 + $0x438] sm:$0xff] %v6016_v34  ;;  %v2572_v39 = vpop.f32.mrf.mxu0  ;;  %v5802_v30 = vld [vmem:[%s6590_s23 + $0x610] ss:$8 sps:$4 sm:$0xff]   ;;  %v5807_v34 = vld [vmem:[%s6590_s23 + $0x224] ss:$8 sps:$4 sm:$0xff]  }
 0x13e   : > { %v3084_v40 = vpop.f32.mrf.mxu1  ;;  %6029 = vtanh.f32 %v4339_v35  ;;  %v5810_v35 = vld [vmem:[%s6590_s23 + $0x624] ss:$8 sps:$4 sm:$0xff]  }
 0x13f   : > { %v6018_v41 = vpop.eup %6017  ;;  %6031 = vtanh.f32 %v4467_v36  ;;  %v2575_v42 = vpop.f32.mrf.mxu0  ;;  %2766 = vmatmul.mubr.bf16.gmra.mxu0 %v5781_v32  ;;  %3278 = vmatmul.mubr.bf16.gmra.mxu1 %v5784_v33 }
 0x140   : > { %v3087_v43 = vpop.f32.mrf.mxu1  ;;  %v6020_v44 = vpop.eup %6019  ;;  %4848 = vst [vmem:[%s6755_s28 + $0x40] sm:$0xff] %v6018_v41  ;;  %v4340_v45 = vadd.f32 %v6732_v55, %v2575_v42  ;;  %2773 = vmatprep.mubr.bf16.mxu0 %v5789_v37  ;;  %3285 = vmatprep.mubr.bf16.mxu1 %v5792_v38 }
 0x141   : > { %v4468_v46 = vadd.f32 %v6732_v55, %v3087_v43  ;;  %4976 = vst [vmem:[%s6755_s28 + $0x440] sm:$0xff] %v6020_v44  ;;  %v2577_v47 = vpop.f32.mrf.mxu0 }
 0x142   : > { %v3089_v48 = vpop.f32.mrf.mxu1  ;;  %6033 = vtanh.f32 %v4340_v45 }
 0x143   : > { %v6022_v49 = vpop.eup %6021  ;;  %6035 = vtanh.f32 %v4468_v46  ;;  %v2578_v50 = vpop.f32.mrf.mxu0 }
 0x144   : > { %v3090_v51 = vpop.f32.mrf.mxu1  ;;  %v6024_v54 = vpop.eup %6023  ;;  %4849 = vst [vmem:[%s6755_s28 + $0x48] sm:$0xff] %v6022_v49  ;;  %v4341_v56 = vadd.f32 %v6732_v55, %v2578_v50  ;;  %v5805_v49 = vld [vmem:[%s6590_s23 + $0x220] ss:$8 sps:$4 sm:$0xff]  }
 0x145   : > { %v4469_v57 = vadd.f32 %v6732_v55, %v3090_v51  ;;  %4977 = vst [vmem:[%s6755_s28 + $0x448] sm:$0xff] %v6024_v54  ;;  %v2580_v60 = vpop.f32.mrf.mxu0  ;;  %v5808_v50 = vld [vmem:[%s6590_s23 + $0x620] ss:$8 sps:$4 sm:$0xff]   ;;  %v5813_v54 = vld [vmem:[%s6590_s23 + $0x234] ss:$8 sps:$4 sm:$0xff]  }
 0x146   : > { %v3092_v61 = vpop.f32.mrf.mxu1  ;;  %6037 = vtanh.f32 %v4341_v56  ;;  %v5816_v56 = vld [vmem:[%s6590_s23 + $0x634] ss:$8 sps:$4 sm:$0xff]  }
 0x147   : > { %v6026_v62 = vpop.eup %6025  ;;  %6039 = vtanh.f32 %v4469_v57  ;;  %v2583_v63 = vpop.f32.mrf.mxu0  ;;  %2774 = vmatmul.mubr.bf16.gmra.mxu0 %v5787_v52  ;;  %3286 = vmatmul.mubr.bf16.gmra.mxu1 %v5790_v53 }
 0x148   : > { %v3095_v0 = vpop.f32.mrf.mxu1  ;;  %v6028_v1 = vpop.eup %6027  ;;  %4850 = vst [vmem:[%s6755_s28 + $0x50] sm:$0xff] %v6026_v62  ;;  %v4342_v2 = vadd.f32 %v6732_v55, %v2583_v63  ;;  %2781 = vmatprep.mubr.bf16.mxu0 %v5795_v58  ;;  %3293 = vmatprep.mubr.bf16.mxu1 %v5798_v59 }
 0x149   : > { %v4470_v3 = vadd.f32 %v6732_v55, %v3095_v0  ;;  %4978 = vst [vmem:[%s6755_s28 + $0x450] sm:$0xff] %v6028_v1  ;;  %v2585_v4 = vpop.f32.mrf.mxu0 }
 0x14a   : > { %v3097_v5 = vpop.f32.mrf.mxu1  ;;  %6041 = vtanh.f32 %v4342_v2 }
 0x14b   : > { %v6030_v6 = vpop.eup %6029  ;;  %6043 = vtanh.f32 %v4470_v3  ;;  %v2586_v7 = vpop.f32.mrf.mxu0 }
 0x14c   : > { %v3098_v8 = vpop.f32.mrf.mxu1  ;;  %v6032_v11 = vpop.eup %6031  ;;  %4851 = vst [vmem:[%s6755_s28 + $0x58] sm:$0xff] %v6030_v6  ;;  %v4343_v12 = vadd.f32 %v6732_v55, %v2586_v7  ;;  %v5811_v6 = vld [vmem:[%s6590_s23 + $0x230] ss:$8 sps:$4 sm:$0xff]  }
 0x14d   : > { %v4471_v13 = vadd.f32 %v6732_v55, %v3098_v8  ;;  %4979 = vst [vmem:[%s6755_s28 + $0x458] sm:$0xff] %v6032_v11  ;;  %v2588_v16 = vpop.f32.mrf.mxu0  ;;  %v5814_v7 = vld [vmem:[%s6590_s23 + $0x630] ss:$8 sps:$4 sm:$0xff]   ;;  %v5819_v11 = vld [vmem:[%s6590_s23 + $0x244] ss:$8 sps:$4 sm:$0xff]  }
 0x14e   : > { %v3100_v17 = vpop.f32.mrf.mxu1  ;;  %6045 = vtanh.f32 %v4343_v12  ;;  %v5822_v12 = vld [vmem:[%s6590_s23 + $0x644] ss:$8 sps:$4 sm:$0xff]  }
 0x14f   : > { %v6034_v18 = vpop.eup %6033  ;;  %6047 = vtanh.f32 %v4471_v13  ;;  %v2591_v19 = vpop.f32.mrf.mxu0  ;;  %2782 = vmatmul.mubr.bf16.gmra.mxu0 %v5793_v9  ;;  %3294 = vmatmul.mubr.bf16.gmra.mxu1 %v5796_v10 }
 0x150   : > { %v3103_v20 = vpop.f32.mrf.mxu1  ;;  %v6036_v21 = vpop.eup %6035  ;;  %4852 = vst [vmem:[%s6755_s28 + $0x60] sm:$0xff] %v6034_v18  ;;  %v4344_v22 = vadd.f32 %v6732_v55, %v2591_v19  ;;  %2789 = vmatprep.mubr.bf16.mxu0 %v5801_v14  ;;  %3301 = vmatprep.mubr.bf16.mxu1 %v5804_v15 }
 0x151   : > { %v4472_v23 = vadd.f32 %v6732_v55, %v3103_v20  ;;  %4980 = vst [vmem:[%s6755_s28 + $0x460] sm:$0xff] %v6036_v21  ;;  %v2593_v24 = vpop.f32.mrf.mxu0 }
 0x152   : > { %v3105_v25 = vpop.f32.mrf.mxu1  ;;  %6049 = vtanh.f32 %v4344_v22 }
 0x153   : > { %v6038_v26 = vpop.eup %6037  ;;  %6051 = vtanh.f32 %v4472_v23  ;;  %v2594_v27 = vpop.f32.mrf.mxu0 }
 0x154   : > { %v3106_v28 = vpop.f32.mrf.mxu1  ;;  %v6040_v31 = vpop.eup %6039  ;;  %4853 = vst [vmem:[%s6755_s28 + $0x68] sm:$0xff] %v6038_v26  ;;  %v4345_v32 = vadd.f32 %v6732_v55, %v2594_v27  ;;  %v5817_v26 = vld [vmem:[%s6590_s23 + $0x240] ss:$8 sps:$4 sm:$0xff]  }
 0x155   : > { %v4473_v33 = vadd.f32 %v6732_v55, %v3106_v28  ;;  %4981 = vst [vmem:[%s6755_s28 + $0x468] sm:$0xff] %v6040_v31  ;;  %v2596_v36 = vpop.f32.mrf.mxu0  ;;  %v5820_v27 = vld [vmem:[%s6590_s23 + $0x640] ss:$8 sps:$4 sm:$0xff]   ;;  %v5825_v31 = vld [vmem:[%s6590_s23 + $0x254] ss:$8 sps:$4 sm:$0xff]  }
 0x156   : > { %v3108_v37 = vpop.f32.mrf.mxu1  ;;  %6053 = vtanh.f32 %v4345_v32  ;;  %v5828_v32 = vld [vmem:[%s6590_s23 + $0x654] ss:$8 sps:$4 sm:$0xff]  }
 0x157   : > { %v6042_v38 = vpop.eup %6041  ;;  %6055 = vtanh.f32 %v4473_v33  ;;  %v2599_v39 = vpop.f32.mrf.mxu0  ;;  %2790 = vmatmul.mubr.bf16.gmra.mxu0 %v5799_v29  ;;  %3302 = vmatmul.mubr.bf16.gmra.mxu1 %v5802_v30 }
 0x158   : > { %v3111_v40 = vpop.f32.mrf.mxu1  ;;  %v6044_v41 = vpop.eup %6043  ;;  %4854 = vst [vmem:[%s6755_s28 + $0x70] sm:$0xff] %v6042_v38  ;;  %v4346_v42 = vadd.f32 %v6732_v55, %v2599_v39  ;;  %2797 = vmatprep.mubr.bf16.mxu0 %v5807_v34  ;;  %3309 = vmatprep.mubr.bf16.mxu1 %v5810_v35 }
 0x159   : > { %v4474_v43 = vadd.f32 %v6732_v55, %v3111_v40  ;;  %4982 = vst [vmem:[%s6755_s28 + $0x470] sm:$0xff] %v6044_v41  ;;  %v2601_v44 = vpop.f32.mrf.mxu0 }
 0x15a   : > { %v3113_v45 = vpop.f32.mrf.mxu1  ;;  %6057 = vtanh.f32 %v4346_v42 }
 0x15b   : > { %v6046_v46 = vpop.eup %6045  ;;  %6059 = vtanh.f32 %v4474_v43  ;;  %v2602_v47 = vpop.f32.mrf.mxu0 }
 0x15c   : > { %v3114_v48 = vpop.f32.mrf.mxu1  ;;  %v6048_v51 = vpop.eup %6047  ;;  %4855 = vst [vmem:[%s6755_s28 + $0x78] sm:$0xff] %v6046_v46  ;;  %v4347_v52 = vadd.f32 %v6732_v55, %v2602_v47  ;;  %v5823_v46 = vld [vmem:[%s6590_s23 + $0x250] ss:$8 sps:$4 sm:$0xff]  }
 0x15d   : > { %v4475_v53 = vadd.f32 %v6732_v55, %v3114_v48  ;;  %4983 = vst [vmem:[%s6755_s28 + $0x478] sm:$0xff] %v6048_v51  ;;  %v2604_v57 = vpop.f32.mrf.mxu0  ;;  %v5826_v47 = vld [vmem:[%s6590_s23 + $0x650] ss:$8 sps:$4 sm:$0xff]   ;;  %v5831_v51 = vld [vmem:[%s6590_s23 + $0x264] ss:$8 sps:$4 sm:$0xff]  }
 0x15e   : > { %v3116_v58 = vpop.f32.mrf.mxu1  ;;  %6061 = vtanh.f32 %v4347_v52  ;;  %v5834_v52 = vld [vmem:[%s6590_s23 + $0x664] ss:$8 sps:$4 sm:$0xff]  }
 0x15f   : > { %v6050_v59 = vpop.eup %6049  ;;  %6063 = vtanh.f32 %v4475_v53  ;;  %v2607_v60 = vpop.f32.mrf.mxu0  ;;  %2798 = vmatmul.mubr.bf16.gmra.mxu0 %v5805_v49  ;;  %3310 = vmatmul.mubr.bf16.gmra.mxu1 %v5808_v50 }
 0x160   : > { %v3119_v61 = vpop.f32.mrf.mxu1  ;;  %v6052_v62 = vpop.eup %6051  ;;  %4856 = vst [vmem:[%s6755_s28 + $0x80] sm:$0xff] %v6050_v59  ;;  %v4348_v63 = vadd.f32 %v6732_v55, %v2607_v60  ;;  %2805 = vmatprep.mubr.bf16.mxu0 %v5813_v54  ;;  %3317 = vmatprep.mubr.bf16.mxu1 %v5816_v56 }
 0x161   : > { %v4476_v0 = vadd.f32 %v6732_v55, %v3119_v61  ;;  %4984 = vst [vmem:[%s6755_s28 + $0x480] sm:$0xff] %v6052_v62  ;;  %v2609_v1 = vpop.f32.mrf.mxu0 }
 0x162   : > { %v3121_v2 = vpop.f32.mrf.mxu1  ;;  %6065 = vtanh.f32 %v4348_v63 }
 0x163   : > { %v6054_v3 = vpop.eup %6053  ;;  %6067 = vtanh.f32 %v4476_v0  ;;  %v2610_v4 = vpop.f32.mrf.mxu0 }
 0x164   : > { %v3122_v5 = vpop.f32.mrf.mxu1  ;;  %v6056_v8 = vpop.eup %6055  ;;  %4857 = vst [vmem:[%s6755_s28 + $0x88] sm:$0xff] %v6054_v3  ;;  %v4349_v9 = vadd.f32 %v6732_v55, %v2610_v4  ;;  %v5829_v3 = vld [vmem:[%s6590_s23 + $0x260] ss:$8 sps:$4 sm:$0xff]  }
 0x165   : > { %v4477_v10 = vadd.f32 %v6732_v55, %v3122_v5  ;;  %4985 = vst [vmem:[%s6755_s28 + $0x488] sm:$0xff] %v6056_v8  ;;  %v2612_v13 = vpop.f32.mrf.mxu0  ;;  %v5832_v4 = vld [vmem:[%s6590_s23 + $0x660] ss:$8 sps:$4 sm:$0xff]   ;;  %v5837_v8 = vld [vmem:[%s6590_s23 + $0x274] ss:$8 sps:$4 sm:$0xff]  }
 0x166   : > { %v3124_v14 = vpop.f32.mrf.mxu1  ;;  %6069 = vtanh.f32 %v4349_v9  ;;  %v5840_v9 = vld [vmem:[%s6590_s23 + $0x674] ss:$8 sps:$4 sm:$0xff]  }
 0x167   : > { %v6058_v15 = vpop.eup %6057  ;;  %6071 = vtanh.f32 %v4477_v10  ;;  %v2615_v16 = vpop.f32.mrf.mxu0  ;;  %2806 = vmatmul.mubr.bf16.gmra.mxu0 %v5811_v6  ;;  %3318 = vmatmul.mubr.bf16.gmra.mxu1 %v5814_v7 }
 0x168   : > { %v3127_v17 = vpop.f32.mrf.mxu1  ;;  %v6060_v18 = vpop.eup %6059  ;;  %4858 = vst [vmem:[%s6755_s28 + $0x90] sm:$0xff] %v6058_v15  ;;  %v4350_v19 = vadd.f32 %v6732_v55, %v2615_v16  ;;  %2813 = vmatprep.mubr.bf16.mxu0 %v5819_v11  ;;  %3325 = vmatprep.mubr.bf16.mxu1 %v5822_v12 }
 0x169   : > { %v4478_v20 = vadd.f32 %v6732_v55, %v3127_v17  ;;  %4986 = vst [vmem:[%s6755_s28 + $0x490] sm:$0xff] %v6060_v18  ;;  %v2617_v21 = vpop.f32.mrf.mxu0 }
 0x16a   : > { %v3129_v22 = vpop.f32.mrf.mxu1  ;;  %6073 = vtanh.f32 %v4350_v19 }
 0x16b   : > { %v6062_v23 = vpop.eup %6061  ;;  %6075 = vtanh.f32 %v4478_v20  ;;  %v2618_v24 = vpop.f32.mrf.mxu0 }
 0x16c   : > { %v3130_v25 = vpop.f32.mrf.mxu1  ;;  %v6064_v28 = vpop.eup %6063  ;;  %4859 = vst [vmem:[%s6755_s28 + $0x98] sm:$0xff] %v6062_v23  ;;  %v4351_v29 = vadd.f32 %v6732_v55, %v2618_v24  ;;  %v5835_v23 = vld [vmem:[%s6590_s23 + $0x270] ss:$8 sps:$4 sm:$0xff]  }
 0x16d   : > { %v4479_v30 = vadd.f32 %v6732_v55, %v3130_v25  ;;  %4987 = vst [vmem:[%s6755_s28 + $0x498] sm:$0xff] %v6064_v28  ;;  %v2620_v33 = vpop.f32.mrf.mxu0  ;;  %v5838_v24 = vld [vmem:[%s6590_s23 + $0x670] ss:$8 sps:$4 sm:$0xff]   ;;  %v5843_v28 = vld [vmem:[%s6590_s23 + $0x284] ss:$8 sps:$4 sm:$0xff]  }
 0x16e   : > { %v3132_v34 = vpop.f32.mrf.mxu1  ;;  %6077 = vtanh.f32 %v4351_v29  ;;  %v5846_v29 = vld [vmem:[%s6590_s23 + $0x684] ss:$8 sps:$4 sm:$0xff]  }
 0x16f   : > { %v6066_v35 = vpop.eup %6065  ;;  %6079 = vtanh.f32 %v4479_v30  ;;  %v2623_v36 = vpop.f32.mrf.mxu0  ;;  %2814 = vmatmul.mubr.bf16.gmra.mxu0 %v5817_v26  ;;  %3326 = vmatmul.mubr.bf16.gmra.mxu1 %v5820_v27 }
 0x170   : > { %v3135_v37 = vpop.f32.mrf.mxu1  ;;  %v6068_v38 = vpop.eup %6067  ;;  %4860 = vst [vmem:[%s6755_s28 + $0xa0] sm:$0xff] %v6066_v35  ;;  %v4352_v39 = vadd.f32 %v6732_v55, %v2623_v36  ;;  %2821 = vmatprep.mubr.bf16.mxu0 %v5825_v31  ;;  %3333 = vmatprep.mubr.bf16.mxu1 %v5828_v32 }
 0x171   : > { %v4480_v40 = vadd.f32 %v6732_v55, %v3135_v37  ;;  %4988 = vst [vmem:[%s6755_s28 + $0x4a0] sm:$0xff] %v6068_v38  ;;  %v2625_v41 = vpop.f32.mrf.mxu0 }
 0x172   : > { %v3137_v42 = vpop.f32.mrf.mxu1  ;;  %6081 = vtanh.f32 %v4352_v39 }
 0x173   : > { %v6070_v43 = vpop.eup %6069  ;;  %6083 = vtanh.f32 %v4480_v40  ;;  %v2626_v44 = vpop.f32.mrf.mxu0 }
 0x174   : > { %v3138_v45 = vpop.f32.mrf.mxu1  ;;  %v6072_v48 = vpop.eup %6071  ;;  %4861 = vst [vmem:[%s6755_s28 + $0xa8] sm:$0xff] %v6070_v43  ;;  %v4353_v49 = vadd.f32 %v6732_v55, %v2626_v44  ;;  %v5841_v43 = vld [vmem:[%s6590_s23 + $0x280] ss:$8 sps:$4 sm:$0xff]  }
 0x175   : > { %v4481_v50 = vadd.f32 %v6732_v55, %v3138_v45  ;;  %4989 = vst [vmem:[%s6755_s28 + $0x4a8] sm:$0xff] %v6072_v48  ;;  %v2628_v53 = vpop.f32.mrf.mxu0  ;;  %v5844_v44 = vld [vmem:[%s6590_s23 + $0x680] ss:$8 sps:$4 sm:$0xff]   ;;  %v5849_v48 = vld [vmem:[%s6590_s23 + $0x294] ss:$8 sps:$4 sm:$0xff]  }
 0x176   : > { %v3140_v54 = vpop.f32.mrf.mxu1  ;;  %6085 = vtanh.f32 %v4353_v49  ;;  %v5852_v49 = vld [vmem:[%s6590_s23 + $0x694] ss:$8 sps:$4 sm:$0xff]  }
 0x177   : > { %v6074_v56 = vpop.eup %6073  ;;  %6087 = vtanh.f32 %v4481_v50  ;;  %v2631_v57 = vpop.f32.mrf.mxu0  ;;  %2822 = vmatmul.mubr.bf16.gmra.mxu0 %v5823_v46  ;;  %3334 = vmatmul.mubr.bf16.gmra.mxu1 %v5826_v47 }
 0x178   : > { %v3143_v58 = vpop.f32.mrf.mxu1  ;;  %v6076_v59 = vpop.eup %6075  ;;  %4862 = vst [vmem:[%s6755_s28 + $0xb0] sm:$0xff] %v6074_v56  ;;  %v4354_v60 = vadd.f32 %v6732_v55, %v2631_v57  ;;  %2829 = vmatprep.mubr.bf16.mxu0 %v5831_v51  ;;  %3341 = vmatprep.mubr.bf16.mxu1 %v5834_v52 }
 0x179   : > { %v4482_v61 = vadd.f32 %v6732_v55, %v3143_v58  ;;  %4990 = vst [vmem:[%s6755_s28 + $0x4b0] sm:$0xff] %v6076_v59  ;;  %v2633_v62 = vpop.f32.mrf.mxu0 }
 0x17a   : > { %v3145_v63 = vpop.f32.mrf.mxu1  ;;  %6089 = vtanh.f32 %v4354_v60 }
 0x17b   : > { %v6078_v0 = vpop.eup %6077  ;;  %6091 = vtanh.f32 %v4482_v61  ;;  %v2634_v1 = vpop.f32.mrf.mxu0 }
 0x17c   : > { %v3146_v2 = vpop.f32.mrf.mxu1  ;;  %v6080_v5 = vpop.eup %6079  ;;  %4863 = vst [vmem:[%s6755_s28 + $0xb8] sm:$0xff] %v6078_v0  ;;  %v4355_v6 = vadd.f32 %v6732_v55, %v2634_v1  ;;  %v5847_v0 = vld [vmem:[%s6590_s23 + $0x290] ss:$8 sps:$4 sm:$0xff]  }
 0x17d   : > { %v4483_v7 = vadd.f32 %v6732_v55, %v3146_v2  ;;  %4991 = vst [vmem:[%s6755_s28 + $0x4b8] sm:$0xff] %v6080_v5  ;;  %v2636_v10 = vpop.f32.mrf.mxu0  ;;  %v5850_v1 = vld [vmem:[%s6590_s23 + $0x690] ss:$8 sps:$4 sm:$0xff]   ;;  %v5855_v5 = vld [vmem:[%s6590_s23 + $0x2a4] ss:$8 sps:$4 sm:$0xff]  }
 0x17e   : > { %v3148_v11 = vpop.f32.mrf.mxu1  ;;  %6093 = vtanh.f32 %v4355_v6  ;;  %v5858_v6 = vld [vmem:[%s6590_s23 + $0x6a4] ss:$8 sps:$4 sm:$0xff]  }
 0x17f   : > { %v6082_v12 = vpop.eup %6081  ;;  %6095 = vtanh.f32 %v4483_v7  ;;  %v2639_v13 = vpop.f32.mrf.mxu0  ;;  %2830 = vmatmul.mubr.bf16.gmra.mxu0 %v5829_v3  ;;  %3342 = vmatmul.mubr.bf16.gmra.mxu1 %v5832_v4 }
 0x180   : > { %v3151_v14 = vpop.f32.mrf.mxu1  ;;  %v6084_v15 = vpop.eup %6083  ;;  %4864 = vst [vmem:[%s6755_s28 + $0xc0] sm:$0xff] %v6082_v12  ;;  %v4356_v16 = vadd.f32 %v6732_v55, %v2639_v13  ;;  %2837 = vmatprep.mubr.bf16.mxu0 %v5837_v8  ;;  %3349 = vmatprep.mubr.bf16.mxu1 %v5840_v9 }
 0x181   : > { %v4484_v17 = vadd.f32 %v6732_v55, %v3151_v14  ;;  %4992 = vst [vmem:[%s6755_s28 + $0x4c0] sm:$0xff] %v6084_v15  ;;  %v2641_v18 = vpop.f32.mrf.mxu0 }
 0x182   : > { %v3153_v19 = vpop.f32.mrf.mxu1  ;;  %6097 = vtanh.f32 %v4356_v16 }
 0x183   : > { %v6086_v20 = vpop.eup %6085  ;;  %6099 = vtanh.f32 %v4484_v17  ;;  %v2642_v21 = vpop.f32.mrf.mxu0 }
 0x184   : > { %v3154_v22 = vpop.f32.mrf.mxu1  ;;  %v6088_v25 = vpop.eup %6087  ;;  %4865 = vst [vmem:[%s6755_s28 + $0xc8] sm:$0xff] %v6086_v20  ;;  %v4357_v26 = vadd.f32 %v6732_v55, %v2642_v21  ;;  %v5853_v20 = vld [vmem:[%s6590_s23 + $0x2a0] ss:$8 sps:$4 sm:$0xff]  }
 0x185   : > { %v4485_v27 = vadd.f32 %v6732_v55, %v3154_v22  ;;  %4993 = vst [vmem:[%s6755_s28 + $0x4c8] sm:$0xff] %v6088_v25  ;;  %v2644_v30 = vpop.f32.mrf.mxu0  ;;  %v5856_v21 = vld [vmem:[%s6590_s23 + $0x6a0] ss:$8 sps:$4 sm:$0xff]   ;;  %v5861_v25 = vld [vmem:[%s6590_s23 + $0x2b4] ss:$8 sps:$4 sm:$0xff]  }
 0x186   : > { %v3156_v31 = vpop.f32.mrf.mxu1  ;;  %6101 = vtanh.f32 %v4357_v26  ;;  %v5864_v26 = vld [vmem:[%s6590_s23 + $0x6b4] ss:$8 sps:$4 sm:$0xff]  }
 0x187   : > { %v6090_v32 = vpop.eup %6089  ;;  %6103 = vtanh.f32 %v4485_v27  ;;  %v2647_v33 = vpop.f32.mrf.mxu0  ;;  %2838 = vmatmul.mubr.bf16.gmra.mxu0 %v5835_v23  ;;  %3350 = vmatmul.mubr.bf16.gmra.mxu1 %v5838_v24 }
 0x188   : > { %v3159_v34 = vpop.f32.mrf.mxu1  ;;  %v6092_v35 = vpop.eup %6091  ;;  %4866 = vst [vmem:[%s6755_s28 + $0xd0] sm:$0xff] %v6090_v32  ;;  %v4358_v36 = vadd.f32 %v6732_v55, %v2647_v33  ;;  %2845 = vmatprep.mubr.bf16.mxu0 %v5843_v28  ;;  %3357 = vmatprep.mubr.bf16.mxu1 %v5846_v29 }
 0x189   : > { %v4486_v37 = vadd.f32 %v6732_v55, %v3159_v34  ;;  %4994 = vst [vmem:[%s6755_s28 + $0x4d0] sm:$0xff] %v6092_v35  ;;  %v2649_v38 = vpop.f32.mrf.mxu0 }
 0x18a   : > { %v3161_v39 = vpop.f32.mrf.mxu1  ;;  %6105 = vtanh.f32 %v4358_v36 }
 0x18b   : > { %v6094_v40 = vpop.eup %6093  ;;  %6107 = vtanh.f32 %v4486_v37  ;;  %v2650_v41 = vpop.f32.mrf.mxu0 }
 0x18c   : > { %v3162_v42 = vpop.f32.mrf.mxu1  ;;  %v6096_v45 = vpop.eup %6095  ;;  %4867 = vst [vmem:[%s6755_s28 + $0xd8] sm:$0xff] %v6094_v40  ;;  %v4359_v46 = vadd.f32 %v6732_v55, %v2650_v41  ;;  %v5859_v40 = vld [vmem:[%s6590_s23 + $0x2b0] ss:$8 sps:$4 sm:$0xff]  }
 0x18d   : > { %v4487_v47 = vadd.f32 %v6732_v55, %v3162_v42  ;;  %4995 = vst [vmem:[%s6755_s28 + $0x4d8] sm:$0xff] %v6096_v45  ;;  %v2652_v50 = vpop.f32.mrf.mxu0  ;;  %v5862_v41 = vld [vmem:[%s6590_s23 + $0x6b0] ss:$8 sps:$4 sm:$0xff]   ;;  %v5867_v45 = vld [vmem:[%s6590_s23 + $0x2c4] ss:$8 sps:$4 sm:$0xff]  }
 0x18e   : > { %v3164_v51 = vpop.f32.mrf.mxu1  ;;  %6109 = vtanh.f32 %v4359_v46  ;;  %v5870_v46 = vld [vmem:[%s6590_s23 + $0x6c4] ss:$8 sps:$4 sm:$0xff]  }
 0x18f   : > { %v6098_v52 = vpop.eup %6097  ;;  %6111 = vtanh.f32 %v4487_v47  ;;  %v2655_v53 = vpop.f32.mrf.mxu0  ;;  %2846 = vmatmul.mubr.bf16.gmra.mxu0 %v5841_v43  ;;  %3358 = vmatmul.mubr.bf16.gmra.mxu1 %v5844_v44 }
 0x190   : > { %v3167_v54 = vpop.f32.mrf.mxu1  ;;  %v6100_v56 = vpop.eup %6099  ;;  %4868 = vst [vmem:[%s6755_s28 + $0xe0] sm:$0xff] %v6098_v52  ;;  %v4360_v57 = vadd.f32 %v6732_v55, %v2655_v53  ;;  %2853 = vmatprep.mubr.bf16.mxu0 %v5849_v48  ;;  %3365 = vmatprep.mubr.bf16.mxu1 %v5852_v49 }
 0x191   : > { %v4488_v58 = vadd.f32 %v6732_v55, %v3167_v54  ;;  %4996 = vst [vmem:[%s6755_s28 + $0x4e0] sm:$0xff] %v6100_v56  ;;  %v2657_v59 = vpop.f32.mrf.mxu0  ;;  %v6935_v55 = vld [vmem:[%s7433_s2] ss:$0 sm:$0xff] }
 0x192   : > { %v3169_v60 = vpop.f32.mrf.mxu1  ;;  %6113 = vtanh.f32 %v4360_v57 }
 0x193   : > { %v6102_v61 = vpop.eup %6101  ;;  %6115 = vtanh.f32 %v4488_v58  ;;  %v2658_v62 = vpop.f32.mrf.mxu0 }
 0x194   : > { %v3170_v63 = vpop.f32.mrf.mxu1  ;;  %v6104_v2 = vpop.eup %6103  ;;  %4869 = vst [vmem:[%s6755_s28 + $0xe8] sm:$0xff] %v6102_v61  ;;  %v4361_v3 = vadd.f32 %v6935_v55, %v2658_v62  ;;  %v5865_v61 = vld [vmem:[%s6590_s23 + $0x2c0] ss:$8 sps:$4 sm:$0xff]  }
 0x195   : > { %v4489_v4 = vadd.f32 %v6935_v55, %v3170_v63  ;;  %4997 = vst [vmem:[%s6755_s28 + $0x4e8] sm:$0xff] %v6104_v2  ;;  %v2660_v7 = vpop.f32.mrf.mxu0  ;;  %v5868_v62 = vld [vmem:[%s6590_s23 + $0x6c0] ss:$8 sps:$4 sm:$0xff]   ;;  %v5873_v2 = vld [vmem:[%s6590_s23 + $0x2d4] ss:$8 sps:$4 sm:$0xff]  }
 0x196   : > { %v3172_v8 = vpop.f32.mrf.mxu1  ;;  %6117 = vtanh.f32 %v4361_v3  ;;  %v5876_v3 = vld [vmem:[%s6590_s23 + $0x6d4] ss:$8 sps:$4 sm:$0xff]  }
 0x197   : > { %v6106_v9 = vpop.eup %6105  ;;  %6119 = vtanh.f32 %v4489_v4  ;;  %v2663_v10 = vpop.f32.mrf.mxu0  ;;  %2854 = vmatmul.mubr.bf16.gmra.mxu0 %v5847_v0  ;;  %3366 = vmatmul.mubr.bf16.gmra.mxu1 %v5850_v1 }
 0x198   : > { %v3175_v11 = vpop.f32.mrf.mxu1  ;;  %v6108_v12 = vpop.eup %6107  ;;  %4870 = vst [vmem:[%s6755_s28 + $0xf0] sm:$0xff] %v6106_v9  ;;  %v4362_v13 = vadd.f32 %v6935_v55, %v2663_v10  ;;  %2861 = vmatprep.mubr.bf16.mxu0 %v5855_v5  ;;  %3373 = vmatprep.mubr.bf16.mxu1 %v5858_v6 }
 0x199   : > { %v4490_v14 = vadd.f32 %v6935_v55, %v3175_v11  ;;  %4998 = vst [vmem:[%s6755_s28 + $0x4f0] sm:$0xff] %v6108_v12  ;;  %v2665_v15 = vpop.f32.mrf.mxu0 }
 0x19a   : > { %v3177_v16 = vpop.f32.mrf.mxu1  ;;  %6121 = vtanh.f32 %v4362_v13 }
 0x19b   : > { %v6110_v17 = vpop.eup %6109  ;;  %6123 = vtanh.f32 %v4490_v14  ;;  %v2666_v18 = vpop.f32.mrf.mxu0 }
 0x19c   : > { %v3178_v19 = vpop.f32.mrf.mxu1  ;;  %v6112_v22 = vpop.eup %6111  ;;  %4871 = vst [vmem:[%s6755_s28 + $0xf8] sm:$0xff] %v6110_v17  ;;  %v4363_v23 = vadd.f32 %v6935_v55, %v2666_v18  ;;  %v5871_v17 = vld [vmem:[%s6590_s23 + $0x2d0] ss:$8 sps:$4 sm:$0xff]  }
 0x19d   : > { %v4491_v24 = vadd.f32 %v6935_v55, %v3178_v19  ;;  %4999 = vst [vmem:[%s6755_s28 + $0x4f8] sm:$0xff] %v6112_v22  ;;  %v2668_v27 = vpop.f32.mrf.mxu0  ;;  %v5874_v18 = vld [vmem:[%s6590_s23 + $0x6d0] ss:$8 sps:$4 sm:$0xff]   ;;  %v5879_v22 = vld [vmem:[%s6590_s23 + $0x2e4] ss:$8 sps:$4 sm:$0xff]  }
 0x19e   : > { %v3180_v28 = vpop.f32.mrf.mxu1  ;;  %6125 = vtanh.f32 %v4363_v23  ;;  %v5882_v23 = vld [vmem:[%s6590_s23 + $0x6e4] ss:$8 sps:$4 sm:$0xff]  }
 0x19f   : > { %v6114_v29 = vpop.eup %6113  ;;  %6127 = vtanh.f32 %v4491_v24  ;;  %v2671_v30 = vpop.f32.mrf.mxu0  ;;  %2862 = vmatmul.mubr.bf16.gmra.mxu0 %v5853_v20  ;;  %3374 = vmatmul.mubr.bf16.gmra.mxu1 %v5856_v21 }
 0x1a0   : > { %v3183_v31 = vpop.f32.mrf.mxu1  ;;  %v6116_v32 = vpop.eup %6115  ;;  %4872 = vst [vmem:[%s6755_s28 + $0x100] sm:$0xff] %v6114_v29  ;;  %v4364_v33 = vadd.f32 %v6935_v55, %v2671_v30  ;;  %2869 = vmatprep.mubr.bf16.mxu0 %v5861_v25  ;;  %3381 = vmatprep.mubr.bf16.mxu1 %v5864_v26 }
 0x1a1   : > { %v4492_v34 = vadd.f32 %v6935_v55, %v3183_v31  ;;  %5000 = vst [vmem:[%s6755_s28 + $0x500] sm:$0xff] %v6116_v32  ;;  %v2673_v35 = vpop.f32.mrf.mxu0 }
 0x1a2   : > { %v3185_v36 = vpop.f32.mrf.mxu1  ;;  %6129 = vtanh.f32 %v4364_v33 }
 0x1a3   : > { %v6118_v37 = vpop.eup %6117  ;;  %6131 = vtanh.f32 %v4492_v34  ;;  %v2674_v38 = vpop.f32.mrf.mxu0 }
 0x1a4   : > { %v3186_v39 = vpop.f32.mrf.mxu1  ;;  %v6120_v42 = vpop.eup %6119  ;;  %4873 = vst [vmem:[%s6755_s28 + $0x108] sm:$0xff] %v6118_v37  ;;  %v4365_v43 = vadd.f32 %v6935_v55, %v2674_v38  ;;  %v5877_v37 = vld [vmem:[%s6590_s23 + $0x2e0] ss:$8 sps:$4 sm:$0xff]  }
 0x1a5   : > { %v4493_v44 = vadd.f32 %v6935_v55, %v3186_v39  ;;  %5001 = vst [vmem:[%s6755_s28 + $0x508] sm:$0xff] %v6120_v42  ;;  %v2676_v47 = vpop.f32.mrf.mxu0  ;;  %v5880_v38 = vld [vmem:[%s6590_s23 + $0x6e0] ss:$8 sps:$4 sm:$0xff]   ;;  %v5885_v42 = vld [vmem:[%s6590_s23 + $0x2f4] ss:$8 sps:$4 sm:$0xff]  }
 0x1a6   : > { %v3188_v48 = vpop.f32.mrf.mxu1  ;;  %6133 = vtanh.f32 %v4365_v43  ;;  %v5888_v43 = vld [vmem:[%s6590_s23 + $0x6f4] ss:$8 sps:$4 sm:$0xff]  }
 0x1a7   : > { %v6122_v49 = vpop.eup %6121  ;;  %6135 = vtanh.f32 %v4493_v44  ;;  %v2679_v50 = vpop.f32.mrf.mxu0  ;;  %2870 = vmatmul.mubr.bf16.gmra.mxu0 %v5859_v40  ;;  %3382 = vmatmul.mubr.bf16.gmra.mxu1 %v5862_v41 }
 0x1a8   : > { %v3191_v51 = vpop.f32.mrf.mxu1  ;;  %v6124_v52 = vpop.eup %6123  ;;  %4874 = vst [vmem:[%s6755_s28 + $0x110] sm:$0xff] %v6122_v49  ;;  %v4366_v53 = vadd.f32 %v6935_v55, %v2679_v50  ;;  %2877 = vmatprep.mubr.bf16.mxu0 %v5867_v45  ;;  %3389 = vmatprep.mubr.bf16.mxu1 %v5870_v46 }
 0x1a9   : > { %v4494_v54 = vadd.f32 %v6935_v55, %v3191_v51  ;;  %5002 = vst [vmem:[%s6755_s28 + $0x510] sm:$0xff] %v6124_v52  ;;  %v2681_v56 = vpop.f32.mrf.mxu0 }
 0x1aa   : > { %v3193_v57 = vpop.f32.mrf.mxu1  ;;  %6137 = vtanh.f32 %v4366_v53 }
 0x1ab   : > { %v6126_v58 = vpop.eup %6125  ;;  %6139 = vtanh.f32 %v4494_v54  ;;  %v2682_v59 = vpop.f32.mrf.mxu0 }
 0x1ac   : > { %v3194_v60 = vpop.f32.mrf.mxu1  ;;  %v6128_v63 = vpop.eup %6127  ;;  %4875 = vst [vmem:[%s6755_s28 + $0x118] sm:$0xff] %v6126_v58  ;;  %v4367_v0 = vadd.f32 %v6935_v55, %v2682_v59  ;;  %v5883_v58 = vld [vmem:[%s6590_s23 + $0x2f0] ss:$8 sps:$4 sm:$0xff]  }
 0x1ad   : > { %v4495_v1 = vadd.f32 %v6935_v55, %v3194_v60  ;;  %5003 = vst [vmem:[%s6755_s28 + $0x518] sm:$0xff] %v6128_v63  ;;  %v2684_v4 = vpop.f32.mrf.mxu0  ;;  %v5886_v59 = vld [vmem:[%s6590_s23 + $0x6f0] ss:$8 sps:$4 sm:$0xff]   ;;  %v5891_v63 = vld [vmem:[%s6590_s23 + $0x304] ss:$8 sps:$4 sm:$0xff]  }
 0x1ae   : > { %v3196_v5 = vpop.f32.mrf.mxu1  ;;  %6141 = vtanh.f32 %v4367_v0  ;;  %v5894_v0 = vld [vmem:[%s6590_s23 + $0x704] ss:$8 sps:$4 sm:$0xff]  }
 0x1af   : > { %v6130_v6 = vpop.eup %6129  ;;  %6143 = vtanh.f32 %v4495_v1  ;;  %v2687_v7 = vpop.f32.mrf.mxu0  ;;  %2878 = vmatmul.mubr.bf16.gmra.mxu0 %v5865_v61  ;;  %3390 = vmatmul.mubr.bf16.gmra.mxu1 %v5868_v62 }
 0x1b0   : > { %v3199_v8 = vpop.f32.mrf.mxu1  ;;  %v6132_v9 = vpop.eup %6131  ;;  %4876 = vst [vmem:[%s6755_s28 + $0x120] sm:$0xff] %v6130_v6  ;;  %v4368_v10 = vadd.f32 %v6935_v55, %v2687_v7  ;;  %2885 = vmatprep.mubr.bf16.mxu0 %v5873_v2  ;;  %3397 = vmatprep.mubr.bf16.mxu1 %v5876_v3 }
 0x1b1   : > { %v4496_v11 = vadd.f32 %v6935_v55, %v3199_v8  ;;  %5004 = vst [vmem:[%s6755_s28 + $0x520] sm:$0xff] %v6132_v9  ;;  %v2689_v12 = vpop.f32.mrf.mxu0 }
 0x1b2   : > { %v3201_v13 = vpop.f32.mrf.mxu1  ;;  %6145 = vtanh.f32 %v4368_v10 }
 0x1b3   : > { %v6134_v14 = vpop.eup %6133  ;;  %6147 = vtanh.f32 %v4496_v11  ;;  %v2690_v15 = vpop.f32.mrf.mxu0 }
 0x1b4   : > { %v3202_v16 = vpop.f32.mrf.mxu1  ;;  %v6136_v19 = vpop.eup %6135  ;;  %4877 = vst [vmem:[%s6755_s28 + $0x128] sm:$0xff] %v6134_v14  ;;  %v4369_v20 = vadd.f32 %v6935_v55, %v2690_v15  ;;  %v5889_v14 = vld [vmem:[%s6590_s23 + $0x300] ss:$8 sps:$4 sm:$0xff]  }
 0x1b5   : > { %v4497_v21 = vadd.f32 %v6935_v55, %v3202_v16  ;;  %5005 = vst [vmem:[%s6755_s28 + $0x528] sm:$0xff] %v6136_v19  ;;  %v2692_v24 = vpop.f32.mrf.mxu0  ;;  %v5892_v15 = vld [vmem:[%s6590_s23 + $0x700] ss:$8 sps:$4 sm:$0xff]   ;;  %v5897_v19 = vld [vmem:[%s6590_s23 + $0x314] ss:$8 sps:$4 sm:$0xff]  }
 0x1b6   : > { %v3204_v25 = vpop.f32.mrf.mxu1  ;;  %6149 = vtanh.f32 %v4369_v20  ;;  %v5900_v20 = vld [vmem:[%s6590_s23 + $0x714] ss:$8 sps:$4 sm:$0xff]  }
 0x1b7   : > { %v6138_v26 = vpop.eup %6137  ;;  %6151 = vtanh.f32 %v4497_v21  ;;  %v2695_v27 = vpop.f32.mrf.mxu0  ;;  %2886 = vmatmul.mubr.bf16.gmra.mxu0 %v5871_v17  ;;  %3398 = vmatmul.mubr.bf16.gmra.mxu1 %v5874_v18 }
 0x1b8   : > { %v3207_v28 = vpop.f32.mrf.mxu1  ;;  %v6140_v29 = vpop.eup %6139  ;;  %4878 = vst [vmem:[%s6755_s28 + $0x130] sm:$0xff] %v6138_v26  ;;  %v4370_v30 = vadd.f32 %v6935_v55, %v2695_v27  ;;  %2893 = vmatprep.mubr.bf16.mxu0 %v5879_v22  ;;  %3405 = vmatprep.mubr.bf16.mxu1 %v5882_v23 }
 0x1b9   : > { %v4498_v31 = vadd.f32 %v6935_v55, %v3207_v28  ;;  %5006 = vst [vmem:[%s6755_s28 + $0x530] sm:$0xff] %v6140_v29  ;;  %v2697_v32 = vpop.f32.mrf.mxu0 }
 0x1ba   : > { %v3209_v33 = vpop.f32.mrf.mxu1  ;;  %6153 = vtanh.f32 %v4370_v30 }
 0x1bb   : > { %v6142_v34 = vpop.eup %6141  ;;  %6155 = vtanh.f32 %v4498_v31  ;;  %v2698_v35 = vpop.f32.mrf.mxu0 }
 0x1bc   : > { %v3210_v36 = vpop.f32.mrf.mxu1  ;;  %v6144_v39 = vpop.eup %6143  ;;  %4879 = vst [vmem:[%s6755_s28 + $0x138] sm:$0xff] %v6142_v34  ;;  %v4371_v40 = vadd.f32 %v6935_v55, %v2698_v35  ;;  %v5895_v34 = vld [vmem:[%s6590_s23 + $0x310] ss:$8 sps:$4 sm:$0xff]  }
 0x1bd   : > { %v4499_v41 = vadd.f32 %v6935_v55, %v3210_v36  ;;  %5007 = vst [vmem:[%s6755_s28 + $0x538] sm:$0xff] %v6144_v39  ;;  %v2700_v44 = vpop.f32.mrf.mxu0  ;;  %v5898_v35 = vld [vmem:[%s6590_s23 + $0x710] ss:$8 sps:$4 sm:$0xff]   ;;  %v5903_v39 = vld [vmem:[%s6590_s23 + $0x324] ss:$8 sps:$4 sm:$0xff]  }
 0x1be   : > { %v3212_v45 = vpop.f32.mrf.mxu1  ;;  %6157 = vtanh.f32 %v4371_v40  ;;  %v5906_v40 = vld [vmem:[%s6590_s23 + $0x724] ss:$8 sps:$4 sm:$0xff]  }
 0x1bf   : > { %v6146_v46 = vpop.eup %6145  ;;  %6159 = vtanh.f32 %v4499_v41  ;;  %v2703_v47 = vpop.f32.mrf.mxu0  ;;  %2894 = vmatmul.mubr.bf16.gmra.mxu0 %v5877_v37  ;;  %3406 = vmatmul.mubr.bf16.gmra.mxu1 %v5880_v38 }
 0x1c0   : > { %v3215_v48 = vpop.f32.mrf.mxu1  ;;  %v6148_v49 = vpop.eup %6147  ;;  %4880 = vst [vmem:[%s6755_s28 + $0x140] sm:$0xff] %v6146_v46  ;;  %v4372_v50 = vadd.f32 %v6935_v55, %v2703_v47  ;;  %2901 = vmatprep.mubr.bf16.mxu0 %v5885_v42  ;;  %3413 = vmatprep.mubr.bf16.mxu1 %v5888_v43 }
 0x1c1   : > { %v4500_v51 = vadd.f32 %v6935_v55, %v3215_v48  ;;  %5008 = vst [vmem:[%s6755_s28 + $0x540] sm:$0xff] %v6148_v49  ;;  %v2705_v52 = vpop.f32.mrf.mxu0 }
 0x1c2   : > { %v3217_v53 = vpop.f32.mrf.mxu1  ;;  %6161 = vtanh.f32 %v4372_v50 }
 0x1c3   : > { %v6150_v54 = vpop.eup %6149  ;;  %6163 = vtanh.f32 %v4500_v51  ;;  %v2706_v56 = vpop.f32.mrf.mxu0 }
 0x1c4   : > { %v3218_v57 = vpop.f32.mrf.mxu1  ;;  %v6152_v60 = vpop.eup %6151  ;;  %4881 = vst [vmem:[%s6755_s28 + $0x148] sm:$0xff] %v6150_v54  ;;  %v4373_v61 = vadd.f32 %v6935_v55, %v2706_v56  ;;  %v5901_v54 = vld [vmem:[%s6590_s23 + $0x320] ss:$8 sps:$4 sm:$0xff]  }
 0x1c5   : > { %v4501_v62 = vadd.f32 %v6935_v55, %v3218_v57  ;;  %5009 = vst [vmem:[%s6755_s28 + $0x548] sm:$0xff] %v6152_v60  ;;  %v2708_v1 = vpop.f32.mrf.mxu0  ;;  %v5904_v56 = vld [vmem:[%s6590_s23 + $0x720] ss:$8 sps:$4 sm:$0xff]   ;;  %v5909_v60 = vld [vmem:[%s6590_s23 + $0x334] ss:$8 sps:$4 sm:$0xff]  }
 0x1c6   : > { %v3220_v2 = vpop.f32.mrf.mxu1  ;;  %6165 = vtanh.f32 %v4373_v61  ;;  %v5912_v61 = vld [vmem:[%s6590_s23 + $0x734] ss:$8 sps:$4 sm:$0xff]  }
 0x1c7   : > { %v6154_v3 = vpop.eup %6153  ;;  %6167 = vtanh.f32 %v4501_v62  ;;  %v2711_v4 = vpop.f32.mrf.mxu0  ;;  %2902 = vmatmul.mubr.bf16.gmra.mxu0 %v5883_v58  ;;  %3414 = vmatmul.mubr.bf16.gmra.mxu1 %v5886_v59 }
 0x1c8   : > { %v3223_v5 = vpop.f32.mrf.mxu1  ;;  %v6156_v6 = vpop.eup %6155  ;;  %4882 = vst [vmem:[%s6755_s28 + $0x150] sm:$0xff] %v6154_v3  ;;  %v4374_v7 = vadd.f32 %v6935_v55, %v2711_v4  ;;  %2909 = vmatprep.mubr.bf16.mxu0 %v5891_v63  ;;  %3421 = vmatprep.mubr.bf16.mxu1 %v5894_v0 }
 0x1c9   : > { %v4502_v8 = vadd.f32 %v6935_v55, %v3223_v5  ;;  %5010 = vst [vmem:[%s6755_s28 + $0x550] sm:$0xff] %v6156_v6  ;;  %v2713_v9 = vpop.f32.mrf.mxu0 }
 0x1ca   : > { %v3225_v10 = vpop.f32.mrf.mxu1  ;;  %6169 = vtanh.f32 %v4374_v7 }
 0x1cb   : > { %v6158_v11 = vpop.eup %6157  ;;  %6171 = vtanh.f32 %v4502_v8  ;;  %v2714_v12 = vpop.f32.mrf.mxu0 }
 0x1cc   : > { %v3226_v13 = vpop.f32.mrf.mxu1  ;;  %v6160_v16 = vpop.eup %6159  ;;  %4883 = vst [vmem:[%s6755_s28 + $0x158] sm:$0xff] %v6158_v11  ;;  %v4375_v17 = vadd.f32 %v6935_v55, %v2714_v12  ;;  %v5907_v11 = vld [vmem:[%s6590_s23 + $0x330] ss:$8 sps:$4 sm:$0xff]  }
 0x1cd   : > { %v4503_v18 = vadd.f32 %v6935_v55, %v3226_v13  ;;  %5011 = vst [vmem:[%s6755_s28 + $0x558] sm:$0xff] %v6160_v16  ;;  %v2716_v21 = vpop.f32.mrf.mxu0  ;;  %v5910_v12 = vld [vmem:[%s6590_s23 + $0x730] ss:$8 sps:$4 sm:$0xff]   ;;  %v5915_v16 = vld [vmem:[%s6590_s23 + $0x344] ss:$8 sps:$4 sm:$0xff]  }
 0x1ce   : > { %v3228_v22 = vpop.f32.mrf.mxu1  ;;  %6173 = vtanh.f32 %v4375_v17  ;;  %v5918_v17 = vld [vmem:[%s6590_s23 + $0x744] ss:$8 sps:$4 sm:$0xff]  }
 0x1cf   : > { %v6162_v23 = vpop.eup %6161  ;;  %6175 = vtanh.f32 %v4503_v18  ;;  %v2719_v24 = vpop.f32.mrf.mxu0  ;;  %2910 = vmatmul.mubr.bf16.gmra.mxu0 %v5889_v14  ;;  %3422 = vmatmul.mubr.bf16.gmra.mxu1 %v5892_v15 }
 0x1d0   : > { %v3231_v25 = vpop.f32.mrf.mxu1  ;;  %v6164_v26 = vpop.eup %6163  ;;  %4884 = vst [vmem:[%s6755_s28 + $0x160] sm:$0xff] %v6162_v23  ;;  %v4376_v27 = vadd.f32 %v6935_v55, %v2719_v24  ;;  %2917 = vmatprep.mubr.bf16.mxu0 %v5897_v19  ;;  %3429 = vmatprep.mubr.bf16.mxu1 %v5900_v20 }
 0x1d1   : > { %v4504_v28 = vadd.f32 %v6935_v55, %v3231_v25  ;;  %5012 = vst [vmem:[%s6755_s28 + $0x560] sm:$0xff] %v6164_v26  ;;  %v2721_v29 = vpop.f32.mrf.mxu0 }
 0x1d2   : > { %v3233_v30 = vpop.f32.mrf.mxu1  ;;  %6177 = vtanh.f32 %v4376_v27 }
 0x1d3   : > { %v6166_v31 = vpop.eup %6165  ;;  %6179 = vtanh.f32 %v4504_v28  ;;  %v2722_v32 = vpop.f32.mrf.mxu0 }
 0x1d4   : > { %v3234_v33 = vpop.f32.mrf.mxu1  ;;  %v6168_v36 = vpop.eup %6167  ;;  %4885 = vst [vmem:[%s6755_s28 + $0x168] sm:$0xff] %v6166_v31  ;;  %v4377_v37 = vadd.f32 %v6935_v55, %v2722_v32  ;;  %v5913_v31 = vld [vmem:[%s6590_s23 + $0x340] ss:$8 sps:$4 sm:$0xff]  }
 0x1d5   : > { %v4505_v38 = vadd.f32 %v6935_v55, %v3234_v33  ;;  %5013 = vst [vmem:[%s6755_s28 + $0x568] sm:$0xff] %v6168_v36  ;;  %v2724_v41 = vpop.f32.mrf.mxu0  ;;  %v5916_v32 = vld [vmem:[%s6590_s23 + $0x740] ss:$8 sps:$4 sm:$0xff]   ;;  %v5921_v36 = vld [vmem:[%s6590_s23 + $0x354] ss:$8 sps:$4 sm:$0xff]  }
 0x1d6   : > { %v3236_v42 = vpop.f32.mrf.mxu1  ;;  %6181 = vtanh.f32 %v4377_v37  ;;  %v5924_v37 = vld [vmem:[%s6590_s23 + $0x754] ss:$8 sps:$4 sm:$0xff]  }
 0x1d7   : > { %v6170_v43 = vpop.eup %6169  ;;  %6183 = vtanh.f32 %v4505_v38  ;;  %v2727_v44 = vpop.f32.mrf.mxu0  ;;  %2918 = vmatmul.mubr.bf16.gmra.mxu0 %v5895_v34  ;;  %3430 = vmatmul.mubr.bf16.gmra.mxu1 %v5898_v35 }
 0x1d8   : > { %v3239_v45 = vpop.f32.mrf.mxu1  ;;  %v6172_v46 = vpop.eup %6171  ;;  %4886 = vst [vmem:[%s6755_s28 + $0x170] sm:$0xff] %v6170_v43  ;;  %v4378_v47 = vadd.f32 %v6935_v55, %v2727_v44  ;;  %2925 = vmatprep.mubr.bf16.mxu0 %v5903_v39  ;;  %3437 = vmatprep.mubr.bf16.mxu1 %v5906_v40 }
 0x1d9   : > { %v4506_v48 = vadd.f32 %v6935_v55, %v3239_v45  ;;  %5014 = vst [vmem:[%s6755_s28 + $0x570] sm:$0xff] %v6172_v46  ;;  %v2729_v49 = vpop.f32.mrf.mxu0 }
 0x1da   : > { %v3241_v50 = vpop.f32.mrf.mxu1  ;;  %6185 = vtanh.f32 %v4378_v47 }
 0x1db   : > { %v6174_v51 = vpop.eup %6173  ;;  %6187 = vtanh.f32 %v4506_v48  ;;  %v2730_v52 = vpop.f32.mrf.mxu0 }
 0x1dc   : > { %v3242_v53 = vpop.f32.mrf.mxu1  ;;  %v6176_v57 = vpop.eup %6175  ;;  %4887 = vst [vmem:[%s6755_s28 + $0x178] sm:$0xff] %v6174_v51  ;;  %v4379_v58 = vadd.f32 %v6935_v55, %v2730_v52  ;;  %v5919_v51 = vld [vmem:[%s6590_s23 + $0x350] ss:$8 sps:$4 sm:$0xff]  }
 0x1dd   : > { %v4507_v59 = vadd.f32 %v6935_v55, %v3242_v53  ;;  %5015 = vst [vmem:[%s6755_s28 + $0x578] sm:$0xff] %v6176_v57  ;;  %v2732_v62 = vpop.f32.mrf.mxu0  ;;  %v5922_v52 = vld [vmem:[%s6590_s23 + $0x750] ss:$8 sps:$4 sm:$0xff]   ;;  %v5927_v57 = vld [vmem:[%s6590_s23 + $0x364] ss:$8 sps:$4 sm:$0xff]  }
 0x1de   : > { %v3244_v63 = vpop.f32.mrf.mxu1  ;;  %6189 = vtanh.f32 %v4379_v58  ;;  %v5930_v58 = vld [vmem:[%s6590_s23 + $0x764] ss:$8 sps:$4 sm:$0xff]  }
 0x1df   : > { %v6178_v0 = vpop.eup %6177  ;;  %6191 = vtanh.f32 %v4507_v59  ;;  %v2735_v1 = vpop.f32.mrf.mxu0  ;;  %2926 = vmatmul.mubr.bf16.gmra.mxu0 %v5901_v54  ;;  %3438 = vmatmul.mubr.bf16.gmra.mxu1 %v5904_v56 }
 0x1e0   : > { %v3247_v2 = vpop.f32.mrf.mxu1  ;;  %v6180_v3 = vpop.eup %6179  ;;  %4888 = vst [vmem:[%s6755_s28 + $0x180] sm:$0xff] %v6178_v0  ;;  %v4380_v4 = vadd.f32 %v6935_v55, %v2735_v1  ;;  %2933 = vmatprep.mubr.bf16.mxu0 %v5909_v60  ;;  %3445 = vmatprep.mubr.bf16.mxu1 %v5912_v61 }
 0x1e1   : > { %v4508_v5 = vadd.f32 %v6935_v55, %v3247_v2  ;;  %5016 = vst [vmem:[%s6755_s28 + $0x580] sm:$0xff] %v6180_v3  ;;  %v2737_v6 = vpop.f32.mrf.mxu0 }
 0x1e2   : > { %v3249_v7 = vpop.f32.mrf.mxu1  ;;  %6193 = vtanh.f32 %v4380_v4 }
 0x1e3   : > { %v6182_v8 = vpop.eup %6181  ;;  %6195 = vtanh.f32 %v4508_v5  ;;  %v2738_v9 = vpop.f32.mrf.mxu0 }
 0x1e4   : > { %v3250_v10 = vpop.f32.mrf.mxu1  ;;  %v6184_v13 = vpop.eup %6183  ;;  %4889 = vst [vmem:[%s6755_s28 + $0x188] sm:$0xff] %v6182_v8  ;;  %v4381_v14 = vadd.f32 %v6935_v55, %v2738_v9  ;;  %v5925_v8 = vld [vmem:[%s6590_s23 + $0x360] ss:$8 sps:$4 sm:$0xff]  }
 0x1e5   : > { %v4509_v15 = vadd.f32 %v6935_v55, %v3250_v10  ;;  %5017 = vst [vmem:[%s6755_s28 + $0x588] sm:$0xff] %v6184_v13  ;;  %v2740_v18 = vpop.f32.mrf.mxu0  ;;  %v5928_v9 = vld [vmem:[%s6590_s23 + $0x760] ss:$8 sps:$4 sm:$0xff]   ;;  %v5933_v13 = vld [vmem:[%s6590_s23 + $0x374] ss:$8 sps:$4 sm:$0xff]  }
 0x1e6   : > { %v3252_v19 = vpop.f32.mrf.mxu1  ;;  %6197 = vtanh.f32 %v4381_v14  ;;  %v5936_v14 = vld [vmem:[%s6590_s23 + $0x774] ss:$8 sps:$4 sm:$0xff]  }
 0x1e7   : > { %v6186_v20 = vpop.eup %6185  ;;  %6199 = vtanh.f32 %v4509_v15  ;;  %v2743_v21 = vpop.f32.mrf.mxu0  ;;  %2934 = vmatmul.mubr.bf16.gmra.mxu0 %v5907_v11  ;;  %3446 = vmatmul.mubr.bf16.gmra.mxu1 %v5910_v12 }
 0x1e8   : > { %v3255_v22 = vpop.f32.mrf.mxu1  ;;  %v6188_v23 = vpop.eup %6187  ;;  %4890 = vst [vmem:[%s6755_s28 + $0x190] sm:$0xff] %v6186_v20  ;;  %v4382_v24 = vadd.f32 %v6935_v55, %v2743_v21  ;;  %2941 = vmatprep.mubr.bf16.mxu0 %v5915_v16  ;;  %3453 = vmatprep.mubr.bf16.mxu1 %v5918_v17 }
 0x1e9   : > { %v4510_v25 = vadd.f32 %v6935_v55, %v3255_v22  ;;  %5018 = vst [vmem:[%s6755_s28 + $0x590] sm:$0xff] %v6188_v23  ;;  %v2745_v26 = vpop.f32.mrf.mxu0 }
 0x1ea   : > { %v3257_v27 = vpop.f32.mrf.mxu1  ;;  %6201 = vtanh.f32 %v4382_v24 }
 0x1eb   : > { %v6190_v28 = vpop.eup %6189  ;;  %6203 = vtanh.f32 %v4510_v25  ;;  %v2746_v29 = vpop.f32.mrf.mxu0 }
 0x1ec   : > { %v3258_v30 = vpop.f32.mrf.mxu1  ;;  %v6192_v33 = vpop.eup %6191  ;;  %4891 = vst [vmem:[%s6755_s28 + $0x198] sm:$0xff] %v6190_v28  ;;  %v4383_v34 = vadd.f32 %v6935_v55, %v2746_v29  ;;  %v5931_v28 = vld [vmem:[%s6590_s23 + $0x370] ss:$8 sps:$4 sm:$0xff]  }
 0x1ed   : > { %v4511_v35 = vadd.f32 %v6935_v55, %v3258_v30  ;;  %5019 = vst [vmem:[%s6755_s28 + $0x598] sm:$0xff] %v6192_v33  ;;  %v2748_v38 = vpop.f32.mrf.mxu0  ;;  %v5934_v29 = vld [vmem:[%s6590_s23 + $0x770] ss:$8 sps:$4 sm:$0xff]   ;;  %v5939_v33 = vld [vmem:[%s6590_s23 + $0x384] ss:$8 sps:$4 sm:$0xff]  }
 0x1ee   : > { %v3260_v39 = vpop.f32.mrf.mxu1  ;;  %6205 = vtanh.f32 %v4383_v34  ;;  %v5942_v34 = vld [vmem:[%s6590_s23 + $0x784] ss:$8 sps:$4 sm:$0xff]  }
 0x1ef   : > { %v6194_v40 = vpop.eup %6193  ;;  %6207 = vtanh.f32 %v4511_v35  ;;  %v2751_v41 = vpop.f32.mrf.mxu0  ;;  %2942 = vmatmul.mubr.bf16.gmra.mxu0 %v5913_v31  ;;  %3454 = vmatmul.mubr.bf16.gmra.mxu1 %v5916_v32 }
 0x1f0   : > { %v3263_v42 = vpop.f32.mrf.mxu1  ;;  %v6196_v43 = vpop.eup %6195  ;;  %4892 = vst [vmem:[%s6755_s28 + $0x1a0] sm:$0xff] %v6194_v40  ;;  %v4384_v44 = vadd.f32 %v6935_v55, %v2751_v41  ;;  %2949 = vmatprep.mubr.bf16.mxu0 %v5921_v36  ;;  %3461 = vmatprep.mubr.bf16.mxu1 %v5924_v37 }
 0x1f1   : > { %v4512_v45 = vadd.f32 %v6935_v55, %v3263_v42  ;;  %5020 = vst [vmem:[%s6755_s28 + $0x5a0] sm:$0xff] %v6196_v43  ;;  %v2753_v46 = vpop.f32.mrf.mxu0 }
 0x1f2   : > { %v3265_v47 = vpop.f32.mrf.mxu1  ;;  %6209 = vtanh.f32 %v4384_v44 }
 0x1f3   : > { %v6198_v48 = vpop.eup %6197  ;;  %6211 = vtanh.f32 %v4512_v45  ;;  %v2754_v49 = vpop.f32.mrf.mxu0 }
 0x1f4   : > { %v3266_v50 = vpop.f32.mrf.mxu1  ;;  %v6200_v53 = vpop.eup %6199  ;;  %4893 = vst [vmem:[%s6755_s28 + $0x1a8] sm:$0xff] %v6198_v48  ;;  %v4385_v54 = vadd.f32 %v6935_v55, %v2754_v49  ;;  %v5937_v48 = vld [vmem:[%s6590_s23 + $0x380] ss:$8 sps:$4 sm:$0xff]  }
 0x1f5   : > { %v4513_v56 = vadd.f32 %v6935_v55, %v3266_v50  ;;  %5021 = vst [vmem:[%s6755_s28 + $0x5a8] sm:$0xff] %v6200_v53  ;;  %v2756_v59 = vpop.f32.mrf.mxu0  ;;  %v5940_v49 = vld [vmem:[%s6590_s23 + $0x780] ss:$8 sps:$4 sm:$0xff]   ;;  %v5945_v53 = vld [vmem:[%s6590_s23 + $0x394] ss:$8 sps:$4 sm:$0xff]  }
 0x1f6   : > { %v3268_v60 = vpop.f32.mrf.mxu1  ;;  %6213 = vtanh.f32 %v4385_v54  ;;  %v5948_v54 = vld [vmem:[%s6590_s23 + $0x794] ss:$8 sps:$4 sm:$0xff]  }
 0x1f7   : > { %v6202_v61 = vpop.eup %6201  ;;  %6215 = vtanh.f32 %v4513_v56  ;;  %v2759_v62 = vpop.f32.mrf.mxu0  ;;  %2950 = vmatmul.mubr.bf16.gmra.mxu0 %v5919_v51  ;;  %3462 = vmatmul.mubr.bf16.gmra.mxu1 %v5922_v52 }
 0x1f8   : > { %v3271_v63 = vpop.f32.mrf.mxu1  ;;  %v6204_v0 = vpop.eup %6203  ;;  %4894 = vst [vmem:[%s6755_s28 + $0x1b0] sm:$0xff] %v6202_v61  ;;  %v4386_v1 = vadd.f32 %v6935_v55, %v2759_v62  ;;  %2957 = vmatprep.mubr.bf16.mxu0 %v5927_v57  ;;  %3469 = vmatprep.mubr.bf16.mxu1 %v5930_v58 }
 0x1f9   : > { %v4514_v2 = vadd.f32 %v6935_v55, %v3271_v63  ;;  %5022 = vst [vmem:[%s6755_s28 + $0x5b0] sm:$0xff] %v6204_v0  ;;  %v2761_v3 = vpop.f32.mrf.mxu0 }
 0x1fa   : > { %v3273_v4 = vpop.f32.mrf.mxu1  ;;  %6217 = vtanh.f32 %v4386_v1 }
 0x1fb   : > { %v6206_v5 = vpop.eup %6205  ;;  %6219 = vtanh.f32 %v4514_v2  ;;  %v2762_v6 = vpop.f32.mrf.mxu0 }
 0x1fc   : > { %v3274_v7 = vpop.f32.mrf.mxu1  ;;  %v6208_v10 = vpop.eup %6207  ;;  %4895 = vst [vmem:[%s6755_s28 + $0x1b8] sm:$0xff] %v6206_v5  ;;  %v4387_v11 = vadd.f32 %v6935_v55, %v2762_v6  ;;  %v5943_v5 = vld [vmem:[%s6590_s23 + $0x390] ss:$8 sps:$4 sm:$0xff]  }
 0x1fd   : > { %v4515_v12 = vadd.f32 %v6935_v55, %v3274_v7  ;;  %5023 = vst [vmem:[%s6755_s28 + $0x5b8] sm:$0xff] %v6208_v10  ;;  %v2764_v15 = vpop.f32.mrf.mxu0  ;;  %v5946_v6 = vld [vmem:[%s6590_s23 + $0x790] ss:$8 sps:$4 sm:$0xff]   ;;  %v5951_v10 = vld [vmem:[%s6590_s23 + $0x3a4] ss:$8 sps:$4 sm:$0xff]  }
 0x1fe   : > { %v3276_v16 = vpop.f32.mrf.mxu1  ;;  %6221 = vtanh.f32 %v4387_v11  ;;  %v5954_v11 = vld [vmem:[%s6590_s23 + $0x7a4] ss:$8 sps:$4 sm:$0xff]  }
 0x1ff   : > { %v6210_v17 = vpop.eup %6209  ;;  %6223 = vtanh.f32 %v4515_v12  ;;  %v2767_v18 = vpop.f32.mrf.mxu0  ;;  %2958 = vmatmul.mubr.bf16.gmra.mxu0 %v5925_v8  ;;  %3470 = vmatmul.mubr.bf16.gmra.mxu1 %v5928_v9 }
 0x200   : > { %v3279_v19 = vpop.f32.mrf.mxu1  ;;  %v6212_v20 = vpop.eup %6211  ;;  %4896 = vst [vmem:[%s6755_s28 + $0x1c0] sm:$0xff] %v6210_v17  ;;  %v4388_v21 = vadd.f32 %v6935_v55, %v2767_v18  ;;  %2965 = vmatprep.mubr.bf16.mxu0 %v5933_v13  ;;  %3477 = vmatprep.mubr.bf16.mxu1 %v5936_v14 }
 0x201   : > { %v4516_v22 = vadd.f32 %v6935_v55, %v3279_v19  ;;  %5024 = vst [vmem:[%s6755_s28 + $0x5c0] sm:$0xff] %v6212_v20  ;;  %v2769_v23 = vpop.f32.mrf.mxu0 }
 0x202   : > { %v3281_v24 = vpop.f32.mrf.mxu1  ;;  %6225 = vtanh.f32 %v4388_v21 }
 0x203   : > { %v6214_v25 = vpop.eup %6213  ;;  %6227 = vtanh.f32 %v4516_v22  ;;  %v2770_v26 = vpop.f32.mrf.mxu0 }
 0x204   : > { %v3282_v27 = vpop.f32.mrf.mxu1  ;;  %v6216_v30 = vpop.eup %6215  ;;  %4897 = vst [vmem:[%s6755_s28 + $0x1c8] sm:$0xff] %v6214_v25  ;;  %v4389_v31 = vadd.f32 %v6935_v55, %v2770_v26  ;;  %v5949_v25 = vld [vmem:[%s6590_s23 + $0x3a0] ss:$8 sps:$4 sm:$0xff]  }
 0x205   : > { %v4517_v32 = vadd.f32 %v6935_v55, %v3282_v27  ;;  %5025 = vst [vmem:[%s6755_s28 + $0x5c8] sm:$0xff] %v6216_v30  ;;  %v2772_v35 = vpop.f32.mrf.mxu0  ;;  %v5952_v26 = vld [vmem:[%s6590_s23 + $0x7a0] ss:$8 sps:$4 sm:$0xff]   ;;  %v5957_v30 = vld [vmem:[%s6590_s23 + $0x3b4] ss:$8 sps:$4 sm:$0xff]  }
 0x206   : > { %v3284_v36 = vpop.f32.mrf.mxu1  ;;  %6229 = vtanh.f32 %v4389_v31  ;;  %v5960_v31 = vld [vmem:[%s6590_s23 + $0x7b4] ss:$8 sps:$4 sm:$0xff]  }
 0x207   : > { %v6218_v37 = vpop.eup %6217  ;;  %6231 = vtanh.f32 %v4517_v32  ;;  %v2775_v38 = vpop.f32.mrf.mxu0  ;;  %2966 = vmatmul.mubr.bf16.gmra.mxu0 %v5931_v28  ;;  %3478 = vmatmul.mubr.bf16.gmra.mxu1 %v5934_v29 }
 0x208   : > { %v3287_v39 = vpop.f32.mrf.mxu1  ;;  %v6220_v40 = vpop.eup %6219  ;;  %4898 = vst [vmem:[%s6755_s28 + $0x1d0] sm:$0xff] %v6218_v37  ;;  %v4390_v41 = vadd.f32 %v6935_v55, %v2775_v38  ;;  %2973 = vmatprep.mubr.bf16.mxu0 %v5939_v33  ;;  %3485 = vmatprep.mubr.bf16.mxu1 %v5942_v34 }
 0x209   : > { %v4518_v42 = vadd.f32 %v6935_v55, %v3287_v39  ;;  %5026 = vst [vmem:[%s6755_s28 + $0x5d0] sm:$0xff] %v6220_v40  ;;  %v2777_v43 = vpop.f32.mrf.mxu0 }
 0x20a   : > { %v3289_v44 = vpop.f32.mrf.mxu1  ;;  %6233 = vtanh.f32 %v4390_v41 }
 0x20b   : > { %v6222_v45 = vpop.eup %6221  ;;  %6235 = vtanh.f32 %v4518_v42  ;;  %v2778_v46 = vpop.f32.mrf.mxu0 }
 0x20c   : > { %v3290_v47 = vpop.f32.mrf.mxu1  ;;  %v6224_v50 = vpop.eup %6223  ;;  %4899 = vst [vmem:[%s6755_s28 + $0x1d8] sm:$0xff] %v6222_v45  ;;  %v4391_v51 = vadd.f32 %v6935_v55, %v2778_v46  ;;  %v5955_v45 = vld [vmem:[%s6590_s23 + $0x3b0] ss:$8 sps:$4 sm:$0xff]  }
 0x20d   : > { %v4519_v52 = vadd.f32 %v6935_v55, %v3290_v47  ;;  %5027 = vst [vmem:[%s6755_s28 + $0x5d8] sm:$0xff] %v6224_v50  ;;  %v2780_v56 = vpop.f32.mrf.mxu0  ;;  %v5958_v46 = vld [vmem:[%s6590_s23 + $0x7b0] ss:$8 sps:$4 sm:$0xff]   ;;  %v5963_v50 = vld [vmem:[%s6590_s23 + $0x3c4] ss:$8 sps:$4 sm:$0xff]  }
 0x20e   : > { %v3292_v57 = vpop.f32.mrf.mxu1  ;;  %6237 = vtanh.f32 %v4391_v51  ;;  %v5966_v51 = vld [vmem:[%s6590_s23 + $0x7c4] ss:$8 sps:$4 sm:$0xff]  }
 0x20f   : > { %v6226_v58 = vpop.eup %6225  ;;  %6239 = vtanh.f32 %v4519_v52  ;;  %v2783_v59 = vpop.f32.mrf.mxu0  ;;  %2974 = vmatmul.mubr.bf16.gmra.mxu0 %v5937_v48  ;;  %3486 = vmatmul.mubr.bf16.gmra.mxu1 %v5940_v49 }
 0x210   : > { %v3295_v60 = vpop.f32.mrf.mxu1  ;;  %v6228_v61 = vpop.eup %6227  ;;  %4900 = vst [vmem:[%s6755_s28 + $0x1e0] sm:$0xff] %v6226_v58  ;;  %v4392_v62 = vadd.f32 %v6935_v55, %v2783_v59  ;;  %2981 = vmatprep.mubr.bf16.mxu0 %v5945_v53  ;;  %3493 = vmatprep.mubr.bf16.mxu1 %v5948_v54 }
 0x211   : > { %v4520_v63 = vadd.f32 %v6935_v55, %v3295_v60  ;;  %5028 = vst [vmem:[%s6755_s28 + $0x5e0] sm:$0xff] %v6228_v61  ;;  %v2785_v0 = vpop.f32.mrf.mxu0  ;;  %v7132_v55 = vld [vmem:[%s7433_s2] ss:$0 sm:$0xff] }
 0x212   : > { %v3297_v1 = vpop.f32.mrf.mxu1  ;;  %6241 = vtanh.f32 %v4392_v62 }
 0x213   : > { %v6230_v2 = vpop.eup %6229  ;;  %6243 = vtanh.f32 %v4520_v63  ;;  %v2786_v3 = vpop.f32.mrf.mxu0 }
 0x214   : > { %v3298_v4 = vpop.f32.mrf.mxu1  ;;  %v6232_v7 = vpop.eup %6231  ;;  %4901 = vst [vmem:[%s6755_s28 + $0x1e8] sm:$0xff] %v6230_v2  ;;  %v4393_v8 = vadd.f32 %v7132_v55, %v2786_v3  ;;  %v5961_v2 = vld [vmem:[%s6590_s23 + $0x3c0] ss:$8 sps:$4 sm:$0xff]  }
 0x215   : > { %v4521_v9 = vadd.f32 %v7132_v55, %v3298_v4  ;;  %5029 = vst [vmem:[%s6755_s28 + $0x5e8] sm:$0xff] %v6232_v7  ;;  %v2788_v12 = vpop.f32.mrf.mxu0  ;;  %v5964_v3 = vld [vmem:[%s6590_s23 + $0x7c0] ss:$8 sps:$4 sm:$0xff]   ;;  %v5969_v7 = vld [vmem:[%s6590_s23 + $0x3d4] ss:$8 sps:$4 sm:$0xff]  }
 0x216   : > { %v3300_v13 = vpop.f32.mrf.mxu1  ;;  %6245 = vtanh.f32 %v4393_v8  ;;  %v5972_v8 = vld [vmem:[%s6590_s23 + $0x7d4] ss:$8 sps:$4 sm:$0xff]  }
 0x217   : > { %v6234_v14 = vpop.eup %6233  ;;  %6247 = vtanh.f32 %v4521_v9  ;;  %v2791_v15 = vpop.f32.mrf.mxu0  ;;  %2982 = vmatmul.mubr.bf16.gmra.mxu0 %v5943_v5  ;;  %3494 = vmatmul.mubr.bf16.gmra.mxu1 %v5946_v6 }
 0x218   : > { %v3303_v16 = vpop.f32.mrf.mxu1  ;;  %v6236_v17 = vpop.eup %6235  ;;  %4902 = vst [vmem:[%s6755_s28 + $0x1f0] sm:$0xff] %v6234_v14  ;;  %v4394_v18 = vadd.f32 %v7132_v55, %v2791_v15  ;;  %2989 = vmatprep.mubr.bf16.mxu0 %v5951_v10  ;;  %3501 = vmatprep.mubr.bf16.mxu1 %v5954_v11 }
 0x219   : > { %v4522_v19 = vadd.f32 %v7132_v55, %v3303_v16  ;;  %5030 = vst [vmem:[%s6755_s28 + $0x5f0] sm:$0xff] %v6236_v17  ;;  %v2793_v20 = vpop.f32.mrf.mxu0 }
 0x21a   : > { %v3305_v21 = vpop.f32.mrf.mxu1  ;;  %6249 = vtanh.f32 %v4394_v18 }
 0x21b   : > { %v6238_v22 = vpop.eup %6237  ;;  %6251 = vtanh.f32 %v4522_v19  ;;  %v2794_v23 = vpop.f32.mrf.mxu0 }
 0x21c   : > { %v3306_v24 = vpop.f32.mrf.mxu1  ;;  %v6240_v27 = vpop.eup %6239  ;;  %4903 = vst [vmem:[%s6755_s28 + $0x1f8] sm:$0xff] %v6238_v22  ;;  %v4395_v28 = vadd.f32 %v7132_v55, %v2794_v23  ;;  %v5967_v22 = vld [vmem:[%s6590_s23 + $0x3d0] ss:$8 sps:$4 sm:$0xff]  }
 0x21d   : > { %v4523_v29 = vadd.f32 %v7132_v55, %v3306_v24  ;;  %5031 = vst [vmem:[%s6755_s28 + $0x5f8] sm:$0xff] %v6240_v27  ;;  %v2796_v32 = vpop.f32.mrf.mxu0  ;;  %v5970_v23 = vld [vmem:[%s6590_s23 + $0x7d0] ss:$8 sps:$4 sm:$0xff]   ;;  %v5975_v27 = vld [vmem:[%s6590_s23 + $0x3e4] ss:$8 sps:$4 sm:$0xff]  }
 0x21e   : > { %v3308_v33 = vpop.f32.mrf.mxu1  ;;  %6253 = vtanh.f32 %v4395_v28  ;;  %v5978_v28 = vld [vmem:[%s6590_s23 + $0x7e4] ss:$8 sps:$4 sm:$0xff]  }
 0x21f   : > { %v6242_v34 = vpop.eup %6241  ;;  %6255 = vtanh.f32 %v4523_v29  ;;  %v2799_v35 = vpop.f32.mrf.mxu0  ;;  %2990 = vmatmul.mubr.bf16.gmra.mxu0 %v5949_v25  ;;  %3502 = vmatmul.mubr.bf16.gmra.mxu1 %v5952_v26 }
 0x220   : > { %v3311_v36 = vpop.f32.mrf.mxu1  ;;  %v6244_v37 = vpop.eup %6243  ;;  %4904 = vst [vmem:[%s6755_s28 + $0x200] sm:$0xff] %v6242_v34  ;;  %v4396_v38 = vadd.f32 %v7132_v55, %v2799_v35  ;;  %2997 = vmatprep.mubr.bf16.mxu0 %v5957_v30  ;;  %3509 = vmatprep.mubr.bf16.mxu1 %v5960_v31 }
 0x221   : > { %v4524_v39 = vadd.f32 %v7132_v55, %v3311_v36  ;;  %5032 = vst [vmem:[%s6755_s28 + $0x600] sm:$0xff] %v6244_v37  ;;  %v2801_v40 = vpop.f32.mrf.mxu0 }
 0x222   : > { %v3313_v41 = vpop.f32.mrf.mxu1  ;;  %6257 = vtanh.f32 %v4396_v38 }
 0x223   : > { %v6246_v42 = vpop.eup %6245  ;;  %6259 = vtanh.f32 %v4524_v39  ;;  %v2802_v43 = vpop.f32.mrf.mxu0 }
 0x224   : > { %v3314_v44 = vpop.f32.mrf.mxu1  ;;  %v6248_v47 = vpop.eup %6247  ;;  %4905 = vst [vmem:[%s6755_s28 + $0x208] sm:$0xff] %v6246_v42  ;;  %v4397_v48 = vadd.f32 %v7132_v55, %v2802_v43  ;;  %v5973_v42 = vld [vmem:[%s6590_s23 + $0x3e0] ss:$8 sps:$4 sm:$0xff]  }
 0x225   : > { %v4525_v49 = vadd.f32 %v7132_v55, %v3314_v44  ;;  %5033 = vst [vmem:[%s6755_s28 + $0x608] sm:$0xff] %v6248_v47  ;;  %v2804_v52 = vpop.f32.mrf.mxu0  ;;  %v5976_v43 = vld [vmem:[%s6590_s23 + $0x7e0] ss:$8 sps:$4 sm:$0xff]   ;;  %v5981_v47 = vld [vmem:[%s6590_s23 + $0x3f4] ss:$8 sps:$4 sm:$0xff]  }
 0x226   : > { %v3316_v53 = vpop.f32.mrf.mxu1  ;;  %6261 = vtanh.f32 %v4397_v48  ;;  %v5984_v48 = vld [vmem:[%s6590_s23 + $0x7f4] ss:$8 sps:$4 sm:$0xff]  }
 0x227   : > { %v6250_v54 = vpop.eup %6249  ;;  %6263 = vtanh.f32 %v4525_v49  ;;  %v2807_v56 = vpop.f32.mrf.mxu0  ;;  %2998 = vmatmul.mubr.bf16.gmra.mxu0 %v5955_v45  ;;  %3510 = vmatmul.mubr.bf16.gmra.mxu1 %v5958_v46 }
 0x228   : > { %v3319_v57 = vpop.f32.mrf.mxu1  ;;  %v6252_v58 = vpop.eup %6251  ;;  %4906 = vst [vmem:[%s6755_s28 + $0x210] sm:$0xff] %v6250_v54  ;;  %v4398_v59 = vadd.f32 %v7132_v55, %v2807_v56  ;;  %3005 = vmatprep.mubr.bf16.mxu0 %v5963_v50  ;;  %3517 = vmatprep.mubr.bf16.mxu1 %v5966_v51 }
 0x229   : > { %v4526_v60 = vadd.f32 %v7132_v55, %v3319_v57  ;;  %5034 = vst [vmem:[%s6755_s28 + $0x610] sm:$0xff] %v6252_v58  ;;  %v2809_v61 = vpop.f32.mrf.mxu0 }
 0x22a   : > { %v3321_v62 = vpop.f32.mrf.mxu1  ;;  %6265 = vtanh.f32 %v4398_v59 }
 0x22b   : > { %v6254_v63 = vpop.eup %6253  ;;  %6267 = vtanh.f32 %v4526_v60  ;;  %v2810_v0 = vpop.f32.mrf.mxu0 }
 0x22c   : > { %v3322_v1 = vpop.f32.mrf.mxu1  ;;  %v6256_v4 = vpop.eup %6255  ;;  %4907 = vst [vmem:[%s6755_s28 + $0x218] sm:$0xff] %v6254_v63  ;;  %v4399_v5 = vadd.f32 %v7132_v55, %v2810_v0  ;;  %v5979_v63 = vld [vmem:[%s6590_s23 + $0x3f0] ss:$8 sps:$4 sm:$0xff]  }
 0x22d   : > { %v4527_v6 = vadd.f32 %v7132_v55, %v3322_v1  ;;  %5035 = vst [vmem:[%s6755_s28 + $0x618] sm:$0xff] %v6256_v4  ;;  %v2812_v9 = vpop.f32.mrf.mxu0  ;;  %v5982_v0 = vld [vmem:[%s6590_s23 + $0x7f0] ss:$8 sps:$4 sm:$0xff]  }
 0x22e   : > { %v3324_v10 = vpop.f32.mrf.mxu1  ;;  %6269 = vtanh.f32 %v4399_v5 }
 0x22f   : > { %v6258_v11 = vpop.eup %6257  ;;  %6271 = vtanh.f32 %v4527_v6  ;;  %v2815_v12 = vpop.f32.mrf.mxu0  ;;  %3006 = vmatmul.mubr.bf16.gmra.mxu0 %v5961_v2  ;;  %3518 = vmatmul.mubr.bf16.gmra.mxu1 %v5964_v3 }
 0x230   : > { %v3327_v13 = vpop.f32.mrf.mxu1  ;;  %v6260_v14 = vpop.eup %6259  ;;  %4908 = vst [vmem:[%s6755_s28 + $0x220] sm:$0xff] %v6258_v11  ;;  %v4400_v15 = vadd.f32 %v7132_v55, %v2815_v12  ;;  %3013 = vmatprep.mubr.bf16.mxu0 %v5969_v7  ;;  %3525 = vmatprep.mubr.bf16.mxu1 %v5972_v8 }
 0x231   : > { %v4528_v16 = vadd.f32 %v7132_v55, %v3327_v13  ;;  %5036 = vst [vmem:[%s6755_s28 + $0x620] sm:$0xff] %v6260_v14  ;;  %v2817_v17 = vpop.f32.mrf.mxu0 }
 0x232   : > { %v3329_v18 = vpop.f32.mrf.mxu1  ;;  %6273 = vtanh.f32 %v4400_v15 }
 0x233   : > { %v6262_v19 = vpop.eup %6261  ;;  %6275 = vtanh.f32 %v4528_v16  ;;  %v2818_v20 = vpop.f32.mrf.mxu0 }
 0x234   : > { %v3330_v21 = vpop.f32.mrf.mxu1  ;;  %v6264_v24 = vpop.eup %6263  ;;  %4909 = vst [vmem:[%s6755_s28 + $0x228] sm:$0xff] %v6262_v19  ;;  %v4401_v25 = vadd.f32 %v7132_v55, %v2818_v20 }
 0x235   : > { %v4529_v26 = vadd.f32 %v7132_v55, %v3330_v21  ;;  %5037 = vst [vmem:[%s6755_s28 + $0x628] sm:$0xff] %v6264_v24  ;;  %v2820_v29 = vpop.f32.mrf.mxu0 }
 0x236   : > { %v3332_v30 = vpop.f32.mrf.mxu1  ;;  %6277 = vtanh.f32 %v4401_v25 }
 0x237   : > { %v6266_v31 = vpop.eup %6265  ;;  %6279 = vtanh.f32 %v4529_v26  ;;  %v2823_v32 = vpop.f32.mrf.mxu0  ;;  %3014 = vmatmul.mubr.bf16.gmra.mxu0 %v5967_v22  ;;  %3526 = vmatmul.mubr.bf16.gmra.mxu1 %v5970_v23 }
 0x238   : > { %v3335_v33 = vpop.f32.mrf.mxu1  ;;  %v6268_v34 = vpop.eup %6267  ;;  %4910 = vst [vmem:[%s6755_s28 + $0x230] sm:$0xff] %v6266_v31  ;;  %v4402_v35 = vadd.f32 %v7132_v55, %v2823_v32  ;;  %3021 = vmatprep.mubr.bf16.mxu0 %v5975_v27  ;;  %3533 = vmatprep.mubr.bf16.mxu1 %v5978_v28 }
 0x239   : > { %v4530_v36 = vadd.f32 %v7132_v55, %v3335_v33  ;;  %5038 = vst [vmem:[%s6755_s28 + $0x630] sm:$0xff] %v6268_v34  ;;  %v2825_v37 = vpop.f32.mrf.mxu0 }
 0x23a   : > { %v3337_v38 = vpop.f32.mrf.mxu1  ;;  %6281 = vtanh.f32 %v4402_v35 }
 0x23b   : > { %v6270_v39 = vpop.eup %6269  ;;  %6283 = vtanh.f32 %v4530_v36  ;;  %v2826_v40 = vpop.f32.mrf.mxu0 }
 0x23c   : > { %v3338_v41 = vpop.f32.mrf.mxu1  ;;  %v6272_v44 = vpop.eup %6271  ;;  %4911 = vst [vmem:[%s6755_s28 + $0x238] sm:$0xff] %v6270_v39  ;;  %v4403_v45 = vadd.f32 %v7132_v55, %v2826_v40 }
 0x23d   : > { %v4531_v46 = vadd.f32 %v7132_v55, %v3338_v41  ;;  %5039 = vst [vmem:[%s6755_s28 + $0x638] sm:$0xff] %v6272_v44  ;;  %v2828_v49 = vpop.f32.mrf.mxu0 }
 0x23e   : > { %v3340_v50 = vpop.f32.mrf.mxu1  ;;  %6285 = vtanh.f32 %v4403_v45 }
 0x23f   : > { %v6274_v51 = vpop.eup %6273  ;;  %6287 = vtanh.f32 %v4531_v46  ;;  %v2831_v52 = vpop.f32.mrf.mxu0  ;;  %3022 = vmatmul.mubr.bf16.gmra.mxu0 %v5973_v42  ;;  %3534 = vmatmul.mubr.bf16.gmra.mxu1 %v5976_v43 }
 0x240   : > { %v3343_v53 = vpop.f32.mrf.mxu1  ;;  %v6276_v54 = vpop.eup %6275  ;;  %4912 = vst [vmem:[%s6755_s28 + $0x240] sm:$0xff] %v6274_v51  ;;  %v4404_v56 = vadd.f32 %v7132_v55, %v2831_v52  ;;  %3029 = vmatprep.mubr.bf16.mxu0 %v5981_v47  ;;  %3541 = vmatprep.mubr.bf16.mxu1 %v5984_v48 }
 0x241   : > { %v4532_v57 = vadd.f32 %v7132_v55, %v3343_v53  ;;  %5040 = vst [vmem:[%s6755_s28 + $0x640] sm:$0xff] %v6276_v54  ;;  %v2833_v58 = vpop.f32.mrf.mxu0 }
 0x242   : > { %v3345_v59 = vpop.f32.mrf.mxu1  ;;  %6289 = vtanh.f32 %v4404_v56 }
 0x243   : > { %v6278_v60 = vpop.eup %6277  ;;  %6291 = vtanh.f32 %v4532_v57  ;;  %v2834_v61 = vpop.f32.mrf.mxu0 }
 0x244   : > { %v3346_v62 = vpop.f32.mrf.mxu1  ;;  %v6280_v1 = vpop.eup %6279  ;;  %4913 = vst [vmem:[%s6755_s28 + $0x248] sm:$0xff] %v6278_v60  ;;  %v4405_v2 = vadd.f32 %v7132_v55, %v2834_v61 }
 0x245   : > { %v4533_v3 = vadd.f32 %v7132_v55, %v3346_v62  ;;  %5041 = vst [vmem:[%s6755_s28 + $0x648] sm:$0xff] %v6280_v1  ;;  %v2836_v4 = vpop.f32.mrf.mxu0 }
 0x246   : > { %v3348_v5 = vpop.f32.mrf.mxu1  ;;  %6293 = vtanh.f32 %v4405_v2 }
 0x247   : > { %v6282_v6 = vpop.eup %6281  ;;  %6295 = vtanh.f32 %v4533_v3  ;;  %v2839_v7 = vpop.f32.mrf.mxu0  ;;  %3030 = vmatmul.mubr.bf16.gmra.mxu0 %v5979_v63  ;;  %3542 = vmatmul.mubr.bf16.gmra.mxu1 %v5982_v0 }
 0x248   : > { %v3351_v8 = vpop.f32.mrf.mxu1  ;;  %v6284_v9 = vpop.eup %6283  ;;  %4914 = vst [vmem:[%s6755_s28 + $0x250] sm:$0xff] %v6282_v6  ;;  %v4406_v10 = vadd.f32 %v7132_v55, %v2839_v7 }
 0x249   : > { %v4534_v11 = vadd.f32 %v7132_v55, %v3351_v8  ;;  %5042 = vst [vmem:[%s6755_s28 + $0x650] sm:$0xff] %v6284_v9  ;;  %v2841_v12 = vpop.f32.mrf.mxu0 }
 0x24a   : > { %v3353_v13 = vpop.f32.mrf.mxu1  ;;  %6297 = vtanh.f32 %v4406_v10 }
 0x24b   : > { %v6286_v14 = vpop.eup %6285  ;;  %6299 = vtanh.f32 %v4534_v11  ;;  %v2842_v15 = vpop.f32.mrf.mxu0 }
 0x24c   : > { %v3354_v16 = vpop.f32.mrf.mxu1  ;;  %v6288_v17 = vpop.eup %6287  ;;  %4915 = vst [vmem:[%s6755_s28 + $0x258] sm:$0xff] %v6286_v14  ;;  %v4407_v18 = vadd.f32 %v7132_v55, %v2842_v15 }
 0x24d   : > { %v4535_v19 = vadd.f32 %v7132_v55, %v3354_v16  ;;  %5043 = vst [vmem:[%s6755_s28 + $0x658] sm:$0xff] %v6288_v17  ;;  %v2844_v20 = vpop.f32.mrf.mxu0 }
 0x24e   : > { %v3356_v21 = vpop.f32.mrf.mxu1  ;;  %6301 = vtanh.f32 %v4407_v18 }
 0x24f   : > { %v6290_v22 = vpop.eup %6289  ;;  %6303 = vtanh.f32 %v4535_v19  ;;  %v2847_v23 = vpop.f32.mrf.mxu0 }
 0x250   : > { %v3359_v24 = vpop.f32.mrf.mxu1  ;;  %v6292_v25 = vpop.eup %6291  ;;  %4916 = vst [vmem:[%s6755_s28 + $0x260] sm:$0xff] %v6290_v22  ;;  %v4408_v26 = vadd.f32 %v7132_v55, %v2847_v23 }
 0x251   : > { %v4536_v27 = vadd.f32 %v7132_v55, %v3359_v24  ;;  %5044 = vst [vmem:[%s6755_s28 + $0x660] sm:$0xff] %v6292_v25  ;;  %v2849_v28 = vpop.f32.mrf.mxu0 }
 0x252   : > { %v3361_v29 = vpop.f32.mrf.mxu1  ;;  %6305 = vtanh.f32 %v4408_v26 }
 0x253   : > { %v6294_v30 = vpop.eup %6293  ;;  %6307 = vtanh.f32 %v4536_v27  ;;  %v2850_v31 = vpop.f32.mrf.mxu0 }
 0x254   : > { %v3362_v32 = vpop.f32.mrf.mxu1  ;;  %v6296_v33 = vpop.eup %6295  ;;  %4917 = vst [vmem:[%s6755_s28 + $0x268] sm:$0xff] %v6294_v30  ;;  %v4409_v34 = vadd.f32 %v7132_v55, %v2850_v31 }
 0x255   : > { %v4537_v35 = vadd.f32 %v7132_v55, %v3362_v32  ;;  %5045 = vst [vmem:[%s6755_s28 + $0x668] sm:$0xff] %v6296_v33  ;;  %v2852_v36 = vpop.f32.mrf.mxu0 }
 0x256   : > { %v3364_v37 = vpop.f32.mrf.mxu1  ;;  %6309 = vtanh.f32 %v4409_v34 }
 0x257   : > { %v6298_v38 = vpop.eup %6297  ;;  %6311 = vtanh.f32 %v4537_v35  ;;  %v2855_v39 = vpop.f32.mrf.mxu0 }
 0x258   : > { %v3367_v40 = vpop.f32.mrf.mxu1  ;;  %v6300_v41 = vpop.eup %6299  ;;  %4918 = vst [vmem:[%s6755_s28 + $0x270] sm:$0xff] %v6298_v38  ;;  %v4410_v42 = vadd.f32 %v7132_v55, %v2855_v39 }
 0x259   : > { %v4538_v43 = vadd.f32 %v7132_v55, %v3367_v40  ;;  %5046 = vst [vmem:[%s6755_s28 + $0x670] sm:$0xff] %v6300_v41  ;;  %v2857_v44 = vpop.f32.mrf.mxu0 }
 0x25a   : > { %v3369_v45 = vpop.f32.mrf.mxu1  ;;  %6313 = vtanh.f32 %v4410_v42 }
 0x25b   : > { %v6302_v46 = vpop.eup %6301  ;;  %6315 = vtanh.f32 %v4538_v43  ;;  %v2858_v47 = vpop.f32.mrf.mxu0 }
 0x25c   : > { %v3370_v48 = vpop.f32.mrf.mxu1  ;;  %v6304_v49 = vpop.eup %6303  ;;  %4919 = vst [vmem:[%s6755_s28 + $0x278] sm:$0xff] %v6302_v46  ;;  %v4411_v50 = vadd.f32 %v7132_v55, %v2858_v47 }
 0x25d   : > { %v4539_v51 = vadd.f32 %v7132_v55, %v3370_v48  ;;  %5047 = vst [vmem:[%s6755_s28 + $0x678] sm:$0xff] %v6304_v49  ;;  %v2860_v52 = vpop.f32.mrf.mxu0 }
 0x25e   : > { %v3372_v53 = vpop.f32.mrf.mxu1  ;;  %6317 = vtanh.f32 %v4411_v50 }
 0x25f   : > { %v6306_v54 = vpop.eup %6305  ;;  %6319 = vtanh.f32 %v4539_v51  ;;  %v2863_v56 = vpop.f32.mrf.mxu0 }
 0x260   : > { %v3375_v57 = vpop.f32.mrf.mxu1  ;;  %v6308_v58 = vpop.eup %6307  ;;  %4920 = vst [vmem:[%s6755_s28 + $0x280] sm:$0xff] %v6306_v54  ;;  %v4412_v59 = vadd.f32 %v7132_v55, %v2863_v56 }
 0x261   : > { %v4540_v60 = vadd.f32 %v7132_v55, %v3375_v57  ;;  %5048 = vst [vmem:[%s6755_s28 + $0x680] sm:$0xff] %v6308_v58  ;;  %v2865_v61 = vpop.f32.mrf.mxu0 }
 0x262   : > { %v3377_v62 = vpop.f32.mrf.mxu1  ;;  %6321 = vtanh.f32 %v4412_v59 }
 0x263   : > { %v6310_v63 = vpop.eup %6309  ;;  %6323 = vtanh.f32 %v4540_v60  ;;  %v2866_v0 = vpop.f32.mrf.mxu0 }
 0x264   : > { %v3378_v1 = vpop.f32.mrf.mxu1  ;;  %v6312_v2 = vpop.eup %6311  ;;  %4921 = vst [vmem:[%s6755_s28 + $0x288] sm:$0xff] %v6310_v63  ;;  %v4413_v3 = vadd.f32 %v7132_v55, %v2866_v0 }
 0x265   : > { %v4541_v4 = vadd.f32 %v7132_v55, %v3378_v1  ;;  %5049 = vst [vmem:[%s6755_s28 + $0x688] sm:$0xff] %v6312_v2  ;;  %v2868_v5 = vpop.f32.mrf.mxu0 }
 0x266   : > { %v3380_v6 = vpop.f32.mrf.mxu1  ;;  %6325 = vtanh.f32 %v4413_v3 }
 0x267   : > { %v6314_v7 = vpop.eup %6313  ;;  %6327 = vtanh.f32 %v4541_v4  ;;  %v2871_v8 = vpop.f32.mrf.mxu0 }
 0x268   : > { %v3383_v9 = vpop.f32.mrf.mxu1  ;;  %v6316_v10 = vpop.eup %6315  ;;  %4922 = vst [vmem:[%s6755_s28 + $0x290] sm:$0xff] %v6314_v7  ;;  %v4414_v11 = vadd.f32 %v7132_v55, %v2871_v8 }
 0x269   : > { %v4542_v12 = vadd.f32 %v7132_v55, %v3383_v9  ;;  %5050 = vst [vmem:[%s6755_s28 + $0x690] sm:$0xff] %v6316_v10  ;;  %v2873_v13 = vpop.f32.mrf.mxu0 }
 0x26a   : > { %v3385_v14 = vpop.f32.mrf.mxu1  ;;  %6329 = vtanh.f32 %v4414_v11 }
 0x26b   : > { %v6318_v15 = vpop.eup %6317  ;;  %6331 = vtanh.f32 %v4542_v12  ;;  %v2874_v16 = vpop.f32.mrf.mxu0 }
 0x26c   : > { %v3386_v17 = vpop.f32.mrf.mxu1  ;;  %v6320_v18 = vpop.eup %6319  ;;  %4923 = vst [vmem:[%s6755_s28 + $0x298] sm:$0xff] %v6318_v15  ;;  %v4415_v19 = vadd.f32 %v7132_v55, %v2874_v16 }
 0x26d   : > { %v4543_v20 = vadd.f32 %v7132_v55, %v3386_v17  ;;  %5051 = vst [vmem:[%s6755_s28 + $0x698] sm:$0xff] %v6320_v18  ;;  %v2876_v21 = vpop.f32.mrf.mxu0 }
 0x26e   : > { %v3388_v22 = vpop.f32.mrf.mxu1  ;;  %6333 = vtanh.f32 %v4415_v19 }
 0x26f   : > { %v6322_v23 = vpop.eup %6321  ;;  %6335 = vtanh.f32 %v4543_v20  ;;  %v2879_v24 = vpop.f32.mrf.mxu0 }
 0x270   : > { %v3391_v25 = vpop.f32.mrf.mxu1  ;;  %v6324_v26 = vpop.eup %6323  ;;  %4924 = vst [vmem:[%s6755_s28 + $0x2a0] sm:$0xff] %v6322_v23  ;;  %v4416_v27 = vadd.f32 %v7132_v55, %v2879_v24 }
 0x271   : > { %v4544_v28 = vadd.f32 %v7132_v55, %v3391_v25  ;;  %5052 = vst [vmem:[%s6755_s28 + $0x6a0] sm:$0xff] %v6324_v26  ;;  %v2881_v29 = vpop.f32.mrf.mxu0 }
 0x272   : > { %v3393_v30 = vpop.f32.mrf.mxu1  ;;  %6337 = vtanh.f32 %v4416_v27 }
 0x273   : > { %v6326_v31 = vpop.eup %6325  ;;  %6339 = vtanh.f32 %v4544_v28  ;;  %v2882_v32 = vpop.f32.mrf.mxu0 }
 0x274   : > { %v3394_v33 = vpop.f32.mrf.mxu1  ;;  %v6328_v34 = vpop.eup %6327  ;;  %4925 = vst [vmem:[%s6755_s28 + $0x2a8] sm:$0xff] %v6326_v31  ;;  %v4417_v35 = vadd.f32 %v7132_v55, %v2882_v32 }
 0x275   : > { %v4545_v36 = vadd.f32 %v7132_v55, %v3394_v33  ;;  %5053 = vst [vmem:[%s6755_s28 + $0x6a8] sm:$0xff] %v6328_v34  ;;  %v2884_v37 = vpop.f32.mrf.mxu0 }
 0x276   : > { %v3396_v38 = vpop.f32.mrf.mxu1  ;;  %6341 = vtanh.f32 %v4417_v35 }
 0x277   : > { %v6330_v39 = vpop.eup %6329  ;;  %6343 = vtanh.f32 %v4545_v36  ;;  %v2887_v40 = vpop.f32.mrf.mxu0 }
 0x278   : > { %v3399_v41 = vpop.f32.mrf.mxu1  ;;  %v6332_v42 = vpop.eup %6331  ;;  %4926 = vst [vmem:[%s6755_s28 + $0x2b0] sm:$0xff] %v6330_v39  ;;  %v4418_v43 = vadd.f32 %v7132_v55, %v2887_v40 }
 0x279   : > { %v4546_v44 = vadd.f32 %v7132_v55, %v3399_v41  ;;  %5054 = vst [vmem:[%s6755_s28 + $0x6b0] sm:$0xff] %v6332_v42  ;;  %v2889_v45 = vpop.f32.mrf.mxu0 }
 0x27a   : > { %v3401_v46 = vpop.f32.mrf.mxu1  ;;  %6345 = vtanh.f32 %v4418_v43 }
 0x27b   : > { %v6334_v47 = vpop.eup %6333  ;;  %6347 = vtanh.f32 %v4546_v44  ;;  %v2890_v48 = vpop.f32.mrf.mxu0 }
 0x27c   : > { %v3402_v49 = vpop.f32.mrf.mxu1  ;;  %v6336_v50 = vpop.eup %6335  ;;  %4927 = vst [vmem:[%s6755_s28 + $0x2b8] sm:$0xff] %v6334_v47  ;;  %v4419_v51 = vadd.f32 %v7132_v55, %v2890_v48 }
 0x27d   : > { %v4547_v52 = vadd.f32 %v7132_v55, %v3402_v49  ;;  %5055 = vst [vmem:[%s6755_s28 + $0x6b8] sm:$0xff] %v6336_v50  ;;  %v2892_v53 = vpop.f32.mrf.mxu0 }
 0x27e   : > { %v3404_v54 = vpop.f32.mrf.mxu1  ;;  %6349 = vtanh.f32 %v4419_v51 }
 0x27f   : > { %v6338_v56 = vpop.eup %6337  ;;  %6351 = vtanh.f32 %v4547_v52  ;;  %v2895_v57 = vpop.f32.mrf.mxu0 }
 0x280   : > { %v3407_v58 = vpop.f32.mrf.mxu1  ;;  %v6340_v59 = vpop.eup %6339  ;;  %4928 = vst [vmem:[%s6755_s28 + $0x2c0] sm:$0xff] %v6338_v56  ;;  %v4420_v60 = vadd.f32 %v7132_v55, %v2895_v57 }
 0x281   : > { %v4548_v61 = vadd.f32 %v7132_v55, %v3407_v58  ;;  %5056 = vst [vmem:[%s6755_s28 + $0x6c0] sm:$0xff] %v6340_v59  ;;  %v2897_v62 = vpop.f32.mrf.mxu0 }
 0x282   : > { %v3409_v63 = vpop.f32.mrf.mxu1  ;;  %6353 = vtanh.f32 %v4420_v60 }
 0x283   : > { %v6342_v0 = vpop.eup %6341  ;;  %6355 = vtanh.f32 %v4548_v61  ;;  %v2898_v1 = vpop.f32.mrf.mxu0 }
 0x284   : > { %v3410_v2 = vpop.f32.mrf.mxu1  ;;  %v6344_v3 = vpop.eup %6343  ;;  %4929 = vst [vmem:[%s6755_s28 + $0x2c8] sm:$0xff] %v6342_v0  ;;  %v4421_v4 = vadd.f32 %v7132_v55, %v2898_v1 }
 0x285   : > { %v4549_v5 = vadd.f32 %v7132_v55, %v3410_v2  ;;  %5057 = vst [vmem:[%s6755_s28 + $0x6c8] sm:$0xff] %v6344_v3  ;;  %v2900_v6 = vpop.f32.mrf.mxu0 }
 0x286   : > { %v3412_v7 = vpop.f32.mrf.mxu1  ;;  %6357 = vtanh.f32 %v4421_v4 }
 0x287   : > { %v6346_v8 = vpop.eup %6345  ;;  %6359 = vtanh.f32 %v4549_v5  ;;  %v2903_v9 = vpop.f32.mrf.mxu0 }
 0x288   : > { %v3415_v10 = vpop.f32.mrf.mxu1  ;;  %v6348_v11 = vpop.eup %6347  ;;  %4930 = vst [vmem:[%s6755_s28 + $0x2d0] sm:$0xff] %v6346_v8  ;;  %v4422_v12 = vadd.f32 %v7132_v55, %v2903_v9 }
 0x289   : > { %v4550_v13 = vadd.f32 %v7132_v55, %v3415_v10  ;;  %5058 = vst [vmem:[%s6755_s28 + $0x6d0] sm:$0xff] %v6348_v11  ;;  %v2905_v14 = vpop.f32.mrf.mxu0 }
 0x28a   : > { %v3417_v15 = vpop.f32.mrf.mxu1  ;;  %6361 = vtanh.f32 %v4422_v12 }
 0x28b   : > { %v6350_v16 = vpop.eup %6349  ;;  %6363 = vtanh.f32 %v4550_v13  ;;  %v2906_v17 = vpop.f32.mrf.mxu0 }
 0x28c   : > { %v3418_v18 = vpop.f32.mrf.mxu1  ;;  %v6352_v19 = vpop.eup %6351  ;;  %4931 = vst [vmem:[%s6755_s28 + $0x2d8] sm:$0xff] %v6350_v16  ;;  %v4423_v20 = vadd.f32 %v7132_v55, %v2906_v17 }
 0x28d   : > { %v4551_v21 = vadd.f32 %v7132_v55, %v3418_v18  ;;  %5059 = vst [vmem:[%s6755_s28 + $0x6d8] sm:$0xff] %v6352_v19  ;;  %v2908_v22 = vpop.f32.mrf.mxu0 }
 0x28e   : > { %v3420_v23 = vpop.f32.mrf.mxu1  ;;  %6365 = vtanh.f32 %v4423_v20 }
 0x28f   : > { %v6354_v24 = vpop.eup %6353  ;;  %6367 = vtanh.f32 %v4551_v21  ;;  %v2911_v25 = vpop.f32.mrf.mxu0 }
 0x290   : > { %v3423_v26 = vpop.f32.mrf.mxu1  ;;  %v6356_v27 = vpop.eup %6355  ;;  %4932 = vst [vmem:[%s6755_s28 + $0x2e0] sm:$0xff] %v6354_v24  ;;  %v4424_v28 = vadd.f32 %v7132_v55, %v2911_v25 }
 0x291   : > { %v4552_v29 = vadd.f32 %v7132_v55, %v3423_v26  ;;  %5060 = vst [vmem:[%s6755_s28 + $0x6e0] sm:$0xff] %v6356_v27  ;;  %v2913_v30 = vpop.f32.mrf.mxu0 }
 0x292   : > { %v3425_v31 = vpop.f32.mrf.mxu1  ;;  %6369 = vtanh.f32 %v4424_v28 }
 0x293   : > { %v6358_v32 = vpop.eup %6357  ;;  %6371 = vtanh.f32 %v4552_v29  ;;  %v2914_v33 = vpop.f32.mrf.mxu0  ;;  %v7317_v29 = vld [vmem:[%s7433_s2] ss:$0 sm:$0xff] }
 0x294   : > { %v3426_v34 = vpop.f32.mrf.mxu1  ;;  %v6360_v35 = vpop.eup %6359  ;;  %4933 = vst [vmem:[%s6755_s28 + $0x2e8] sm:$0xff] %v6358_v32  ;;  %v4425_v36 = vadd.f32 %v7132_v55, %v2914_v33 }
 0x295   : > { %v4553_v37 = vadd.f32 %v7132_v55, %v3426_v34  ;;  %5061 = vst [vmem:[%s6755_s28 + $0x6e8] sm:$0xff] %v6360_v35  ;;  %v2916_v38 = vpop.f32.mrf.mxu0 }
 0x296   : > { %v3428_v39 = vpop.f32.mrf.mxu1  ;;  %6373 = vtanh.f32 %v4425_v36 }
 0x297   : > { %v6362_v40 = vpop.eup %6361  ;;  %6375 = vtanh.f32 %v4553_v37  ;;  %v2919_v41 = vpop.f32.mrf.mxu0 }
 0x298   : > { %v3431_v42 = vpop.f32.mrf.mxu1  ;;  %v6364_v43 = vpop.eup %6363  ;;  %4934 = vst [vmem:[%s6755_s28 + $0x2f0] sm:$0xff] %v6362_v40  ;;  %v4426_v44 = vadd.f32 %v7132_v55, %v2919_v41 }
 0x299   : > { %v4554_v45 = vadd.f32 %v7132_v55, %v3431_v42  ;;  %5062 = vst [vmem:[%s6755_s28 + $0x6f0] sm:$0xff] %v6364_v43  ;;  %v2921_v46 = vpop.f32.mrf.mxu0 }
 0x29a   : > { %v3433_v47 = vpop.f32.mrf.mxu1  ;;  %6377 = vtanh.f32 %v4426_v44 }
 0x29b   : > { %v6366_v48 = vpop.eup %6365  ;;  %6379 = vtanh.f32 %v4554_v45  ;;  %v2922_v49 = vpop.f32.mrf.mxu0 }
 0x29c   : > { %v3434_v50 = vpop.f32.mrf.mxu1  ;;  %v6368_v51 = vpop.eup %6367  ;;  %4935 = vst [vmem:[%s6755_s28 + $0x2f8] sm:$0xff] %v6366_v48  ;;  %v4427_v52 = vadd.f32 %v7132_v55, %v2922_v49 }
 0x29d   : > { %v4555_v53 = vadd.f32 %v7132_v55, %v3434_v50  ;;  %5063 = vst [vmem:[%s6755_s28 + $0x6f8] sm:$0xff] %v6368_v51  ;;  %v2924_v54 = vpop.f32.mrf.mxu0 }
 0x29e   : > { %v3436_v56 = vpop.f32.mrf.mxu1  ;;  %6381 = vtanh.f32 %v4427_v52 }
 0x29f   : > { %v6370_v57 = vpop.eup %6369  ;;  %6383 = vtanh.f32 %v4555_v53  ;;  %v2927_v58 = vpop.f32.mrf.mxu0 }
 0x2a0   : > { %v3439_v59 = vpop.f32.mrf.mxu1  ;;  %v6372_v60 = vpop.eup %6371  ;;  %4936 = vst [vmem:[%s6755_s28 + $0x300] sm:$0xff] %v6370_v57  ;;  %v4428_v61 = vadd.f32 %v7132_v55, %v2927_v58 }
 0x2a1   : > { %v4556_v62 = vadd.f32 %v7132_v55, %v3439_v59  ;;  %5064 = vst [vmem:[%s6755_s28 + $0x700] sm:$0xff] %v6372_v60  ;;  %v2929_v63 = vpop.f32.mrf.mxu0 }
 0x2a2   : > { %v3441_v0 = vpop.f32.mrf.mxu1  ;;  %6385 = vtanh.f32 %v4428_v61 }
 0x2a3   : > { %v6374_v1 = vpop.eup %6373  ;;  %6387 = vtanh.f32 %v4556_v62  ;;  %v2930_v2 = vpop.f32.mrf.mxu0 }
 0x2a4   : > { %v3442_v3 = vpop.f32.mrf.mxu1  ;;  %v6376_v4 = vpop.eup %6375  ;;  %4937 = vst [vmem:[%s6755_s28 + $0x308] sm:$0xff] %v6374_v1  ;;  %v4429_v5 = vadd.f32 %v7132_v55, %v2930_v2 }
 0x2a5   : > { %v4557_v6 = vadd.f32 %v7132_v55, %v3442_v3  ;;  %5065 = vst [vmem:[%s6755_s28 + $0x708] sm:$0xff] %v6376_v4  ;;  %v2932_v7 = vpop.f32.mrf.mxu0 }
 0x2a6   : > { %v3444_v8 = vpop.f32.mrf.mxu1  ;;  %6389 = vtanh.f32 %v4429_v5 }
 0x2a7   : > { %v6378_v9 = vpop.eup %6377  ;;  %6391 = vtanh.f32 %v4557_v6  ;;  %v2935_v10 = vpop.f32.mrf.mxu0 }
 0x2a8   : > { %v3447_v11 = vpop.f32.mrf.mxu1  ;;  %v6380_v12 = vpop.eup %6379  ;;  %4938 = vst [vmem:[%s6755_s28 + $0x310] sm:$0xff] %v6378_v9  ;;  %v4430_v13 = vadd.f32 %v7132_v55, %v2935_v10 }
 0x2a9   : > { %v4558_v14 = vadd.f32 %v7132_v55, %v3447_v11  ;;  %5066 = vst [vmem:[%s6755_s28 + $0x710] sm:$0xff] %v6380_v12  ;;  %v2937_v15 = vpop.f32.mrf.mxu0 }
 0x2aa   : > { %v3449_v16 = vpop.f32.mrf.mxu1  ;;  %6393 = vtanh.f32 %v4430_v13 }
 0x2ab   : > { %v6382_v17 = vpop.eup %6381  ;;  %6395 = vtanh.f32 %v4558_v14  ;;  %v2938_v18 = vpop.f32.mrf.mxu0 }
 0x2ac   : > { %v3450_v19 = vpop.f32.mrf.mxu1  ;;  %v6384_v20 = vpop.eup %6383  ;;  %4939 = vst [vmem:[%s6755_s28 + $0x318] sm:$0xff] %v6382_v17  ;;  %v4431_v21 = vadd.f32 %v7132_v55, %v2938_v18 }
 0x2ad   : > { %v4559_v22 = vadd.f32 %v7132_v55, %v3450_v19  ;;  %5067 = vst [vmem:[%s6755_s28 + $0x718] sm:$0xff] %v6384_v20  ;;  %v2940_v23 = vpop.f32.mrf.mxu0 }
 0x2ae   : > { %v3452_v24 = vpop.f32.mrf.mxu1  ;;  %6397 = vtanh.f32 %v4431_v21 }
 0x2af   : > { %v6386_v25 = vpop.eup %6385  ;;  %6399 = vtanh.f32 %v4559_v22  ;;  %v2943_v26 = vpop.f32.mrf.mxu0 }
 0x2b0   : > { %v3455_v27 = vpop.f32.mrf.mxu1  ;;  %v6388_v28 = vpop.eup %6387  ;;  %4940 = vst [vmem:[%s6755_s28 + $0x320] sm:$0xff] %v6386_v25  ;;  %v4432_v30 = vadd.f32 %v7317_v29, %v2943_v26 }
 0x2b1   : > { %v4560_v55 = vadd.f32 %v7317_v29, %v3455_v27  ;;  %5068 = vst [vmem:[%s6755_s28 + $0x720] sm:$0xff] %v6388_v28  ;;  %v2945_v31 = vpop.f32.mrf.mxu0 }
 0x2b2   : > { %v3457_v32 = vpop.f32.mrf.mxu1  ;;  %6401 = vtanh.f32 %v4432_v30 }
 0x2b3   : > { %v6390_v33 = vpop.eup %6389  ;;  %6403 = vtanh.f32 %v4560_v55  ;;  %v2946_v34 = vpop.f32.mrf.mxu0 }
 0x2b4   : > { %v3458_v35 = vpop.f32.mrf.mxu1  ;;  %v6392_v36 = vpop.eup %6391  ;;  %4941 = vst [vmem:[%s6755_s28 + $0x328] sm:$0xff] %v6390_v33  ;;  %v4433_v37 = vadd.f32 %v7317_v29, %v2946_v34 }
 0x2b5   : > { %v4561_v38 = vadd.f32 %v7317_v29, %v3458_v35  ;;  %5069 = vst [vmem:[%s6755_s28 + $0x728] sm:$0xff] %v6392_v36  ;;  %v2948_v39 = vpop.f32.mrf.mxu0 }
 0x2b6   : > { %v3460_v40 = vpop.f32.mrf.mxu1  ;;  %6405 = vtanh.f32 %v4433_v37 }
 0x2b7   : > { %v6394_v41 = vpop.eup %6393  ;;  %6407 = vtanh.f32 %v4561_v38  ;;  %v2951_v42 = vpop.f32.mrf.mxu0 }
 0x2b8   : > { %v3463_v43 = vpop.f32.mrf.mxu1  ;;  %v6396_v44 = vpop.eup %6395  ;;  %4942 = vst [vmem:[%s6755_s28 + $0x330] sm:$0xff] %v6394_v41  ;;  %v4434_v45 = vadd.f32 %v7317_v29, %v2951_v42 }
 0x2b9   : > { %v4562_v46 = vadd.f32 %v7317_v29, %v3463_v43  ;;  %5070 = vst [vmem:[%s6755_s28 + $0x730] sm:$0xff] %v6396_v44  ;;  %v2953_v47 = vpop.f32.mrf.mxu0 }
 0x2ba   : > { %v3465_v48 = vpop.f32.mrf.mxu1  ;;  %6409 = vtanh.f32 %v4434_v45 }
 0x2bb   : > { %v6398_v49 = vpop.eup %6397  ;;  %6411 = vtanh.f32 %v4562_v46  ;;  %v2954_v50 = vpop.f32.mrf.mxu0 }
 0x2bc   : > { %v3466_v51 = vpop.f32.mrf.mxu1  ;;  %v6400_v52 = vpop.eup %6399  ;;  %4943 = vst [vmem:[%s6755_s28 + $0x338] sm:$0xff] %v6398_v49  ;;  %v4435_v53 = vadd.f32 %v7317_v29, %v2954_v50 }
 0x2bd   : > { %v4563_v54 = vadd.f32 %v7317_v29, %v3466_v51  ;;  %5071 = vst [vmem:[%s6755_s28 + $0x738] sm:$0xff] %v6400_v52  ;;  %v2956_v56 = vpop.f32.mrf.mxu0 }
 0x2be   : > { %v3468_v57 = vpop.f32.mrf.mxu1  ;;  %6413 = vtanh.f32 %v4435_v53 }
 0x2bf   : > { %v6402_v58 = vpop.eup %6401  ;;  %6415 = vtanh.f32 %v4563_v54  ;;  %v2959_v59 = vpop.f32.mrf.mxu0 }
 0x2c0   : > { %v3471_v60 = vpop.f32.mrf.mxu1  ;;  %v6404_v61 = vpop.eup %6403  ;;  %4944 = vst [vmem:[%s6755_s28 + $0x340] sm:$0xff] %v6402_v58  ;;  %v4436_v62 = vadd.f32 %v7317_v29, %v2959_v59 }
 0x2c1   : > { %v4564_v63 = vadd.f32 %v7317_v29, %v3471_v60  ;;  %5072 = vst [vmem:[%s6755_s28 + $0x740] sm:$0xff] %v6404_v61  ;;  %v2961_v0 = vpop.f32.mrf.mxu0 }
 0x2c2   : > { %v3473_v1 = vpop.f32.mrf.mxu1  ;;  %6417 = vtanh.f32 %v4436_v62 }
 0x2c3   : > { %v6406_v2 = vpop.eup %6405  ;;  %6419 = vtanh.f32 %v4564_v63  ;;  %v2962_v3 = vpop.f32.mrf.mxu0 }
 0x2c4   : > { %v3474_v4 = vpop.f32.mrf.mxu1  ;;  %v6408_v5 = vpop.eup %6407  ;;  %4945 = vst [vmem:[%s6755_s28 + $0x348] sm:$0xff] %v6406_v2  ;;  %v4437_v6 = vadd.f32 %v7317_v29, %v2962_v3 }
 0x2c5   : > { %v4565_v7 = vadd.f32 %v7317_v29, %v3474_v4  ;;  %5073 = vst [vmem:[%s6755_s28 + $0x748] sm:$0xff] %v6408_v5  ;;  %v2964_v8 = vpop.f32.mrf.mxu0 }
 0x2c6   : > { %v3476_v9 = vpop.f32.mrf.mxu1  ;;  %6421 = vtanh.f32 %v4437_v6 }
 0x2c7   : > { %v6410_v10 = vpop.eup %6409  ;;  %6423 = vtanh.f32 %v4565_v7  ;;  %v2967_v11 = vpop.f32.mrf.mxu0 }
 0x2c8   : > { %v3479_v12 = vpop.f32.mrf.mxu1  ;;  %v6412_v13 = vpop.eup %6411  ;;  %4946 = vst [vmem:[%s6755_s28 + $0x350] sm:$0xff] %v6410_v10  ;;  %v4438_v14 = vadd.f32 %v7317_v29, %v2967_v11 }
 0x2c9   : > { %v4566_v15 = vadd.f32 %v7317_v29, %v3479_v12  ;;  %5074 = vst [vmem:[%s6755_s28 + $0x750] sm:$0xff] %v6412_v13  ;;  %v2969_v16 = vpop.f32.mrf.mxu0 }
 0x2ca   : > { %v3481_v17 = vpop.f32.mrf.mxu1  ;;  %6425 = vtanh.f32 %v4438_v14 }
 0x2cb   : > { %v6414_v18 = vpop.eup %6413  ;;  %6427 = vtanh.f32 %v4566_v15  ;;  %v2970_v19 = vpop.f32.mrf.mxu0 }
 0x2cc   : > { %v3482_v20 = vpop.f32.mrf.mxu1  ;;  %v6416_v21 = vpop.eup %6415  ;;  %4947 = vst [vmem:[%s6755_s28 + $0x358] sm:$0xff] %v6414_v18  ;;  %v4439_v22 = vadd.f32 %v7317_v29, %v2970_v19 }
 0x2cd   : > { %v4567_v23 = vadd.f32 %v7317_v29, %v3482_v20  ;;  %5075 = vst [vmem:[%s6755_s28 + $0x758] sm:$0xff] %v6416_v21  ;;  %v2972_v24 = vpop.f32.mrf.mxu0 }
 0x2ce   : > { %v3484_v25 = vpop.f32.mrf.mxu1  ;;  %6429 = vtanh.f32 %v4439_v22 }
 0x2cf   : > { %v6418_v26 = vpop.eup %6417  ;;  %6431 = vtanh.f32 %v4567_v23  ;;  %v2975_v27 = vpop.f32.mrf.mxu0 }
 0x2d0   : > { %v3487_v28 = vpop.f32.mrf.mxu1  ;;  %v6420_v30 = vpop.eup %6419  ;;  %4948 = vst [vmem:[%s6755_s28 + $0x360] sm:$0xff] %v6418_v26  ;;  %v4440_v55 = vadd.f32 %v7317_v29, %v2975_v27 }
 0x2d1   : > { %v4568_v31 = vadd.f32 %v7317_v29, %v3487_v28  ;;  %5076 = vst [vmem:[%s6755_s28 + $0x760] sm:$0xff] %v6420_v30  ;;  %v2977_v32 = vpop.f32.mrf.mxu0 }
 0x2d2   : > { %v3489_v33 = vpop.f32.mrf.mxu1  ;;  %6433 = vtanh.f32 %v4440_v55 }
 0x2d3   : > { %v6422_v34 = vpop.eup %6421  ;;  %6435 = vtanh.f32 %v4568_v31  ;;  %v2978_v35 = vpop.f32.mrf.mxu0 }
 0x2d4   : > { %v3490_v36 = vpop.f32.mrf.mxu1  ;;  %v6424_v37 = vpop.eup %6423  ;;  %4949 = vst [vmem:[%s6755_s28 + $0x368] sm:$0xff] %v6422_v34  ;;  %v4441_v38 = vadd.f32 %v7317_v29, %v2978_v35 }
 0x2d5   : > { %v4569_v39 = vadd.f32 %v7317_v29, %v3490_v36  ;;  %5077 = vst [vmem:[%s6755_s28 + $0x768] sm:$0xff] %v6424_v37  ;;  %v2980_v40 = vpop.f32.mrf.mxu0 }
 0x2d6   : > { %v3492_v41 = vpop.f32.mrf.mxu1  ;;  %6437 = vtanh.f32 %v4441_v38 }
 0x2d7   : > { %v6426_v42 = vpop.eup %6425  ;;  %6439 = vtanh.f32 %v4569_v39  ;;  %v2983_v43 = vpop.f32.mrf.mxu0 }
 0x2d8   : > { %v3495_v44 = vpop.f32.mrf.mxu1  ;;  %v6428_v45 = vpop.eup %6427  ;;  %4950 = vst [vmem:[%s6755_s28 + $0x370] sm:$0xff] %v6426_v42  ;;  %v4442_v46 = vadd.f32 %v7317_v29, %v2983_v43 }
 0x2d9   : > { %v4570_v47 = vadd.f32 %v7317_v29, %v3495_v44  ;;  %5078 = vst [vmem:[%s6755_s28 + $0x770] sm:$0xff] %v6428_v45  ;;  %v2985_v48 = vpop.f32.mrf.mxu0 }
 0x2da   : > { %v3497_v49 = vpop.f32.mrf.mxu1  ;;  %6441 = vtanh.f32 %v4442_v46 }
 0x2db   : > { %v6430_v50 = vpop.eup %6429  ;;  %6443 = vtanh.f32 %v4570_v47  ;;  %v2986_v51 = vpop.f32.mrf.mxu0 }
 0x2dc   : > { %v3498_v52 = vpop.f32.mrf.mxu1  ;;  %v6432_v53 = vpop.eup %6431  ;;  %4951 = vst [vmem:[%s6755_s28 + $0x378] sm:$0xff] %v6430_v50  ;;  %v4443_v54 = vadd.f32 %v7317_v29, %v2986_v51 }
 0x2dd   : > { %v4571_v56 = vadd.f32 %v7317_v29, %v3498_v52  ;;  %5079 = vst [vmem:[%s6755_s28 + $0x778] sm:$0xff] %v6432_v53  ;;  %v2988_v57 = vpop.f32.mrf.mxu0 }
 0x2de   : > { %v3500_v58 = vpop.f32.mrf.mxu1  ;;  %6445 = vtanh.f32 %v4443_v54 }
 0x2df   : > { %v6434_v59 = vpop.eup %6433  ;;  %6447 = vtanh.f32 %v4571_v56  ;;  %v2991_v60 = vpop.f32.mrf.mxu0 }
 0x2e0   : > { %v3503_v61 = vpop.f32.mrf.mxu1  ;;  %v6436_v62 = vpop.eup %6435  ;;  %4952 = vst [vmem:[%s6755_s28 + $0x380] sm:$0xff] %v6434_v59  ;;  %v4444_v63 = vadd.f32 %v7317_v29, %v2991_v60 }
 0x2e1   : > { %v4572_v0 = vadd.f32 %v7317_v29, %v3503_v61  ;;  %5080 = vst [vmem:[%s6755_s28 + $0x780] sm:$0xff] %v6436_v62  ;;  %v2993_v1 = vpop.f32.mrf.mxu0 }
 0x2e2   : > { %v3505_v2 = vpop.f32.mrf.mxu1  ;;  %6449 = vtanh.f32 %v4444_v63 }
 0x2e3   : > { %v6438_v3 = vpop.eup %6437  ;;  %6451 = vtanh.f32 %v4572_v0  ;;  %v2994_v4 = vpop.f32.mrf.mxu0 }
 0x2e4   : > { %v3506_v5 = vpop.f32.mrf.mxu1  ;;  %v6440_v6 = vpop.eup %6439  ;;  %4953 = vst [vmem:[%s6755_s28 + $0x388] sm:$0xff] %v6438_v3  ;;  %v4445_v7 = vadd.f32 %v7317_v29, %v2994_v4 }
 0x2e5   : > { %v4573_v8 = vadd.f32 %v7317_v29, %v3506_v5  ;;  %5081 = vst [vmem:[%s6755_s28 + $0x788] sm:$0xff] %v6440_v6  ;;  %v2996_v9 = vpop.f32.mrf.mxu0 }
 0x2e6   : > { %v3508_v10 = vpop.f32.mrf.mxu1  ;;  %6453 = vtanh.f32 %v4445_v7 }
 0x2e7   : > { %v6442_v11 = vpop.eup %6441  ;;  %6455 = vtanh.f32 %v4573_v8  ;;  %v2999_v12 = vpop.f32.mrf.mxu0 }
 0x2e8   : > { %v3511_v13 = vpop.f32.mrf.mxu1  ;;  %v6444_v14 = vpop.eup %6443  ;;  %4954 = vst [vmem:[%s6755_s28 + $0x390] sm:$0xff] %v6442_v11  ;;  %v4446_v15 = vadd.f32 %v7317_v29, %v2999_v12 }
 0x2e9   : > { %v4574_v16 = vadd.f32 %v7317_v29, %v3511_v13  ;;  %5082 = vst [vmem:[%s6755_s28 + $0x790] sm:$0xff] %v6444_v14  ;;  %v3001_v17 = vpop.f32.mrf.mxu0 }
 0x2ea   : > { %v3513_v18 = vpop.f32.mrf.mxu1  ;;  %6457 = vtanh.f32 %v4446_v15 }
 0x2eb   : > { %v6446_v19 = vpop.eup %6445  ;;  %6459 = vtanh.f32 %v4574_v16  ;;  %v3002_v20 = vpop.f32.mrf.mxu0 }
 0x2ec   : > { %v3514_v21 = vpop.f32.mrf.mxu1  ;;  %v6448_v22 = vpop.eup %6447  ;;  %4955 = vst [vmem:[%s6755_s28 + $0x398] sm:$0xff] %v6446_v19  ;;  %v4447_v23 = vadd.f32 %v7317_v29, %v3002_v20 }
 0x2ed   : > { %v4575_v24 = vadd.f32 %v7317_v29, %v3514_v21  ;;  %5083 = vst [vmem:[%s6755_s28 + $0x798] sm:$0xff] %v6448_v22  ;;  %v3004_v25 = vpop.f32.mrf.mxu0 }
 0x2ee   : > { %v3516_v26 = vpop.f32.mrf.mxu1  ;;  %6461 = vtanh.f32 %v4447_v23 }
 0x2ef   : > { %v6450_v27 = vpop.eup %6449  ;;  %6463 = vtanh.f32 %v4575_v24  ;;  %v3007_v28 = vpop.f32.mrf.mxu0 }
 0x2f0   : > { %v3519_v30 = vpop.f32.mrf.mxu1  ;;  %v6452_v55 = vpop.eup %6451  ;;  %4956 = vst [vmem:[%s6755_s28 + $0x3a0] sm:$0xff] %v6450_v27  ;;  %v4448_v31 = vadd.f32 %v7317_v29, %v3007_v28 }
 0x2f1   : > { %v4576_v32 = vadd.f32 %v7317_v29, %v3519_v30  ;;  %5084 = vst [vmem:[%s6755_s28 + $0x7a0] sm:$0xff] %v6452_v55  ;;  %v3009_v33 = vpop.f32.mrf.mxu0 }
 0x2f2   : > { %v3521_v34 = vpop.f32.mrf.mxu1  ;;  %6465 = vtanh.f32 %v4448_v31 }
 0x2f3   : > { %v6454_v35 = vpop.eup %6453  ;;  %6467 = vtanh.f32 %v4576_v32  ;;  %v3010_v36 = vpop.f32.mrf.mxu0 }
 0x2f4   : > { %v3522_v37 = vpop.f32.mrf.mxu1  ;;  %v6456_v38 = vpop.eup %6455  ;;  %4957 = vst [vmem:[%s6755_s28 + $0x3a8] sm:$0xff] %v6454_v35  ;;  %v4449_v39 = vadd.f32 %v7317_v29, %v3010_v36 }
 0x2f5   : > { %v4577_v40 = vadd.f32 %v7317_v29, %v3522_v37  ;;  %5085 = vst [vmem:[%s6755_s28 + $0x7a8] sm:$0xff] %v6456_v38  ;;  %v3012_v41 = vpop.f32.mrf.mxu0 }
 0x2f6   : > { %v3524_v42 = vpop.f32.mrf.mxu1  ;;  %6469 = vtanh.f32 %v4449_v39 }
 0x2f7   : > { %v6458_v43 = vpop.eup %6457  ;;  %6471 = vtanh.f32 %v4577_v40  ;;  %v3015_v44 = vpop.f32.mrf.mxu0 }
 0x2f8   : > { %v3527_v45 = vpop.f32.mrf.mxu1  ;;  %v6460_v46 = vpop.eup %6459  ;;  %4958 = vst [vmem:[%s6755_s28 + $0x3b0] sm:$0xff] %v6458_v43  ;;  %v4450_v47 = vadd.f32 %v7317_v29, %v3015_v44 }
 0x2f9   : > { %v4578_v48 = vadd.f32 %v7317_v29, %v3527_v45  ;;  %5086 = vst [vmem:[%s6755_s28 + $0x7b0] sm:$0xff] %v6460_v46  ;;  %v3017_v49 = vpop.f32.mrf.mxu0 }
 0x2fa   : > { %v3529_v50 = vpop.f32.mrf.mxu1  ;;  %6473 = vtanh.f32 %v4450_v47 }
 0x2fb   : > { %v6462_v51 = vpop.eup %6461  ;;  %6475 = vtanh.f32 %v4578_v48  ;;  %v3018_v52 = vpop.f32.mrf.mxu0 }
 0x2fc   : > { %v3530_v53 = vpop.f32.mrf.mxu1  ;;  %v6464_v54 = vpop.eup %6463  ;;  %4959 = vst [vmem:[%s6755_s28 + $0x3b8] sm:$0xff] %v6462_v51  ;;  %v4451_v56 = vadd.f32 %v7317_v29, %v3018_v52 }
 0x2fd   : > { %v4579_v57 = vadd.f32 %v7317_v29, %v3530_v53  ;;  %5087 = vst [vmem:[%s6755_s28 + $0x7b8] sm:$0xff] %v6464_v54  ;;  %v3020_v58 = vpop.f32.mrf.mxu0 }
 0x2fe   : > { %v3532_v59 = vpop.f32.mrf.mxu1  ;;  %6477 = vtanh.f32 %v4451_v56 }
 0x2ff   : > { %v6466_v60 = vpop.eup %6465  ;;  %6479 = vtanh.f32 %v4579_v57  ;;  %v3023_v61 = vpop.f32.mrf.mxu0 }
 0x300   : > { %v3535_v62 = vpop.f32.mrf.mxu1  ;;  %v6468_v63 = vpop.eup %6467  ;;  %4960 = vst [vmem:[%s6755_s28 + $0x3c0] sm:$0xff] %v6466_v60  ;;  %v4452_v0 = vadd.f32 %v7317_v29, %v3023_v61 }
 0x301   : > { %v4580_v1 = vadd.f32 %v7317_v29, %v3535_v62  ;;  %5088 = vst [vmem:[%s6755_s28 + $0x7c0] sm:$0xff] %v6468_v63  ;;  %v3025_v2 = vpop.f32.mrf.mxu0 }
 0x302   : > { %v3537_v3 = vpop.f32.mrf.mxu1  ;;  %6481 = vtanh.f32 %v4452_v0 }
 0x303   : > { %v6470_v4 = vpop.eup %6469  ;;  %6483 = vtanh.f32 %v4580_v1  ;;  %v3026_v5 = vpop.f32.mrf.mxu0 }
 0x304   : > { %v3538_v6 = vpop.f32.mrf.mxu1  ;;  %v6472_v7 = vpop.eup %6471  ;;  %4961 = vst [vmem:[%s6755_s28 + $0x3c8] sm:$0xff] %v6470_v4  ;;  %v4453_v8 = vadd.f32 %v7317_v29, %v3026_v5 }
 0x305   : > { %v4581_v9 = vadd.f32 %v7317_v29, %v3538_v6  ;;  %5089 = vst [vmem:[%s6755_s28 + $0x7c8] sm:$0xff] %v6472_v7  ;;  %v3028_v10 = vpop.f32.mrf.mxu0 }
 0x306   : > { %v3540_v11 = vpop.f32.mrf.mxu1  ;;  %6485 = vtanh.f32 %v4453_v8 }
 0x307   : > { %v6474_v12 = vpop.eup %6473  ;;  %6487 = vtanh.f32 %v4581_v9  ;;  %v3031_v13 = vpop.f32.mrf.mxu0 }
 0x308   : > { %v3543_v14 = vpop.f32.mrf.mxu1  ;;  %v6476_v15 = vpop.eup %6475  ;;  %4962 = vst [vmem:[%s6755_s28 + $0x3d0] sm:$0xff] %v6474_v12  ;;  %v4454_v16 = vadd.f32 %v7317_v29, %v3031_v13 }
 0x309   : > { %v4582_v17 = vadd.f32 %v7317_v29, %v3543_v14  ;;  %5090 = vst [vmem:[%s6755_s28 + $0x7d0] sm:$0xff] %v6476_v15  ;;  %v3033_v18 = vpop.f32.mrf.mxu0 }
 0x30a   : > { %v3545_v19 = vpop.f32.mrf.mxu1  ;;  %6489 = vtanh.f32 %v4454_v16 }
 0x30b   : > { %v6478_v20 = vpop.eup %6477  ;;  %6491 = vtanh.f32 %v4582_v17  ;;  %v3034_v21 = vpop.f32.mrf.mxu0 }
 0x30c   : > { %v3546_v22 = vpop.f32.mrf.mxu1  ;;  %v6480_v23 = vpop.eup %6479  ;;  %4963 = vst [vmem:[%s6755_s28 + $0x3d8] sm:$0xff] %v6478_v20  ;;  %v4455_v24 = vadd.f32 %v7317_v29, %v3034_v21 }
 0x30d   : > { %v4583_v25 = vadd.f32 %v7317_v29, %v3546_v22  ;;  %5091 = vst [vmem:[%s6755_s28 + $0x7d8] sm:$0xff] %v6480_v23  ;;  %v3036_v26 = vpop.f32.mrf.mxu0 }
 0x30e   : > { %v3548_v27 = vpop.f32.mrf.mxu1  ;;  %6493 = vtanh.f32 %v4455_v24 }
 0x30f   : > { %v6482_v28 = vpop.eup %6481  ;;  %6495 = vtanh.f32 %v4583_v25 }
 0x310   : > { %v6484_v30 = vpop.eup %6483  ;;  %4964 = vst [vmem:[%s6755_s28 + $0x3e0] sm:$0xff] %v6482_v28 }
 0x311   : > { %5092 = vst [vmem:[%s6755_s28 + $0x7e0] sm:$0xff] %v6484_v30 }
 0x313   : > { %v6486_v55 = vpop.eup %6485 }
 0x314   : > { %v6488_v31 = vpop.eup %6487  ;;  %4965 = vst [vmem:[%s6755_s28 + $0x3e8] sm:$0xff] %v6486_v55 }
 0x315   : > { %5093 = vst [vmem:[%s6755_s28 + $0x7e8] sm:$0xff] %v6488_v31 }
 0x317   : > { %v6490_v32 = vpop.eup %6489 }
 0x318   : > { %v6492_v33 = vpop.eup %6491  ;;  %4966 = vst [vmem:[%s6755_s28 + $0x3f0] sm:$0xff] %v6490_v32 }
 0x319   : > { %5094 = vst [vmem:[%s6755_s28 + $0x7f0] sm:$0xff] %v6492_v33 }
 0x31b   : > { %v6494_v29 = vpop.eup %6493 }
 0x31c   : > { %v6496_v34 = vpop.eup %6495  ;;  %4967 = vst [vmem:[%s6755_s28 + $0x3f8] sm:$0xff] %v6494_v29 }
 0x31d   : > { %5095 = vst [vmem:[%s6755_s28 + $0x7f8] sm:$0xff] %v6496_v34 }
 0x31e PF: > { %s13_s14 = sadd.s32 1, %s6522_s14   ;;  %s7435_s12 = smov %s6518_s13 }
 0x31f   : > { %p10_p5 = scmp.ge.s32.totalorder %s13_s14, 6   ;;  %s7436_s13 = smov %s7438_s15 }
 0x321   :  { %12 = sbr.rel (!%p10_p5) target bundleno = 2 (0x2), region = 76 }

</bundles_post_ra>
